<compile_context>
chip_gen: v5e
topology: v5e:2x2
jax: 0.10.0
libtpu: 0.0.40
codegen_flags: <defaults>
</compile_context>

<pallas_src>
import functools
import math

import numpy as np
import jax
import jax.numpy as jnp
from jax import lax
from jax.experimental import pallas as pl
from jax.experimental.pallas import tpu as pltpu

_S = 4   # stride of the 8x8 convs -> phase (sub-pixel) factor


# ------------------------------ kernel bodies -------------------------------

def _pointwise_prelu_kernel(x_ref, w_ref, b_ref, alpha_ref, o_ref):
    """o = PReLU(x @ w + b) for one (TM, K) row block (the 1x1 conv stage)."""
    acc = jnp.dot(x_ref[...], w_ref[...], preferred_element_type=jnp.float32)
    acc = acc + b_ref[...]
    alpha = alpha_ref[0, 0]
    o_ref[...] = jnp.where(acc >= 0.0, acc, alpha * acc).astype(o_ref.dtype)


def _phase_conv3x3_kernel(top_ref, cur_ref, bot_ref, w_ref, b_ref, alpha_ref,
                          *rest, q, res_sign, stack_k):
    """3x3 stride-1 conv over the phase grid for one (TM, C) row block.

    o = PReLU(sum_{dy,dx} shift_{dy,dx}(x) @ W[dy,dx] + b) [+/- residual]

    Rows are flattened as r = p*Q + col.  dy shifts (+/-Q rows) come from
    aligned slices + one-image-row halos; dx shifts (+/-1 row) are applied to
    the f32 group accumulators via pltpu.roll and masked at the column border.
    """
    if len(rest) == 2:
        res_ref, o_ref = rest
    else:
        (o_ref,) = rest
        res_ref = None

    j = pl.program_id(1)
    npb = pl.num_programs(1)
    tm, _ = cur_ref.shape
    ncols = o_ref.shape[1]

    # Halo rows (one image row above / below), zeroed outside the image so the
    # zero padding of the original 8x8 conv is preserved (no 0*garbage hazard:
    # the clamped halo blocks are real in-bounds data multiplied by 0/1).
    top_ok = (j > 0).astype(cur_ref.dtype)
    bot_ok = (j < npb - 1).astype(cur_ref.dtype)
    cur = cur_ref[...]
    x_m1 = jnp.concatenate([top_ref[...] * top_ok, cur[:tm - q]], axis=0)  # rows r-Q
    x_p1 = jnp.concatenate([cur[q:], bot_ref[...] * bot_ok], axis=0)       # rows r+Q

    if stack_k:
        # dy stacked along the contraction: one K=3C dot per dx tap group.
        lhs = jnp.concatenate([x_m1, cur, x_p1], axis=1)                   # (TM, 3C)
        s_m1 = jnp.dot(lhs, w_ref[0], preferred_element_type=jnp.float32)  # dx=-1
        s_0 = jnp.dot(lhs, w_ref[1], preferred_element_type=jnp.float32)   # dx= 0
        s_p1 = jnp.dot(lhs, w_ref[2], preferred_element_type=jnp.float32)  # dx=+1
    else:
        # Narrow-C input (deconv stage): stack dx groups along the OUTPUT axis
        # -> 3 dots of (TM, C) @ (C, 3*ncols), lane-aligned output slices.
        t = (jnp.dot(x_m1, w_ref[0], preferred_element_type=jnp.float32)
             + jnp.dot(cur, w_ref[1], preferred_element_type=jnp.float32)
             + jnp.dot(x_p1, w_ref[2], preferred_element_type=jnp.float32))
        s_m1 = t[:, :ncols]
        s_0 = t[:, ncols:2 * ncols]
        s_p1 = t[:, 2 * ncols:]

    # Post-matmul image-column border masks (f32, (TM, 1) broadcast).  The +/-1
    # row roll wraps exactly one row (row 0 / row TM-1); those rows are always
    # column-border rows, so the masks also cover the wrap.
    row_idx = lax.broadcasted_iota(jnp.int32, (tm, 1), 0)
    if q & (q - 1) == 0:
        col_idx = jnp.bitwise_and(row_idx, q - 1)
    else:
        col_idx = jnp.remainder(row_idx, q)
    mask_l = (col_idx > 0).astype(jnp.float32)      # dx = -1 group valid
    mask_r = (col_idx < q - 1).astype(jnp.float32)  # dx = +1 group valid

    acc = (s_0
           + mask_l * pltpu.roll(s_m1, shift=1, axis=0)
           + mask_r * pltpu.roll(s_p1, shift=tm - 1, axis=0))
    acc = acc + b_ref[...]
    alpha = alpha_ref[0, 0]
    y = jnp.where(acc >= 0.0, acc, alpha * acc)
    if res_ref is not None:
        y = y + res_sign * res_ref[...].astype(jnp.float32)
    o_ref[...] = y.astype(o_ref.dtype)


# ------------------------------ pallas wrappers ------------------------------

def _compiler_params():
    return pltpu.CompilerParams(
        dimension_semantics=("parallel", "parallel"),
        vmem_limit_bytes=32 * 1024 * 1024)


def pointwise_prelu(x, w, b, alpha, *, block_rows, out_dtype=jnp.bfloat16):
    """PReLU(x @ w + b) over (N, R, K), tiled in `block_rows` row blocks."""
    n, r, k = x.shape
    ncols = w.shape[1]
    assert r % block_rows == 0
    rb = r // block_rows
    flops = 2 * n * r * k * ncols
    nbytes = int(x.size * x.dtype.itemsize + w.size * w.dtype.itemsize
                 + n * r * ncols * jnp.dtype(out_dtype).itemsize)
    return pl.pallas_call(
        _pointwise_prelu_kernel,
        out_shape=jax.ShapeDtypeStruct((n, r, ncols), out_dtype),
        grid=(n, rb),
        in_specs=[
            pl.BlockSpec((None, block_rows, k), lambda i, j: (i, j, 0)),
            pl.BlockSpec((k, ncols), lambda i, j: (0, 0)),
            pl.BlockSpec((1, ncols), lambda i, j: (0, 0)),
            pl.BlockSpec(memory_space=pltpu.MemorySpace.SMEM),
        ],
        out_specs=pl.BlockSpec((None, block_rows, ncols), lambda i, j: (i, j, 0)),
        compiler_params=_compiler_params(),
        cost_estimate=pl.CostEstimate(flops=flops, transcendentals=0,
                                      bytes_accessed=nbytes),
    )(x, w, b.reshape(1, ncols).astype(jnp.float32),
      jnp.asarray(alpha, jnp.float32).reshape(1, 1))


def phase_conv3x3(x, w_taps, b, alpha, *, p, q, tp, residual=None, sign=1.0,
                  out_dtype=jnp.bfloat16):
    """3x3 stride-1 conv over the phase grid (implements the 8x8/s4/p2 (de)convs).

    Weight layouts (see packing helpers):
      * (3, 3*C, ncols)  -> K-stacked dy per dx group    (conv stages, C=128)
      * (3, C, 3*ncols)  -> N-stacked dx per dy slice    (deconv stage, C=fil)
    """
    n, r, c = x.shape
    assert r == p * q and p % tp == 0 and q % 16 == 0
    assert w_taps.shape[0] == 3
    stack_k = (w_taps.shape[1] == 3 * c)
    ncols = w_taps.shape[2] if stack_k else w_taps.shape[2] // 3
    tm = tp * q
    pb = p // tp

    center = lambda i, j: (i, j, 0)
    topm = lambda i, j: (i, jnp.maximum(j * tp - 1, 0), 0)       # image row above
    botm = lambda i, j: (i, jnp.minimum(j * tp + tp, p - 1), 0)  # image row below

    in_specs = [
        pl.BlockSpec((None, q, c), topm),
        pl.BlockSpec((None, tm, c), center),
        pl.BlockSpec((None, q, c), botm),
        pl.BlockSpec(w_taps.shape, lambda i, j: (0, 0, 0)),      # resident weights
        pl.BlockSpec((1, ncols), lambda i, j: (0, 0)),
        pl.BlockSpec(memory_space=pltpu.MemorySpace.SMEM),
    ]
    args = [x, x, x, w_taps,
            b.reshape(1, ncols).astype(jnp.float32),
            jnp.asarray(alpha, jnp.float32).reshape(1, 1)]
    if residual is not None:
        in_specs.append(pl.BlockSpec((None, tm, ncols), center))
        args.append(residual)

    kernel = functools.partial(_phase_conv3x3_kernel, q=q,
                               res_sign=float(sign), stack_k=stack_k)
    flops = 2 * n * r * 9 * c * ncols
    nbytes = int(x.size * x.dtype.itemsize * (1 + 2.0 / tp)
                 + w_taps.size * w_taps.dtype.itemsize
                 + n * r * ncols * jnp.dtype(out_dtype).itemsize
                 + (0 if residual is None
                    else residual.size * residual.dtype.itemsize))
    return pl.pallas_call(
        kernel,
        out_shape=jax.ShapeDtypeStruct((n, r, ncols), out_dtype),
        grid=(n, pb),
        in_specs=in_specs,
        out_specs=pl.BlockSpec((None, tm, ncols), center),
        compiler_params=_compiler_params(),
        cost_estimate=pl.CostEstimate(flops=flops, transcendentals=0,
                                      bytes_accessed=nbytes),
    )(*args)


# ----------------------- host-side weight repacking (numpy) ------------------

def _pack_conv_taps(w):
    """Conv2d(k=8,s=4,p=2) weight (cout, cin, 8, 8) -> (3_dx, 3*16*cin, cout):
    per dx group, dy stacked along K; K ordered (dy, ry, rx, cin) to match the
    kernel's [x(dy=-1) | x(dy=0) | x(dy=+1)] phase-layout concat."""
    cout, cin = w.shape[0], w.shape[1]
    taps = np.zeros((3, 3, _S, _S, cin, cout), np.float32)   # (dy, dx, ry, rx, ci, co)
    for dy in (-1, 0, 1):
        for ry in range(_S):
            ky = _S * dy + ry + 2
            if not 0 <= ky < 8:
                continue
            for dx in (-1, 0, 1):
                for rx in range(_S):
                    kx = _S * dx + rx + 2
                    if not 0 <= kx < 8:
                        continue
                    taps[dy + 1, dx + 1, ry, rx] = w[:, :, ky, kx].T
    t = np.transpose(taps, (1, 0, 2, 3, 4, 5))                # (dx, dy, ry, rx, ci, co)
    return np.ascontiguousarray(t).reshape(3, 3 * _S * _S * cin, cout)


def _pack_deconv_taps(w):
    """ConvTranspose2d(k=8,s=4,p=2) weight (cin, cout, 8, 8) ->
    (3_dy, cin, 3*16*cout): per dy slice, dx groups stacked along the output
    axis; output columns ordered (dx, ry, rx, cout) (phase layout per group)."""
    cin, cout = w.shape[0], w.shape[1]
    taps = np.zeros((3, 3, cin, _S, _S, cout), np.float32)    # (dy, dx, ci, ry, rx, co)
    for dy in (-1, 0, 1):
        for ry in range(_S):
            ky = -_S * dy + ry + 2
            if not 0 <= ky < 8:
                continue
            for dx in (-1, 0, 1):
                for rx in range(_S):
                    kx = -_S * dx + rx + 2
                    if not 0 <= kx < 8:
                        continue
                    taps[dy + 1, dx + 1, :, ry, rx] = w[:, :, ky, kx]
    t = np.transpose(taps, (0, 2, 1, 3, 4, 5))                # (dy, ci, dx, ry, rx, co)
    return np.ascontiguousarray(t).reshape(3, cin, 3 * _S * _S * cout)


def _pack_1x1_block(w):
    """Conv2d 1x1 weight (cout, cin, 1, 1) -> block-diagonal (16*cin, 16*cout)
    acting per phase on phase-layout channels.  Kept while 16*cin is small
    (dense MXU K, lane-dense output); revisit for large fil*stage."""
    cout, cin = w.shape[0], w.shape[1]
    wt = w[:, :, 0, 0].T
    blk = np.zeros((_S * _S, cin, _S * _S, cout), np.float32)
    for ph in range(_S * _S):
        blk[ph, :, ph, :] = wt
    return blk.reshape(_S * _S * cin, _S * _S * cout)


def make_params(seed, fil, stage):
    rng = np.random.RandomState(seed)

    def uni(shape, fan_in):
        bound = 1.0 / math.sqrt(fan_in)
        return rng.uniform(-bound, bound, size=shape).astype(np.float32)

    cin = fil * stage
    raw = {
        'w1': uni((fil, cin, 1, 1), cin), 'b1': uni((fil,), cin),
        'a1': np.float32(0.25),
        'wc1': uni((fil, fil, 8, 8), fil * 64), 'bc1': uni((fil,), fil * 64),
        'ac1': np.float32(0.25),
        'wd1': uni((fil, fil, 8, 8), fil * 64), 'bd1': uni((fil,), fil * 64),
        'ad1': np.float32(0.25),
        'wc2': uni((fil, fil, 8, 8), fil * 64), 'bc2': uni((fil,), fil * 64),
        'ac2': np.float32(0.25),
    }
    params = {
        'w1blk': jnp.asarray(_pack_1x1_block(raw['w1']), jnp.bfloat16),
        'b1t': jnp.asarray(np.tile(raw['b1'], _S * _S)),
        'a1': raw['a1'],
        'wc1': jnp.asarray(_pack_conv_taps(raw['wc1']), jnp.bfloat16),
        'bc1': jnp.asarray(raw['bc1']), 'ac1': raw['ac1'],
        'wd1': jnp.asarray(_pack_deconv_taps(raw['wd1']), jnp.bfloat16),
        'bd1t': jnp.asarray(np.tile(raw['bd1'], _S * _S)), 'ad1': raw['ad1'],
        'wc2': jnp.asarray(_pack_conv_taps(raw['wc2']), jnp.bfloat16),
        'bc2': jnp.asarray(raw['bc2']), 'ac2': raw['ac2'],
    }
    return params, raw


# --------------------------------- forward ----------------------------------

def nchw_to_phase(x):
    """(N, C, H, W) -> (N, P*Q, 16*C), columns ordered (ry, rx, c)."""
    n, c, h, w = x.shape
    p, q = h // _S, w // _S
    y = jnp.transpose(x, (0, 2, 3, 1))
    y = y.reshape(n, p, _S, q, _S, c)
    y = jnp.transpose(y, (0, 1, 3, 2, 4, 5))
    return y.reshape(n, p * q, _S * _S * c)


def _pick_tp(n, p, q, target_rows=512, min_steps=8):
    """Largest tp dividing p with tp*q <= target_rows while keeping the
    (batch, row-block) grid >= min_steps deep (pipelining / v7x 2-TC)."""
    divs = [d for d in range(1, p + 1) if p % d == 0 and d * q <= target_rows]
    if not divs:
        divs = [1]
    deep = [d for d in divs if n * (p // d) >= min_steps]
    return max(deep) if deep else max(divs)


def dense_d_block(x_nchw, params, fil, block_rows_target=512):
    n, _, h, w = x_nchw.shape
    assert h % _S == 0 and w % _S == 0
    p, q = h // _S, w // _S
    assert q % 16 == 0, "W/4 must be a multiple of 16 (bf16 sublane tile)"
    tp = _pick_tp(n, p, q, block_rows_target)
    tm = tp * q

    xp = nchw_to_phase(x_nchw).astype(jnp.bfloat16)          # (n, P*Q, 16*cin)

    # x1 = PReLU(conv1x1(x))           -> phase layout, 16*fil cols (lane dense)
    x1p = pointwise_prelu(xp, params['w1blk'], params['b1t'], params['a1'],
                          block_rows=tm)
    # x2 = PReLU(DD_Conv1(x1))         -> low-res grid, fil cols
    x2 = phase_conv3x3(x1p, params['wc1'], params['bc1'], params['ac1'],
                       p=p, q=q, tp=tp)
    # x3 = PReLU(DD_Deconv1(x2)) - x1  -> phase layout, 16*fil cols (fused residual)
    x3p = phase_conv3x3(x2, params['wd1'], params['bd1t'], params['ad1'],
                        p=p, q=q, tp=tp, residual=x1p, sign=-1.0)
    # x4 = PReLU(DD_Conv2(x3)) + x2    -> low-res grid, fil cols (fused residual)
    x4 = phase_conv3x3(x3p, params['wc2'], params['bc2'], params['ac2'],
                       p=p, q=q, tp=tp, residual=x2, sign=1.0,
                       out_dtype=jnp.float32)

    # TODO(synk): fuse stages 2-4 per row block (+/-2-row halo) so x2 / x3p
    # never round-trip HBM and the fil-lane outputs avoid masked stores.
    return jnp.transpose(x4.reshape(n, p, q, fil), (0, 3, 1, 2))  # (n, fil, H/4, W/4)


# ------------------------- pure-XLA f32 reference ----------------------------

def ref_dense_d_block(x, raw):
    hi = lax.Precision.HIGHEST

    def conv(v, wt, b, stride, pad):
        y = lax.conv_general_dilated(
            v, jnp.asarray(wt), (stride, stride), [(pad, pad), (pad, pad)],
            dimension_numbers=('NCHW', 'OIHW', 'NCHW'), precision=hi)
        return y + jnp.asarray(b)[None, :, None, None]

    def deconv(v, wt, b, stride, pad, ker):
        wf = jnp.transpose(jnp.flip(jnp.asarray(wt), (2, 3)), (1, 0, 2, 3))
        y = lax.conv_general_dilated(
            v, wf, (1, 1), [(ker - 1 - pad, ker - 1 - pad)] * 2,
            lhs_dilation=(stride, stride),
            dimension_numbers=('NCHW', 'OIHW', 'NCHW'), precision=hi)
        return y + jnp.asarray(b)[None, :, None, None]

    def prelu(v, a):
        return jnp.where(v >= 0, v, a * v)

    x1 = prelu(conv(x, raw['w1'], raw['b1'], 1, 0), raw['a1'])
    x2 = prelu(conv(x1, raw['wc1'], raw['bc1'], 4, 2), raw['ac1'])
    x3 = prelu(deconv(x2, raw['wd1'], raw['bd1'], 4, 2, 8), raw['ad1']) - x1
    x4 = prelu(conv(x3, raw['wc2'], raw['bc2'], 4, 2), raw['ac2']) + x2
    return x4


if __name__ == "__main__":
    N, FIL, STAGE, H, W = 2, 8, 2, 128, 128
    key = jax.random.PRNGKey(0)
    x = jax.random.normal(key, (N, FIL * STAGE, H, W), dtype=jnp.float32)

    params, raw = make_params(0, FIL, STAGE)
    fwd = jax.jit(functools.partial(dense_d_block, fil=FIL))
    out = jax.block_until_ready(fwd(x, params))

    assert out.shape == (N, FIL, H // 4, W // 4), out.shape
    assert bool(jnp.all(jnp.isfinite(out)))

    # bf16 Pallas kernels vs f32 XLA reference of the same DenseDBlock forward.
    ref = ref_dense_d_block(x, raw)
    rel = float(jnp.linalg.norm(out - ref) / (jnp.linalg.norm(ref) + 1e-8))
    assert rel < 5e-2, f"relative L2 error vs reference too large: {rel}"

    print("KERNEL_OK")
</pallas_src>

<mosaic_0001>
module attributes {stable_mosaic.version = 11 : i64} {
  func.func @_pointwise_prelu_kernel(%arg0: i32, %arg1: i32, %arg2: memref<1x256x256xbf16, #tpu.memory_space<vmem>>, %arg3: memref<256x128xbf16, #tpu.memory_space<vmem>>, %arg4: memref<1x128xf32, #tpu.memory_space<vmem>>, %arg5: memref<1x1xf32, #tpu.memory_space<smem>>, %arg6: memref<1x256x128xbf16, #tpu.memory_space<vmem>>) attributes {dimension_semantics = [#tpu.dimension_semantics<parallel>, #tpu.dimension_semantics<parallel>], iteration_bounds = array<i64: 2, 4>, scalar_prefetch = 0 : i64, scratch_operands = 0 : i64, tpu.core_type = #tpu.core_type<tc>, window_params = [{transform_indices = @transform_0, window_bounds = array<i64: 1, 256, 256>}, {pipeline_mode = #tpu.pipeline_mode<synchronous>, transform_indices = @transform_1, window_bounds = array<i64: 256, 128>}, {pipeline_mode = #tpu.pipeline_mode<synchronous>, transform_indices = @transform_2, window_bounds = array<i64: 1, 128>}, {transform_indices = @transform_3, window_bounds = array<i64: 1, 1>}, {transform_indices = @transform_4, window_bounds = array<i64: 1, 256, 128>}]} {
    %c0 = arith.constant 0 : index
    %c0_0 = arith.constant 0 : index
    %c0_1 = arith.constant 0 : index
    %0 = vector.load %arg2[%c0, %c0_0, %c0_1] : memref<1x256x256xbf16, #tpu.memory_space<vmem>>, vector<1x256x256xbf16>
    %1 = vector.shape_cast %0 : vector<1x256x256xbf16> to vector<256x256xbf16>
    %c0_2 = arith.constant 0 : index
    %c0_3 = arith.constant 0 : index
    %2 = vector.load %arg3[%c0_2, %c0_3] : memref<256x128xbf16, #tpu.memory_space<vmem>>, vector<256x128xbf16>
    %cst = arith.constant dense<0.000000e+00> : vector<256x128xf32>
    %3 = tpu.matmul %1, %2, %cst {dimension_numbers = #tpu.dot_dimension_numbers<[1], [0], [0], [1], [0, 0, 1, 1], [], []>} : vector<256x256xbf16>, vector<256x128xbf16>, vector<256x128xf32> -> vector<256x128xf32>
    %c0_4 = arith.constant 0 : index
    %c0_5 = arith.constant 0 : index
    %4 = vector.load %arg4[%c0_4, %c0_5] : memref<1x128xf32, #tpu.memory_space<vmem>>, vector<1x128xf32>
    %5 = vector.broadcast %4 : vector<1x128xf32> to vector<256x128xf32>
    %6 = arith.addf %3, %5 : vector<256x128xf32>
    %c0_6 = arith.constant 0 : index
    %c0_7 = arith.constant 0 : index
    %7 = memref.load %arg5[%c0_6, %c0_7] : memref<1x1xf32, #tpu.memory_space<smem>>
    %cst_8 = arith.constant 0.000000e+00 : f32
    %8 = vector.broadcast %cst_8 : f32 to vector<256x128xf32>
    %9 = arith.cmpf oge, %6, %8 : vector<256x128xf32>
    %10 = vector.broadcast %7 : f32 to vector<256x128xf32>
    %11 = arith.mulf %10, %6 : vector<256x128xf32>
    %12 = arith.select %9, %6, %11 : vector<256x128xi1>, vector<256x128xf32>
    %13 = arith.truncf %12 : vector<256x128xf32> to vector<256x128xbf16>
    %c0_9 = arith.constant 0 : index
    %c0_10 = arith.constant 0 : index
    %c0_11 = arith.constant 0 : index
    %14 = vector.load %arg6[%c0_9, %c0_10, %c0_11] : memref<1x256x128xbf16, #tpu.memory_space<vmem>>, vector<1x256x128xbf16>
    %15 = vector.shape_cast %14 : vector<1x256x128xbf16> to vector<256x128xbf16>
    %16 = vector.shape_cast %13 : vector<256x128xbf16> to vector<1x256x128xbf16>
    tpu.vector_store %arg6[%c0_9, %c0_10, %c0_11], %16 {strides = array<i32>} : memref<1x256x128xbf16, #tpu.memory_space<vmem>>, vector<1x256x128xbf16>,
    return
  }
  func.func @transform_0(%arg0: i32, %arg1: i32) -> (i32, i32, i32) {
    %c0_i32 = arith.constant 0 : i32
    %c0_i32_0 = arith.constant 0 : i32
    return %arg0, %arg1, %c0_i32 : i32, i32, i32
  }
  func.func @transform_1(%arg0: i32, %arg1: i32) -> (i32, i32) {
    %c0_i32 = arith.constant 0 : i32
    %c0_i32_0 = arith.constant 0 : i32
    %c0_i32_1 = arith.constant 0 : i32
    return %c0_i32, %c0_i32_0 : i32, i32
  }
  func.func @transform_2(%arg0: i32, %arg1: i32) -> (i32, i32) {
    %c0_i32 = arith.constant 0 : i32
    %c0_i32_0 = arith.constant 0 : i32
    %c0_i32_1 = arith.constant 0 : i32
    return %c0_i32, %c0_i32_0 : i32, i32
  }
  func.func @transform_3(%arg0: i32, %arg1: i32) -> (i32, i32) {
    %c0_i32 = arith.constant 0 : i32
    %c0_i32_0 = arith.constant 0 : i32
    %c0_i32_1 = arith.constant 0 : i32
    return %c0_i32, %c0_i32_0 : i32, i32
  }
  func.func @transform_4(%arg0: i32, %arg1: i32) -> (i32, i32, i32) {
    %c0_i32 = arith.constant 0 : i32
    %c0_i32_0 = arith.constant 0 : i32
    return %arg0, %arg1, %c0_i32 : i32, i32, i32
  }
}

module attributes {stable_mosaic.version = 11 : i64} {
  func.func @_phase_conv3x3_kernel(%arg0: i32, %arg1: i32, %arg2: memref<1x32x128xbf16, #tpu.memory_space<vmem>>, %arg3: memref<1x256x128xbf16, #tpu.memory_space<vmem>>, %arg4: memref<1x32x128xbf16, #tpu.memory_space<vmem>>, %arg5: memref<3x384x8xbf16, #tpu.memory_space<vmem>>, %arg6: memref<1x8xf32, #tpu.memory_space<vmem>>, %arg7: memref<1x1xf32, #tpu.memory_space<smem>>, %arg8: memref<1x256x8xbf16, #tpu.memory_space<vmem>>) attributes {dimension_semantics = [#tpu.dimension_semantics<parallel>, #tpu.dimension_semantics<parallel>], iteration_bounds = array<i64: 2, 4>, scalar_prefetch = 0 : i64, scratch_operands = 0 : i64, tpu.core_type = #tpu.core_type<tc>, window_params = [{transform_indices = @transform_0, window_bounds = array<i64: 1, 32, 128>}, {transform_indices = @transform_1, window_bounds = array<i64: 1, 256, 128>}, {transform_indices = @transform_2, window_bounds = array<i64: 1, 32, 128>}, {pipeline_mode = #tpu.pipeline_mode<synchronous>, transform_indices = @transform_3, window_bounds = array<i64: 3, 384, 8>}, {pipeline_mode = #tpu.pipeline_mode<synchronous>, transform_indices = @transform_4, window_bounds = array<i64: 1, 8>}, {transform_indices = @transform_5, window_bounds = array<i64: 1, 1>}, {transform_indices = @transform_6, window_bounds = array<i64: 1, 256, 8>}]} {
    %c0_i32 = arith.constant 0 : i32
    %0 = arith.cmpi sgt, %arg1, %c0_i32 : i32
    %1 = arith.extui %0 : i1 to i32
    %2 = arith.sitofp %1 : i32 to f32
    %3 = arith.truncf %2 : f32 to bf16
    %c3_i32 = arith.constant 3 : i32
    %4 = arith.cmpi slt, %arg1, %c3_i32 : i32
    %5 = arith.extui %4 : i1 to i32
    %6 = arith.sitofp %5 : i32 to f32
    %7 = arith.truncf %6 : f32 to bf16
    %c0 = arith.constant 0 : index
    %c0_0 = arith.constant 0 : index
    %c0_1 = arith.constant 0 : index
    %8 = vector.load %arg3[%c0, %c0_0, %c0_1] : memref<1x256x128xbf16, #tpu.memory_space<vmem>>, vector<1x256x128xbf16>
    %9 = vector.shape_cast %8 : vector<1x256x128xbf16> to vector<256x128xbf16>
    %c0_2 = arith.constant 0 : index
    %c0_3 = arith.constant 0 : index
    %c0_4 = arith.constant 0 : index
    %10 = vector.load %arg2[%c0_2, %c0_3, %c0_4] : memref<1x32x128xbf16, #tpu.memory_space<vmem>>, vector<1x32x128xbf16>
    %11 = vector.shape_cast %10 : vector<1x32x128xbf16> to vector<32x128xbf16>
    %12 = vector.broadcast %3 : bf16 to vector<32x128xbf16>
    %13 = arith.mulf %11, %12 : vector<32x128xbf16>
    %14 = vector.extract_strided_slice %9 {offsets = [0, 0], sizes = [224, 128], strides = [1, 1]} : vector<256x128xbf16> to vector<224x128xbf16>
    %15 = tpu.concatenate %13, %14 in 0 : vector<32x128xbf16>, vector<224x128xbf16> -> vector<256x128xbf16>
    %16 = vector.extract_strided_slice %9 {offsets = [32, 0], sizes = [224, 128], strides = [1, 1]} : vector<256x128xbf16> to vector<224x128xbf16>
    %c0_5 = arith.constant 0 : index
    %c0_6 = arith.constant 0 : index
    %c0_7 = arith.constant 0 : index
    %17 = vector.load %arg4[%c0_5, %c0_6, %c0_7] : memref<1x32x128xbf16, #tpu.memory_space<vmem>>, vector<1x32x128xbf16>
    %18 = vector.shape_cast %17 : vector<1x32x128xbf16> to vector<32x128xbf16>
    %19 = vector.broadcast %7 : bf16 to vector<32x128xbf16>
    %20 = arith.mulf %18, %19 : vector<32x128xbf16>
    %21 = tpu.concatenate %16, %20 in 0 : vector<224x128xbf16>, vector<32x128xbf16> -> vector<256x128xbf16>
    %22 = tpu.concatenate %15, %9, %21 in 1 : vector<256x128xbf16>, vector<256x128xbf16>, vector<256x128xbf16> -> vector<256x384xbf16>
    %c0_8 = arith.constant 0 : index
    %c0_9 = arith.constant 0 : index
    %c0_10 = arith.constant 0 : index
    %23 = vector.load %arg5[%c0_8, %c0_9, %c0_10] : memref<3x384x8xbf16, #tpu.memory_space<vmem>>, vector<1x384x8xbf16>
    %24 = vector.shape_cast %23 : vector<1x384x8xbf16> to vector<384x8xbf16>
    %cst = arith.constant dense<0.000000e+00> : vector<256x8xf32>
    %25 = tpu.matmul %22, %24, %cst {dimension_numbers = #tpu.dot_dimension_numbers<[1], [0], [0], [1], [0, 0, 1, 1], [], []>} : vector<256x384xbf16>, vector<384x8xbf16>, vector<256x8xf32> -> vector<256x8xf32>
    %c1 = arith.constant 1 : index
    %c0_11 = arith.constant 0 : index
    %c0_12 = arith.constant 0 : index
    %26 = vector.load %arg5[%c1, %c0_11, %c0_12] : memref<3x384x8xbf16, #tpu.memory_space<vmem>>, vector<1x384x8xbf16>
    %27 = vector.shape_cast %26 : vector<1x384x8xbf16> to vector<384x8xbf16>
    %cst_13 = arith.constant dense<0.000000e+00> : vector<256x8xf32>
    %28 = tpu.matmul %22, %27, %cst_13 {dimension_numbers = #tpu.dot_dimension_numbers<[1], [0], [0], [1], [0, 0, 1, 1], [], []>} : vector<256x384xbf16>, vector<384x8xbf16>, vector<256x8xf32> -> vector<256x8xf32>
    %c2 = arith.constant 2 : index
    %c0_14 = arith.constant 0 : index
    %c0_15 = arith.constant 0 : index
    %29 = vector.load %arg5[%c2, %c0_14, %c0_15] : memref<3x384x8xbf16, #tpu.memory_space<vmem>>, vector<1x384x8xbf16>
    %30 = vector.shape_cast %29 : vector<1x384x8xbf16> to vector<384x8xbf16>
    %cst_16 = arith.constant dense<0.000000e+00> : vector<256x8xf32>
    %31 = tpu.matmul %22, %30, %cst_16 {dimension_numbers = #tpu.dot_dimension_numbers<[1], [0], [0], [1], [0, 0, 1, 1], [], []>} : vector<256x384xbf16>, vector<384x8xbf16>, vector<256x8xf32> -> vector<256x8xf32>
    %32 = tpu.iota {dimensions = array<i32: 0>} : vector<256x1xi32>
    %c31_i32 = arith.constant 31 : i32
    %33 = vector.broadcast %c31_i32 : i32 to vector<256x1xi32>
    %34 = arith.andi %32, %33 : vector<256x1xi32>
    %c0_i32_17 = arith.constant 0 : i32
    %35 = vector.broadcast %c0_i32_17 : i32 to vector<256x1xi32>
    %36 = arith.cmpi sgt, %34, %35 : vector<256x1xi32>
    %37 = arith.extui %36 : vector<256x1xi1> to vector<256x1xi32>
    %38 = arith.sitofp %37 : vector<256x1xi32> to vector<256x1xf32>
    %c31_i32_18 = arith.constant 31 : i32
    %39 = vector.broadcast %c31_i32_18 : i32 to vector<256x1xi32>
    %40 = arith.cmpi slt, %34, %39 : vector<256x1xi32>
    %41 = arith.extui %40 : vector<256x1xi1> to vector<256x1xi32>
    %42 = arith.sitofp %41 : vector<256x1xi32> to vector<256x1xf32>
    %c1_i32 = arith.constant 1 : i32
    %43 = tpu.dynamic_rotate %25 by %c1_i32 dim 0 : vector<256x8xf32>, i32 -> vector<256x8xf32>
    %44 = vector.broadcast %38 : vector<256x1xf32> to vector<256x8xf32>
    %45 = arith.mulf %44, %43 : vector<256x8xf32>
    %46 = arith.addf %28, %45 : vector<256x8xf32>
    %c255_i32 = arith.constant 255 : i32
    %47 = tpu.dynamic_rotate %31 by %c255_i32 dim 0 : vector<256x8xf32>, i32 -> vector<256x8xf32>
    %48 = vector.broadcast %42 : vector<256x1xf32> to vector<256x8xf32>
    %49 = arith.mulf %48, %47 : vector<256x8xf32>
    %50 = arith.addf %46, %49 : vector<256x8xf32>
    %c0_19 = arith.constant 0 : index
    %c0_20 = arith.constant 0 : index
    %51 = vector.load %arg6[%c0_19, %c0_20] : memref<1x8xf32, #tpu.memory_space<vmem>>, vector<1x8xf32>
    %52 = vector.broadcast %51 : vector<1x8xf32> to vector<256x8xf32>
    %53 = arith.addf %50, %52 : vector<256x8xf32>
    %c0_21 = arith.constant 0 : index
    %c0_22 = arith.constant 0 : index
    %54 = memref.load %arg7[%c0_21, %c0_22] : memref<1x1xf32, #tpu.memory_space<smem>>
    %cst_23 = arith.constant 0.000000e+00 : f32
    %55 = vector.broadcast %cst_23 : f32 to vector<256x8xf32>
    %56 = arith.cmpf oge, %53, %55 : vector<256x8xf32>
    %57 = vector.broadcast %54 : f32 to vector<256x8xf32>
    %58 = arith.mulf %57, %53 : vector<256x8xf32>
    %59 = arith.select %56, %53, %58 : vector<256x8xi1>, vector<256x8xf32>
    %60 = arith.truncf %59 : vector<256x8xf32> to vector<256x8xbf16>
    %c0_24 = arith.constant 0 : index
    %c0_25 = arith.constant 0 : index
    %c0_26 = arith.constant 0 : index
    %61 = vector.load %arg8[%c0_24, %c0_25, %c0_26] : memref<1x256x8xbf16, #tpu.memory_space<vmem>>, vector<1x256x8xbf16>
    %62 = vector.shape_cast %61 : vector<1x256x8xbf16> to vector<256x8xbf16>
    %63 = vector.shape_cast %60 : vector<256x8xbf16> to vector<1x256x8xbf16>
    tpu.vector_store %arg8[%c0_24, %c0_25, %c0_26], %63 {strides = array<i32>} : memref<1x256x8xbf16, #tpu.memory_space<vmem>>, vector<1x256x8xbf16>,
    return
  }
  func.func @transform_0(%arg0: i32, %arg1: i32) -> (i32, i32, i32) {
    %c8_i32 = arith.constant 8 : i32
    %0 = arith.muli %arg1, %c8_i32 : i32
    %c1_i32 = arith.constant 1 : i32
    %1 = arith.subi %0, %c1_i32 : i32
    %c0_i32 = arith.constant 0 : i32
    %2 = arith.maxsi %1, %c0_i32 : i32
    %c0_i32_0 = arith.constant 0 : i32
    %c0_i32_1 = arith.constant 0 : i32
    return %arg0, %2, %c0_i32_0 : i32, i32, i32
  }
  func.func @transform_1(%arg0: i32, %arg1: i32) -> (i32, i32, i32) {
    %c0_i32 = arith.constant 0 : i32
    %c0_i32_0 = arith.constant 0 : i32
    return %arg0, %arg1, %c0_i32 : i32, i32, i32
  }
  func.func @transform_2(%arg0: i32, %arg1: i32) -> (i32, i32, i32) {
    %c8_i32 = arith.constant 8 : i32
    %0 = arith.muli %arg1, %c8_i32 : i32
    %c8_i32_0 = arith.constant 8 : i32
    %1 = arith.addi %0, %c8_i32_0 : i32
    %c31_i32 = arith.constant 31 : i32
    %2 = arith.minsi %1, %c31_i32 : i32
    %c0_i32 = arith.constant 0 : i32
    %c0_i32_1 = arith.constant 0 : i32
    return %arg0, %2, %c0_i32 : i32, i32, i32
  }
  func.func @transform_3(%arg0: i32, %arg1: i32) -> (i32, i32, i32) {
    %c0_i32 = arith.constant 0 : i32
    %c0_i32_0 = arith.constant 0 : i32
    %c0_i32_1 = arith.constant 0 : i32
    %c0_i32_2 = arith.constant 0 : i32
    return %c0_i32, %c0_i32_0, %c0_i32_1 : i32, i32, i32
  }
  func.func @transform_4(%arg0: i32, %arg1: i32) -> (i32, i32) {
    %c0_i32 = arith.constant 0 : i32
    %c0_i32_0 = arith.constant 0 : i32
    %c0_i32_1 = arith.constant 0 : i32
    return %c0_i32, %c0_i32_0 : i32, i32
  }
  func.func @transform_5(%arg0: i32, %arg1: i32) -> (i32, i32) {
    %c0_i32 = arith.constant 0 : i32
    %c0_i32_0 = arith.constant 0 : i32
    %c0_i32_1 = arith.constant 0 : i32
    return %c0_i32, %c0_i32_0 : i32, i32
  }
  func.func @transform_6(%arg0: i32, %arg1: i32) -> (i32, i32, i32) {
    %c0_i32 = arith.constant 0 : i32
    %c0_i32_0 = arith.constant 0 : i32
    return %arg0, %arg1, %c0_i32 : i32, i32, i32
  }
}

module attributes {stable_mosaic.version = 11 : i64} {
  func.func @_phase_conv3x3_kernel(%arg0: i32, %arg1: i32, %arg2: memref<1x32x8xbf16, #tpu.memory_space<vmem>>, %arg3: memref<1x256x8xbf16, #tpu.memory_space<vmem>>, %arg4: memref<1x32x8xbf16, #tpu.memory_space<vmem>>, %arg5: memref<3x8x384xbf16, #tpu.memory_space<vmem>>, %arg6: memref<1x128xf32, #tpu.memory_space<vmem>>, %arg7: memref<1x1xf32, #tpu.memory_space<smem>>, %arg8: memref<1x256x128xbf16, #tpu.memory_space<vmem>>, %arg9: memref<1x256x128xbf16, #tpu.memory_space<vmem>>) attributes {dimension_semantics = [#tpu.dimension_semantics<parallel>, #tpu.dimension_semantics<parallel>], iteration_bounds = array<i64: 2, 4>, scalar_prefetch = 0 : i64, scratch_operands = 0 : i64, tpu.core_type = #tpu.core_type<tc>, window_params = [{transform_indices = @transform_0, window_bounds = array<i64: 1, 32, 8>}, {transform_indices = @transform_1, window_bounds = array<i64: 1, 256, 8>}, {transform_indices = @transform_2, window_bounds = array<i64: 1, 32, 8>}, {pipeline_mode = #tpu.pipeline_mode<synchronous>, transform_indices = @transform_3, window_bounds = array<i64: 3, 8, 384>}, {pipeline_mode = #tpu.pipeline_mode<synchronous>, transform_indices = @transform_4, window_bounds = array<i64: 1, 128>}, {transform_indices = @transform_5, window_bounds = array<i64: 1, 1>}, {transform_indices = @transform_6, window_bounds = array<i64: 1, 256, 128>}, {transform_indices = @transform_7, window_bounds = array<i64: 1, 256, 128>}]} {
    %c0_i32 = arith.constant 0 : i32
    %0 = arith.cmpi sgt, %arg1, %c0_i32 : i32
    %1 = arith.extui %0 : i1 to i32
    %2 = arith.sitofp %1 : i32 to f32
    %3 = arith.truncf %2 : f32 to bf16
    %c3_i32 = arith.constant 3 : i32
    %4 = arith.cmpi slt, %arg1, %c3_i32 : i32
    %5 = arith.extui %4 : i1 to i32
    %6 = arith.sitofp %5 : i32 to f32
    %7 = arith.truncf %6 : f32 to bf16
    %c0 = arith.constant 0 : index
    %c0_0 = arith.constant 0 : index
    %c0_1 = arith.constant 0 : index
    %8 = vector.load %arg3[%c0, %c0_0, %c0_1] : memref<1x256x8xbf16, #tpu.memory_space<vmem>>, vector<1x256x8xbf16>
    %9 = vector.shape_cast %8 : vector<1x256x8xbf16> to vector<256x8xbf16>
    %c0_2 = arith.constant 0 : index
    %c0_3 = arith.constant 0 : index
    %c0_4 = arith.constant 0 : index
    %10 = vector.load %arg2[%c0_2, %c0_3, %c0_4] : memref<1x32x8xbf16, #tpu.memory_space<vmem>>, vector<1x32x8xbf16>
    %11 = vector.shape_cast %10 : vector<1x32x8xbf16> to vector<32x8xbf16>
    %12 = vector.broadcast %3 : bf16 to vector<32x8xbf16>
    %13 = arith.mulf %11, %12 : vector<32x8xbf16>
    %14 = vector.extract_strided_slice %9 {offsets = [0, 0], sizes = [224, 8], strides = [1, 1]} : vector<256x8xbf16> to vector<224x8xbf16>
    %15 = tpu.concatenate %13, %14 in 0 : vector<32x8xbf16>, vector<224x8xbf16> -> vector<256x8xbf16>
    %16 = vector.extract_strided_slice %9 {offsets = [32, 0], sizes = [224, 8], strides = [1, 1]} : vector<256x8xbf16> to vector<224x8xbf16>
    %c0_5 = arith.constant 0 : index
    %c0_6 = arith.constant 0 : index
    %c0_7 = arith.constant 0 : index
    %17 = vector.load %arg4[%c0_5, %c0_6, %c0_7] : memref<1x32x8xbf16, #tpu.memory_space<vmem>>, vector<1x32x8xbf16>
    %18 = vector.shape_cast %17 : vector<1x32x8xbf16> to vector<32x8xbf16>
    %19 = vector.broadcast %7 : bf16 to vector<32x8xbf16>
    %20 = arith.mulf %18, %19 : vector<32x8xbf16>
    %21 = tpu.concatenate %16, %20 in 0 : vector<224x8xbf16>, vector<32x8xbf16> -> vector<256x8xbf16>
    %c0_8 = arith.constant 0 : index
    %c0_9 = arith.constant 0 : index
    %c0_10 = arith.constant 0 : index
    %22 = vector.load %arg5[%c0_8, %c0_9, %c0_10] : memref<3x8x384xbf16, #tpu.memory_space<vmem>>, vector<1x8x384xbf16>
    %23 = vector.shape_cast %22 : vector<1x8x384xbf16> to vector<8x384xbf16>
    %cst = arith.constant dense<0.000000e+00> : vector<256x384xf32>
    %24 = tpu.matmul %15, %23, %cst {dimension_numbers = #tpu.dot_dimension_numbers<[1], [0], [0], [1], [0, 0, 1, 1], [], []>} : vector<256x8xbf16>, vector<8x384xbf16>, vector<256x384xf32> -> vector<256x384xf32>
    %c1 = arith.constant 1 : index
    %c0_11 = arith.constant 0 : index
    %c0_12 = arith.constant 0 : index
    %25 = vector.load %arg5[%c1, %c0_11, %c0_12] : memref<3x8x384xbf16, #tpu.memory_space<vmem>>, vector<1x8x384xbf16>
    %26 = vector.shape_cast %25 : vector<1x8x384xbf16> to vector<8x384xbf16>
    %cst_13 = arith.constant dense<0.000000e+00> : vector<256x384xf32>
    %27 = tpu.matmul %9, %26, %cst_13 {dimension_numbers = #tpu.dot_dimension_numbers<[1], [0], [0], [1], [0, 0, 1, 1], [], []>} : vector<256x8xbf16>, vector<8x384xbf16>, vector<256x384xf32> -> vector<256x384xf32>
    %28 = arith.addf %24, %27 : vector<256x384xf32>
    %c2 = arith.constant 2 : index
    %c0_14 = arith.constant 0 : index
    %c0_15 = arith.constant 0 : index
    %29 = vector.load %arg5[%c2, %c0_14, %c0_15] : memref<3x8x384xbf16, #tpu.memory_space<vmem>>, vector<1x8x384xbf16>
    %30 = vector.shape_cast %29 : vector<1x8x384xbf16> to vector<8x384xbf16>
    %cst_16 = arith.constant dense<0.000000e+00> : vector<256x384xf32>
    %31 = tpu.matmul %21, %30, %cst_16 {dimension_numbers = #tpu.dot_dimension_numbers<[1], [0], [0], [1], [0, 0, 1, 1], [], []>} : vector<256x8xbf16>, vector<8x384xbf16>, vector<256x384xf32> -> vector<256x384xf32>
    %32 = arith.addf %28, %31 : vector<256x384xf32>
    %33 = vector.extract_strided_slice %32 {offsets = [0, 0], sizes = [256, 128], strides = [1, 1]} : vector<256x384xf32> to vector<256x128xf32>
    %34 = vector.extract_strided_slice %32 {offsets = [0, 128], sizes = [256, 128], strides = [1, 1]} : vector<256x384xf32> to vector<256x128xf32>
    %35 = vector.extract_strided_slice %32 {offsets = [0, 256], sizes = [256, 128], strides = [1, 1]} : vector<256x384xf32> to vector<256x128xf32>
    %36 = tpu.iota {dimensions = array<i32: 0>} : vector<256x1xi32>
    %c31_i32 = arith.constant 31 : i32
    %37 = vector.broadcast %c31_i32 : i32 to vector<256x1xi32>
    %38 = arith.andi %36, %37 : vector<256x1xi32>
    %c0_i32_17 = arith.constant 0 : i32
    %39 = vector.broadcast %c0_i32_17 : i32 to vector<256x1xi32>
    %40 = arith.cmpi sgt, %38, %39 : vector<256x1xi32>
    %41 = arith.extui %40 : vector<256x1xi1> to vector<256x1xi32>
    %42 = arith.sitofp %41 : vector<256x1xi32> to vector<256x1xf32>
    %c31_i32_18 = arith.constant 31 : i32
    %43 = vector.broadcast %c31_i32_18 : i32 to vector<256x1xi32>
    %44 = arith.cmpi slt, %38, %43 : vector<256x1xi32>
    %45 = arith.extui %44 : vector<256x1xi1> to vector<256x1xi32>
    %46 = arith.sitofp %45 : vector<256x1xi32> to vector<256x1xf32>
    %c1_i32 = arith.constant 1 : i32
    %47 = tpu.dynamic_rotate %33 by %c1_i32 dim 0 : vector<256x128xf32>, i32 -> vector<256x128xf32>
    %48 = vector.broadcast %42 : vector<256x1xf32> to vector<256x128xf32>
    %49 = arith.mulf %48, %47 : vector<256x128xf32>
    %50 = arith.addf %34, %49 : vector<256x128xf32>
    %c255_i32 = arith.constant 255 : i32
    %51 = tpu.dynamic_rotate %35 by %c255_i32 dim 0 : vector<256x128xf32>, i32 -> vector<256x128xf32>
    %52 = vector.broadcast %46 : vector<256x1xf32> to vector<256x128xf32>
    %53 = arith.mulf %52, %51 : vector<256x128xf32>
    %54 = arith.addf %50, %53 : vector<256x128xf32>
    %c0_19 = arith.constant 0 : index
    %c0_20 = arith.constant 0 : index
    %55 = vector.load %arg6[%c0_19, %c0_20] : memref<1x128xf32, #tpu.memory_space<vmem>>, vector<1x128xf32>
    %56 = vector.broadcast %55 : vector<1x128xf32> to vector<256x128xf32>
    %57 = arith.addf %54, %56 : vector<256x128xf32>
    %c0_21 = arith.constant 0 : index
    %c0_22 = arith.constant 0 : index
    %58 = memref.load %arg7[%c0_21, %c0_22] : memref<1x1xf32, #tpu.memory_space<smem>>
    %cst_23 = arith.constant 0.000000e+00 : f32
    %59 = vector.broadcast %cst_23 : f32 to vector<256x128xf32>
    %60 = arith.cmpf oge, %57, %59 : vector<256x128xf32>
    %61 = vector.broadcast %58 : f32 to vector<256x128xf32>
    %62 = arith.mulf %61, %57 : vector<256x128xf32>
    %63 = arith.select %60, %57, %62 : vector<256x128xi1>, vector<256x128xf32>
    %c0_24 = arith.constant 0 : index
    %c0_25 = arith.constant 0 : index
    %c0_26 = arith.constant 0 : index
    %64 = vector.load %arg8[%c0_24, %c0_25, %c0_26] : memref<1x256x128xbf16, #tpu.memory_space<vmem>>, vector<1x256x128xbf16>
    %65 = vector.shape_cast %64 : vector<1x256x128xbf16> to vector<256x128xbf16>
    %66 = arith.extf %65 : vector<256x128xbf16> to vector<256x128xf32>
    %cst_27 = arith.constant -1.000000e+00 : f32
    %67 = vector.broadcast %cst_27 : f32 to vector<256x128xf32>
    %68 = arith.mulf %67, %66 : vector<256x128xf32>
    %69 = arith.addf %63, %68 : vector<256x128xf32>
    %70 = arith.truncf %69 : vector<256x128xf32> to vector<256x128xbf16>
    %c0_28 = arith.constant 0 : index
    %c0_29 = arith.constant 0 : index
    %c0_30 = arith.constant 0 : index
    %71 = vector.load %arg9[%c0_28, %c0_29, %c0_30] : memref<1x256x128xbf16, #tpu.memory_space<vmem>>, vector<1x256x128xbf16>
    %72 = vector.shape_cast %71 : vector<1x256x128xbf16> to vector<256x128xbf16>
    %73 = vector.shape_cast %70 : vector<256x128xbf16> to vector<1x256x128xbf16>
    tpu.vector_store %arg9[%c0_28, %c0_29, %c0_30], %73 {strides = array<i32>} : memref<1x256x128xbf16, #tpu.memory_space<vmem>>, vector<1x256x128xbf16>,
    return
  }
  func.func @transform_0(%arg0: i32, %arg1: i32) -> (i32, i32, i32) {
    %c8_i32 = arith.constant 8 : i32
    %0 = arith.muli %arg1, %c8_i32 : i32
    %c1_i32 = arith.constant 1 : i32
    %1 = arith.subi %0, %c1_i32 : i32
    %c0_i32 = arith.constant 0 : i32
    %2 = arith.maxsi %1, %c0_i32 : i32
    %c0_i32_0 = arith.constant 0 : i32
    %c0_i32_1 = arith.constant 0 : i32
    return %arg0, %2, %c0_i32_0 : i32, i32, i32
  }
  func.func @transform_1(%arg0: i32, %arg1: i32) -> (i32, i32, i32) {
    %c0_i32 = arith.constant 0 : i32
    %c0_i32_0 = arith.constant 0 : i32
    return %arg0, %arg1, %c0_i32 : i32, i32, i32
  }
  func.func @transform_2(%arg0: i32, %arg1: i32) -> (i32, i32, i32) {
    %c8_i32 = arith.constant 8 : i32
    %0 = arith.muli %arg1, %c8_i32 : i32
    %c8_i32_0 = arith.constant 8 : i32
    %1 = arith.addi %0, %c8_i32_0 : i32
    %c31_i32 = arith.constant 31 : i32
    %2 = arith.minsi %1, %c31_i32 : i32
    %c0_i32 = arith.constant 0 : i32
    %c0_i32_1 = arith.constant 0 : i32
    return %arg0, %2, %c0_i32 : i32, i32, i32
  }
  func.func @transform_3(%arg0: i32, %arg1: i32) -> (i32, i32, i32) {
    %c0_i32 = arith.constant 0 : i32
    %c0_i32_0 = arith.constant 0 : i32
    %c0_i32_1 = arith.constant 0 : i32
    %c0_i32_2 = arith.constant 0 : i32
    return %c0_i32, %c0_i32_0, %c0_i32_1 : i32, i32, i32
  }
  func.func @transform_4(%arg0: i32, %arg1: i32) -> (i32, i32) {
    %c0_i32 = arith.constant 0 : i32
    %c0_i32_0 = arith.constant 0 : i32
    %c0_i32_1 = arith.constant 0 : i32
    return %c0_i32, %c0_i32_0 : i32, i32
  }
  func.func @transform_5(%arg0: i32, %arg1: i32) -> (i32, i32) {
    %c0_i32 = arith.constant 0 : i32
    %c0_i32_0 = arith.constant 0 : i32
    %c0_i32_1 = arith.constant 0 : i32
    return %c0_i32, %c0_i32_0 : i32, i32
  }
  func.func @transform_6(%arg0: i32, %arg1: i32) -> (i32, i32, i32) {
    %c0_i32 = arith.constant 0 : i32
    %c0_i32_0 = arith.constant 0 : i32
    return %arg0, %arg1, %c0_i32 : i32, i32, i32
  }
  func.func @transform_7(%arg0: i32, %arg1: i32) -> (i32, i32, i32) {
    %c0_i32 = arith.constant 0 : i32
    %c0_i32_0 = arith.constant 0 : i32
    return %arg0, %arg1, %c0_i32 : i32, i32, i32
  }
}

module attributes {stable_mosaic.version = 11 : i64} {
  func.func @_phase_conv3x3_kernel(%arg0: i32, %arg1: i32, %arg2: memref<1x32x128xbf16, #tpu.memory_space<vmem>>, %arg3: memref<1x256x128xbf16, #tpu.memory_space<vmem>>, %arg4: memref<1x32x128xbf16, #tpu.memory_space<vmem>>, %arg5: memref<3x384x8xbf16, #tpu.memory_space<vmem>>, %arg6: memref<1x8xf32, #tpu.memory_space<vmem>>, %arg7: memref<1x1xf32, #tpu.memory_space<smem>>, %arg8: memref<1x256x8xbf16, #tpu.memory_space<vmem>>, %arg9: memref<1x256x8xf32, #tpu.memory_space<vmem>>) attributes {dimension_semantics = [#tpu.dimension_semantics<parallel>, #tpu.dimension_semantics<parallel>], iteration_bounds = array<i64: 2, 4>, scalar_prefetch = 0 : i64, scratch_operands = 0 : i64, tpu.core_type = #tpu.core_type<tc>, window_params = [{transform_indices = @transform_0, window_bounds = array<i64: 1, 32, 128>}, {transform_indices = @transform_1, window_bounds = array<i64: 1, 256, 128>}, {transform_indices = @transform_2, window_bounds = array<i64: 1, 32, 128>}, {pipeline_mode = #tpu.pipeline_mode<synchronous>, transform_indices = @transform_3, window_bounds = array<i64: 3, 384, 8>}, {pipeline_mode = #tpu.pipeline_mode<synchronous>, transform_indices = @transform_4, window_bounds = array<i64: 1, 8>}, {transform_indices = @transform_5, window_bounds = array<i64: 1, 1>}, {transform_indices = @transform_6, window_bounds = array<i64: 1, 256, 8>}, {transform_indices = @transform_7, window_bounds = array<i64: 1, 256, 8>}]} {
    %c0_i32 = arith.constant 0 : i32
    %0 = arith.cmpi sgt, %arg1, %c0_i32 : i32
    %1 = arith.extui %0 : i1 to i32
    %2 = arith.sitofp %1 : i32 to f32
    %3 = arith.truncf %2 : f32 to bf16
    %c3_i32 = arith.constant 3 : i32
    %4 = arith.cmpi slt, %arg1, %c3_i32 : i32
    %5 = arith.extui %4 : i1 to i32
    %6 = arith.sitofp %5 : i32 to f32
    %7 = arith.truncf %6 : f32 to bf16
    %c0 = arith.constant 0 : index
    %c0_0 = arith.constant 0 : index
    %c0_1 = arith.constant 0 : index
    %8 = vector.load %arg3[%c0, %c0_0, %c0_1] : memref<1x256x128xbf16, #tpu.memory_space<vmem>>, vector<1x256x128xbf16>
    %9 = vector.shape_cast %8 : vector<1x256x128xbf16> to vector<256x128xbf16>
    %c0_2 = arith.constant 0 : index
    %c0_3 = arith.constant 0 : index
    %c0_4 = arith.constant 0 : index
    %10 = vector.load %arg2[%c0_2, %c0_3, %c0_4] : memref<1x32x128xbf16, #tpu.memory_space<vmem>>, vector<1x32x128xbf16>
    %11 = vector.shape_cast %10 : vector<1x32x128xbf16> to vector<32x128xbf16>
    %12 = vector.broadcast %3 : bf16 to vector<32x128xbf16>
    %13 = arith.mulf %11, %12 : vector<32x128xbf16>
    %14 = vector.extract_strided_slice %9 {offsets = [0, 0], sizes = [224, 128], strides = [1, 1]} : vector<256x128xbf16> to vector<224x128xbf16>
    %15 = tpu.concatenate %13, %14 in 0 : vector<32x128xbf16>, vector<224x128xbf16> -> vector<256x128xbf16>
    %16 = vector.extract_strided_slice %9 {offsets = [32, 0], sizes = [224, 128], strides = [1, 1]} : vector<256x128xbf16> to vector<224x128xbf16>
    %c0_5 = arith.constant 0 : index
    %c0_6 = arith.constant 0 : index
    %c0_7 = arith.constant 0 : index
    %17 = vector.load %arg4[%c0_5, %c0_6, %c0_7] : memref<1x32x128xbf16, #tpu.memory_space<vmem>>, vector<1x32x128xbf16>
    %18 = vector.shape_cast %17 : vector<1x32x128xbf16> to vector<32x128xbf16>
    %19 = vector.broadcast %7 : bf16 to vector<32x128xbf16>
    %20 = arith.mulf %18, %19 : vector<32x128xbf16>
    %21 = tpu.concatenate %16, %20 in 0 : vector<224x128xbf16>, vector<32x128xbf16> -> vector<256x128xbf16>
    %22 = tpu.concatenate %15, %9, %21 in 1 : vector<256x128xbf16>, vector<256x128xbf16>, vector<256x128xbf16> -> vector<256x384xbf16>
    %c0_8 = arith.constant 0 : index
    %c0_9 = arith.constant 0 : index
    %c0_10 = arith.constant 0 : index
    %23 = vector.load %arg5[%c0_8, %c0_9, %c0_10] : memref<3x384x8xbf16, #tpu.memory_space<vmem>>, vector<1x384x8xbf16>
    %24 = vector.shape_cast %23 : vector<1x384x8xbf16> to vector<384x8xbf16>
    %cst = arith.constant dense<0.000000e+00> : vector<256x8xf32>
    %25 = tpu.matmul %22, %24, %cst {dimension_numbers = #tpu.dot_dimension_numbers<[1], [0], [0], [1], [0, 0, 1, 1], [], []>} : vector<256x384xbf16>, vector<384x8xbf16>, vector<256x8xf32> -> vector<256x8xf32>
    %c1 = arith.constant 1 : index
    %c0_11 = arith.constant 0 : index
    %c0_12 = arith.constant 0 : index
    %26 = vector.load %arg5[%c1, %c0_11, %c0_12] : memref<3x384x8xbf16, #tpu.memory_space<vmem>>, vector<1x384x8xbf16>
    %27 = vector.shape_cast %26 : vector<1x384x8xbf16> to vector<384x8xbf16>
    %cst_13 = arith.constant dense<0.000000e+00> : vector<256x8xf32>
    %28 = tpu.matmul %22, %27, %cst_13 {dimension_numbers = #tpu.dot_dimension_numbers<[1], [0], [0], [1], [0, 0, 1, 1], [], []>} : vector<256x384xbf16>, vector<384x8xbf16>, vector<256x8xf32> -> vector<256x8xf32>
    %c2 = arith.constant 2 : index
    %c0_14 = arith.constant 0 : index
    %c0_15 = arith.constant 0 : index
    %29 = vector.load %arg5[%c2, %c0_14, %c0_15] : memref<3x384x8xbf16, #tpu.memory_space<vmem>>, vector<1x384x8xbf16>
    %30 = vector.shape_cast %29 : vector<1x384x8xbf16> to vector<384x8xbf16>
    %cst_16 = arith.constant dense<0.000000e+00> : vector<256x8xf32>
    %31 = tpu.matmul %22, %30, %cst_16 {dimension_numbers = #tpu.dot_dimension_numbers<[1], [0], [0], [1], [0, 0, 1, 1], [], []>} : vector<256x384xbf16>, vector<384x8xbf16>, vector<256x8xf32> -> vector<256x8xf32>
    %32 = tpu.iota {dimensions = array<i32: 0>} : vector<256x1xi32>
    %c31_i32 = arith.constant 31 : i32
    %33 = vector.broadcast %c31_i32 : i32 to vector<256x1xi32>
    %34 = arith.andi %32, %33 : vector<256x1xi32>
    %c0_i32_17 = arith.constant 0 : i32
    %35 = vector.broadcast %c0_i32_17 : i32 to vector<256x1xi32>
    %36 = arith.cmpi sgt, %34, %35 : vector<256x1xi32>
    %37 = arith.extui %36 : vector<256x1xi1> to vector<256x1xi32>
    %38 = arith.sitofp %37 : vector<256x1xi32> to vector<256x1xf32>
    %c31_i32_18 = arith.constant 31 : i32
    %39 = vector.broadcast %c31_i32_18 : i32 to vector<256x1xi32>
    %40 = arith.cmpi slt, %34, %39 : vector<256x1xi32>
    %41 = arith.extui %40 : vector<256x1xi1> to vector<256x1xi32>
    %42 = arith.sitofp %41 : vector<256x1xi32> to vector<256x1xf32>
    %c1_i32 = arith.constant 1 : i32
    %43 = tpu.dynamic_rotate %25 by %c1_i32 dim 0 : vector<256x8xf32>, i32 -> vector<256x8xf32>
    %44 = vector.broadcast %38 : vector<256x1xf32> to vector<256x8xf32>
    %45 = arith.mulf %44, %43 : vector<256x8xf32>
    %46 = arith.addf %28, %45 : vector<256x8xf32>
    %c255_i32 = arith.constant 255 : i32
    %47 = tpu.dynamic_rotate %31 by %c255_i32 dim 0 : vector<256x8xf32>, i32 -> vector<256x8xf32>
    %48 = vector.broadcast %42 : vector<256x1xf32> to vector<256x8xf32>
    %49 = arith.mulf %48, %47 : vector<256x8xf32>
    %50 = arith.addf %46, %49 : vector<256x8xf32>
    %c0_19 = arith.constant 0 : index
    %c0_20 = arith.constant 0 : index
    %51 = vector.load %arg6[%c0_19, %c0_20] : memref<1x8xf32, #tpu.memory_space<vmem>>, vector<1x8xf32>
    %52 = vector.broadcast %51 : vector<1x8xf32> to vector<256x8xf32>
    %53 = arith.addf %50, %52 : vector<256x8xf32>
    %c0_21 = arith.constant 0 : index
    %c0_22 = arith.constant 0 : index
    %54 = memref.load %arg7[%c0_21, %c0_22] : memref<1x1xf32, #tpu.memory_space<smem>>
    %cst_23 = arith.constant 0.000000e+00 : f32
    %55 = vector.broadcast %cst_23 : f32 to vector<256x8xf32>
    %56 = arith.cmpf oge, %53, %55 : vector<256x8xf32>
    %57 = vector.broadcast %54 : f32 to vector<256x8xf32>
    %58 = arith.mulf %57, %53 : vector<256x8xf32>
    %59 = arith.select %56, %53, %58 : vector<256x8xi1>, vector<256x8xf32>
    %c0_24 = arith.constant 0 : index
    %c0_25 = arith.constant 0 : index
    %c0_26 = arith.constant 0 : index
    %60 = vector.load %arg8[%c0_24, %c0_25, %c0_26] : memref<1x256x8xbf16, #tpu.memory_space<vmem>>, vector<1x256x8xbf16>
    %61 = vector.shape_cast %60 : vector<1x256x8xbf16> to vector<256x8xbf16>
    %62 = arith.extf %61 : vector<256x8xbf16> to vector<256x8xf32>
    %cst_27 = arith.constant 1.000000e+00 : f32
    %63 = vector.broadcast %cst_27 : f32 to vector<256x8xf32>
    %64 = arith.mulf %63, %62 : vector<256x8xf32>
    %65 = arith.addf %59, %64 : vector<256x8xf32>
    %c0_28 = arith.constant 0 : index
    %c0_29 = arith.constant 0 : index
    %c0_30 = arith.constant 0 : index
    %66 = vector.load %arg9[%c0_28, %c0_29, %c0_30] : memref<1x256x8xf32, #tpu.memory_space<vmem>>, vector<1x256x8xf32>
    %67 = vector.shape_cast %66 : vector<1x256x8xf32> to vector<256x8xf32>
    %68 = vector.shape_cast %65 : vector<256x8xf32> to vector<1x256x8xf32>
    tpu.vector_store %arg9[%c0_28, %c0_29, %c0_30], %68 {strides = array<i32>} : memref<1x256x8xf32, #tpu.memory_space<vmem>>, vector<1x256x8xf32>,
    return
  }
  func.func @transform_0(%arg0: i32, %arg1: i32) -> (i32, i32, i32) {
    %c8_i32 = arith.constant 8 : i32
    %0 = arith.muli %arg1, %c8_i32 : i32
    %c1_i32 = arith.constant 1 : i32
    %1 = arith.subi %0, %c1_i32 : i32
    %c0_i32 = arith.constant 0 : i32
    %2 = arith.maxsi %1, %c0_i32 : i32
    %c0_i32_0 = arith.constant 0 : i32
    %c0_i32_1 = arith.constant 0 : i32
    return %arg0, %2, %c0_i32_0 : i32, i32, i32
  }
  func.func @transform_1(%arg0: i32, %arg1: i32) -> (i32, i32, i32) {
    %c0_i32 = arith.constant 0 : i32
    %c0_i32_0 = arith.constant 0 : i32
    return %arg0, %arg1, %c0_i32 : i32, i32, i32
  }
  func.func @transform_2(%arg0: i32, %arg1: i32) -> (i32, i32, i32) {
    %c8_i32 = arith.constant 8 : i32
    %0 = arith.muli %arg1, %c8_i32 : i32
    %c8_i32_0 = arith.constant 8 : i32
    %1 = arith.addi %0, %c8_i32_0 : i32
    %c31_i32 = arith.constant 31 : i32
    %2 = arith.minsi %1, %c31_i32 : i32
    %c0_i32 = arith.constant 0 : i32
    %c0_i32_1 = arith.constant 0 : i32
    return %arg0, %2, %c0_i32 : i32, i32, i32
  }
  func.func @transform_3(%arg0: i32, %arg1: i32) -> (i32, i32, i32) {
    %c0_i32 = arith.constant 0 : i32
    %c0_i32_0 = arith.constant 0 : i32
    %c0_i32_1 = arith.constant 0 : i32
    %c0_i32_2 = arith.constant 0 : i32
    return %c0_i32, %c0_i32_0, %c0_i32_1 : i32, i32, i32
  }
  func.func @transform_4(%arg0: i32, %arg1: i32) -> (i32, i32) {
    %c0_i32 = arith.constant 0 : i32
    %c0_i32_0 = arith.constant 0 : i32
    %c0_i32_1 = arith.constant 0 : i32
    return %c0_i32, %c0_i32_0 : i32, i32
  }
  func.func @transform_5(%arg0: i32, %arg1: i32) -> (i32, i32) {
    %c0_i32 = arith.constant 0 : i32
    %c0_i32_0 = arith.constant 0 : i32
    %c0_i32_1 = arith.constant 0 : i32
    return %c0_i32, %c0_i32_0 : i32, i32
  }
  func.func @transform_6(%arg0: i32, %arg1: i32) -> (i32, i32, i32) {
    %c0_i32 = arith.constant 0 : i32
    %c0_i32_0 = arith.constant 0 : i32
    return %arg0, %arg1, %c0_i32 : i32, i32, i32
  }
  func.func @transform_7(%arg0: i32, %arg1: i32) -> (i32, i32, i32) {
    %c0_i32 = arith.constant 0 : i32
    %c0_i32_0 = arith.constant 0 : i32
    return %arg0, %arg1, %c0_i32 : i32, i32, i32
  }
}

</mosaic_0001>

<bundles_post_ra>
// kernel: dense_d_block.4
= control target key start
LH: loop header
LB: loop body
LE: loop exit
PB: predicated region body
PF: predicated region fallthrough
CT: control target
= control target key end

     0   :  { %s1472_s17 = smov 0   ;;  %s1474_s18 = smov 0   ;;  %s1744_s0 = inlined_call_operand.vmem [shape: bf16[2,1024,256], index: 0, kind: input, shape index: {}]   ;;  %s1745_s1 = inlined_call_operand.vmem [shape: bf16[256,128], index: 1, kind: input, shape index: {}]   ;;  %s1746_s2 = inlined_call_operand.vmem [shape: f32[1,128], index: 2, kind: input, shape index: {}]   ;;  %s1747_s3 = inlined_call_operand.<no memory space> [shape: f32[1,1], index: 3, kind: input, shape index: {}]   ;;  %s1748_s4 = inlined_call_operand.vmem [shape: bf16[2,1024,128], index: 4, kind: output, shape index: {}]  }
   0x1   :  { %9 = sst [smem:[#allocation2]] %s1747_s3  ;;  %s1476_s19 = smov 0  }
   0x2   :  { %s1478_s20 = smov 0   ;;  %s1480_s21 = smov 0  }
   0x3 LB: > { %s24_s3 = sadd.s32 1, %s1434_s19  ;;  %s27_s22 = sadd.s32 1, %s1438_s20  ;;  %s1442_s21 = sphi %s1480_s21, %s15_s21   ;;  %s1438_s20 = sphi %s1478_s20, %s1752_s20   ;;  %s1434_s19 = sphi %s1476_s19, %s1751_s19   ;;  %s1430_s18 = sphi %s1474_s18, %s1750_s18   ;;  %s1426_s17 = sphi %s1472_s17, %s1749_s17  }
   0x4   : > { %p25_p0 = scmp.ge.s32.totalorder %s24_s3, 4  ;;  %p1002_p1 = scmp.ge.s32.totalorder %s1442_s21, 1 }
   0x5   : > { %p185_p2 = scmp.lt.s32.totalorder %s1442_s21, 9 }
   0x6   : > { %s1754_s3 = smov (%p25_p0, %s24_s3), 0  ;;  %s1756_s22 = smov (!%p25_p0, %s27_s22), %s1438_s20 }
   0x7   : > { %p186_p3 = pnand %p1002_p1, %p185_p2  ;;  %p29_p4 = scmp.ge.s32.totalorder %s1756_s22, 2 }
   0x8   : > { %s1003_s29 = sshll.u32 (!%p186_p3), %s1426_s17, 5  ;;  %p221_p5 = scmp.lt.s32.totalorder (!%p186_p3), %s1430_s18, 1 }
   0x9   : > { %s1758_s22 = smov (%p29_p4, %s1756_s22), 0  ;;  %189 = sbr.rel (%p186_p3) target bundleno = 308 (0x134), region = 36 }
   0xa   : > { %p223_p6 = scmp.lt.s32.totalorder (!%p186_p3), %s1003_s29, 127  ;;  %s743_s24 = sld [smem:[#allocation2]] (!%p186_p3) }
   0xe   : > { %v1243_v0 = vld [vmem:[%s1745_s1 + $0x38] sm:$0xff]  ;;  %v1242_v2 = vld [vmem:[%s1745_s1 + $0x30] sm:$0xff]  ;;  %v1241_v4 = vld [vmem:[%s1745_s1 + $0x28] sm:$0xff]  ;;  %s1760_s18 = smov (!%p221_p5, %s1430_s18), 1  ;;  %s1762_s29 = smov (!%p223_p6, %s1003_s29), 127 }
   0xf   : > { %v1251_v1 = vld [vmem:[%s1745_s1 + $0x78] sm:$0xff]  ;;  %565 = vmatpush.bf16.msra.mxu0 %v1243_v0  ;;  %1347 = vmatpush.bf16.msra.mxu2 %v1243_v0  ;;  %v1250_v3 = vld [vmem:[%s1745_s1 + $0x70] sm:$0xff]  ;;  %v1249_v5 = vld [vmem:[%s1745_s1 + $0x68] sm:$0xff]  ;;  %s1004_s14 = sshll.u32 %s1762_s29, 1  ;;  %s1005_s15 = sshll.u32 %s1760_s18, 8 }
  0x10   : > { %654 = vmatpush.bf16.msra.mxu1 %v1251_v1  ;;  %1355 = vmatpush.bf16.msra.mxu3 %v1251_v1  ;;  %v1240_v6 = vld [vmem:[%s1745_s1 + $0x20] sm:$0xff]  ;;  %v1239_v8 = vld [vmem:[%s1745_s1 + $0x18] sm:$0xff]  ;;  %s227_s25 = sadd.s32 %s1005_s15, %s1004_s14  ;;  %v1238_v10 = vld [vmem:[%s1745_s1 + $0x10] sm:$0xff]  ;;  %s1008_s17 = sshll.u32 %s1760_s18, 7 }
  0x11   : > { %v1248_v7 = vld [vmem:[%s1745_s1 + $0x60] sm:$0xff]  ;;  %v1247_v9 = vld [vmem:[%s1745_s1 + $0x58] sm:$0xff]  ;;  %v1246_v11 = vld [vmem:[%s1745_s1 + $0x50] sm:$0xff]  ;;  %s1006_s5 = sshll.u32 %s227_s25, 2  ;;  %s1586_s23 = sadd.s32 %s1008_s17, %s1762_s29 }
  0x12   : > { %v1237_v12 = vld [vmem:[%s1745_s1 + $0x8] sm:$0xff]  ;;  %s1557_s10 = scalar_lea.vmem %s1744_s0, %s1006_s5  ;;  %v1236_v14 = vld [vmem:[%s1745_s1] sm:$0xff]  ;;  %s1009_s25 = sshll.u32 %s1586_s23, 2 }
  0x13   : > { %566 = vmatpush.bf16.msra.mxu0 %v1242_v2  ;;  %1348 = vmatpush.bf16.msra.mxu2 %v1242_v2  ;;  %v1245_v13 = vld [vmem:[%s1745_s1 + $0x48] sm:$0xff]  ;;  %v1244_v15 = vld [vmem:[%s1745_s1 + $0x40] sm:$0xff]  ;;  %v1020_v28 = vld [vmem:[%s1557_s10 + $0x10] sm:$0xf]  ;;  %s1652_s28 = scalar_lea.vmem %s1748_s4, %s1009_s25 }
  0x14   : > { %655 = vmatpush.bf16.msra.mxu1 %v1250_v3  ;;  %1356 = vmatpush.bf16.msra.mxu3 %v1250_v3  ;;  %v1012_v16 = vld [vmem:[%s1557_s10] sm:$0xf]  ;;  %v1205_v17 = vld [vmem:[%s1557_s10 + $0x4] sm:$0xf0]  ;;  %v1204_v20 = vld [vmem:[%s1557_s10 + $0x4] sm:$0xf] }
  0x15   : > { %v1076_v18 = vld [vmem:[%s1557_s10 + $0x80] sm:$0xf]  ;;  %v1221_v19 = vld [vmem:[%s1557_s10 + $0x84] sm:$0xf0]  ;;  %v1014_v21 = vld [vmem:[%s1557_s10 + $0x8] sm:$0xf0]  ;;  %v1013_v24 = vor.u32 %v1205_v17, %v1012_v16 }
  0x16   : > { %v1220_v22 = vld [vmem:[%s1557_s10 + $0x84] sm:$0xf]  ;;  %v1078_v23 = vld [vmem:[%s1557_s10 + $0x88] sm:$0xf0]  ;;  %v1077_v25 = vor.u32 %v1221_v19, %v1076_v18  ;;  %v1017_v26 = vor.u32 %v1204_v20, %v1014_v21  ;;  %v1207_v29 = vld [vmem:[%s1557_s10 + $0x14] sm:$0xf0] }
  0x17   : > { %567 = vmatpush.bf16.msra.mxu0 %v1241_v4  ;;  %1349 = vmatpush.bf16.msra.mxu2 %v1241_v4  ;;  %v1081_v27 = vor.u32 %v1220_v22, %v1078_v23  ;;  %v1084_v30 = vld [vmem:[%s1557_s10 + $0x90] sm:$0xf]  ;;  %v1223_v31 = vld [vmem:[%s1557_s10 + $0x94] sm:$0xf0]  ;;  %v1206_v32 = vld [vmem:[%s1557_s10 + $0x14] sm:$0xf]  ;;  %v1021_v36 = vor.u32 %v1207_v29, %v1020_v28 }
  0x18   : > { %656 = vmatpush.bf16.msra.mxu1 %v1249_v5  ;;  %1357 = vmatpush.bf16.msra.mxu3 %v1249_v5  ;;  %v1022_v33 = vld [vmem:[%s1557_s10 + $0x18] sm:$0xf0]  ;;  %v1222_v34 = vld [vmem:[%s1557_s10 + $0x94] sm:$0xf]  ;;  %v1085_v37 = vor.u32 %v1223_v31, %v1084_v30  ;;  %v1028_v40 = vld [vmem:[%s1557_s10 + $0x20] sm:$0xf] }
  0x19   : > { %v1086_v35 = vld [vmem:[%s1557_s10 + $0x98] sm:$0xf0]  ;;  %v1025_v38 = vor.u32 %v1206_v32, %v1022_v33  ;;  %v1209_v41 = vld [vmem:[%s1557_s10 + $0x24] sm:$0xf0]  ;;  %v1092_v42 = vld [vmem:[%s1557_s10 + $0xa0] sm:$0xf] }
  0x1a   : > { %v1089_v39 = vor.u32 %v1222_v34, %v1086_v35  ;;  %v1225_v43 = vld [vmem:[%s1557_s10 + $0xa4] sm:$0xf0]  ;;  %v1208_v44 = vld [vmem:[%s1557_s10 + $0x24] sm:$0xf]  ;;  %v1030_v45 = vld [vmem:[%s1557_s10 + $0x28] sm:$0xf0]  ;;  %v1029_v48 = vor.u32 %v1209_v41, %v1028_v40 }
  0x1b   : > { %568 = vmatpush.bf16.msra.mxu0 %v1240_v6  ;;  %1350 = vmatpush.bf16.msra.mxu2 %v1240_v6  ;;  %v1224_v46 = vld [vmem:[%s1557_s10 + $0xa4] sm:$0xf]  ;;  %v1094_v47 = vld [vmem:[%s1557_s10 + $0xa8] sm:$0xf0]  ;;  %v1093_v49 = vor.u32 %v1225_v43, %v1092_v42  ;;  %v1033_v50 = vor.u32 %v1208_v44, %v1030_v45  ;;  %v1036_v52 = vld [vmem:[%s1557_s10 + $0x30] sm:$0xf] }
  0x1c   : > { %657 = vmatpush.bf16.msra.mxu1 %v1248_v7  ;;  %1358 = vmatpush.bf16.msra.mxu3 %v1248_v7  ;;  %v1097_v51 = vor.u32 %v1224_v46, %v1094_v47  ;;  %v1211_v53 = vld [vmem:[%s1557_s10 + $0x34] sm:$0xf0]  ;;  %v1100_v54 = vld [vmem:[%s1557_s10 + $0xb0] sm:$0xf]  ;;  %v1210_v56 = vld [vmem:[%s1557_s10 + $0x34] sm:$0xf] }
  0x1d   : > { %v1227_v55 = vld [vmem:[%s1557_s10 + $0xb4] sm:$0xf0]  ;;  %v1038_v57 = vld [vmem:[%s1557_s10 + $0x38] sm:$0xf0]  ;;  %v1226_v58 = vld [vmem:[%s1557_s10 + $0xb4] sm:$0xf]  ;;  %v1037_v60 = vor.u32 %v1211_v53, %v1036_v52 }
  0x1e   : > { %v1102_v59 = vld [vmem:[%s1557_s10 + $0xb8] sm:$0xf0]  ;;  %v1101_v61 = vor.u32 %v1227_v55, %v1100_v54  ;;  %v1041_v62 = vor.u32 %v1210_v56, %v1038_v57  ;;  %v1044_v0 = vld [vmem:[%s1557_s10 + $0x40] sm:$0xf]  ;;  %v1213_v1 = vld [vmem:[%s1557_s10 + $0x44] sm:$0xf0]  ;;  %v1642_v55 = vstv %s743_s24 }
  0x1f   : > { %569 = vmatpush.bf16.msra.mxu0 %v1239_v8  ;;  %1351 = vmatpush.bf16.msra.mxu2 %v1239_v8  ;;  %v1105_v63 = vor.u32 %v1226_v58, %v1102_v59  ;;  %v1108_v2 = vld [vmem:[%s1557_s10 + $0xc0] sm:$0xf]  ;;  %v1229_v3 = vld [vmem:[%s1557_s10 + $0xc4] sm:$0xf0]  ;;  %v1212_v4 = vld [vmem:[%s1557_s10 + $0x44] sm:$0xf]  ;;  %v1045_v8 = vor.u32 %v1213_v1, %v1044_v0 }
  0x20   : > { %658 = vmatpush.bf16.msra.mxu1 %v1247_v9  ;;  %1359 = vmatpush.bf16.msra.mxu3 %v1247_v9  ;;  %v1046_v5 = vld [vmem:[%s1557_s10 + $0x48] sm:$0xf0]  ;;  %v1228_v6 = vld [vmem:[%s1557_s10 + $0xc4] sm:$0xf]  ;;  %v1109_v9 = vor.u32 %v1229_v3, %v1108_v2  ;;  %v1214_v16 = vld [vmem:[%s1557_s10 + $0x54] sm:$0xf] }
  0x21   : > { %v1110_v7 = vld [vmem:[%s1557_s10 + $0xc8] sm:$0xf0]  ;;  %v1054_v17 = vld [vmem:[%s1557_s10 + $0x58] sm:$0xf0]  ;;  %v1230_v18 = vld [vmem:[%s1557_s10 + $0xd4] sm:$0xf] }
  0x22   : > { %v1118_v19 = vld [vmem:[%s1557_s10 + $0xd8] sm:$0xf0]  ;;  %v1057_v22 = vor.u32 %v1214_v16, %v1054_v17  ;;  %v1216_v28 = vld [vmem:[%s1557_s10 + $0x64] sm:$0xf]  ;;  %v1062_v29 = vld [vmem:[%s1557_s10 + $0x68] sm:$0xf0] }
  0x23   : > { %570 = vmatpush.bf16.msra.mxu0 %v1238_v10  ;;  %1352 = vmatpush.bf16.msra.mxu2 %v1238_v10  ;;  %v1049_v10 = vor.u32 %v1212_v4, %v1046_v5  ;;  %v1121_v23 = vor.u32 %v1230_v18, %v1118_v19  ;;  %v1232_v30 = vld [vmem:[%s1557_s10 + $0xe4] sm:$0xf]  ;;  %v1126_v31 = vld [vmem:[%s1557_s10 + $0xe8] sm:$0xf0]  ;;  %v1065_v34 = vor.u32 %v1216_v28, %v1062_v29  ;;  %v1218_v40 = vld [vmem:[%s1557_s10 + $0x74] sm:$0xf] }
  0x24   : > { %659 = vmatpush.bf16.msra.mxu1 %v1246_v11  ;;  %1360 = vmatpush.bf16.msra.mxu3 %v1246_v11  ;;  %v1113_v11 = vor.u32 %v1228_v6, %v1110_v7  ;;  %v1129_v35 = vor.u32 %v1232_v30, %v1126_v31  ;;  %v1070_v41 = vld [vmem:[%s1557_s10 + $0x78] sm:$0xf0]  ;;  %v1234_v42 = vld [vmem:[%s1557_s10 + $0xf4] sm:$0xf] }
  0x25   : > { %v1134_v43 = vld [vmem:[%s1557_s10 + $0xf8] sm:$0xf0]  ;;  %v1073_v46 = vor.u32 %v1218_v40, %v1070_v41 }
  0x26   : > { %v1137_v47 = vor.u32 %v1234_v42, %v1134_v43 }
  0x27   : > { %571 = vmatpush.bf16.msra.mxu0 %v1237_v12  ;;  %1353 = vmatpush.bf16.msra.mxu2 %v1237_v12  ;;  %v1052_v12 = vld [vmem:[%s1557_s10 + $0x50] sm:$0xf] }
  0x28   : > { %660 = vmatpush.bf16.msra.mxu1 %v1245_v13  ;;  %1361 = vmatpush.bf16.msra.mxu3 %v1245_v13  ;;  %v1215_v13 = vld [vmem:[%s1557_s10 + $0x54] sm:$0xf0] }
  0x29   : > { %v1053_v20 = vor.u32 %v1215_v13, %v1052_v12 }
  0x2b   : > { %572 = vmatpush.bf16.msra.mxu0 %v1236_v14  ;;  %1354 = vmatpush.bf16.msra.mxu2 %v1236_v14  ;;  %v1116_v14 = vld [vmem:[%s1557_s10 + $0xd0] sm:$0xf] }
  0x2c   : > { %661 = vmatpush.bf16.msra.mxu1 %v1244_v15  ;;  %1362 = vmatpush.bf16.msra.mxu3 %v1244_v15  ;;  %v1231_v15 = vld [vmem:[%s1557_s10 + $0xd4] sm:$0xf0] }
  0x2d   : > { %v1117_v21 = vor.u32 %v1231_v15, %v1116_v14 }
  0x2e   : > { %573 = vmatmul.bf16.vlgmr.msra.gmra.mxu0 %v1013_v24  ;;  %613 = vmatmul.bf16.vlgmr.msra.gmra.mxu2 %v1077_v25  ;;  %v1060_v24 = vld [vmem:[%s1557_s10 + $0x60] sm:$0xf]  ;;  %v1217_v25 = vld [vmem:[%s1557_s10 + $0x64] sm:$0xf0] }
  0x2f   : > { %662 = vmatmul.bf16.vlgmr.msra.gmra.mxu1 %v1017_v26  ;;  %702 = vmatmul.bf16.vlgmr.msra.gmra.mxu3 %v1081_v27  ;;  %v1124_v26 = vld [vmem:[%s1557_s10 + $0xe0] sm:$0xf]  ;;  %v1233_v27 = vld [vmem:[%s1557_s10 + $0xe4] sm:$0xf0]  ;;  %v1061_v32 = vor.u32 %v1217_v25, %v1060_v24 }
  0x30   : > { %v1125_v33 = vor.u32 %v1233_v27, %v1124_v26 }
  0x3e   : > { %578 = vmatmul.bf16.gmra.mxu0 %v1021_v36  ;;  %618 = vmatmul.bf16.gmra.mxu2 %v1085_v37  ;;  %v1068_v36 = vld [vmem:[%s1557_s10 + $0x70] sm:$0xf]  ;;  %v1219_v37 = vld [vmem:[%s1557_s10 + $0x74] sm:$0xf0] }
  0x3f   : > { %667 = vmatmul.bf16.gmra.mxu1 %v1025_v38  ;;  %707 = vmatmul.bf16.gmra.mxu3 %v1089_v39  ;;  %v1132_v38 = vld [vmem:[%s1557_s10 + $0xf0] sm:$0xf]  ;;  %v1235_v39 = vld [vmem:[%s1557_s10 + $0xf4] sm:$0xf0]  ;;  %v1069_v44 = vor.u32 %v1219_v37, %v1068_v36 }
  0x40   : > { %v1133_v45 = vor.u32 %v1235_v39, %v1132_v38 }
  0x4e   : > { %583 = vmatmul.bf16.gmra.mxu0 %v1029_v48  ;;  %623 = vmatmul.bf16.gmra.mxu2 %v1093_v49  ;;  %v1639_v48 = vld [vmem:[%s1746_s2] ss:$0 sm:$0xff] }
  0x4f   : > { %672 = vmatmul.bf16.gmra.mxu1 %v1033_v50  ;;  %712 = vmatmul.bf16.gmra.mxu3 %v1097_v51 }
  0x5e   : > { %588 = vmatmul.bf16.gmra.mxu0 %v1037_v60  ;;  %628 = vmatmul.bf16.gmra.mxu2 %v1101_v61 }
  0x5f   : > { %677 = vmatmul.bf16.gmra.mxu1 %v1041_v62  ;;  %717 = vmatmul.bf16.gmra.mxu3 %v1105_v63 }
  0x6e   : > { %593 = vmatmul.bf16.gmra.mxu0 %v1045_v8  ;;  %633 = vmatmul.bf16.gmra.mxu2 %v1109_v9 }
  0x6f   : > { %682 = vmatmul.bf16.gmra.mxu1 %v1049_v10  ;;  %722 = vmatmul.bf16.gmra.mxu3 %v1113_v11 }
  0x7e   : > { %598 = vmatmul.bf16.gmra.mxu0 %v1053_v20  ;;  %638 = vmatmul.bf16.gmra.mxu2 %v1117_v21 }
  0x7f   : > { %687 = vmatmul.bf16.gmra.mxu1 %v1057_v22  ;;  %727 = vmatmul.bf16.gmra.mxu3 %v1121_v23 }
  0x8e   : > { %603 = vmatmul.bf16.gmra.mxu0 %v1061_v32  ;;  %643 = vmatmul.bf16.gmra.mxu2 %v1125_v33 }
  0x8f   : > { %692 = vmatmul.bf16.gmra.mxu1 %v1065_v34  ;;  %732 = vmatmul.bf16.gmra.mxu3 %v1129_v35 }
  0x9e   : > { %608 = vmatmul.bf16.gmra.mxu0 %v1069_v44  ;;  %648 = vmatmul.bf16.gmra.mxu2 %v1133_v45 }
  0x9f   : > { %697 = vmatmul.bf16.gmra.mxu1 %v1073_v46  ;;  %737 = vmatmul.bf16.gmra.mxu3 %v1137_v47 }
  0xab   : > { %v574_v49 = vpop.f32.mrf.mxu0 }
  0xac   : > { %v663_v50 = vpop.f32.mrf.mxu1  ;;  %v575_v51 = vadd.f32 %v1639_v48, %v574_v49 }
  0xae   : > { %v664_v53 = vadd.f32 %v663_v50, %v575_v51 }
  0xb0   : > { %v777_v60 = vmul.f32 %v1642_v55, %v664_v53  ;;  %vm744_vm0 = vcmp.ge.f32.partialorder %v664_v53, 0.0 }
  0xb1   : > { %v614_v52 = vpop.f32.mrf.mxu2 }
  0xb2   : > { %v703_v54 = vpop.f32.mrf.mxu3  ;;  %v615_v57 = vadd.f32 %v1639_v48, %v614_v52  ;;  %v809_v1 = vsel %vm744_vm0, %v664_v53, %v777_v60 }
  0xb3   : > { %v576_v56 = vpop.f32.mrf.mxu0 }
  0xb4   : > { %v577_v58 = vadd.f32 %v1639_v48, %v576_v56  ;;  %v665_v59 = vpop.f32.mrf.mxu1  ;;  %v704_v62 = vadd.f32 %v703_v54, %v615_v57 }
  0xb6   : > { %v666_v61 = vadd.f32 %v665_v59, %v577_v58  ;;  %v793_v7 = vmul.f32 %v1642_v55, %v704_v62  ;;  %vm760_vm2 = vcmp.ge.f32.partialorder %v704_v62, 0.0 }
  0xb8   : > { %vm745_vm1 = vcmp.ge.f32.partialorder %v666_v61, 0.0  ;;  %v778_v63 = vmul.f32 %v1642_v55, %v666_v61  ;;  %v825_v12 = vsel %vm760_vm2, %v704_v62, %v793_v7 }
  0xb9   : > { %v616_v0 = vpop.f32.mrf.mxu2 }
  0xba   : > { %v810_v2 = vsel %vm745_vm1, %v666_v61, %v778_v63  ;;  %v617_v3 = vadd.f32 %v1639_v48, %v616_v0  ;;  %v705_v4 = vpop.f32.mrf.mxu3 }
  0xbb   : > { %v1255_v5 = vpack.c.bf16 %v810_v2, %v809_v1  ;;  %v579_v6 = vpop.f32.mrf.mxu0 }
  0xbc   : > { %v706_v8 = vadd.f32 %v705_v4, %v617_v3  ;;  %v668_v9 = vpop.f32.mrf.mxu1  ;;  %v580_v11 = vadd.f32 %v1639_v48, %v579_v6 }
  0xbd   : > { %1256 = vst [vmem:[%s1652_s28] sm:$0xff] %v1255_v5  }
  0xbe   : > { %vm761_vm3 = vcmp.ge.f32.partialorder %v706_v8, 0.0  ;;  %v794_v10 = vmul.f32 %v1642_v55, %v706_v8  ;;  %v669_v16 = vadd.f32 %v668_v9, %v580_v11 }
  0xc0   : > { %v826_v13 = vsel %vm761_vm3, %v706_v8, %v794_v10  ;;  %v779_v22 = vmul.f32 %v1642_v55, %v669_v16  ;;  %vm746_vm4 = vcmp.ge.f32.partialorder %v669_v16, 0.0 }
  0xc1   : > { %v1295_v14 = vpack.c.bf16 %v826_v13, %v825_v12  ;;  %v619_v15 = vpop.f32.mrf.mxu2 }
  0xc2   : > { %v708_v17 = vpop.f32.mrf.mxu3  ;;  %v620_v19 = vadd.f32 %v1639_v48, %v619_v15  ;;  %v811_v27 = vsel %vm746_vm4, %v669_v16, %v779_v22 }
  0xc3   : > { %1339 = vst [vmem:[%s1652_s28 + $0x40] sm:$0xff] %v1295_v14   ;;  %v581_v18 = vpop.f32.mrf.mxu0 }
  0xc4   : > { %v582_v20 = vadd.f32 %v1639_v48, %v581_v18  ;;  %v670_v21 = vpop.f32.mrf.mxu1  ;;  %v709_v24 = vadd.f32 %v708_v17, %v620_v19 }
  0xc6   : > { %v671_v23 = vadd.f32 %v670_v21, %v582_v20  ;;  %v795_v33 = vmul.f32 %v1642_v55, %v709_v24  ;;  %vm762_vm6 = vcmp.ge.f32.partialorder %v709_v24, 0.0 }
  0xc8   : > { %vm747_vm5 = vcmp.ge.f32.partialorder %v671_v23, 0.0  ;;  %v780_v25 = vmul.f32 %v1642_v55, %v671_v23  ;;  %v827_v38 = vsel %vm762_vm6, %v709_v24, %v795_v33 }
  0xc9   : > { %v621_v26 = vpop.f32.mrf.mxu2 }
  0xca   : > { %v812_v28 = vsel %vm747_vm5, %v671_v23, %v780_v25  ;;  %v622_v29 = vadd.f32 %v1639_v48, %v621_v26  ;;  %v710_v30 = vpop.f32.mrf.mxu3 }
  0xcb   : > { %v1260_v31 = vpack.c.bf16 %v812_v28, %v811_v27  ;;  %v584_v32 = vpop.f32.mrf.mxu0 }
  0xcc   : > { %v711_v34 = vadd.f32 %v710_v30, %v622_v29  ;;  %v673_v35 = vpop.f32.mrf.mxu1  ;;  %v585_v37 = vadd.f32 %v1639_v48, %v584_v32 }
  0xcd   : > { %1332 = vst [vmem:[%s1652_s28 + $0x8] sm:$0xff] %v1260_v31  }
  0xce   : > { %vm763_vm7 = vcmp.ge.f32.partialorder %v711_v34, 0.0  ;;  %v796_v36 = vmul.f32 %v1642_v55, %v711_v34  ;;  %v674_v42 = vadd.f32 %v673_v35, %v585_v37 }
  0xd0   : > { %v828_v39 = vsel %vm763_vm7, %v711_v34, %v796_v36  ;;  %v781_v49 = vmul.f32 %v1642_v55, %v674_v42  ;;  %vm748_vm8 = vcmp.ge.f32.partialorder %v674_v42, 0.0 }
  0xd1   : > { %v1300_v40 = vpack.c.bf16 %v828_v39, %v827_v38  ;;  %v624_v41 = vpop.f32.mrf.mxu2 }
  0xd2   : > { %v713_v43 = vpop.f32.mrf.mxu3  ;;  %v625_v45 = vadd.f32 %v1639_v48, %v624_v41  ;;  %v813_v54 = vsel %vm748_vm8, %v674_v42, %v781_v49 }
  0xd3   : > { %1340 = vst [vmem:[%s1652_s28 + $0x48] sm:$0xff] %v1300_v40   ;;  %v586_v44 = vpop.f32.mrf.mxu0 }
  0xd4   : > { %v587_v46 = vadd.f32 %v1639_v48, %v586_v44  ;;  %v675_v47 = vpop.f32.mrf.mxu1  ;;  %v714_v51 = vadd.f32 %v713_v43, %v625_v45 }
  0xd6   : > { %v676_v50 = vadd.f32 %v675_v47, %v587_v46  ;;  %v797_v61 = vmul.f32 %v1642_v55, %v714_v51  ;;  %vm764_vm10 = vcmp.ge.f32.partialorder %v714_v51, 0.0 }
  0xd8   : > { %vm749_vm9 = vcmp.ge.f32.partialorder %v676_v50, 0.0  ;;  %v782_v52 = vmul.f32 %v1642_v55, %v676_v50  ;;  %v829_v2 = vsel %vm764_vm10, %v714_v51, %v797_v61 }
  0xd9   : > { %v626_v53 = vpop.f32.mrf.mxu2 }
  0xda   : > { %v814_v56 = vsel %vm749_vm9, %v676_v50, %v782_v52  ;;  %v627_v57 = vadd.f32 %v1639_v48, %v626_v53  ;;  %v715_v58 = vpop.f32.mrf.mxu3 }
  0xdb   : > { %v1265_v59 = vpack.c.bf16 %v814_v56, %v813_v54  ;;  %v589_v60 = vpop.f32.mrf.mxu0 }
  0xdc   : > { %v716_v62 = vadd.f32 %v715_v58, %v627_v57  ;;  %v678_v63 = vpop.f32.mrf.mxu1  ;;  %v590_v1 = vadd.f32 %v1639_v48, %v589_v60 }
  0xdd   : > { %1333 = vst [vmem:[%s1652_s28 + $0x10] sm:$0xff] %v1265_v59  }
  0xde   : > { %vm765_vm11 = vcmp.ge.f32.partialorder %v716_v62, 0.0  ;;  %v798_v0 = vmul.f32 %v1642_v55, %v716_v62  ;;  %v679_v6 = vadd.f32 %v678_v63, %v590_v1 }
  0xe0   : > { %v830_v3 = vsel %vm765_vm11, %v716_v62, %v798_v0  ;;  %v783_v12 = vmul.f32 %v1642_v55, %v679_v6  ;;  %vm750_vm12 = vcmp.ge.f32.partialorder %v679_v6, 0.0 }
  0xe1   : > { %v1305_v4 = vpack.c.bf16 %v830_v3, %v829_v2  ;;  %v629_v5 = vpop.f32.mrf.mxu2 }
  0xe2   : > { %v718_v7 = vpop.f32.mrf.mxu3  ;;  %v630_v9 = vadd.f32 %v1639_v48, %v629_v5  ;;  %v815_v17 = vsel %vm750_vm12, %v679_v6, %v783_v12 }
  0xe3   : > { %1341 = vst [vmem:[%s1652_s28 + $0x50] sm:$0xff] %v1305_v4   ;;  %v591_v8 = vpop.f32.mrf.mxu0 }
  0xe4   : > { %v592_v10 = vadd.f32 %v1639_v48, %v591_v8  ;;  %v680_v11 = vpop.f32.mrf.mxu1  ;;  %v719_v14 = vadd.f32 %v718_v7, %v630_v9 }
  0xe6   : > { %v681_v13 = vadd.f32 %v680_v11, %v592_v10  ;;  %v799_v23 = vmul.f32 %v1642_v55, %v719_v14  ;;  %vm766_vm14 = vcmp.ge.f32.partialorder %v719_v14, 0.0 }
  0xe8   : > { %vm751_vm13 = vcmp.ge.f32.partialorder %v681_v13, 0.0  ;;  %v784_v15 = vmul.f32 %v1642_v55, %v681_v13  ;;  %v831_v28 = vsel %vm766_vm14, %v719_v14, %v799_v23 }
  0xe9   : > { %v631_v16 = vpop.f32.mrf.mxu2 }
  0xea   : > { %v816_v18 = vsel %vm751_vm13, %v681_v13, %v784_v15  ;;  %v632_v19 = vadd.f32 %v1639_v48, %v631_v16  ;;  %v720_v20 = vpop.f32.mrf.mxu3 }
  0xeb   : > { %v1270_v21 = vpack.c.bf16 %v816_v18, %v815_v17  ;;  %v594_v22 = vpop.f32.mrf.mxu0 }
  0xec   : > { %v721_v24 = vadd.f32 %v720_v20, %v632_v19  ;;  %v683_v25 = vpop.f32.mrf.mxu1  ;;  %v595_v27 = vadd.f32 %v1639_v48, %v594_v22 }
  0xed   : > { %1334 = vst [vmem:[%s1652_s28 + $0x18] sm:$0xff] %v1270_v21  }
  0xee   : > { %vm767_vm15 = vcmp.ge.f32.partialorder %v721_v24, 0.0  ;;  %v800_v26 = vmul.f32 %v1642_v55, %v721_v24  ;;  %v684_v32 = vadd.f32 %v683_v25, %v595_v27 }
  0xf0   : > { %v832_v29 = vsel %vm767_vm15, %v721_v24, %v800_v26  ;;  %v785_v38 = vmul.f32 %v1642_v55, %v684_v32  ;;  %vm752_vm0 = vcmp.ge.f32.partialorder %v684_v32, 0.0 }
  0xf1   : > { %v1310_v30 = vpack.c.bf16 %v832_v29, %v831_v28  ;;  %v634_v31 = vpop.f32.mrf.mxu2 }
  0xf2   : > { %v723_v33 = vpop.f32.mrf.mxu3  ;;  %v635_v35 = vadd.f32 %v1639_v48, %v634_v31  ;;  %v817_v43 = vsel %vm752_vm0, %v684_v32, %v785_v38 }
  0xf3   : > { %1342 = vst [vmem:[%s1652_s28 + $0x58] sm:$0xff] %v1310_v30   ;;  %v596_v34 = vpop.f32.mrf.mxu0 }
  0xf4   : > { %v597_v36 = vadd.f32 %v1639_v48, %v596_v34  ;;  %v685_v37 = vpop.f32.mrf.mxu1  ;;  %v724_v40 = vadd.f32 %v723_v33, %v635_v35 }
  0xf6   : > { %v686_v39 = vadd.f32 %v685_v37, %v597_v36  ;;  %v801_v50 = vmul.f32 %v1642_v55, %v724_v40  ;;  %vm768_vm2 = vcmp.ge.f32.partialorder %v724_v40, 0.0 }
  0xf8   : > { %vm753_vm1 = vcmp.ge.f32.partialorder %v686_v39, 0.0  ;;  %v786_v41 = vmul.f32 %v1642_v55, %v686_v39  ;;  %v833_v56 = vsel %vm768_vm2, %v724_v40, %v801_v50 }
  0xf9   : > { %v636_v42 = vpop.f32.mrf.mxu2 }
  0xfa   : > { %v818_v44 = vsel %vm753_vm1, %v686_v39, %v786_v41  ;;  %v637_v45 = vadd.f32 %v1639_v48, %v636_v42  ;;  %v725_v46 = vpop.f32.mrf.mxu3 }
  0xfb   : > { %v1275_v47 = vpack.c.bf16 %v818_v44, %v817_v43  ;;  %v599_v49 = vpop.f32.mrf.mxu0 }
  0xfc   : > { %v726_v51 = vadd.f32 %v725_v46, %v637_v45  ;;  %v688_v52 = vpop.f32.mrf.mxu1  ;;  %v600_v54 = vadd.f32 %v1639_v48, %v599_v49 }
  0xfd   : > { %1335 = vst [vmem:[%s1652_s28 + $0x20] sm:$0xff] %v1275_v47  }
  0xfe   : > { %vm769_vm3 = vcmp.ge.f32.partialorder %v726_v51, 0.0  ;;  %v802_v53 = vmul.f32 %v1642_v55, %v726_v51  ;;  %v689_v60 = vadd.f32 %v688_v52, %v600_v54 }
 0x100   : > { %v834_v57 = vsel %vm769_vm3, %v726_v51, %v802_v53  ;;  %v787_v2 = vmul.f32 %v1642_v55, %v689_v60  ;;  %vm754_vm4 = vcmp.ge.f32.partialorder %v689_v60, 0.0 }
 0x101   : > { %v1315_v58 = vpack.c.bf16 %v834_v57, %v833_v56  ;;  %v639_v59 = vpop.f32.mrf.mxu2 }
 0x102   : > { %v728_v61 = vpop.f32.mrf.mxu3  ;;  %v640_v63 = vadd.f32 %v1639_v48, %v639_v59  ;;  %v819_v7 = vsel %vm754_vm4, %v689_v60, %v787_v2 }
 0x103   : > { %1343 = vst [vmem:[%s1652_s28 + $0x60] sm:$0xff] %v1315_v58   ;;  %v601_v62 = vpop.f32.mrf.mxu0 }
 0x104   : > { %v602_v0 = vadd.f32 %v1639_v48, %v601_v62  ;;  %v690_v1 = vpop.f32.mrf.mxu1  ;;  %v729_v4 = vadd.f32 %v728_v61, %v640_v63 }
 0x106   : > { %v691_v3 = vadd.f32 %v690_v1, %v602_v0  ;;  %v803_v13 = vmul.f32 %v1642_v55, %v729_v4  ;;  %vm770_vm6 = vcmp.ge.f32.partialorder %v729_v4, 0.0 }
 0x108   : > { %vm755_vm5 = vcmp.ge.f32.partialorder %v691_v3, 0.0  ;;  %v788_v5 = vmul.f32 %v1642_v55, %v691_v3  ;;  %v835_v18 = vsel %vm770_vm6, %v729_v4, %v803_v13 }
 0x109   : > { %v641_v6 = vpop.f32.mrf.mxu2 }
 0x10a   : > { %v820_v8 = vsel %vm755_vm5, %v691_v3, %v788_v5  ;;  %v642_v9 = vadd.f32 %v1639_v48, %v641_v6  ;;  %v730_v10 = vpop.f32.mrf.mxu3 }
 0x10b   : > { %v1280_v11 = vpack.c.bf16 %v820_v8, %v819_v7  ;;  %v604_v12 = vpop.f32.mrf.mxu0 }
 0x10c   : > { %v731_v14 = vadd.f32 %v730_v10, %v642_v9  ;;  %v693_v15 = vpop.f32.mrf.mxu1  ;;  %v605_v17 = vadd.f32 %v1639_v48, %v604_v12 }
 0x10d   : > { %1336 = vst [vmem:[%s1652_s28 + $0x28] sm:$0xff] %v1280_v11  }
 0x10e   : > { %vm771_vm7 = vcmp.ge.f32.partialorder %v731_v14, 0.0  ;;  %v804_v16 = vmul.f32 %v1642_v55, %v731_v14  ;;  %v694_v22 = vadd.f32 %v693_v15, %v605_v17 }
 0x110   : > { %v836_v19 = vsel %vm771_vm7, %v731_v14, %v804_v16  ;;  %v789_v28 = vmul.f32 %v1642_v55, %v694_v22  ;;  %vm756_vm8 = vcmp.ge.f32.partialorder %v694_v22, 0.0 }
 0x111   : > { %v1320_v20 = vpack.c.bf16 %v836_v19, %v835_v18  ;;  %v644_v21 = vpop.f32.mrf.mxu2 }
 0x112   : > { %v733_v23 = vpop.f32.mrf.mxu3  ;;  %v645_v25 = vadd.f32 %v1639_v48, %v644_v21  ;;  %v821_v33 = vsel %vm756_vm8, %v694_v22, %v789_v28 }
 0x113   : > { %1344 = vst [vmem:[%s1652_s28 + $0x68] sm:$0xff] %v1320_v20   ;;  %v606_v24 = vpop.f32.mrf.mxu0 }
 0x114   : > { %v607_v26 = vadd.f32 %v1639_v48, %v606_v24  ;;  %v695_v27 = vpop.f32.mrf.mxu1  ;;  %v734_v30 = vadd.f32 %v733_v23, %v645_v25 }
 0x116   : > { %v696_v29 = vadd.f32 %v695_v27, %v607_v26  ;;  %v805_v39 = vmul.f32 %v1642_v55, %v734_v30  ;;  %vm772_vm10 = vcmp.ge.f32.partialorder %v734_v30, 0.0 }
 0x118   : > { %vm757_vm9 = vcmp.ge.f32.partialorder %v696_v29, 0.0  ;;  %v790_v31 = vmul.f32 %v1642_v55, %v696_v29  ;;  %v837_v44 = vsel %vm772_vm10, %v734_v30, %v805_v39 }
 0x119   : > { %v646_v32 = vpop.f32.mrf.mxu2 }
 0x11a   : > { %v822_v34 = vsel %vm757_vm9, %v696_v29, %v790_v31  ;;  %v647_v35 = vadd.f32 %v1639_v48, %v646_v32  ;;  %v735_v36 = vpop.f32.mrf.mxu3 }
 0x11b   : > { %v1285_v37 = vpack.c.bf16 %v822_v34, %v821_v33  ;;  %v609_v38 = vpop.f32.mrf.mxu0 }
 0x11c   : > { %v736_v40 = vadd.f32 %v735_v36, %v647_v35  ;;  %v698_v41 = vpop.f32.mrf.mxu1  ;;  %v610_v43 = vadd.f32 %v1639_v48, %v609_v38 }
 0x11d   : > { %1337 = vst [vmem:[%s1652_s28 + $0x30] sm:$0xff] %v1285_v37  }
 0x11e   : > { %vm773_vm11 = vcmp.ge.f32.partialorder %v736_v40, 0.0  ;;  %v806_v42 = vmul.f32 %v1642_v55, %v736_v40  ;;  %v699_v49 = vadd.f32 %v698_v41, %v610_v43 }
 0x120   : > { %v838_v45 = vsel %vm773_vm11, %v736_v40, %v806_v42  ;;  %v791_v56 = vmul.f32 %v1642_v55, %v699_v49  ;;  %vm758_vm12 = vcmp.ge.f32.partialorder %v699_v49, 0.0 }
 0x121   : > { %v1325_v46 = vpack.c.bf16 %v838_v45, %v837_v44  ;;  %v649_v47 = vpop.f32.mrf.mxu2 }
 0x122   : > { %v738_v50 = vpop.f32.mrf.mxu3  ;;  %v650_v52 = vadd.f32 %v1639_v48, %v649_v47  ;;  %v823_v61 = vsel %vm758_vm12, %v699_v49, %v791_v56 }
 0x123   : > { %1345 = vst [vmem:[%s1652_s28 + $0x70] sm:$0xff] %v1325_v46   ;;  %v611_v51 = vpop.f32.mrf.mxu0 }
 0x124   : > { %v612_v53 = vadd.f32 %v1639_v48, %v611_v51  ;;  %v700_v54 = vpop.f32.mrf.mxu1  ;;  %v739_v58 = vadd.f32 %v738_v50, %v650_v52 }
 0x126   : > { %v701_v57 = vadd.f32 %v700_v54, %v612_v53  ;;  %v807_v2 = vmul.f32 %v1642_v55, %v739_v58  ;;  %vm774_vm14 = vcmp.ge.f32.partialorder %v739_v58, 0.0 }
 0x128   : > { %vm759_vm13 = vcmp.ge.f32.partialorder %v701_v57, 0.0  ;;  %v792_v59 = vmul.f32 %v1642_v55, %v701_v57  ;;  %v839_v5 = vsel %vm774_vm14, %v739_v58, %v807_v2 }
 0x129   : > { %v651_v60 = vpop.f32.mrf.mxu2 }
 0x12a   : > { %v824_v62 = vsel %vm759_vm13, %v701_v57, %v792_v59  ;;  %v652_v63 = vadd.f32 %v1639_v48, %v651_v60  ;;  %v740_v1 = vpop.f32.mrf.mxu3 }
 0x12b   : > { %v1290_v0 = vpack.c.bf16 %v824_v62, %v823_v61 }
 0x12c   : > { %v741_v3 = vadd.f32 %v740_v1, %v652_v63 }
 0x12d   : > { %1338 = vst [vmem:[%s1652_s28 + $0x38] sm:$0xff] %v1290_v0  }
 0x12e   : > { %vm775_vm15 = vcmp.ge.f32.partialorder %v741_v3, 0.0  ;;  %v808_v4 = vmul.f32 %v1642_v55, %v741_v3 }
 0x130   : > { %v840_v6 = vsel %vm775_vm15, %v741_v3, %v808_v4 }
 0x131   : > { %v1330_v7 = vpack.c.bf16 %v840_v6, %v839_v5 }
 0x133   : > { %1346 = vst [vmem:[%s1652_s28 + $0x78] sm:$0xff] %v1330_v7  }
 0x134 PF: > { %s15_s21 = sadd.s32 1, %s1442_s21   ;;  %s1749_s17 = smov %s1434_s19 }
 0x135   : > { %p12_p7 = scmp.ge.s32.totalorder %s15_s21, 10   ;;  %s1750_s18 = smov %s1438_s20 }
 0x136   : > { %s1751_s19 = smov %s1754_s3  ;;  %s1752_s20 = smov %s1758_s22 }
 0x137   :  { %14 = sbr.rel (!%p12_p7) target bundleno = 3 (0x3), region = 66 }

// kernel: dense_d_block.5
= control target key start
LH: loop header
LB: loop body
LE: loop exit
PB: predicated region body
PF: predicated region fallthrough
CT: control target
= control target key end

     0   :  { %s3583_s23 = smov 0   ;;  %s3585_s24 = smov 0   ;;  %s4724_s0 = inlined_call_operand.vmem [shape: bf16[2,1024,128], index: 0, kind: input, shape index: {}, may-alias: {0,1,2}]   ;;  %s4725_s1 = inlined_call_operand.vmem [shape: bf16[2,1024,128], index: 1, kind: input, shape index: {}, may-alias: {0,1,2}]   ;;  %s4726_s2 = inlined_call_operand.vmem [shape: bf16[2,1024,128], index: 2, kind: input, shape index: {}, may-alias: {0,1,2}]   ;;  %s4727_s3 = inlined_call_operand.vmem [shape: bf16[3,384,8], index: 3, kind: input, shape index: {}]   ;;  %s4728_s4 = inlined_call_operand.vmem [shape: f32[1,8], index: 4, kind: input, shape index: {}]   ;;  %s4729_s5 = inlined_call_operand.<no memory space> [shape: f32[1,1], index: 5, kind: input, shape index: {}]   ;;  %s4730_s6 = inlined_call_operand.vmem [shape: bf16[2,1024,8], index: 6, kind: output, shape index: {}]  }
   0x1   :  { %11 = sst [smem:[#allocation2]] %s4729_s5  ;;  %s3587_s25 = smov 0  }
   0x2   :  { %s3589_s26 = smov 0   ;;  %s3591_s27 = smov 0  }
   0x3 LB: > { %s26_s5 = sadd.s32 1, %s3534_s25  ;;  %s29_s28 = sadd.s32 1, %s3538_s26  ;;  %s3542_s27 = sphi %s3591_s27, %s17_s27   ;;  %s3538_s26 = sphi %s3589_s26, %s4806_s26   ;;  %s3534_s25 = sphi %s3587_s25, %s4805_s25   ;;  %s3530_s24 = sphi %s3585_s24, %s4804_s24   ;;  %s3526_s23 = sphi %s3583_s23, %s4803_s23  }
   0x4   : > { %p27_p0 = scmp.ge.s32.totalorder %s26_s5, 4  ;;  %p2837_p1 = scmp.ge.s32.totalorder %s3542_s27, 1 }
   0x5   : > { %p300_p2 = scmp.lt.s32.totalorder %s3542_s27, 9 }
   0x6   : > { %s4808_s5 = smov (%p27_p0, %s26_s5), 0  ;;  %s4810_s28 = smov (!%p27_p0, %s29_s28), %s3538_s26 }
   0x7   : > { %p301_p3 = pnand %p2837_p1, %p300_p2  ;;  %p31_p4 = scmp.ge.s32.totalorder %s4810_s28, 2 }
   0x9   : > { %s4812_s28 = smov (%p31_p4, %s4810_s28), 0  ;;  %304 = sbr.rel (%p301_p3) target bundleno = 762 (0x2fa), region = 44 }
   0xe   : > { %v3342_v0 = vld [vmem:[%s4727_s3 + $0x38] sm:$0xff]  ;;  %p369_p5 = scmp.lt.s32.totalorder %s3530_s24, 1  ;;  %s2843_s7 = sshll.u32 %s3526_s23, 5  ;;  %v3341_v1 = vld [vmem:[%s4727_s3 + $0x30] sm:$0xff]  ;;  %v3340_v2 = vld [vmem:[%s4727_s3 + $0x28] sm:$0xff]  ;;  %vm2668_vm4 = vcmask 60416  }
   0xf   : > { %s2838_s8 = sshll.u32 %s3526_s23, 3  ;;  %3425 = vmatpush.bf16.msra.mxu1 %v3342_v0  ;;  %3426 = vmatpush.bf16.msra.mxu2 %v3342_v0  ;;  %p385_p6 = scmp.lt.s32.totalorder %s2843_s7, 127  ;;  %v3339_v3 = vld [vmem:[%s4727_s3 + $0x20] sm:$0xff]  ;;  %v3338_v4 = vld [vmem:[%s4727_s3 + $0x18] sm:$0xff]  ;;  %v3337_v5 = vld [vmem:[%s4727_s3 + $0x10] sm:$0xff] }
  0x10   : > { %3427 = vmatpush.bf16.msra.mxu3 %v3342_v0  ;;  %832 = vmatpush.bf16.msra.mxu0 %v3342_v0  ;;  %s4814_s24 = smov (!%p369_p5, %s3530_s24), 1  ;;  %s2839_s11 = sadd.s32 4294967295, %s2838_s8  ;;  %v3336_v7 = vld [vmem:[%s4727_s3 + $0x8] sm:$0xff]  ;;  %v3335_v12 = vld [vmem:[%s4727_s3] sm:$0xff]  ;;  %v3358_v15 = vld [vmem:[%s4727_s3 + $0xb8] sm:$0xff] }
  0x11   : > { %p366_p7 = scmp.gt.s32.totalorder %s2839_s11, 0  ;;  %p420_p8 = scmp.gt.s32.totalorder %s3526_s23, 0  ;;  %v3390_v16 = vld [vmem:[%s4727_s3 + $0x1b8] sm:$0xff]  ;;  %v3357_v28 = vld [vmem:[%s4727_s3 + $0xb0] sm:$0xff]  ;;  %v3356_v35 = vld [vmem:[%s4727_s3 + $0xa8] sm:$0xff] }
  0x12   : > { %s4816_s7 = smov (!%p385_p6, %s2843_s7), 127  ;;  %s3634_s19 = sshll.u32 %s4814_s24, 7  ;;  %v3350_v23 = vld [vmem:[%s4727_s3 + $0x78] sm:$0xff]  ;;  %v3389_v29 = vld [vmem:[%s4727_s3 + $0x1b0] sm:$0xff]  ;;  %v3388_v36 = vld [vmem:[%s4727_s3 + $0x1a8] sm:$0xff] }
  0x13   : > { %3428 = vmatpush.bf16.msra.mxu1 %v3341_v1  ;;  %3429 = vmatpush.bf16.msra.mxu2 %v3341_v1  ;;  %s4818_s11 = smov (!%p366_p7, %s2839_s11), 0  ;;  %v3398_v31 = vld [vmem:[%s4727_s3 + $0x1f8] sm:$0xff]  ;;  %v3349_v32 = vld [vmem:[%s4727_s3 + $0x70] sm:$0xff]  ;;  %v3348_v38 = vld [vmem:[%s4727_s3 + $0x68] sm:$0xff]  ;;  %p433_p11 = scmp.lt.s32.totalorder %s3526_s23, 3 }
  0x14   : > { %3430 = vmatpush.bf16.msra.mxu3 %v3341_v1  ;;  %833 = vmatpush.bf16.msra.mxu0 %v3341_v1  ;;  %s421_s14 = scalar_select %p420_p8, 1, 0  ;;  %v3397_v37 = vld [vmem:[%s4727_s3 + $0x1f0] sm:$0xff]  ;;  %v3355_v41 = vld [vmem:[%s4727_s3 + $0xa0] sm:$0xff]  ;;  %v3396_v43 = vld [vmem:[%s4727_s3 + $0x1e8] sm:$0xff] }
  0x15   : > { %s2840_s17 = sshll.u32 %s4818_s11, 2  ;;  %v3387_v42 = vld [vmem:[%s4727_s3 + $0x1a0] sm:$0xff]  ;;  %v3354_v47 = vld [vmem:[%s4727_s3 + $0x98] sm:$0xff]  ;;  %v3353_v55 = vld [vmem:[%s4727_s3 + $0x90] sm:$0xff] }
  0x16   : > { %p371_p9 = scmp.lt.s32.totalorder %s2840_s17, 127  ;;  %s422_s18 = scvt.s32.f32 %s421_s14  ;;  %v3347_v44 = vld [vmem:[%s4727_s3 + $0x60] sm:$0xff]  ;;  %v3386_v48 = vld [vmem:[%s4727_s3 + $0x198] sm:$0xff]  ;;  %v3385_v56 = vld [vmem:[%s4727_s3 + $0x190] sm:$0xff] }
  0x17   : > { %3431 = vmatpush.bf16.msra.mxu1 %v3340_v2  ;;  %3432 = vmatpush.bf16.msra.mxu2 %v3340_v2  ;;  %v3395_v52 = vld [vmem:[%s4727_s3 + $0x1e0] sm:$0xff]  ;;  %v3346_v54 = vld [vmem:[%s4727_s3 + $0x58] sm:$0xff]  ;;  %v3345_v58 = vld [vmem:[%s4727_s3 + $0x50] sm:$0xff]  ;;  %s393_s14 = sadd.s32 8, %s2838_s8 }
  0x18   : > { %3433 = vmatpush.bf16.msra.mxu3 %v3340_v2  ;;  %834 = vmatpush.bf16.msra.mxu0 %v3340_v2  ;;  %s4820_s17 = smov (!%p371_p9, %s2840_s17), 127  ;;  %p424_p10 = scmp.ne.f32.partialorder %s422_s18, %s422_s18  ;;  %v3394_v57 = vld [vmem:[%s4727_s3 + $0x1d8] sm:$0xff]  ;;  %v3352_v59 = vld [vmem:[%s4727_s3 + $0x88] sm:$0xff]  ;;  %v3393_v61 = vld [vmem:[%s4727_s3 + $0x1d0] sm:$0xff] }
  0x19   : > { %s425_s22 = sshrl.u32 %s422_s18, 16  ;;  %s374_s29 = sadd.s32 %s3634_s19, %s4820_s17  ;;  %v3384_v60 = vld [vmem:[%s4727_s3 + $0x188] sm:$0xff]  ;;  %v3351_v63 = vld [vmem:[%s4727_s3 + $0x80] sm:$0xff] }
  0x1a   : > { %s426_s30 = sand.u32 1, %s425_s22  ;;  %s2842_s9 = sshll.u32 %s374_s29, 2  ;;  %v3344_v62 = vld [vmem:[%s4727_s3 + $0x48] sm:$0xff]  ;;  %v3383_v0 = vld [vmem:[%s4727_s3 + $0x180] sm:$0xff] }
  0x1b   : > { %3434 = vmatpush.bf16.msra.mxu1 %v3339_v3  ;;  %3435 = vmatpush.bf16.msra.mxu2 %v3339_v3  ;;  %s427_s10 = sadd.s32 32767, %s426_s30  ;;  %s3643_s12 = scalar_lea.vmem %s4724_s0, %s2842_s9  ;;  %v3392_v1 = vld [vmem:[%s4727_s3 + $0x1c8] sm:$0xff]  ;;  %v3343_v2 = vld [vmem:[%s4727_s3 + $0x40] sm:$0xff] }
  0x1c   : > { %3436 = vmatpush.bf16.msra.mxu3 %v3339_v3  ;;  %835 = vmatpush.bf16.msra.mxu0 %v3339_v3  ;;  %s428_s13 = sadd.s32 %s427_s10, %s422_s18  ;;  %s388_s17 = sadd.s32 %s3634_s19, %s4816_s7  ;;  %v3408_v6 = vld [vmem:[%s3643_s12] sm:$0xff]   ;;  %v3423_v17 = vld [vmem:[%s3643_s12 + $0x8] sm:$0xff]  }
  0x1d   : > { %s429_s16 = sand.u32 4294901760, %s428_s13  ;;  %s3655_s30 = sshll.u32 %s388_s17, 2  ;;  %v3409_v8 = vunpack.c.l.bf16 %v3408_v6  ;;  %v3410_v9 = vunpack.c.h.bf16 %v3408_v6  ;;  %v3413_v26 = vunpack.c.l.bf16 %v3423_v17  ;;  %v3414_v27 = vunpack.c.h.bf16 %v3423_v17  ;;  %v3391_v6 = vld [vmem:[%s4727_s3 + $0x1c0] sm:$0xff]  ;;  %v3373_v17 = vld [vmem:[%s4727_s3 + $0x130] sm:$0xff] }
  0x1e   : > { %s4822_s16 = smov (%p424_p10, %s429_s16), 2143289344  ;;  %s3664_s11 = scalar_lea.vmem %s4725_s1, %s3655_s30 }
  0x1f   : > { %3437 = vmatpush.bf16.msra.mxu1 %v3338_v4  ;;  %3438 = vmatpush.bf16.msra.mxu2 %v3338_v4  ;;  %s432_s20 = sshrl.u32 %s4822_s16, 16  ;;  %v3674_v18 = vld [vmem:[%s3664_s11 + $0x10] sm:$0xff]  ;;  %v3734_v49 = vld [vmem:[%s3664_s11 + $0x18] sm:$0xff]  ;;  %v3791_v3 = vld [vmem:[%s3664_s11 + $0x20] sm:$0xff]  ;;  %p394_p12 = scmp.lt.s32.totalorder %s393_s14, 31 }
  0x20   : > { %3439 = vmatpush.bf16.msra.mxu3 %v3338_v4  ;;  %836 = vmatpush.bf16.msra.mxu0 %v3338_v4  ;;  %s482_s29 = sshll.u32 %s432_s20, 16  ;;  %v3677_v19 = vld [vmem:[%s3664_s11 + $0x30] sm:$0xff]  ;;  %v3737_v50 = vld [vmem:[%s3664_s11 + $0x38] sm:$0xff]  ;;  %v3794_v4 = vld [vmem:[%s3664_s11 + $0x40] sm:$0xff] }
  0x21   : > { %s483_s18 = sor.u32 %s482_s29, %s432_s20  ;;  %v3680_v22 = vld [vmem:[%s3664_s11 + $0x50] sm:$0xff]  ;;  %v3740_v51 = vld [vmem:[%s3664_s11 + $0x58] sm:$0xff]  ;;  %s4824_s14 = smov (!%p394_p12, %s393_s14), 31 }
  0x22   : > { %v484_v10 = vstv %s483_s18  ;;  %s434_s7 = scalar_select %p433_p11, 1, 0 }
  0x23   : > { %3440 = vmatpush.bf16.msra.mxu1 %v3337_v5  ;;  %3441 = vmatpush.bf16.msra.mxu2 %v3337_v5  ;;  %v490_v11 = vunpack.c.l.bf16 %v484_v10  ;;  %v3406_v10 = vld [vmem:[%s4727_s3 + $0x238] sm:$0xff]  ;;  %s2847_s17 = sshll.u32 %s4824_s14, 2  ;;  %s4388_s18 = scalar_lea.vmem %s4730_s6, %s3655_s30 }
  0x24   : > { %3442 = vmatpush.bf16.msra.mxu3 %v3337_v5  ;;  %837 = vmatpush.bf16.msra.mxu0 %v3337_v5  ;;  %v3797_v5 = vld [vmem:[%s3664_s11 + $0x60] sm:$0xff]  ;;  %s4060_s15 = scvt.s32.f32 %s434_s7  ;;  %p399_p13 = scmp.lt.s32.totalorder %s2847_s17, 127 }
  0x25   : > { %v491_v13 = vmul.f32 %v3409_v8, %v490_v11  ;;  %v492_v14 = vmul.f32 %v3410_v9, %v490_v11  ;;  %v493_v33 = vmul.f32 %v3413_v26, %v490_v11  ;;  %v494_v34 = vmul.f32 %v3414_v27, %v490_v11  ;;  %v3366_v8 = vld [vmem:[%s4727_s3 + $0xf8] sm:$0xff]  ;;  %v3380_v26 = vld [vmem:[%s4727_s3 + $0x168] sm:$0xff] }
  0x26   : > { %v3374_v9 = vld [vmem:[%s4727_s3 + $0x138] sm:$0xff]  ;;  %s438_s16 = sshrl.u32 %s4060_s15, 16  ;;  %p437_p0 = scmp.ne.f32.partialorder %s4060_s15, %s4060_s15 }
  0x27   : > { %3443 = vmatpush.bf16.msra.mxu1 %v3336_v7  ;;  %3444 = vmatpush.bf16.msra.mxu2 %v3336_v7  ;;  %v495_v20 = vpack.c.bf16 %v491_v13, %v491_v13  ;;  %v496_v21 = vpack.c.bf16 %v492_v14, %v492_v14  ;;  %v497_v39 = vpack.c.bf16 %v493_v33, %v493_v33  ;;  %v3382_v11 = vld [vmem:[%s4727_s3 + $0x178] sm:$0xff]  ;;  %v3825_v13 = vld [vmem:[%s3664_s11 + $0x48] sm:$0xff]  ;;  %s439_s23 = sand.u32 1, %s438_s16  ;;  %s4826_s17 = smov (!%p399_p13, %s2847_s17), 127 }
  0x28   : > { %3445 = vmatpush.bf16.msra.mxu3 %v3336_v7  ;;  %838 = vmatpush.bf16.msra.mxu0 %v3336_v7  ;;  %v498_v40 = vpack.c.bf16 %v494_v34, %v494_v34  ;;  %v3803_v7 = vld [vmem:[%s3664_s11] sm:$0xff]  ;;  %v3828_v14 = vld [vmem:[%s3664_s11 + $0x68] sm:$0xff]  ;;  %s440_s8 = sadd.s32 32767, %s439_s23  ;;  %s402_s21 = sadd.s32 %s3634_s19, %s4826_s17 }
  0x29   : > { %v503_v24 = vunpack.c.l.b16 %v495_v20  ;;  %v504_v25 = vunpack.c.l.b16 %v496_v21  ;;  %v505_v45 = vunpack.c.l.b16 %v497_v39  ;;  %v3405_v20 = vld [vmem:[%s4727_s3 + $0x230] sm:$0xff]  ;;  %s441_s20 = sadd.s32 %s440_s8, %s4060_s15  ;;  %s2849_s19 = sshll.u32 %s402_s21, 2 }
  0x2a   : > { %v506_v46 = vunpack.c.l.b16 %v498_v40  ;;  %v3381_v21 = vld [vmem:[%s4727_s3 + $0x170] sm:$0xff]  ;;  %s442_s12 = sand.u32 4294901760, %s441_s20  ;;  %s4110_s14 = scalar_lea.vmem %s4726_s2, %s2849_s19 }
  0x2b   : > { %3446 = vmatpush.bf16.msra.mxu1 %v3335_v12  ;;  %3447 = vmatpush.bf16.msra.mxu2 %v3335_v12  ;;  %v3693_v30 = vpack.c.b16 %v504_v25, %v503_v24  ;;  %v3372_v24 = vld [vmem:[%s4727_s3 + $0x128] sm:$0xff]  ;;  %s4828_s12 = smov (%p437_p0, %s442_s12), 2143289344  ;;  %s2538_s20 = sld [smem:[#allocation2]] }
  0x2c   : > { %3448 = vmatpush.bf16.msra.mxu3 %v3335_v12  ;;  %839 = vmatpush.bf16.msra.mxu0 %v3335_v12  ;;  %v3745_v53 = vpack.c.b16 %v506_v46, %v505_v45  ;;  %v3822_v12 = vld [vmem:[%s3664_s11 + $0x28] sm:$0xff]  ;;  %s445_s22 = sshrl.u32 %s4828_s12, 16 }
  0x2d   : > { %v3404_v25 = vld [vmem:[%s4727_s3 + $0x228] sm:$0xff]  ;;  %s599_s10 = sshll.u32 %s445_s22, 16 }
  0x2e   : > { %860 = vmatmul.bf16.vlgmr.msra.gmra.mxu1 %v3674_v18  ;;  %880 = vmatmul.bf16.vlgmr.msra.gmra.mxu2 %v3677_v19  ;;  %s600_s15 = sor.u32 %s599_s10, %s445_s22 }
  0x2f   : > { %1010 = vmatpush.bf16.msrb.mxu2 %v3358_v15  ;;  %900 = vmatmul.bf16.vlgmr.msra.gmra.mxu3 %v3680_v22  ;;  %v3831_v15 = vld [vmem:[%s3664_s11 + $0x8] sm:$0xff] }
  0x30   : > { %1341 = vmatpush.bf16.msrb.mxu3 %v3390_v16  ;;  %921 = vmatpush.bf16.msrb.mxu1 %v3350_v23  ;;  %v3365_v16 = vld [vmem:[%s4727_s3 + $0xf0] sm:$0xff]  ;;  %v3364_v23 = vld [vmem:[%s4727_s3 + $0xe8] sm:$0xff] }
  0x31   : > { %840 = vmatmul.bf16.vlgmr.msra.gmra.mxu0 %v3693_v30 }
  0x32   : > { %1430 = vmatpush.bf16.msrb.mxu0 %v3398_v31  ;;  %v3371_v31 = vld [vmem:[%s4727_s3 + $0x120] sm:$0xff] }
  0x33   : > { %1011 = vmatpush.bf16.msrb.mxu2 %v3357_v28 }
  0x34   : > { %1342 = vmatpush.bf16.msrb.mxu3 %v3389_v29  ;;  %922 = vmatpush.bf16.msrb.mxu1 %v3349_v32  ;;  %v3363_v29 = vld [vmem:[%s4727_s3 + $0xe0] sm:$0xff] }
  0x36   : > { %1431 = vmatpush.bf16.msrb.mxu0 %v3397_v37  ;;  %v3379_v37 = vld [vmem:[%s4727_s3 + $0x160] sm:$0xff] }
  0x37   : > { %1012 = vmatpush.bf16.msrb.mxu2 %v3356_v35  ;;  %v3403_v35 = vld [vmem:[%s4727_s3 + $0x220] sm:$0xff] }
  0x38   : > { %1343 = vmatpush.bf16.msrb.mxu3 %v3388_v36  ;;  %923 = vmatpush.bf16.msrb.mxu1 %v3348_v38 }
  0x3a   : > { %1432 = vmatpush.bf16.msrb.mxu0 %v3396_v43 }
  0x3b   : > { %1013 = vmatpush.bf16.msrb.mxu2 %v3355_v41 }
  0x3c   : > { %1344 = vmatpush.bf16.msrb.mxu3 %v3387_v42  ;;  %924 = vmatpush.bf16.msrb.mxu1 %v3347_v44 }
  0x3e   : > { %865 = vmatmul.bf16.gmra.mxu1 %v3734_v49  ;;  %885 = vmatmul.bf16.gmra.mxu2 %v3737_v50 }
  0x3f   : > { %1014 = vmatpush.bf16.msrb.mxu2 %v3354_v47  ;;  %905 = vmatmul.bf16.gmra.mxu3 %v3740_v51 }
  0x40   : > { %1345 = vmatpush.bf16.msrb.mxu3 %v3386_v48  ;;  %1433 = vmatpush.bf16.msrb.mxu0 %v3395_v52 }
  0x41   : > { %845 = vmatmul.bf16.gmra.mxu0 %v3745_v53  ;;  %925 = vmatpush.bf16.msrb.mxu1 %v3346_v54  ;;  %v3362_v54 = vld [vmem:[%s4727_s3 + $0xd8] sm:$0xff] }
  0x43   : > { %1015 = vmatpush.bf16.msrb.mxu2 %v3353_v55  ;;  %v3370_v55 = vld [vmem:[%s4727_s3 + $0x118] sm:$0xff] }
  0x44   : > { %1346 = vmatpush.bf16.msrb.mxu3 %v3385_v56  ;;  %1434 = vmatpush.bf16.msrb.mxu0 %v3394_v57 }
  0x45   : > { %926 = vmatpush.bf16.msrb.mxu1 %v3345_v58 }
  0x47   : > { %1016 = vmatpush.bf16.msrb.mxu2 %v3352_v59  ;;  %v3402_v59 = vld [vmem:[%s4727_s3 + $0x218] sm:$0xff] }
  0x48   : > { %1347 = vmatpush.bf16.msrb.mxu3 %v3384_v60  ;;  %1435 = vmatpush.bf16.msrb.mxu0 %v3393_v61  ;;  %v3378_v61 = vld [vmem:[%s4727_s3 + $0x158] sm:$0xff] }
  0x49   : > { %927 = vmatpush.bf16.msrb.mxu1 %v3344_v62 }
  0x4b   : > { %1017 = vmatpush.bf16.msrb.mxu2 %v3351_v63 }
  0x4c   : > { %1348 = vmatpush.bf16.msrb.mxu3 %v3383_v0  ;;  %1436 = vmatpush.bf16.msrb.mxu0 %v3392_v1 }
  0x4d   : > { %928 = vmatpush.bf16.msrb.mxu1 %v3343_v2 }
  0x4e   : > { %870 = vmatmul.bf16.gmra.mxu1 %v3791_v3  ;;  %890 = vmatmul.bf16.gmra.mxu2 %v3794_v4 }
  0x4f   : > { %910 = vmatmul.bf16.gmra.mxu3 %v3797_v5  ;;  %2106 = vmatpush.bf16.msra.mxu2 %v3366_v8 }
  0x50   : > { %1437 = vmatpush.bf16.msrb.mxu0 %v3391_v6  ;;  %2195 = vmatpush.bf16.msra.mxu3 %v3374_v9 }
  0x51   : > { %850 = vmatmul.bf16.gmra.mxu0 %v3803_v7  ;;  %1519 = vmatpush.bf16.msra.mxu1 %v3406_v10 }
  0x53   : > { %2107 = vmatpush.bf16.msra.mxu2 %v3365_v16 }
  0x54   : > { %2284 = vmatpush.bf16.msra.mxu0 %v3382_v11  ;;  %2196 = vmatpush.bf16.msra.mxu3 %v3373_v17 }
  0x55   : > { %1520 = vmatpush.bf16.msra.mxu1 %v3405_v20 }
  0x57   : > { %2108 = vmatpush.bf16.msra.mxu2 %v3364_v23  ;;  %v3369_v23 = vld [vmem:[%s4727_s3 + $0x110] sm:$0xff] }
  0x58   : > { %2285 = vmatpush.bf16.msra.mxu0 %v3381_v21  ;;  %2197 = vmatpush.bf16.msra.mxu3 %v3372_v24  ;;  %v3361_v21 = vld [vmem:[%s4727_s3 + $0xd0] sm:$0xff] }
  0x59   : > { %1521 = vmatpush.bf16.msra.mxu1 %v3404_v25 }
  0x5b   : > { %2109 = vmatpush.bf16.msra.mxu2 %v3363_v29 }
  0x5c   : > { %2286 = vmatpush.bf16.msra.mxu0 %v3380_v26  ;;  %2198 = vmatpush.bf16.msra.mxu3 %v3371_v31 }
  0x5d   : > { %1522 = vmatpush.bf16.msra.mxu1 %v3403_v35  ;;  %v3401_v35 = vld [vmem:[%s4727_s3 + $0x210] sm:$0xff] }
  0x5e   : > { %875 = vmatmul.bf16.gmra.mxu1 %v3822_v12  ;;  %895 = vmatmul.bf16.gmra.mxu2 %v3825_v13 }
  0x5f   : > { %915 = vmatmul.bf16.gmra.mxu3 %v3828_v14  ;;  %2110 = vmatpush.bf16.msra.mxu2 %v3362_v54  ;;  %v3377_v54 = vld [vmem:[%s4727_s3 + $0x150] sm:$0xff] }
  0x60   : > { %2287 = vmatpush.bf16.msra.mxu0 %v3379_v37  ;;  %2199 = vmatpush.bf16.msra.mxu3 %v3370_v55 }
  0x61   : > { %855 = vmatmul.bf16.gmra.mxu0 %v3831_v15  ;;  %1523 = vmatpush.bf16.msra.mxu1 %v3402_v59 }
  0x63   : > { %2111 = vmatpush.bf16.msra.mxu2 %v3361_v21 }
  0x64   : > { %2288 = vmatpush.bf16.msra.mxu0 %v3378_v61  ;;  %2200 = vmatpush.bf16.msra.mxu3 %v3369_v23 }
  0x65   : > { %1524 = vmatpush.bf16.msra.mxu1 %v3401_v35 }
  0x68   : > { %2289 = vmatpush.bf16.msra.mxu0 %v3377_v54 }
  0x6e   : > { %929 = vmatmul.bf16.vlgmr.msrb.gmra.mxu1 %v3803_v7  ;;  %1018 = vmatmul.bf16.vlgmr.msrb.gmra.mxu2 %v3674_v18 }
  0x6f   : > { %1349 = vmatmul.bf16.vlgmr.msrb.gmra.mxu3 %v3693_v30 }
  0x71   : > { %1438 = vmatmul.bf16.vlgmr.msrb.gmra.mxu0 %v3803_v7 }
  0x7e   : > { %934 = vmatmul.bf16.gmra.mxu1 %v3831_v15  ;;  %1023 = vmatmul.bf16.gmra.mxu2 %v3734_v49 }
  0x7f   : > { %1354 = vmatmul.bf16.gmra.mxu3 %v3745_v53 }
  0x81   : > { %1443 = vmatmul.bf16.gmra.mxu0 %v3831_v15 }
  0x8e   : > { %939 = vmatmul.bf16.gmra.mxu1 %v3674_v18  ;;  %1028 = vmatmul.bf16.gmra.mxu2 %v3791_v3 }
  0x8f   : > { %1359 = vmatmul.bf16.gmra.mxu3 %v3803_v7 }
  0x91   : > { %1448 = vmatmul.bf16.gmra.mxu0 %v3674_v18 }
  0x9e   : > { %944 = vmatmul.bf16.gmra.mxu1 %v3734_v49  ;;  %1033 = vmatmul.bf16.gmra.mxu2 %v3822_v12 }
  0x9f   : > { %1364 = vmatmul.bf16.gmra.mxu3 %v3831_v15 }
  0xa1   : > { %1453 = vmatmul.bf16.gmra.mxu0 %v3734_v49 }
  0xab   : > { %v3877_v27 = vpop.f32.mrf.mxu1 }
  0xae   : > { %v3879_v28 = vpop.f32.mrf.mxu0  ;;  %949 = vmatmul.bf16.gmra.mxu1 %v3791_v3  ;;  %1038 = vmatmul.bf16.gmra.mxu2 %v3677_v19 }
  0xaf   : > { %1369 = vmatmul.bf16.gmra.mxu3 %v3674_v18 }
  0xb1   : > { %1458 = vmatmul.bf16.gmra.mxu0 %v3791_v3  ;;  %v3891_v32 = vpop.f32.mrf.mxu2 }
  0xb2   : > { %v3893_v33 = vpop.f32.mrf.mxu3 }
  0xb3   : > { %v3895_v34 = vpop.f32.mrf.mxu1 }
  0xb6   : > { %v3900_v36 = vpop.f32.mrf.mxu0 }
  0xb9   : > { %v3905_v38 = vpop.f32.mrf.mxu2 }
  0xba   : > { %v3907_v39 = vpop.f32.mrf.mxu3 }
  0xbb   : > { %v3909_v40 = vpop.f32.mrf.mxu1 }
  0xbe   : > { %v3911_v41 = vpop.f32.mrf.mxu0  ;;  %954 = vmatmul.bf16.gmra.mxu1 %v3822_v12  ;;  %1043 = vmatmul.bf16.gmra.mxu2 %v3737_v50 }
  0xbf   : > { %1374 = vmatmul.bf16.gmra.mxu3 %v3734_v49 }
  0xc1   : > { %1463 = vmatmul.bf16.gmra.mxu0 %v3822_v12  ;;  %v3917_v42 = vpop.f32.mrf.mxu2 }
  0xc2   : > { %v3919_v43 = vpop.f32.mrf.mxu3 }
  0xc3   : > { %v3921_v44 = vpop.f32.mrf.mxu1 }
  0xc6   : > { %v3923_v45 = vpop.f32.mrf.mxu0 }
  0xc9   : > { %v3925_v46 = vpop.f32.mrf.mxu2 }
  0xca   : > { %v3927_v47 = vpop.f32.mrf.mxu3 }
  0xcb   : > { %v3929_v48 = vpop.f32.mrf.mxu1 }
  0xce   : > { %v3931_v52 = vpop.f32.mrf.mxu0  ;;  %959 = vmatmul.bf16.gmra.mxu1 %v3677_v19  ;;  %1048 = vmatmul.bf16.gmra.mxu2 %v3794_v4 }
  0xcf   : > { %1379 = vmatmul.bf16.gmra.mxu3 %v3791_v3 }
  0xd1   : > { %1468 = vmatmul.bf16.gmra.mxu0 %v3677_v19  ;;  %v3943_v56 = vpop.f32.mrf.mxu2 }
  0xd2   : > { %v3945_v57 = vpop.f32.mrf.mxu3 }
  0xd3   : > { %v3947_v58 = vpop.f32.mrf.mxu1 }
  0xd6   : > { %v3952_v60 = vpop.f32.mrf.mxu0 }
  0xd9   : > { %v3957_v62 = vpop.f32.mrf.mxu2 }
  0xda   : > { %v3959_v63 = vpop.f32.mrf.mxu3 }
  0xdb   : > { %v3961_v0 = vpop.f32.mrf.mxu1 }
  0xde   : > { %v3963_v1 = vpop.f32.mrf.mxu0  ;;  %964 = vmatmul.bf16.gmra.mxu1 %v3737_v50  ;;  %1053 = vmatmul.bf16.gmra.mxu2 %v3825_v13 }
  0xdf   : > { %1384 = vmatmul.bf16.gmra.mxu3 %v3822_v12 }
  0xe1   : > { %1473 = vmatmul.bf16.gmra.mxu0 %v3737_v50  ;;  %v3969_v2 = vpop.f32.mrf.mxu2 }
  0xe2   : > { %v3971_v6 = vpop.f32.mrf.mxu3 }
  0xe3   : > { %v3973_v8 = vpop.f32.mrf.mxu1 }
  0xe6   : > { %v3975_v9 = vpop.f32.mrf.mxu0 }
  0xe9   : > { %v3977_v10 = vpop.f32.mrf.mxu2 }
  0xea   : > { %v3979_v11 = vpop.f32.mrf.mxu3 }
  0xeb   : > { %v930_v16 = vpop.f32.mrf.mxu1 }
  0xec   : > { %v931_v17 = vadd.f32 %v930_v16, %v3879_v28 }
  0xee   : > { %v1439_v20 = vpop.f32.mrf.mxu0  ;;  %969 = vmatmul.bf16.gmra.mxu1 %v3794_v4  ;;  %1058 = vmatmul.bf16.gmra.mxu2 %v3680_v22 }
  0xef   : > { %1389 = vmatmul.bf16.gmra.mxu3 %v3677_v19  ;;  %v1608_v19 = vlaneseq }
  0xf1   : > { %1478 = vmatmul.bf16.gmra.mxu0 %v3794_v4  ;;  %v1019_v24 = vpop.f32.mrf.mxu2  ;;  %v4003_v55 = vshrl.u32 %v1608_v19, 7 }
  0xf2   : > { %v3992_v25 = vadd.f32 %v1019_v24, %v931_v17  ;;  %v1350_v26 = vpop.f32.mrf.mxu3 }
  0xf3   : > { %v3994_v28 = vadd.f32 %v1439_v20, %v1350_v26  ;;  %v932_v29 = vpop.f32.mrf.mxu1  ;;  %vm1897_vm0 = vcmp.lt.s32.totalorder %v4003_v55, 1  ;;  %vm2405_vm2 = vcmp.lt.s32.totalorder %v4003_v55, 7 }
  0xf4   : > { %v933_v31 = vadd.f32 %v932_v29, %v3900_v36  ;;  %v4731_v36 = vrot.slane %v3992_v25, 7 }
  0xf6   : > { %v1441_v37 = vpop.f32.mrf.mxu0 }
  0xf9   : > { %v1021_v59 = vpop.f32.mrf.mxu2 }
  0xfa   : > { %v1022_v61 = vadd.f32 %v1021_v59, %v933_v31  ;;  %v1352_v16 = vpop.f32.mrf.mxu3 }
  0xfb   : > { %v4005_v17 = vadd.f32 %v1441_v37, %v1352_v16  ;;  %v935_v20 = vpop.f32.mrf.mxu1 }
  0xfc   : > { %v1866_v21 = vrot.slane %v1022_v61, 7  ;;  %v936_v23 = vadd.f32 %v935_v20, %v3911_v41 }
  0xfe   : > { %v1444_v24 = vpop.f32.mrf.mxu0  ;;  %974 = vmatmul.bf16.gmra.mxu1 %v3825_v13  ;;  %1063 = vmatmul.bf16.gmra.mxu2 %v3740_v51  ;;  %v4016_v26 = vsel %vm1897_vm0, %v4731_v36, %v1866_v21 }
  0xff   : > { %4738 = vst [vmem:[#allocation3_spill] sm:$0xff] %v4016_v26  ;;  %1394 = vmatmul.bf16.gmra.mxu3 %v3737_v50 }
 0x101   : > { %1483 = vmatmul.bf16.gmra.mxu0 %v3825_v13  ;;  %v1024_v29 = vpop.f32.mrf.mxu2 }
 0x102   : > { %v1025_v19 = vadd.f32 %v1024_v29, %v936_v23  ;;  %v1355_v31 = vpop.f32.mrf.mxu3 }
 0x103   : > { %v4020_v35 = vadd.f32 %v1444_v24, %v1355_v31  ;;  %v937_v41 = vpop.f32.mrf.mxu1 }
 0x104   : > { %v1867_v37 = vrot.slane %v1025_v19, 7  ;;  %v938_v54 = vadd.f32 %v937_v41, %v3923_v45 }
 0x106   : > { %v1446_v59 = vpop.f32.mrf.mxu0  ;;  %v4025_v61 = vsel %vm1897_vm0, %v1866_v21, %v1867_v37  ;;  %v3360_v21 = vld [vmem:[%s4727_s3 + $0xc8] sm:$0xff] }
 0x107   : > { %2112 = vmatpush.bf16.msra.mxu2 %v3360_v21 }
 0x109   : > { %v1026_v16 = vpop.f32.mrf.mxu2 }
 0x10a   : > { %v1027_v20 = vadd.f32 %v1026_v16, %v938_v54  ;;  %v1357_v50 = vpop.f32.mrf.mxu3  ;;  %v3400_v16 = vld [vmem:[%s4727_s3 + $0x208] sm:$0xff] }
 0x10b   : > { %v4027_v36 = vadd.f32 %v1446_v59, %v1357_v50  ;;  %v940_v26 = vpop.f32.mrf.mxu1  ;;  %v3376_v50 = vld [vmem:[%s4727_s3 + $0x148] sm:$0xff]  ;;  %1525 = vmatpush.bf16.msra.mxu1 %v3400_v16 }
 0x10c   : > { %v1868_v23 = vrot.slane %v1027_v20, 7  ;;  %v941_v24 = vadd.f32 %v940_v26, %v3931_v52  ;;  %v3368_v52 = vld [vmem:[%s4727_s3 + $0x108] sm:$0xff]  ;;  %2290 = vmatpush.bf16.msra.mxu0 %v3376_v50 }
 0x10d   : > { %2201 = vmatpush.bf16.msra.mxu3 %v3368_v52 }
 0x10e   : > { %v1449_v29 = vpop.f32.mrf.mxu0  ;;  %979 = vmatmul.bf16.gmra.mxu1 %v3680_v22  ;;  %1068 = vmatmul.bf16.gmra.mxu2 %v3797_v5  ;;  %v4034_v45 = vsel %vm1897_vm0, %v1867_v37, %v1868_v23 }
 0x10f   : > { %4739 = vst [vmem:[#allocation4_spill] sm:$0xff] %v4034_v45  ;;  %1399 = vmatmul.bf16.gmra.mxu3 %v3794_v4 }
 0x111   : > { %1488 = vmatmul.bf16.gmra.mxu0 %v3680_v22  ;;  %v1029_v26 = vpop.f32.mrf.mxu2 }
 0x112   : > { %v1030_v19 = vadd.f32 %v1029_v26, %v941_v24  ;;  %v1360_v31 = vpop.f32.mrf.mxu3 }
 0x113   : > { %v4045_v41 = vadd.f32 %v1449_v29, %v1360_v31  ;;  %v942_v37 = vpop.f32.mrf.mxu1 }
 0x114   : > { %v1869_v54 = vrot.slane %v1030_v19, 7  ;;  %v943_v59 = vadd.f32 %v942_v37, %v3952_v60 }
 0x115   : > { %4740 = vst [vmem:[#allocation5_spill] sm:$0xff] %v4045_v41 }
 0x116   : > { %v1451_v20 = vpop.f32.mrf.mxu0  ;;  %v4058_v24 = vsel %vm1897_vm0, %v1868_v23, %v1869_v54 }
 0x117   : > { %4741 = vst [vmem:[#allocation6_spill] sm:$0xff] %v4058_v24 }
 0x119   : > { %v1031_v60 = vpop.f32.mrf.mxu2 }
 0x11a   : > { %v1032_v29 = vadd.f32 %v1031_v60, %v943_v59  ;;  %v1362_v21 = vpop.f32.mrf.mxu3 }
 0x11b   : > { %v4062_v52 = vadd.f32 %v1451_v20, %v1362_v21  ;;  %v945_v26 = vpop.f32.mrf.mxu1 }
 0x11c   : > { %v1870_v19 = vrot.slane %v1032_v29, 7  ;;  %v946_v31 = vadd.f32 %v945_v26, %v3963_v1 }
 0x11d   : > { %4742 = vst [vmem:[#allocation7_spill] sm:$0xff] %v4062_v52 }
 0x11e   : > { %v1454_v37 = vpop.f32.mrf.mxu0  ;;  %984 = vmatmul.bf16.gmra.mxu1 %v3740_v51  ;;  %1073 = vmatmul.bf16.gmra.mxu2 %v3828_v14  ;;  %v4070_v23 = vsel %vm1897_vm0, %v1869_v54, %v1870_v19 }
 0x11f   : > { %4743 = vst [vmem:[#allocation8_spill] sm:$0xff] %v4070_v23  ;;  %1404 = vmatmul.bf16.gmra.mxu3 %v3825_v13 }
 0x121   : > { %1493 = vmatmul.bf16.gmra.mxu0 %v3740_v51  ;;  %v1034_v59 = vpop.f32.mrf.mxu2 }
 0x122   : > { %v1035_v1 = vadd.f32 %v1034_v59, %v946_v31  ;;  %v1365_v16 = vpop.f32.mrf.mxu3  ;;  %v4085_v59 = vld [vmem:[%s3664_s11 + $0x70] sm:$0xff] }
 0x123   : > { %v4074_v20 = vadd.f32 %v1454_v37, %v1365_v16  ;;  %v947_v50 = vpop.f32.mrf.mxu1 }
 0x124   : > { %v1871_v60 = vrot.slane %v1035_v1, 7  ;;  %v948_v29 = vadd.f32 %v947_v50, %v3975_v9 }
 0x125   : > { %4744 = vst [vmem:[#allocation9_spill] sm:$0xff] %v4074_v20 }
 0x126   : > { %v1456_v21 = vpop.f32.mrf.mxu0  ;;  %v4082_v54 = vsel %vm1897_vm0, %v1870_v19, %v1871_v60 }
 0x127   : > { %4745 = vst [vmem:[#allocation10_spill] sm:$0xff] %v4082_v54  ;;  %v4125_v54 = vld [vmem:[%s3664_s11 + $0x78] sm:$0xff] }
 0x129   : > { %v1036_v26 = vpop.f32.mrf.mxu2 }
 0x12a   : > { %v1037_v31 = vadd.f32 %v1036_v26, %v948_v29  ;;  %v1367_v37 = vpop.f32.mrf.mxu3  ;;  %v3359_v29 = vld [vmem:[%s4727_s3 + $0xc0] sm:$0xff] }
 0x12b   : > { %v4087_v1 = vadd.f32 %v1456_v21, %v1367_v37  ;;  %v950_v9 = vpop.f32.mrf.mxu1  ;;  %v3367_v26 = vld [vmem:[%s4727_s3 + $0x100] sm:$0xff]  ;;  %2113 = vmatpush.bf16.msra.mxu2 %v3359_v29 }
 0x12c   : > { %v1872_v16 = vrot.slane %v1037_v31, 7  ;;  %v951_v21 = vadd.f32 %v950_v9, %v3877_v27  ;;  %2202 = vmatpush.bf16.msra.mxu3 %v3367_v26  ;;  %v3399_v27 = vld [vmem:[%s4727_s3 + $0x200] sm:$0xff]  ;;  %v601_v26 = vstv %s600_s15 }
 0x12d   : > { %4746 = vst [vmem:[#allocation11_spill] sm:$0xff] %v4087_v1  ;;  %1526 = vmatpush.bf16.msra.mxu1 %v3399_v27  ;;  %v607_v52 = vunpack.c.l.bf16 %v601_v26 }
 0x12e   : > { %v1459_v50 = vpop.f32.mrf.mxu0  ;;  %989 = vmatmul.bf16.gmra.mxu1 %v3797_v5  ;;  %1078 = vmatmul.bf16.gmra.mxu2 %v4085_v59  ;;  %v4094_v19 = vsel %vm1897_vm0, %v1871_v60, %v1872_v16 }
 0x12f   : > { %4747 = vst [vmem:[#allocation12_spill] sm:$0xff] %v4094_v19  ;;  %1409 = vmatmul.bf16.gmra.mxu3 %v3680_v22 }
 0x131   : > { %1498 = vmatmul.bf16.gmra.mxu0 %v3797_v5  ;;  %v1039_v31 = vpop.f32.mrf.mxu2 }
 0x132   : > { %v1040_v60 = vadd.f32 %v1039_v31, %v951_v21  ;;  %v1370_v37 = vpop.f32.mrf.mxu3  ;;  %v3416_v21 = vld [vmem:[%s4110_s14] sm:$0xff]  }
 0x133   : > { %v4105_v22 = vadd.f32 %v1459_v50, %v1370_v37  ;;  %v952_v19 = vpop.f32.mrf.mxu1  ;;  %v3375_v50 = vld [vmem:[%s4727_s3 + $0x140] sm:$0xff]  ;;  %v3417_v20 = vunpack.c.l.bf16 %v3416_v21  ;;  %v3418_v23 = vunpack.c.h.bf16 %v3416_v21 }
 0x134   : > { %v1873_v1 = vrot.slane %v1040_v60, 7  ;;  %2291 = vmatpush.bf16.msra.mxu0 %v3375_v50  ;;  %v953_v31 = vadd.f32 %v952_v19, %v3895_v34 }
 0x135   : > { %4748 = vst [vmem:[#allocation13_spill] sm:$0xff] %v4105_v22  ;;  %v609_v50 = vmul.f32 %v3418_v23, %v607_v52 }
 0x136   : > { %v1461_v9 = vpop.f32.mrf.mxu0  ;;  %v4120_v29 = vsel %vm1897_vm0, %v1872_v16, %v1873_v1  ;;  %v608_v16 = vmul.f32 %v3417_v20, %v607_v52 }
 0x137   : > { %4749 = vst [vmem:[#allocation14_spill] sm:$0xff] %v4120_v29 }
 0x138   : > { %v612_v26 = vpack.c.bf16 %v608_v16, %v608_v16 }
 0x139   : > { %v1041_v60 = vpop.f32.mrf.mxu2 }
 0x13a   : > { %v1042_v37 = vadd.f32 %v1041_v60, %v953_v31  ;;  %v1372_v22 = vpop.f32.mrf.mxu3  ;;  %v613_v31 = vpack.c.bf16 %v609_v50, %v609_v50 }
 0x13b   : > { %v4127_v24 = vadd.f32 %v1461_v9, %v1372_v22  ;;  %v955_v27 = vpop.f32.mrf.mxu1 }
 0x13c   : > { %v1874_v41 = vrot.slane %v1042_v37, 7  ;;  %v956_v19 = vadd.f32 %v955_v27, %v3909_v40 }
 0x13d   : > { %4750 = vst [vmem:[#allocation15_spill] sm:$0xff] %v4127_v24  ;;  %v632_v24 = vunpack.c.l.b16 %v612_v26 }
 0x13e   : > { %v1464_v45 = vpop.f32.mrf.mxu0  ;;  %994 = vmatmul.bf16.gmra.mxu1 %v3828_v14  ;;  %1083 = vmatmul.bf16.gmra.mxu2 %v4125_v54  ;;  %v4133_v34 = vsel %vm1897_vm0, %v1873_v1, %v1874_v41  ;;  %v633_v1 = vunpack.c.l.b16 %v613_v31 }
 0x13f   : > { %4751 = vst [vmem:[#allocation16_spill] sm:$0xff] %v4133_v34  ;;  %1414 = vmatmul.bf16.gmra.mxu3 %v3740_v51  ;;  %v3424_v51 = vld [vmem:[%s4110_s14 + $0x8] sm:$0xff]  }
 0x140   : > { %v3421_v16 = vunpack.c.l.bf16 %v3424_v51 }
 0x141   : > { %1503 = vmatmul.bf16.gmra.mxu0 %v3828_v14  ;;  %v1044_v22 = vpop.f32.mrf.mxu2 }
 0x142   : > { %v1045_v9 = vadd.f32 %v1044_v22, %v956_v19  ;;  %v1375_v21 = vpop.f32.mrf.mxu3  ;;  %v4146_v22 = vpack.c.b16 %v633_v1, %v632_v24 }
 0x143   : > { %v4138_v60 = vadd.f32 %v1464_v45, %v1375_v21  ;;  %v957_v20 = vpop.f32.mrf.mxu1  ;;  %v3422_v45 = vunpack.c.h.bf16 %v3424_v51 }
 0x144   : > { %v1875_v23 = vrot.slane %v1045_v9, 7  ;;  %v958_v40 = vadd.f32 %v957_v20, %v3921_v44  ;;  %4752 = vst [vmem:[#allocation17_spill] sm:$0xff] %v4146_v22 }
 0x145   : > { %v611_v31 = vmul.f32 %v3422_v45, %v607_v52 }
 0x146   : > { %v1466_v37 = vpop.f32.mrf.mxu0  ;;  %v4142_v34 = vsel %vm1897_vm0, %v1874_v41, %v1875_v23  ;;  %v610_v41 = vmul.f32 %v3421_v16, %v607_v52 }
 0x147   : > { %v615_v51 = vpack.c.bf16 %v611_v31, %v611_v31 }
 0x148   : > { %v614_v1 = vpack.c.bf16 %v610_v41, %v610_v41 }
 0x149   : > { %v1046_v27 = vpop.f32.mrf.mxu2  ;;  %v635_v45 = vunpack.c.l.b16 %v615_v51 }
 0x14a   : > { %v1047_v29 = vadd.f32 %v1046_v27, %v958_v40  ;;  %v1377_v19 = vpop.f32.mrf.mxu3  ;;  %v634_v16 = vunpack.c.l.b16 %v614_v1 }
 0x14b   : > { %v4148_v50 = vadd.f32 %v1466_v37, %v1377_v19  ;;  %v960_v9 = vpop.f32.mrf.mxu1 }
 0x14c   : > { %v1876_v21 = vrot.slane %v1047_v29, 7  ;;  %v961_v24 = vadd.f32 %v960_v9, %v3929_v48 }
 0x14e   : > { %v1469_v26 = vpop.f32.mrf.mxu0  ;;  %999 = vmatmul.bf16.gmra.mxu1 %v4085_v59  ;;  %1088 = vmatmul.bf16.gmra.mxu2 %v4146_v22  ;;  %v4154_v44 = vsel %vm1897_vm0, %v1875_v23, %v1876_v21 }
 0x14f   : > { %1419 = vmatmul.bf16.gmra.mxu3 %v3797_v5 }
 0x151   : > { %1508 = vmatmul.bf16.gmra.mxu0 %v4085_v59  ;;  %v1049_v20 = vpop.f32.mrf.mxu2 }
 0x152   : > { %v1050_v37 = vadd.f32 %v1049_v20, %v961_v24  ;;  %v1380_v29 = vpop.f32.mrf.mxu3  ;;  %v4166_v24 = vpack.c.b16 %v635_v45, %v634_v16 }
 0x153   : > { %v4159_v40 = vadd.f32 %v1469_v26, %v1380_v29  ;;  %v962_v27 = vpop.f32.mrf.mxu1 }
 0x154   : > { %v1877_v19 = vrot.slane %v1050_v37, 7  ;;  %v963_v5 = vadd.f32 %v962_v27, %v3947_v58 }
 0x156   : > { %v1471_v52 = vpop.f32.mrf.mxu0  ;;  %v4163_v23 = vsel %vm1897_vm0, %v1876_v21, %v1877_v19 }
 0x159   : > { %v1051_v48 = vpop.f32.mrf.mxu2 }
 0x15a   : > { %v1052_v9 = vadd.f32 %v1051_v48, %v963_v5  ;;  %v1382_v22 = vpop.f32.mrf.mxu3 }
 0x15b   : > { %v4168_v41 = vadd.f32 %v1471_v52, %v1382_v22  ;;  %v965_v26 = vpop.f32.mrf.mxu1 }
 0x15c   : > { %v1878_v31 = vrot.slane %v1052_v9, 7  ;;  %v966_v58 = vadd.f32 %v965_v26, %v3961_v0 }
 0x15e   : > { %v1474_v20 = vpop.f32.mrf.mxu0  ;;  %1004 = vmatmul.bf16.gmra.mxu1 %v4125_v54  ;;  %1093 = vmatmul.bf16.gmra.mxu2 %v4166_v24  ;;  %v4174_v21 = vsel %vm1897_vm0, %v1877_v19, %v1878_v31 }
 0x15f   : > { %1424 = vmatmul.bf16.gmra.mxu3 %v3828_v14 }
 0x161   : > { %1513 = vmatmul.bf16.gmra.mxu0 %v4125_v54  ;;  %v1054_v37 = vpop.f32.mrf.mxu2 }
 0x162   : > { %v1055_v22 = vadd.f32 %v1054_v37, %v966_v58  ;;  %v1385_v29 = vpop.f32.mrf.mxu3 }
 0x163   : > { %v4179_v1 = vadd.f32 %v1474_v20, %v1385_v29  ;;  %v967_v51 = vpop.f32.mrf.mxu1 }
 0x164   : > { %v1879_v27 = vrot.slane %v1055_v22, 7  ;;  %v968_v19 = vadd.f32 %v967_v51, %v3973_v8 }
 0x166   : > { %v1476_v52 = vpop.f32.mrf.mxu0  ;;  %v4183_v16 = vsel %vm1897_vm0, %v1878_v31, %v1879_v27 }
 0x169   : > { %v1056_v45 = vpop.f32.mrf.mxu2 }
 0x16a   : > { %v1057_v14 = vadd.f32 %v1056_v45, %v968_v19  ;;  %v1387_v5 = vpop.f32.mrf.mxu3 }
 0x16b   : > { %v4186_v0 = vadd.f32 %v1476_v52, %v1387_v5  ;;  %v970_v48 = vpop.f32.mrf.mxu1 }
 0x16c   : > { %v1880_v9 = vrot.slane %v1057_v14, 7  ;;  %v971_v8 = vadd.f32 %v970_v48, %v3891_v32 }
 0x16e   : > { %v1479_v26 = vpop.f32.mrf.mxu0  ;;  %1527 = vmatmul.bf16.vlgmr.msra.gmra.mxu1 %v3674_v18  ;;  %2114 = vmatmul.bf16.vlgmr.msra.gmra.mxu2 %v3693_v30  ;;  %v4192_v20 = vsel %vm1897_vm0, %v1879_v27, %v1880_v9 }
 0x16f   : > { %2203 = vmatmul.bf16.vlgmr.msra.gmra.mxu3 %v3803_v7 }
 0x171   : > { %2292 = vmatmul.bf16.vlgmr.msra.gmra.mxu0 %v3674_v18  ;;  %v1059_v31 = vpop.f32.mrf.mxu2 }
 0x172   : > { %v1060_v58 = vadd.f32 %v1059_v31, %v971_v8  ;;  %v1390_v37 = vpop.f32.mrf.mxu3 }
 0x173   : > { %v4197_v22 = vadd.f32 %v1479_v26, %v1390_v37  ;;  %v972_v29 = vpop.f32.mrf.mxu1 }
 0x174   : > { %v1881_v51 = vrot.slane %v1060_v58, 7  ;;  %v973_v27 = vadd.f32 %v972_v29, %v3905_v38 }
 0x176   : > { %v1481_v52 = vpop.f32.mrf.mxu0  ;;  %v4201_v30 = vsel %vm1897_vm0, %v1880_v9, %v1881_v51 }
 0x179   : > { %v1061_v19 = vpop.f32.mrf.mxu2 }
 0x17a   : > { %v1062_v45 = vadd.f32 %v1061_v19, %v973_v27  ;;  %v1392_v14 = vpop.f32.mrf.mxu3 }
 0x17b   : > { %v4204_v32 = vadd.f32 %v1481_v52, %v1392_v14  ;;  %v975_v5 = vpop.f32.mrf.mxu1 }
 0x17c   : > { %v1882_v48 = vrot.slane %v1062_v45, 7  ;;  %v976_v38 = vadd.f32 %v975_v5, %v3917_v42 }
 0x17e   : > { %v1484_v8 = vpop.f32.mrf.mxu0  ;;  %1532 = vmatmul.bf16.gmra.mxu1 %v3734_v49  ;;  %2119 = vmatmul.bf16.gmra.mxu2 %v3745_v53  ;;  %v4210_v26 = vsel %vm1897_vm0, %v1881_v51, %v1882_v48 }
 0x17f   : > { %4753 = vst [vmem:[#allocation18_spill] sm:$0xff] %v4210_v26  ;;  %2208 = vmatmul.bf16.gmra.mxu3 %v3831_v15 }
 0x181   : > { %2297 = vmatmul.bf16.gmra.mxu0 %v3734_v49  ;;  %v1064_v9 = vpop.f32.mrf.mxu2 }
 0x182   : > { %v1065_v31 = vadd.f32 %v1064_v9, %v976_v38  ;;  %v1395_v58 = vpop.f32.mrf.mxu3 }
 0x183   : > { %v4215_v37 = vadd.f32 %v1484_v8, %v1395_v58  ;;  %v977_v29 = vpop.f32.mrf.mxu1 }
 0x184   : > { %v1883_v52 = vrot.slane %v1065_v31, 7  ;;  %v978_v51 = vadd.f32 %v977_v29, %v3925_v46 }
 0x186   : > { %v1486_v27 = vpop.f32.mrf.mxu0  ;;  %v4219_v53 = vsel %vm1897_vm0, %v1882_v48, %v1883_v52 }
 0x189   : > { %v1066_v19 = vpop.f32.mrf.mxu2 }
 0x18a   : > { %v1067_v45 = vadd.f32 %v1066_v19, %v978_v51  ;;  %v1397_v14 = vpop.f32.mrf.mxu3 }
 0x18b   : > { %v4222_v42 = vadd.f32 %v1486_v27, %v1397_v14  ;;  %v980_v5 = vpop.f32.mrf.mxu1 }
 0x18c   : > { %v1884_v26 = vrot.slane %v1067_v45, 7  ;;  %v981_v46 = vadd.f32 %v980_v5, %v3943_v56 }
 0x18e   : > { %v1489_v38 = vpop.f32.mrf.mxu0  ;;  %1537 = vmatmul.bf16.gmra.mxu1 %v3791_v3  ;;  %2124 = vmatmul.bf16.gmra.mxu2 %v3803_v7  ;;  %v4228_v8 = vsel %vm1897_vm0, %v1883_v52, %v1884_v26 }
 0x18f   : > { %2213 = vmatmul.bf16.gmra.mxu3 %v3674_v18 }
 0x191   : > { %2302 = vmatmul.bf16.gmra.mxu0 %v3791_v3  ;;  %v1069_v48 = vpop.f32.mrf.mxu2 }
 0x192   : > { %v1070_v9 = vadd.f32 %v1069_v48, %v981_v46  ;;  %v1400_v31 = vpop.f32.mrf.mxu3 }
 0x193   : > { %v4233_v58 = vadd.f32 %v1489_v38, %v1400_v31  ;;  %v982_v29 = vpop.f32.mrf.mxu1 }
 0x194   : > { %v1885_v27 = vrot.slane %v1070_v9, 7  ;;  %v983_v52 = vadd.f32 %v982_v29, %v3957_v62 }
 0x196   : > { %v1491_v51 = vpop.f32.mrf.mxu0  ;;  %v4237_v7 = vsel %vm1897_vm0, %v1884_v26, %v1885_v27 }
 0x199   : > { %v1071_v19 = vpop.f32.mrf.mxu2 }
 0x19a   : > { %v1072_v18 = vadd.f32 %v1071_v19, %v983_v52  ;;  %v1402_v45 = vpop.f32.mrf.mxu3 }
 0x19b   : > { %v4240_v56 = vadd.f32 %v1491_v51, %v1402_v45  ;;  %v985_v14 = vpop.f32.mrf.mxu1 }
 0x19c   : > { %v1886_v5 = vrot.slane %v1072_v18, 7  ;;  %v986_v62 = vadd.f32 %v985_v14, %v3969_v2 }
 0x19e   : > { %v1494_v46 = vpop.f32.mrf.mxu0  ;;  %1542 = vmatmul.bf16.gmra.mxu1 %v3822_v12  ;;  %2129 = vmatmul.bf16.gmra.mxu2 %v3831_v15  ;;  %v4246_v38 = vsel %vm1897_vm0, %v1885_v27, %v1886_v5 }
 0x19f   : > { %2218 = vmatmul.bf16.gmra.mxu3 %v3734_v49 }
 0x1a1   : > { %2307 = vmatmul.bf16.gmra.mxu0 %v3822_v12  ;;  %v1074_v26 = vpop.f32.mrf.mxu2 }
 0x1a2   : > { %v1075_v48 = vadd.f32 %v1074_v26, %v986_v62  ;;  %v1405_v9 = vpop.f32.mrf.mxu3  ;;  %v4261_v26 = vld [vmem:[%s3664_s11 + $0x30] sm:$0xff] }
 0x1a3   : > { %v4251_v31 = vadd.f32 %v1494_v46, %v1405_v9  ;;  %v987_v29 = vpop.f32.mrf.mxu1  ;;  %v3492_v46 = vld [vmem:[%s3664_s11 + $0x10] sm:$0xff] }
 0x1a4   : > { %v1887_v51 = vrot.slane %v1075_v48, 7  ;;  %v988_v49 = vadd.f32 %v987_v29, %v3977_v10 }
 0x1a6   : > { %v1496_v15 = vpop.f32.mrf.mxu0  ;;  %v4255_v27 = vsel %vm1897_vm0, %v1886_v5, %v1887_v51 }
 0x1a7   : > { %4754 = vst [vmem:[#allocation19_spill] sm:$0xff] %v4255_v27  ;;  %v4282_v27 = vld [vmem:[%s3664_s11 + $0x38] sm:$0xff] }
 0x1a9   : > { %v1076_v52 = vpop.f32.mrf.mxu2 }
 0x1aa   : > { %v1077_v2 = vadd.f32 %v1076_v52, %v988_v49  ;;  %v1407_v19 = vpop.f32.mrf.mxu3 }
 0x1ab   : > { %v4258_v18 = vadd.f32 %v1496_v15, %v1407_v19  ;;  %v990_v45 = vpop.f32.mrf.mxu1 }
 0x1ac   : > { %v1888_v14 = vrot.slane %v1077_v2, 7  ;;  %v991_v10 = vadd.f32 %v990_v45, %v3893_v33 }
 0x1ad   : > { %4755 = vst [vmem:[#allocation20_spill] sm:$0xff] %v4258_v18 }
 0x1ae   : > { %v1499_v62 = vpop.f32.mrf.mxu0  ;;  %1547 = vmatmul.bf16.gmra.mxu1 %v4261_v26  ;;  %2134 = vmatmul.bf16.gmra.mxu2 %v3492_v46  ;;  %v4267_v5 = vsel %vm1897_vm0, %v1887_v51, %v1888_v14 }
 0x1af   : > { %4756 = vst [vmem:[#allocation21_spill] sm:$0xff] %v4267_v5  ;;  %2223 = vmatmul.bf16.gmra.mxu3 %v3791_v3 }
 0x1b1   : > { %2312 = vmatmul.bf16.gmra.mxu0 %v4261_v26  ;;  %v1079_v48 = vpop.f32.mrf.mxu2 }
 0x1b2   : > { %v1080_v9 = vadd.f32 %v1079_v48, %v991_v10  ;;  %v1410_v29 = vpop.f32.mrf.mxu3 }
 0x1b3   : > { %v4272_v15 = vadd.f32 %v1499_v62, %v1410_v29  ;;  %v992_v49 = vpop.f32.mrf.mxu1  ;;  %v3494_v62 = vld [vmem:[%s3664_s11 + $0x18] sm:$0xff] }
 0x1b4   : > { %v1889_v52 = vrot.slane %v1080_v9, 7  ;;  %v993_v19 = vadd.f32 %v992_v49, %v3907_v39 }
 0x1b6   : > { %v1501_v2 = vpop.f32.mrf.mxu0  ;;  %v4276_v51 = vsel %vm1897_vm0, %v1888_v14, %v1889_v52 }
 0x1b7   : > { %4757 = vst [vmem:[#allocation22_spill] sm:$0xff] %v4276_v51 }
 0x1b9   : > { %v1081_v46 = vpop.f32.mrf.mxu2 }
 0x1ba   : > { %v1082_v33 = vadd.f32 %v1081_v46, %v993_v19  ;;  %v1412_v45 = vpop.f32.mrf.mxu3 }
 0x1bb   : > { %v4279_v5 = vadd.f32 %v1501_v2, %v1412_v45  ;;  %v995_v18 = vpop.f32.mrf.mxu1 }
 0x1bc   : > { %v1890_v10 = vrot.slane %v1082_v33, 7  ;;  %v996_v39 = vadd.f32 %v995_v18, %v3919_v43 }
 0x1bd   : > { %4758 = vst [vmem:[#allocation23_spill] sm:$0xff] %v4279_v5 }
 0x1be   : > { %v1504_v48 = vpop.f32.mrf.mxu0  ;;  %1552 = vmatmul.bf16.gmra.mxu1 %v4282_v27  ;;  %2139 = vmatmul.bf16.gmra.mxu2 %v3494_v62  ;;  %v4288_v14 = vsel %vm1897_vm0, %v1889_v52, %v1890_v10 }
 0x1bf   : > { %4759 = vst [vmem:[#allocation24_spill] sm:$0xff] %v4288_v14  ;;  %2228 = vmatmul.bf16.gmra.mxu3 %v3822_v12 }
 0x1c1   : > { %2317 = vmatmul.bf16.gmra.mxu0 %v4282_v27  ;;  %v1084_v9 = vpop.f32.mrf.mxu2 }
 0x1c2   : > { %v1085_v29 = vadd.f32 %v1084_v9, %v996_v39  ;;  %v1415_v49 = vpop.f32.mrf.mxu3 }
 0x1c3   : > { %v4293_v2 = vadd.f32 %v1504_v48, %v1415_v49  ;;  %v997_v19 = vpop.f32.mrf.mxu1 }
 0x1c4   : > { %v1891_v46 = vrot.slane %v1085_v29, 7  ;;  %v998_v52 = vadd.f32 %v997_v19, %v3927_v47 }
 0x1c6   : > { %v1506_v33 = vpop.f32.mrf.mxu0  ;;  %v4297_v45 = vsel %vm1897_vm0, %v1890_v10, %v1891_v46 }
 0x1c9   : > { %v1086_v62 = vpop.f32.mrf.mxu2 }
 0x1ca   : > { %v1087_v14 = vadd.f32 %v1086_v62, %v998_v52  ;;  %v1417_v5 = vpop.f32.mrf.mxu3 }
 0x1cb   : > { %v4300_v43 = vadd.f32 %v1506_v33, %v1417_v5  ;;  %v1000_v18 = vpop.f32.mrf.mxu1 }
 0x1cc   : > { %v1892_v51 = vrot.slane %v1087_v14, 7  ;;  %v1001_v47 = vadd.f32 %v1000_v18, %v3945_v57 }
 0x1ce   : > { %v1509_v39 = vpop.f32.mrf.mxu0  ;;  %1557 = vmatmul.bf16.gmra.mxu1 %v3794_v4  ;;  %2144 = vmatmul.bf16.gmra.mxu2 %v3791_v3  ;;  %v4306_v48 = vsel %vm1897_vm0, %v1891_v46, %v1892_v51 }
 0x1cf   : > { %2233 = vmatmul.bf16.gmra.mxu3 %v4261_v26 }
 0x1d1   : > { %2322 = vmatmul.bf16.gmra.mxu0 %v3794_v4  ;;  %v1089_v10 = vpop.f32.mrf.mxu2 }
 0x1d2   : > { %v1090_v5 = vadd.f32 %v1089_v10, %v1001_v47  ;;  %v1420_v9 = vpop.f32.mrf.mxu3 }
 0x1d3   : > { %v4311_v29 = vadd.f32 %v1509_v39, %v1420_v9  ;;  %v1002_v14 = vpop.f32.mrf.mxu1 }
 0x1d4   : > { %v1893_v49 = vrot.slane %v1090_v5, 7  ;;  %v1003_v46 = vadd.f32 %v1002_v14, %v3959_v63 }
 0x1d5   : > { %4760 = vst [vmem:[#allocation25_spill] sm:$0xff] %v4311_v29 }
 0x1d6   : > { %v1511_v19 = vpop.f32.mrf.mxu0  ;;  %v4315_v3 = vsel %vm1897_vm0, %v1892_v51, %v1893_v49 }
 0x1d7   : > { %4761 = vst [vmem:[#allocation26_spill] sm:$0xff] %v4315_v3 }
 0x1d9   : > { %v1091_v33 = vpop.f32.mrf.mxu2 }
 0x1da   : > { %v1092_v52 = vadd.f32 %v1091_v33, %v1003_v46  ;;  %v1422_v62 = vpop.f32.mrf.mxu3 }
 0x1db   : > { %v4318_v57 = vadd.f32 %v1511_v19, %v1422_v62  ;;  %v1005_v4 = vpop.f32.mrf.mxu1 }
 0x1dc   : > { %v1894_v18 = vrot.slane %v1092_v52, 7  ;;  %v1006_v63 = vadd.f32 %v1005_v4, %v3971_v6 }
 0x1dd   : > { %4762 = vst [vmem:[#allocation27_spill] sm:$0xff] %v4318_v57 }
 0x1de   : > { %v1514_v47 = vpop.f32.mrf.mxu0  ;;  %1562 = vmatmul.bf16.gmra.mxu1 %v3825_v13  ;;  %2149 = vmatmul.bf16.gmra.mxu2 %v3822_v12  ;;  %v4324_v39 = vsel %vm1897_vm0, %v1893_v49, %v1894_v18  ;;  %v1641_v12 = vand.u32 31, %v4003_v55 }
 0x1df   : > { %4763 = vst [vmem:[#allocation28_spill] sm:$0xff] %v4324_v39  ;;  %2238 = vmatmul.bf16.gmra.mxu3 %v4282_v27 }
 0x1e0   : > { %vm1673_vm1 = vcmp.gt.s32.totalorder %v1641_v12, 0 }
 0x1e1   : > { %2327 = vmatmul.bf16.gmra.mxu0 %v3825_v13  ;;  %v1094_v51 = vpop.f32.mrf.mxu2 }
 0x1e2   : > { %v1095_v10 = vadd.f32 %v1094_v51, %v1006_v63  ;;  %v1425_v5 = vpop.f32.mrf.mxu3  ;;  %v4734_v63 = vmov 0.0  }
 0x1e3   : > { %v4329_v9 = vadd.f32 %v1514_v47, %v1425_v5  ;;  %v1007_v14 = vpop.f32.mrf.mxu1  ;;  %v3205_v51 = vsel %vm1673_vm1, 1.0, %v4734_v63  ;;  %v4341_v5 = vld [vmem:[%s3664_s11 + $0x50] sm:$0xff] }
 0x1e4   : > { %v1895_v19 = vrot.slane %v1095_v10, 7  ;;  %v1008_v33 = vadd.f32 %v1007_v14, %v3979_v11  ;;  %v4767_v11 = vrot.slane %v3992_v25, 7 }
 0x1e5   : > { %4764 = vst [vmem:[#allocation29_spill] sm:$0xff] %v4329_v9 }
 0x1e6   : > { %v1516_v46 = vpop.f32.mrf.mxu0  ;;  %v4334_v49 = vsel %vm1897_vm0, %v1894_v18, %v1895_v19 }
 0x1e7   : > { %4765 = vst [vmem:[#allocation30_spill] sm:$0xff] %v4334_v49 }
 0x1e9   : > { %v1096_v6 = vpop.f32.mrf.mxu2 }
 0x1ea   : > { %v1097_v13 = vadd.f32 %v1096_v6, %v1008_v33  ;;  %v1427_v52 = vpop.f32.mrf.mxu3 }
 0x1eb   : > { %v4337_v62 = vadd.f32 %v1516_v46, %v1427_v52  ;;  %v1528_v4 = vpop.f32.mrf.mxu1  ;;  %v4354_v46 = vld [vmem:[%s3664_s11 + $0x40] sm:$0xff] }
 0x1ec   : > { %v1896_v47 = vrot.slane %v1097_v13, 7  ;;  %v4359_v6 = vadd.f32 %v1528_v4, %v3994_v28 }
 0x1ed   : > { %4766 = vst [vmem:[#allocation31_spill] sm:$0xff] %v4337_v62 }
 0x1ee   : > { %v2293_v10 = vpop.f32.mrf.mxu0  ;;  %1567 = vmatmul.bf16.gmra.mxu1 %v4341_v5  ;;  %2154 = vmatmul.bf16.gmra.mxu2 %v4261_v26  ;;  %v1929_v18 = vsel %vm1897_vm0, %v1896_v47, %v4767_v11  ;;  %v4351_v14 = vsel %vm1897_vm0, %v1895_v19, %v1896_v47  ;;  %4769 = vst [vmem:[#allocation33_spill] sm:$0xff] %v4359_v6  ;;  %v4737_v47 = vrot.slane %v4359_v6, 1 }
 0x1ef   : > { %4768 = vst [vmem:[#allocation32_spill] sm:$0xff] %v4351_v14  ;;  %2243 = vmatmul.bf16.gmra.mxu3 %v4354_v46  ;;  %v1930_v12 = vmul.f32 %v3205_v51, %v1929_v18  ;;  %v4367_v18 = vld [vmem:[%s4728_s4] ss:$0 sm:$0xff] }
 0x1f1   : > { %2332 = vmatmul.bf16.gmra.mxu0 %v4341_v5  ;;  %v2115_v33 = vpop.f32.mrf.mxu2 }
 0x1f2   : > { %v2116_v26 = vadd.f32 %v2115_v33, %v1930_v12  ;;  %v2204_v25 = vpop.f32.mrf.mxu3  ;;  %v4373_v12 = vstv %s2538_s20  ;;  %v4770_v33 = vld [vmem:[#allocation3_spill] sm:$0xff] }
 0x1f3   : > { %v1530_v13 = vpop.f32.mrf.mxu1 }
 0x1f4   : > { %v2205_v52 = vadd.f32 %v2204_v25, %v2116_v26  ;;  %v1531_v11 = vadd.f32 %v1530_v13, %v4005_v17 }
 0x1f6   : > { %v2295_v19 = vpop.f32.mrf.mxu0  ;;  %v2294_v63 = vadd.f32 %v2293_v10, %v2205_v52  ;;  %v2374_v51 = vrot.slane %v1531_v11, 1 }
 0x1f8   : > { %v2436_v28 = vsel %vm2405_vm2, %v4737_v47, %v2374_v51 }
 0x1f9   : > { %v2470_v4 = vadd.f32 %v2436_v28, %v2294_v63  ;;  %v2117_v17 = vpop.f32.mrf.mxu2  ;;  %v4380_v28 = vld [vmem:[%s3664_s11 + $0x58] sm:$0xff] }
 0x1fa   : > { %v2118_v26 = vadd.f32 %v2117_v17, %v4770_v33  ;;  %v2206_v10 = vpop.f32.mrf.mxu3 }
 0x1fb   : > { %v2506_v25 = vadd.f32 %v4367_v18, %v2470_v4  ;;  %v1533_v13 = vpop.f32.mrf.mxu1 }
 0x1fc   : > { %v2207_v52 = vadd.f32 %v2206_v10, %v2118_v26  ;;  %v1534_v11 = vadd.f32 %v1533_v13, %v4020_v35  ;;  %v4391_v35 = vld [vmem:[%s3664_s11 + $0x48] sm:$0xff] }
 0x1fd   : > { %vm2539_vm3 = vcmp.ge.f32.partialorder %v2506_v25, 0.0  ;;  %v2572_v6 = vmul.f32 %v4373_v12, %v2506_v25 }
 0x1fe   : > { %v2298_v14 = vpop.f32.mrf.mxu0  ;;  %v2296_v47 = vadd.f32 %v2295_v19, %v2207_v52  ;;  %v2375_v63 = vrot.slane %v1534_v11, 1  ;;  %1572 = vmatmul.bf16.gmra.mxu1 %v4380_v28  ;;  %2159 = vmatmul.bf16.gmra.mxu2 %v4282_v27  ;;  %v1612_v52 = vadd.s32 24, %v4003_v55 }
 0x1ff   : > { %v2604_v4 = vsel %vm2539_vm3, %v2506_v25, %v2572_v6  ;;  %2248 = vmatmul.bf16.gmra.mxu3 %v4391_v35  ;;  %v1613_v6 = vadd.s32 32, %v4003_v55 }
 0x200   : > { %v2636_v19 = vpack.c.bf16 %v2604_v4, %v2604_v4  ;;  %v2435_v17 = vsel %vm2405_vm2, %v2374_v51, %v2375_v63 }
 0x201   : > { %2337 = vmatmul.bf16.gmra.mxu0 %v4380_v28  ;;  %v2471_v33 = vadd.f32 %v2435_v17, %v2296_v47  ;;  %v2120_v27 = vpop.f32.mrf.mxu2  ;;  %v1645_v62 = vand.u32 31, %v1613_v6  ;;  %v4772_v6 = vld [vmem:[#allocation5_spill] sm:$0xff] }
 0x202   : > { %2669 = vst.msk [vmem:[%s4388_s18] sm:$0xf] %vm2668_vm4, %v2636_v19  ;;  %v2121_v26 = vadd.f32 %v2120_v27, %v4025_v61  ;;  %v2209_v10 = vpop.f32.mrf.mxu3  ;;  %v1644_v27 = vand.u32 31, %v1612_v52 }
 0x203   : > { %v2507_v25 = vadd.f32 %v4367_v18, %v2471_v33  ;;  %v1535_v13 = vpop.f32.mrf.mxu1  ;;  %vm1677_vm6 = vcmp.gt.s32.totalorder %v1645_v62, 0 }
 0x204   : > { %v2210_v11 = vadd.f32 %v2209_v10, %v2121_v26  ;;  %v1536_v51 = vadd.f32 %v1535_v13, %v4027_v36  ;;  %v4771_v26 = vld [vmem:[#allocation4_spill] sm:$0xff]  ;;  %vm1772_vm7 = vcmp.lt.s32.totalorder %v1644_v27, 31  ;;  %v4774_v27 = vld [vmem:[#allocation6_spill] sm:$0xff] }
 0x205   : > { %vm2540_vm5 = vcmp.ge.f32.partialorder %v2507_v25, 0.0  ;;  %v2573_v47 = vmul.f32 %v4373_v12, %v2507_v25 }
 0x206   : > { %v2300_v4 = vpop.f32.mrf.mxu0  ;;  %v2299_v17 = vadd.f32 %v2298_v14, %v2210_v11  ;;  %v2376_v19 = vrot.slane %v1536_v51, 1  ;;  %v4773_v51 = vmov 0.0  }
 0x207   : > { %v2605_v61 = vsel %vm2540_vm5, %v2507_v25, %v2573_v47  ;;  %v3206_v47 = vsel %vm1677_vm6, 1.0, %v4773_v51 }
 0x208   : > { %v2637_v49 = vpack.c.bf16 %v2605_v61, %v2605_v61  ;;  %v2434_v33 = vsel %vm2405_vm2, %v2375_v63, %v2376_v19 }
 0x209   : > { %v2472_v9 = vadd.f32 %v2434_v33, %v2299_v17  ;;  %v2122_v39 = vpop.f32.mrf.mxu2  ;;  %v1934_v33 = vmul.f32 %v3206_v47, %v4774_v27  ;;  %v4776_v27 = vld [vmem:[#allocation8_spill] sm:$0xff] }
 0x20a   : > { %2670 = vst.msk [vmem:[%s4388_s18 + $0x4] sm:$0xf] %vm2668_vm4, %v2637_v49  ;;  %v2123_v36 = vadd.f32 %v2122_v39, %v4771_v26  ;;  %v2211_v10 = vpop.f32.mrf.mxu3  ;;  %v3213_v49 = vsel %vm1772_vm7, 1.0, %v4773_v51  ;;  %v4416_v39 = vld [vmem:[%s3664_s11 + $0x60] sm:$0xff] }
 0x20b   : > { %v2508_v13 = vadd.f32 %v4367_v18, %v2472_v9  ;;  %v1538_v14 = vpop.f32.mrf.mxu1 }
 0x20c   : > { %v1539_v25 = vadd.f32 %v1538_v14, %v4772_v6  ;;  %v2212_v11 = vadd.f32 %v2211_v10, %v2123_v36 }
 0x20d   : > { %vm2541_vm8 = vcmp.ge.f32.partialorder %v2508_v13, 0.0  ;;  %v2574_v52 = vmul.f32 %v4373_v12, %v2508_v13 }
 0x20e   : > { %v2303_v63 = vpop.f32.mrf.mxu0  ;;  %v2377_v17 = vrot.slane %v1539_v25, 1  ;;  %1577 = vmatmul.bf16.gmra.mxu1 %v4416_v39  ;;  %2164 = vmatmul.bf16.gmra.mxu2 %v4354_v46  ;;  %v2301_v26 = vadd.f32 %v2300_v4, %v2212_v11 }
 0x20f   : > { %v2606_v9 = vsel %vm2541_vm8, %v2508_v13, %v2574_v52  ;;  %2253 = vmatmul.bf16.gmra.mxu3 %v4341_v5  ;;  %v4775_v52 = vld [vmem:[#allocation7_spill] sm:$0xff] }
 0x210   : > { %v2638_v62 = vpack.c.bf16 %v2606_v9, %v2606_v9  ;;  %v2433_v61 = vsel %vm2405_vm2, %v2376_v19, %v2377_v17 }
 0x211   : > { %2342 = vmatmul.bf16.gmra.mxu0 %v4416_v39  ;;  %v2441_v36 = vmul.f32 %v3213_v49, %v2433_v61  ;;  %v2125_v10 = vpop.f32.mrf.mxu2 }
 0x212   : > { %2671 = vst.msk [vmem:[%s4388_s18 + $0x8] sm:$0xf] %vm2668_vm4, %v2638_v62  ;;  %v2126_v14 = vadd.f32 %v2125_v10, %v1934_v33  ;;  %v2214_v6 = vpop.f32.mrf.mxu3 }
 0x213   : > { %v2473_v25 = vadd.f32 %v2441_v36, %v2301_v26  ;;  %v1540_v46 = vpop.f32.mrf.mxu1 }
 0x214   : > { %v2215_v13 = vadd.f32 %v2214_v6, %v2126_v14  ;;  %v1541_v57 = vadd.f32 %v1540_v46, %v4775_v52  ;;  %v4439_v46 = vld [vmem:[%s3664_s11 + $0x68] sm:$0xff] }
 0x215   : > { %v2509_v9 = vadd.f32 %v4367_v18, %v2473_v25 }
 0x216   : > { %v2305_v19 = vpop.f32.mrf.mxu0  ;;  %v2304_v3 = vadd.f32 %v2303_v63, %v2215_v13  ;;  %v2378_v29 = vrot.slane %v1541_v57, 1  ;;  %v4777_v63 = vld [vmem:[#allocation9_spill] sm:$0xff] }
 0x217   : > { %vm2542_vm9 = vcmp.ge.f32.partialorder %v2509_v9, 0.0  ;;  %v2575_v4 = vmul.f32 %v4373_v12, %v2509_v9 }
 0x218   : > { %v2432_v11 = vsel %vm2405_vm2, %v2377_v17, %v2378_v29 }
 0x219   : > { %v2607_v47 = vsel %vm2542_vm9, %v2509_v9, %v2575_v4  ;;  %v2474_v49 = vadd.f32 %v2432_v11, %v2304_v3  ;;  %v2127_v62 = vpop.f32.mrf.mxu2 }
 0x21a   : > { %v2639_v61 = vpack.c.bf16 %v2607_v47, %v2607_v47  ;;  %v2128_v33 = vadd.f32 %v2127_v62, %v4776_v27  ;;  %v2216_v26 = vpop.f32.mrf.mxu3  ;;  %v1617_v62 = vadd.s32 64, %v4003_v55  ;;  %v1616_v27 = vadd.s32 56, %v4003_v55 }
 0x21b   : > { %v2510_v36 = vadd.f32 %v4367_v18, %v2474_v49  ;;  %v1543_v10 = vpop.f32.mrf.mxu1 }
 0x21c   : > { %2672 = vst.msk [vmem:[%s4388_s18 + $0xc] sm:$0xf] %vm2668_vm4, %v2639_v61  ;;  %v2217_v57 = vadd.f32 %v2216_v26, %v2128_v33  ;;  %v1544_v14 = vadd.f32 %v1543_v10, %v4777_v63  ;;  %v4779_v26 = vld [vmem:[#allocation11_spill] sm:$0xff] }
 0x21d   : > { %vm2543_vm10 = vcmp.ge.f32.partialorder %v2510_v36, 0.0  ;;  %v2576_v17 = vmul.f32 %v4373_v12, %v2510_v36 }
 0x21e   : > { %v2308_v6 = vpop.f32.mrf.mxu0  ;;  %v2306_v25 = vadd.f32 %v2305_v19, %v2217_v57  ;;  %v2379_v3 = vrot.slane %v1544_v14, 1  ;;  %1582 = vmatmul.bf16.gmra.mxu1 %v4439_v46  ;;  %2169 = vmatmul.bf16.gmra.mxu2 %v4391_v35  ;;  %v4778_v19 = vld [vmem:[#allocation10_spill] sm:$0xff]  ;;  %v1649_v14 = vand.u32 31, %v1617_v62 }
 0x21f   : > { %v2608_v13 = vsel %vm2543_vm10, %v2510_v36, %v2576_v17  ;;  %2258 = vmatmul.bf16.gmra.mxu3 %v4380_v28 }
 0x220   : > { %v2640_v52 = vpack.c.bf16 %v2608_v13, %v2608_v13  ;;  %v2431_v9 = vsel %vm2405_vm2, %v2378_v29, %v2379_v3  ;;  %vm1681_vm12 = vcmp.gt.s32.totalorder %v1649_v14, 0 }
 0x221   : > { %2347 = vmatmul.bf16.gmra.mxu0 %v4439_v46  ;;  %v2475_v4 = vadd.f32 %v2431_v9, %v2306_v25  ;;  %v2130_v11 = vpop.f32.mrf.mxu2  ;;  %v1648_v25 = vand.u32 31, %v1616_v27 }
 0x222   : > { %2673 = vst.msk [vmem:[%s4388_s18 + $0x10] sm:$0xf] %vm2668_vm4, %v2640_v52  ;;  %v2131_v47 = vadd.f32 %v2130_v11, %v4778_v19  ;;  %v2219_v49 = vpop.f32.mrf.mxu3  ;;  %v4780_v11 = vld [vmem:[#allocation12_spill] sm:$0xff] }
 0x223   : > { %v2511_v35 = vadd.f32 %v4367_v18, %v2475_v4  ;;  %v1545_v61 = vpop.f32.mrf.mxu1  ;;  %vm1776_vm13 = vcmp.lt.s32.totalorder %v1648_v25, 31 }
 0x224   : > { %v2220_v33 = vadd.f32 %v2219_v49, %v2131_v47  ;;  %v1546_v29 = vadd.f32 %v1545_v61, %v4779_v26  ;;  %v3214_v26 = vsel %vm1776_vm13, 1.0, %v4773_v51 }
 0x225   : > { %vm2544_vm11 = vcmp.ge.f32.partialorder %v2511_v35, 0.0  ;;  %v2577_v36 = vmul.f32 %v4373_v12, %v2511_v35 }
 0x226   : > { %v2310_v10 = vpop.f32.mrf.mxu0  ;;  %v2309_v57 = vadd.f32 %v2308_v6, %v2220_v33  ;;  %v2380_v63 = vrot.slane %v1546_v29, 1  ;;  %v4781_v6 = vld [vmem:[#allocation13_spill] sm:$0xff]  ;;  %v3207_v33 = vsel %vm1681_vm12, 1.0, %v4773_v51 }
 0x227   : > { %v2609_v17 = vsel %vm2544_vm11, %v2511_v35, %v2577_v36 }
 0x228   : > { %v2641_v13 = vpack.c.bf16 %v2609_v17, %v2609_v17  ;;  %v2430_v52 = vsel %vm2405_vm2, %v2379_v3, %v2380_v63  ;;  %v4782_v17 = vld [vmem:[#allocation14_spill] sm:$0xff] }
 0x229   : > { %v2476_v9 = vadd.f32 %v2430_v52, %v2309_v57  ;;  %v2132_v4 = vpop.f32.mrf.mxu2  ;;  %v1938_v25 = vmul.f32 %v3207_v33, %v4782_v17 }
 0x22a   : > { %2674 = vst.msk [vmem:[%s4388_s18 + $0x14] sm:$0xf] %vm2668_vm4, %v2641_v13  ;;  %v2133_v19 = vadd.f32 %v2132_v4, %v4780_v11  ;;  %v2221_v47 = vpop.f32.mrf.mxu3 }
 0x22b   : > { %v2512_v49 = vadd.f32 %v4367_v18, %v2476_v9  ;;  %v1548_v61 = vpop.f32.mrf.mxu1 }
 0x22c   : > { %v1549_v62 = vadd.f32 %v1548_v61, %v4781_v6  ;;  %v2222_v27 = vadd.f32 %v2221_v47, %v2133_v19 }
 0x22d   : > { %vm2545_vm14 = vcmp.ge.f32.partialorder %v2512_v49, 0.0  ;;  %v2578_v35 = vmul.f32 %v4373_v12, %v2512_v49 }
 0x22e   : > { %v2313_v3 = vpop.f32.mrf.mxu0  ;;  %v2381_v29 = vrot.slane %v1549_v62, 1  ;;  %1587 = vmatmul.bf16.gmra.mxu1 %v4085_v59  ;;  %2174 = vmatmul.bf16.gmra.mxu2 %v4341_v5  ;;  %v2311_v13 = vadd.f32 %v2310_v10, %v2222_v27 }
 0x22f   : > { %v2610_v36 = vsel %vm2545_vm14, %v2512_v49, %v2578_v35  ;;  %2263 = vmatmul.bf16.gmra.mxu3 %v4416_v39  ;;  %v4783_v49 = vld [vmem:[#allocation15_spill] sm:$0xff] }
 0x230   : > { %v2642_v57 = vpack.c.bf16 %v2610_v36, %v2610_v36  ;;  %v2429_v14 = vsel %vm2405_vm2, %v2380_v63, %v2381_v29 }
 0x231   : > { %2352 = vmatmul.bf16.gmra.mxu0 %v4085_v59  ;;  %v2445_v52 = vmul.f32 %v3214_v26, %v2429_v14  ;;  %v2135_v9 = vpop.f32.mrf.mxu2 }
 0x232   : > { %2675 = vst.msk [vmem:[%s4388_s18 + $0x18] sm:$0xf] %vm2668_vm4, %v2642_v57  ;;  %v2136_v4 = vadd.f32 %v2135_v9, %v1938_v25  ;;  %v2224_v11 = vpop.f32.mrf.mxu3  ;;  %v4784_v57 = vld [vmem:[#allocation16_spill] sm:$0xff] }
 0x233   : > { %v2477_v19 = vadd.f32 %v2445_v52, %v2311_v13  ;;  %v1550_v5 = vpop.f32.mrf.mxu1 }
 0x234   : > { %v2225_v47 = vadd.f32 %v2224_v11, %v2136_v4  ;;  %v1551_v61 = vadd.f32 %v1550_v5, %v4783_v49 }
 0x235   : > { %v2513_v6 = vadd.f32 %v4367_v18, %v2477_v19 }
 0x236   : > { %v2315_v63 = vpop.f32.mrf.mxu0  ;;  %v2314_v62 = vadd.f32 %v2313_v3, %v2225_v47  ;;  %v2382_v59 = vrot.slane %v1551_v61, 1 }
 0x237   : > { %vm2546_vm15 = vcmp.ge.f32.partialorder %v2513_v6, 0.0  ;;  %v2579_v10 = vmul.f32 %v4373_v12, %v2513_v6 }
 0x238   : > { %v2428_v35 = vsel %vm2405_vm2, %v2381_v29, %v2382_v59 }
 0x239   : > { %v2611_v27 = vsel %vm2546_vm15, %v2513_v6, %v2579_v10  ;;  %v2478_v33 = vadd.f32 %v2428_v35, %v2314_v62  ;;  %v2137_v26 = vpop.f32.mrf.mxu2  ;;  %v1620_v10 = vadd.s32 88, %v4003_v55 }
 0x23a   : > { %v2643_v36 = vpack.c.bf16 %v2611_v27, %v2611_v27  ;;  %v2138_v14 = vadd.f32 %v2137_v26, %v4784_v57  ;;  %v2226_v17 = vpop.f32.mrf.mxu3 }
 0x23b   : > { %v2514_v25 = vadd.f32 %v4367_v18, %v2478_v33  ;;  %v1553_v13 = vpop.f32.mrf.mxu1  ;;  %v1652_v57 = vand.u32 31, %v1620_v10 }
 0x23c   : > { %2676 = vst.msk [vmem:[%s4388_s18 + $0x1c] sm:$0xf] %vm2668_vm4, %v2643_v36  ;;  %v2227_v3 = vadd.f32 %v2226_v17, %v2138_v14  ;;  %v1554_v52 = vadd.f32 %v1553_v13, %v4138_v60 }
 0x23d   : > { %vm2547_vm0 = vcmp.ge.f32.partialorder %v2514_v25, 0.0  ;;  %v2580_v9 = vmul.f32 %v4373_v12, %v2514_v25  ;;  %vm1780_vm5 = vcmp.lt.s32.totalorder %v1652_v57, 31 }
 0x23e   : > { %v2318_v29 = vpop.f32.mrf.mxu0  ;;  %v2316_v4 = vadd.f32 %v2315_v63, %v2227_v3  ;;  %v2383_v11 = vrot.slane %v1554_v52, 1  ;;  %1592 = vmatmul.bf16.gmra.mxu1 %v4125_v54  ;;  %2179 = vmatmul.bf16.gmra.mxu2 %v4380_v28  ;;  %v1621_v63 = vadd.s32 96, %v4003_v55 }
 0x23f   : > { %v2612_v19 = vsel %vm2547_vm0, %v2514_v25, %v2580_v9  ;;  %2268 = vmatmul.bf16.gmra.mxu3 %v4439_v46 }
 0x240   : > { %v2644_v5 = vpack.c.bf16 %v2612_v19, %v2612_v19  ;;  %v2427_v47 = vsel %vm2405_vm2, %v2382_v59, %v2383_v11  ;;  %v1653_v36 = vand.u32 31, %v1621_v63 }
 0x241   : > { %2357 = vmatmul.bf16.gmra.mxu0 %v4125_v54  ;;  %v2479_v60 = vadd.f32 %v2427_v47, %v2316_v4  ;;  %v2140_v49 = vpop.f32.mrf.mxu2  ;;  %v3215_v47 = vsel %vm1780_vm5, 1.0, %v4773_v51 }
 0x242   : > { %2677 = vst.msk [vmem:[%s4388_s18 + $0x20] sm:$0xf] %vm2668_vm4, %v2644_v5  ;;  %v2141_v61 = vadd.f32 %v2140_v49, %v4142_v34  ;;  %v2229_v6 = vpop.f32.mrf.mxu3  ;;  %vm1685_vm3 = vcmp.gt.s32.totalorder %v1653_v36, 0 }
 0x243   : > { %v2515_v28 = vadd.f32 %v4367_v18, %v2479_v60  ;;  %v1555_v62 = vpop.f32.mrf.mxu1  ;;  %v3208_v5 = vsel %vm1685_vm3, 1.0, %v4773_v51  ;;  %v4785_v60 = vld [vmem:[#allocation17_spill] sm:$0xff] }
 0x244   : > { %v2230_v35 = vadd.f32 %v2229_v6, %v2141_v61  ;;  %v1556_v59 = vadd.f32 %v1555_v62, %v4148_v50  ;;  %v3501_v61 = vld [vmem:[%s3664_s11 + $0x70] sm:$0xff]  ;;  %v1942_v63 = vmul.f32 %v3208_v5, %v4163_v23 }
 0x245   : > { %vm2548_vm1 = vcmp.ge.f32.partialorder %v2515_v28, 0.0  ;;  %v2581_v54 = vmul.f32 %v4373_v12, %v2515_v28 }
 0x246   : > { %v2320_v27 = vpop.f32.mrf.mxu0  ;;  %v2319_v33 = vadd.f32 %v2318_v29, %v2230_v35  ;;  %v2384_v26 = vrot.slane %v1556_v59, 1 }
 0x247   : > { %v2613_v34 = vsel %vm2548_vm1, %v2515_v28, %v2581_v54 }
 0x248   : > { %v2645_v14 = vpack.c.bf16 %v2613_v34, %v2613_v34  ;;  %v2426_v17 = vsel %vm2405_vm2, %v2383_v11, %v2384_v26 }
 0x249   : > { %v2480_v25 = vadd.f32 %v2426_v17, %v2319_v33  ;;  %v2142_v13 = vpop.f32.mrf.mxu2 }
 0x24a   : > { %2678 = vst.msk [vmem:[%s4388_s18 + $0x24] sm:$0xf] %vm2668_vm4, %v2645_v14  ;;  %v2143_v3 = vadd.f32 %v2142_v13, %v4154_v44  ;;  %v2231_v50 = vpop.f32.mrf.mxu3 }
 0x24b   : > { %v2516_v52 = vadd.f32 %v4367_v18, %v2480_v25  ;;  %v1558_v9 = vpop.f32.mrf.mxu1 }
 0x24c   : > { %v1559_v29 = vadd.f32 %v1558_v9, %v4159_v40  ;;  %v2232_v19 = vadd.f32 %v2231_v50, %v2143_v3 }
 0x24d   : > { %vm2549_vm6 = vcmp.ge.f32.partialorder %v2516_v52, 0.0  ;;  %v2582_v4 = vmul.f32 %v4373_v12, %v2516_v52 }
 0x24e   : > { %v2323_v11 = vpop.f32.mrf.mxu0  ;;  %v2385_v44 = vrot.slane %v1559_v29, 1  ;;  %1597 = vmatmul.bf16.gmra.mxu1 %v4785_v60  ;;  %2184 = vmatmul.bf16.gmra.mxu2 %v4416_v39  ;;  %v2321_v28 = vadd.f32 %v2320_v27, %v2232_v19 }
 0x24f   : > { %v2614_v49 = vsel %vm2549_vm6, %v2516_v52, %v2582_v4  ;;  %2273 = vmatmul.bf16.gmra.mxu3 %v3501_v61 }
 0x250   : > { %v2646_v6 = vpack.c.bf16 %v2614_v49, %v2614_v49  ;;  %v2425_v40 = vsel %vm2405_vm2, %v2384_v26, %v2385_v44 }
 0x251   : > { %2362 = vmatmul.bf16.gmra.mxu0 %v4785_v60  ;;  %v2449_v62 = vmul.f32 %v3215_v47, %v2425_v40  ;;  %v2145_v10 = vpop.f32.mrf.mxu2 }
 0x252   : > { %2679 = vst.msk [vmem:[%s4388_s18 + $0x28] sm:$0xf] %vm2668_vm4, %v2646_v6  ;;  %v2146_v35 = vadd.f32 %v2145_v10, %v1942_v63  ;;  %v2234_v59 = vpop.f32.mrf.mxu3  ;;  %v1625_v63 = vadd.s32 128, %v4003_v55 }
 0x253   : > { %v2481_v54 = vadd.f32 %v2449_v62, %v2321_v28  ;;  %v1560_v39 = vpop.f32.mrf.mxu1  ;;  %v1624_v62 = vadd.s32 120, %v4003_v55 }
 0x254   : > { %v2235_v33 = vadd.f32 %v2234_v59, %v2146_v35  ;;  %v1561_v36 = vadd.f32 %v1560_v39, %v4168_v41 }
 0x255   : > { %v2517_v34 = vadd.f32 %v4367_v18, %v2481_v54 }
 0x256   : > { %v2325_v26 = vpop.f32.mrf.mxu0  ;;  %v2324_v57 = vadd.f32 %v2323_v11, %v2235_v33  ;;  %v2386_v14 = vrot.slane %v1561_v36, 1  ;;  %v1657_v33 = vand.u32 31, %v1625_v63  ;;  %v1656_v36 = vand.u32 31, %v1624_v62 }
 0x257   : > { %vm2550_vm7 = vcmp.ge.f32.partialorder %v2517_v34, 0.0  ;;  %v2583_v23 = vmul.f32 %v4373_v12, %v2517_v34 }
 0x258   : > { %v2424_v27 = vsel %vm2405_vm2, %v2385_v44, %v2386_v14  ;;  %v3502_v44 = vld [vmem:[%s3664_s11 + $0x78] sm:$0xff]  ;;  %vm1689_vm10 = vcmp.gt.s32.totalorder %v1657_v33, 0  ;;  %vm1784_vm11 = vcmp.lt.s32.totalorder %v1656_v36, 31 }
 0x259   : > { %v2615_v17 = vsel %vm2550_vm7, %v2517_v34, %v2583_v23  ;;  %v2482_v25 = vadd.f32 %v2424_v27, %v2324_v57  ;;  %v2147_v13 = vpop.f32.mrf.mxu2 }
 0x25a   : > { %v2647_v3 = vpack.c.bf16 %v2615_v17, %v2615_v17  ;;  %v2148_v50 = vadd.f32 %v2147_v13, %v4174_v21  ;;  %v2236_v41 = vpop.f32.mrf.mxu3 }
 0x25b   : > { %v2518_v52 = vadd.f32 %v4367_v18, %v2482_v25  ;;  %v1563_v9 = vpop.f32.mrf.mxu1 }
 0x25c   : > { %2680 = vst.msk [vmem:[%s4388_s18 + $0x2c] sm:$0xf] %vm2668_vm4, %v2647_v3  ;;  %v2237_v29 = vadd.f32 %v2236_v41, %v2148_v50  ;;  %v1564_v4 = vadd.f32 %v1563_v9, %v4179_v1  ;;  %v3209_v41 = vsel %vm1689_vm10, 1.0, %v4773_v51 }
 0x25d   : > { %vm2551_vm8 = vcmp.ge.f32.partialorder %v2518_v52, 0.0  ;;  %v2584_v19 = vmul.f32 %v4373_v12, %v2518_v52 }
 0x25e   : > { %v2328_v11 = vpop.f32.mrf.mxu0  ;;  %v2326_v5 = vadd.f32 %v2325_v26, %v2237_v29  ;;  %v2387_v47 = vrot.slane %v1564_v4, 1  ;;  %1602 = vmatmul.bf16.gmra.mxu1 %v4166_v24  ;;  %2189 = vmatmul.bf16.gmra.mxu2 %v4439_v46 }
 0x25f   : > { %v2616_v21 = vsel %vm2551_vm8, %v2518_v52, %v2584_v19  ;;  %2278 = vmatmul.bf16.gmra.mxu3 %v3502_v44  ;;  %v3216_v52 = vsel %vm1784_vm11, 1.0, %v4773_v51  ;;  %v1946_v19 = vmul.f32 %v3209_v41, %v4201_v30  ;;  %v1628_v41 = vadd.s32 152, %v4003_v55 }
 0x260   : > { %v2648_v60 = vpack.c.bf16 %v2616_v21, %v2616_v21  ;;  %v2423_v49 = vsel %vm2405_vm2, %v2386_v14, %v2387_v47 }
 0x261   : > { %2367 = vmatmul.bf16.gmra.mxu0 %v4166_v24  ;;  %v2483_v1 = vadd.f32 %v2423_v49, %v2326_v5  ;;  %v2150_v61 = vpop.f32.mrf.mxu2 }
 0x262   : > { %2681 = vst.msk [vmem:[%s4388_s18 + $0x30] sm:$0xf] %vm2668_vm4, %v2648_v60  ;;  %v2151_v6 = vadd.f32 %v2150_v61, %v4183_v16  ;;  %v2239_v40 = vpop.f32.mrf.mxu3 }
 0x263   : > { %v2519_v46 = vadd.f32 %v4367_v18, %v2483_v1  ;;  %v1565_v28 = vpop.f32.mrf.mxu1 }
 0x264   : > { %v2240_v10 = vadd.f32 %v2239_v40, %v2151_v6  ;;  %v1566_v35 = vadd.f32 %v1565_v28, %v4186_v0 }
 0x265   : > { %vm2552_vm9 = vcmp.ge.f32.partialorder %v2519_v46, 0.0  ;;  %v2585_v24 = vmul.f32 %v4373_v12, %v2519_v46 }
 0x266   : > { %v2330_v59 = vpop.f32.mrf.mxu0  ;;  %v2329_v54 = vadd.f32 %v2328_v11, %v2240_v10  ;;  %v2388_v39 = vrot.slane %v1566_v35, 1 }
 0x267   : > { %v2617_v16 = vsel %vm2552_vm9, %v2519_v46, %v2585_v24  ;;  %v4786_v24 = vld [vmem:[#allocation18_spill] sm:$0xff] }
 0x268   : > { %v2649_v34 = vpack.c.bf16 %v2617_v16, %v2617_v16  ;;  %v2422_v26 = vsel %vm2405_vm2, %v2387_v47, %v2388_v39 }
 0x269   : > { %v2484_v57 = vadd.f32 %v2422_v26, %v2329_v54  ;;  %v2152_v14 = vpop.f32.mrf.mxu2 }
 0x26a   : > { %2682 = vst.msk [vmem:[%s4388_s18 + $0x34] sm:$0xf] %vm2668_vm4, %v2649_v34  ;;  %v2153_v23 = vadd.f32 %v2152_v14, %v4192_v20  ;;  %v2241_v0 = vpop.f32.mrf.mxu3 }
 0x26b   : > { %v2520_v27 = vadd.f32 %v4367_v18, %v2484_v57  ;;  %v1568_v17 = vpop.f32.mrf.mxu1 }
 0x26c   : > { %v1569_v25 = vadd.f32 %v1568_v17, %v4197_v22  ;;  %v2242_v3 = vadd.f32 %v2241_v0, %v2153_v23 }
 0x26d   : > { %vm2553_vm12 = vcmp.ge.f32.partialorder %v2520_v27, 0.0  ;;  %v2586_v13 = vmul.f32 %v4373_v12, %v2520_v27 }
 0x26e   : > { %v2333_v50 = vpop.f32.mrf.mxu0  ;;  %v2389_v9 = vrot.slane %v1569_v25, 1  ;;  %v2331_v11 = vadd.f32 %v2330_v59, %v2242_v3 }
 0x26f   : > { %v2618_v20 = vsel %vm2553_vm12, %v2520_v27, %v2586_v13 }
 0x270   : > { %v2650_v29 = vpack.c.bf16 %v2618_v20, %v2618_v20  ;;  %v2421_v4 = vsel %vm2405_vm2, %v2388_v39, %v2389_v9 }
 0x271   : > { %v2453_v5 = vmul.f32 %v3216_v52, %v2421_v4  ;;  %v2155_v22 = vpop.f32.mrf.mxu2 }
 0x272   : > { %2683 = vst.msk [vmem:[%s4388_s18 + $0x38] sm:$0xf] %vm2668_vm4, %v2650_v29  ;;  %v2156_v47 = vadd.f32 %v2155_v22, %v1946_v19  ;;  %v2244_v21 = vpop.f32.mrf.mxu3 }
 0x273   : > { %v2485_v44 = vadd.f32 %v2453_v5, %v2331_v11  ;;  %v1570_v60 = vpop.f32.mrf.mxu1  ;;  %v1660_v5 = vand.u32 31, %v1628_v41 }
 0x274   : > { %v2245_v49 = vadd.f32 %v2244_v21, %v2156_v47  ;;  %v1571_v1 = vadd.f32 %v1570_v60, %v4204_v32 }
 0x275   : > { %v2521_v61 = vadd.f32 %v4367_v18, %v2485_v44  ;;  %vm1788_vm1 = vcmp.lt.s32.totalorder %v1660_v5, 31  ;;  %v4787_v5 = vld [vmem:[#allocation19_spill] sm:$0xff] }
 0x276   : > { %v2335_v6 = vpop.f32.mrf.mxu0  ;;  %v2334_v40 = vadd.f32 %v2333_v50, %v2245_v49  ;;  %v2390_v63 = vrot.slane %v1571_v1, 1 }
 0x277   : > { %vm2554_vm13 = vcmp.ge.f32.partialorder %v2521_v61, 0.0  ;;  %v2587_v30 = vmul.f32 %v4373_v12, %v2521_v61 }
 0x278   : > { %v2420_v46 = vsel %vm2405_vm2, %v2389_v9, %v2390_v63 }
 0x279   : > { %v2619_v28 = vsel %vm2554_vm13, %v2521_v61, %v2587_v30  ;;  %v2486_v62 = vadd.f32 %v2420_v46, %v2334_v40  ;;  %v2157_v10 = vpop.f32.mrf.mxu2  ;;  %v3217_v46 = vsel %vm1788_vm1, 1.0, %v4773_v51 }
 0x27a   : > { %v2651_v35 = vpack.c.bf16 %v2619_v28, %v2619_v28  ;;  %v2158_v59 = vadd.f32 %v2157_v10, %v4786_v24  ;;  %v2246_v54 = vpop.f32.mrf.mxu3 }
 0x27b   : > { %v2522_v32 = vadd.f32 %v4367_v18, %v2486_v62  ;;  %v1573_v39 = vpop.f32.mrf.mxu1 }
 0x27c   : > { %2684 = vst.msk [vmem:[%s4388_s18 + $0x3c] sm:$0xf] %vm2668_vm4, %v2651_v35  ;;  %v2247_v33 = vadd.f32 %v2246_v54, %v2158_v59  ;;  %v1574_v16 = vadd.f32 %v1573_v39, %v4215_v37  ;;  %v1629_v37 = vadd.s32 160, %v4003_v55 }
 0x27d   : > { %vm2555_vm14 = vcmp.ge.f32.partialorder %v2522_v32, 0.0  ;;  %v2588_v36 = vmul.f32 %v4373_v12, %v2522_v32 }
 0x27e   : > { %v2338_v34 = vpop.f32.mrf.mxu0  ;;  %v2336_v26 = vadd.f32 %v2335_v6, %v2247_v33  ;;  %v2391_v57 = vrot.slane %v1574_v16, 1  ;;  %v1661_v11 = vand.u32 31, %v1629_v37 }
 0x27f   : > { %v2620_v14 = vsel %vm2555_vm14, %v2522_v32, %v2588_v36 }
 0x280   : > { %v2652_v23 = vpack.c.bf16 %v2620_v14, %v2620_v14  ;;  %v2419_v0 = vsel %vm2405_vm2, %v2390_v63, %v2391_v57  ;;  %vm1693_vm0 = vcmp.gt.s32.totalorder %v1661_v11, 0 }
 0x281   : > { %v2487_v27 = vadd.f32 %v2419_v0, %v2336_v26  ;;  %v2160_v17 = vpop.f32.mrf.mxu2  ;;  %v3210_v30 = vsel %vm1693_vm0, 1.0, %v4773_v51 }
 0x282   : > { %2685 = vst.msk [vmem:[%s4388_s18 + $0x40] sm:$0xf] %vm2668_vm4, %v2652_v23  ;;  %v2161_v25 = vadd.f32 %v2160_v17, %v4219_v53  ;;  %v2249_v13 = vpop.f32.mrf.mxu3  ;;  %v1950_v35 = vmul.f32 %v3210_v30, %v4237_v7 }
 0x283   : > { %v2523_v3 = vadd.f32 %v4367_v18, %v2487_v27  ;;  %v1575_v50 = vpop.f32.mrf.mxu1 }
 0x284   : > { %v2250_v52 = vadd.f32 %v2249_v13, %v2161_v25  ;;  %v1576_v9 = vadd.f32 %v1575_v50, %v4222_v42 }
 0x285   : > { %vm2556_vm15 = vcmp.ge.f32.partialorder %v2523_v3, 0.0  ;;  %v2589_v20 = vmul.f32 %v4373_v12, %v2523_v3 }
 0x286   : > { %v2340_v29 = vpop.f32.mrf.mxu0  ;;  %v2339_v4 = vadd.f32 %v2338_v34, %v2250_v52  ;;  %v2392_v19 = vrot.slane %v1576_v9, 1 }
 0x287   : > { %v2621_v53 = vsel %vm2556_vm15, %v2523_v3, %v2589_v20 }
 0x288   : > { %v2653_v22 = vpack.c.bf16 %v2621_v53, %v2621_v53  ;;  %v2418_v47 = vsel %vm2405_vm2, %v2391_v57, %v2392_v19 }
 0x289   : > { %v2488_v21 = vadd.f32 %v2418_v47, %v2339_v4  ;;  %v2162_v44 = vpop.f32.mrf.mxu2 }
 0x28a   : > { %2686 = vst.msk [vmem:[%s4388_s18 + $0x44] sm:$0xf] %vm2668_vm4, %v2653_v22  ;;  %v2163_v60 = vadd.f32 %v2162_v44, %v4228_v8  ;;  %v2251_v42 = vpop.f32.mrf.mxu3 }
 0x28b   : > { %v2524_v49 = vadd.f32 %v4367_v18, %v2488_v21  ;;  %v1578_v1 = vpop.f32.mrf.mxu1 }
 0x28c   : > { %v1579_v61 = vadd.f32 %v1578_v1, %v4233_v58  ;;  %v2252_v40 = vadd.f32 %v2251_v42, %v2163_v60  ;;  %v1632_v60 = vadd.s32 184, %v4003_v55 }
 0x28d   : > { %vm2557_vm3 = vcmp.ge.f32.partialorder %v2524_v49, 0.0  ;;  %v2590_v6 = vmul.f32 %v4373_v12, %v2524_v49 }
 0x28e   : > { %v2343_v63 = vpop.f32.mrf.mxu0  ;;  %v2393_v28 = vrot.slane %v1579_v61, 1  ;;  %v2341_v24 = vadd.f32 %v2340_v29, %v2252_v40 }
 0x28f   : > { %v2622_v8 = vsel %vm2557_vm3, %v2524_v49, %v2590_v6  ;;  %v4788_v49 = vld [vmem:[#allocation20_spill] sm:$0xff] }
 0x290   : > { %v2654_v62 = vpack.c.bf16 %v2622_v8, %v2622_v8  ;;  %v2417_v10 = vsel %vm2405_vm2, %v2392_v19, %v2393_v28 }
 0x291   : > { %v2457_v59 = vmul.f32 %v3217_v46, %v2417_v10  ;;  %v2165_v58 = vpop.f32.mrf.mxu2 }
 0x292   : > { %2687 = vst.msk [vmem:[%s4388_s18 + $0x48] sm:$0xf] %vm2668_vm4, %v2654_v62  ;;  %v2166_v54 = vadd.f32 %v2165_v58, %v1950_v35  ;;  %v2254_v32 = vpop.f32.mrf.mxu3 }
 0x293   : > { %v2489_v39 = vadd.f32 %v2457_v59, %v2341_v24  ;;  %v1580_v33 = vpop.f32.mrf.mxu1  ;;  %v4789_v24 = vld [vmem:[#allocation21_spill] sm:$0xff] }
 0x294   : > { %v2255_v16 = vadd.f32 %v2254_v32, %v2166_v54  ;;  %v1581_v36 = vadd.f32 %v1580_v33, %v4240_v56 }
 0x295   : > { %v2525_v34 = vadd.f32 %v4367_v18, %v2489_v39 }
 0x296   : > { %v2345_v26 = vpop.f32.mrf.mxu0  ;;  %v2344_v57 = vadd.f32 %v2343_v63, %v2255_v16  ;;  %v2394_v14 = vrot.slane %v1581_v36, 1 }
 0x297   : > { %vm2558_vm5 = vcmp.ge.f32.partialorder %v2525_v34, 0.0  ;;  %v2591_v7 = vmul.f32 %v4373_v12, %v2525_v34 }
 0x298   : > { %v2416_v23 = vsel %vm2405_vm2, %v2393_v28, %v2394_v14  ;;  %v1664_v28 = vand.u32 31, %v1632_v60 }
 0x299   : > { %v2623_v0 = vsel %vm2558_vm5, %v2525_v34, %v2591_v7  ;;  %v2490_v27 = vadd.f32 %v2416_v23, %v2344_v57  ;;  %v2167_v17 = vpop.f32.mrf.mxu2 }
 0x29a   : > { %v2655_v25 = vpack.c.bf16 %v2623_v0, %v2623_v0  ;;  %v2168_v13 = vadd.f32 %v2167_v17, %v4246_v38  ;;  %v2256_v37 = vpop.f32.mrf.mxu3  ;;  %vm1792_vm9 = vcmp.lt.s32.totalorder %v1664_v28, 31  ;;  %v4790_v0 = vld [vmem:[#allocation22_spill] sm:$0xff] }
 0x29b   : > { %v2526_v56 = vadd.f32 %v4367_v18, %v2490_v27  ;;  %v1583_v3 = vpop.f32.mrf.mxu1 }
 0x29c   : > { %2688 = vst.msk [vmem:[%s4388_s18 + $0x4c] sm:$0xf] %vm2668_vm4, %v2655_v25  ;;  %v2257_v50 = vadd.f32 %v2256_v37, %v2168_v13  ;;  %v1584_v41 = vadd.f32 %v1583_v3, %v4251_v31  ;;  %v1633_v31 = vadd.s32 192, %v4003_v55 }
 0x29d   : > { %vm2559_vm6 = vcmp.ge.f32.partialorder %v2526_v56, 0.0  ;;  %v2592_v52 = vmul.f32 %v4373_v12, %v2526_v56 }
 0x29e   : > { %v2348_v9 = vpop.f32.mrf.mxu0  ;;  %v2346_v20 = vadd.f32 %v2345_v26, %v2257_v50  ;;  %v2395_v29 = vrot.slane %v1584_v41, 1  ;;  %v1665_v30 = vand.u32 31, %v1633_v31  ;;  %v3218_v26 = vsel %vm1792_vm9, 1.0, %v4773_v51  ;;  %v4791_v41 = vld [vmem:[#allocation23_spill] sm:$0xff] }
 0x29f   : > { %v2624_v4 = vsel %vm2559_vm6, %v2526_v56, %v2592_v52 }
 0x2a0   : > { %v2656_v19 = vpack.c.bf16 %v2624_v4, %v2624_v4  ;;  %v2415_v38 = vsel %vm2405_vm2, %v2394_v14, %v2395_v29  ;;  %vm1697_vm8 = vcmp.gt.s32.totalorder %v1665_v30, 0 }
 0x2a1   : > { %v2491_v11 = vadd.f32 %v2415_v38, %v2346_v20  ;;  %v2170_v53 = vpop.f32.mrf.mxu2  ;;  %v3211_v34 = vsel %vm1697_vm8, 1.0, %v4773_v51 }
 0x2a2   : > { %2689 = vst.msk [vmem:[%s4388_s18 + $0x50] sm:$0xf] %vm2668_vm4, %v2656_v19  ;;  %v2171_v22 = vadd.f32 %v2170_v53, %v4787_v5  ;;  %v2259_v47 = vpop.f32.mrf.mxu3  ;;  %v1954_v27 = vmul.f32 %v3211_v34, %v4790_v0 }
 0x2a3   : > { %v2527_v21 = vadd.f32 %v4367_v18, %v2491_v11  ;;  %v1585_v44 = vpop.f32.mrf.mxu1 }
 0x2a4   : > { %v2260_v42 = vadd.f32 %v2259_v47, %v2171_v22  ;;  %v1586_v1 = vadd.f32 %v1585_v44, %v4788_v49  ;;  %v4792_v47 = vld [vmem:[#allocation24_spill] sm:$0xff] }
 0x2a5   : > { %vm2560_vm7 = vcmp.ge.f32.partialorder %v2527_v21, 0.0  ;;  %v2593_v61 = vmul.f32 %v4373_v12, %v2527_v21 }
 0x2a6   : > { %v2350_v6 = vpop.f32.mrf.mxu0  ;;  %v2349_v40 = vadd.f32 %v2348_v9, %v2260_v42  ;;  %v2396_v63 = vrot.slane %v1586_v1, 1 }
 0x2a7   : > { %v2625_v46 = vsel %vm2560_vm7, %v2527_v21, %v2593_v61 }
 0x2a8   : > { %v2657_v8 = vpack.c.bf16 %v2625_v46, %v2625_v46  ;;  %v2414_v62 = vsel %vm2405_vm2, %v2395_v29, %v2396_v63 }
 0x2a9   : > { %v2492_v10 = vadd.f32 %v2414_v62, %v2349_v40  ;;  %v2172_v35 = vpop.f32.mrf.mxu2 }
 0x2aa   : > { %2690 = vst.msk [vmem:[%s4388_s18 + $0x54] sm:$0xf] %vm2668_vm4, %v2657_v8  ;;  %v2173_v59 = vadd.f32 %v2172_v35, %v4789_v24  ;;  %v2261_v58 = vpop.f32.mrf.mxu3 }
 0x2ab   : > { %v2528_v54 = vadd.f32 %v4367_v18, %v2492_v10  ;;  %v1588_v32 = vpop.f32.mrf.mxu1  ;;  %v4650_v10 = vld [vmem:[%s4728_s4] ss:$0 sm:$0xff] }
 0x2ac   : > { %v1589_v39 = vadd.f32 %v1588_v32, %v4272_v15  ;;  %v2262_v16 = vadd.f32 %v2261_v58, %v2173_v59  ;;  %v1636_v59 = vadd.s32 216, %v4003_v55 }
 0x2ad   : > { %vm2561_vm10 = vcmp.ge.f32.partialorder %v2528_v54, 0.0  ;;  %v2594_v33 = vmul.f32 %v4373_v12, %v2528_v54 }
 0x2ae   : > { %v2353_v36 = vpop.f32.mrf.mxu0  ;;  %v2397_v57 = vrot.slane %v1589_v39, 1  ;;  %v2351_v17 = vadd.f32 %v2350_v6, %v2262_v16  ;;  %v1668_v34 = vand.u32 31, %v1636_v59 }
 0x2af   : > { %v2626_v14 = vsel %vm2561_vm10, %v2528_v54, %v2594_v33 }
 0x2b0   : > { %v2658_v7 = vpack.c.bf16 %v2626_v14, %v2626_v14  ;;  %v2413_v23 = vsel %vm2405_vm2, %v2396_v63, %v2397_v57  ;;  %vm1796_vm15 = vcmp.lt.s32.totalorder %v1668_v34, 31 }
 0x2b1   : > { %v2461_v25 = vmul.f32 %v3218_v26, %v2413_v23  ;;  %v2175_v15 = vpop.f32.mrf.mxu2 }
 0x2b2   : > { %2691 = vst.msk [vmem:[%s4388_s18 + $0x58] sm:$0xf] %vm2668_vm4, %v2658_v7  ;;  %v2176_v13 = vadd.f32 %v2175_v15, %v1954_v27  ;;  %v2264_v37 = vpop.f32.mrf.mxu3 }
 0x2b3   : > { %v2493_v56 = vadd.f32 %v2461_v25, %v2351_v17  ;;  %v1590_v3 = vpop.f32.mrf.mxu1  ;;  %v4793_v17 = vld [vmem:[#allocation25_spill] sm:$0xff] }
 0x2b4   : > { %v2265_v50 = vadd.f32 %v2264_v37, %v2176_v13  ;;  %v1591_v52 = vadd.f32 %v1590_v3, %v4791_v41 }
 0x2b5   : > { %v2529_v9 = vadd.f32 %v4367_v18, %v2493_v56  ;;  %v3219_v56 = vsel %vm1796_vm15, 1.0, %v4773_v51 }
 0x2b6   : > { %v2355_v20 = vpop.f32.mrf.mxu0  ;;  %v2354_v29 = vadd.f32 %v2353_v36, %v2265_v50  ;;  %v2398_v4 = vrot.slane %v1591_v52, 1 }
 0x2b7   : > { %vm2562_vm11 = vcmp.ge.f32.partialorder %v2529_v9, 0.0  ;;  %v2595_v19 = vmul.f32 %v4373_v12, %v2529_v9 }
 0x2b8   : > { %v2412_v38 = vsel %vm2405_vm2, %v2397_v57, %v2398_v4 }
 0x2b9   : > { %v2627_v11 = vsel %vm2562_vm11, %v2529_v9, %v2595_v19  ;;  %v2494_v53 = vadd.f32 %v2412_v38, %v2354_v29  ;;  %v2177_v5 = vpop.f32.mrf.mxu2  ;;  %v4794_v9 = vld [vmem:[#allocation26_spill] sm:$0xff] }
 0x2ba   : > { %v2659_v22 = vpack.c.bf16 %v2627_v11, %v2627_v11  ;;  %v2178_v31 = vadd.f32 %v2177_v5, %v4792_v47  ;;  %v2266_v21 = vpop.f32.mrf.mxu3  ;;  %v4795_v47 = vld [vmem:[#allocation27_spill] sm:$0xff] }
 0x2bb   : > { %v2530_v44 = vadd.f32 %v4367_v18, %v2494_v53  ;;  %v1593_v60 = vpop.f32.mrf.mxu1 }
 0x2bc   : > { %2692 = vst.msk [vmem:[%s4388_s18 + $0x5c] sm:$0xf] %vm2668_vm4, %v2659_v22  ;;  %v2267_v42 = vadd.f32 %v2266_v21, %v2178_v31  ;;  %v1594_v49 = vadd.f32 %v1593_v60, %v4293_v2  ;;  %v1637_v2 = vadd.s32 224, %v4003_v55 }
 0x2bd   : > { %vm2563_vm12 = vcmp.ge.f32.partialorder %v2530_v44, 0.0  ;;  %v2596_v1 = vmul.f32 %v4373_v12, %v2530_v44 }
 0x2be   : > { %v2358_v61 = vpop.f32.mrf.mxu0  ;;  %v2356_v6 = vadd.f32 %v2355_v20, %v2267_v42  ;;  %v2399_v40 = vrot.slane %v1594_v49, 1  ;;  %v1669_v16 = vand.u32 31, %v1637_v2  ;;  %v4797_v2 = vld [vmem:[#allocation29_spill] sm:$0xff] }
 0x2bf   : > { %v2628_v63 = vsel %vm2563_vm12, %v2530_v44, %v2596_v1 }
 0x2c0   : > { %v2660_v30 = vpack.c.bf16 %v2628_v63, %v2628_v63  ;;  %v2411_v46 = vsel %vm2405_vm2, %v2398_v4, %v2399_v40  ;;  %vm1701_vm14 = vcmp.gt.s32.totalorder %v1669_v16, 0 }
 0x2c1   : > { %v2495_v28 = vadd.f32 %v2411_v46, %v2356_v6  ;;  %v2180_v8 = vpop.f32.mrf.mxu2  ;;  %v3212_v37 = vsel %vm1701_vm14, 1.0, %v4773_v51 }
 0x2c2   : > { %2693 = vst.msk [vmem:[%s4388_s18 + $0x60] sm:$0xf] %vm2668_vm4, %v2660_v30  ;;  %v2181_v18 = vadd.f32 %v2180_v8, %v4297_v45  ;;  %v2269_v62 = vpop.f32.mrf.mxu3  ;;  %v1958_v20 = vmul.f32 %v3212_v37, %v4794_v9  ;;  %v4796_v30 = vld [vmem:[#allocation28_spill] sm:$0xff] }
 0x2c3   : > { %v2531_v35 = vadd.f32 %v4650_v10, %v2495_v28  ;;  %v1595_v24 = vpop.f32.mrf.mxu1 }
 0x2c4   : > { %v2270_v58 = vadd.f32 %v2269_v62, %v2181_v18  ;;  %v1596_v54 = vadd.f32 %v1595_v24, %v4300_v43 }
 0x2c5   : > { %vm2564_vm13 = vcmp.ge.f32.partialorder %v2531_v35, 0.0  ;;  %v2597_v45 = vmul.f32 %v4373_v12, %v2531_v35 }
 0x2c6   : > { %v2360_v32 = vpop.f32.mrf.mxu0  ;;  %v2359_v39 = vadd.f32 %v2358_v61, %v2270_v58  ;;  %v2400_v33 = vrot.slane %v1596_v54, 1 }
 0x2c7   : > { %v2629_v36 = vsel %vm2564_vm13, %v2531_v35, %v2597_v45 }
 0x2c8   : > { %v2661_v26 = vpack.c.bf16 %v2629_v36, %v2629_v36  ;;  %v2410_v57 = vsel %vm2405_vm2, %v2399_v40, %v2400_v33  ;;  %v4798_v36 = vld [vmem:[#allocation30_spill] sm:$0xff] }
 0x2c9   : > { %v2496_v14 = vadd.f32 %v2410_v57, %v2359_v39  ;;  %v2182_v7 = vpop.f32.mrf.mxu2  ;;  %v1640_v39 = vadd.s32 248, %v4003_v55 }
 0x2ca   : > { %2694 = vst.msk [vmem:[%s4388_s18 + $0x64] sm:$0xf] %vm2668_vm4, %v2661_v26  ;;  %v2183_v23 = vadd.f32 %v2182_v7, %v4306_v48  ;;  %v2271_v43 = vpop.f32.mrf.mxu3 }
 0x2cb   : > { %v2532_v0 = vadd.f32 %v4650_v10, %v2496_v14  ;;  %v1598_v27 = vpop.f32.mrf.mxu1 }
 0x2cc   : > { %v1599_v25 = vadd.f32 %v1598_v27, %v4793_v17  ;;  %v2272_v13 = vadd.f32 %v2271_v43, %v2183_v23  ;;  %v4799_v43 = vld [vmem:[#allocation31_spill] sm:$0xff]  ;;  %v1672_v27 = vand.u32 31, %v1640_v39 }
 0x2cd   : > { %vm2565_vm0 = vcmp.ge.f32.partialorder %v2532_v0, 0.0  ;;  %v2598_v15 = vmul.f32 %v4373_v12, %v2532_v0 }
 0x2ce   : > { %v2401_v3 = vrot.slane %v1599_v25, 1  ;;  %v2363_v48 = vpop.f32.mrf.mxu0  ;;  %v2361_v29 = vadd.f32 %v2360_v32, %v2272_v13  ;;  %vm1800_vm6 = vcmp.lt.s32.totalorder %v1672_v27, 31 }
 0x2cf   : > { %v2630_v50 = vsel %vm2565_vm0, %v2532_v0, %v2598_v15 }
 0x2d0   : > { %v2662_v41 = vpack.c.bf16 %v2630_v50, %v2630_v50  ;;  %v2409_v52 = vsel %vm2405_vm2, %v2400_v33, %v2401_v3 }
 0x2d1   : > { %v2465_v4 = vmul.f32 %v3219_v56, %v2409_v52  ;;  %v2185_v19 = vpop.f32.mrf.mxu2  ;;  %v4801_v52 = vld [vmem:[#allocation33_spill] sm:$0xff] }
 0x2d2   : > { %2695 = vst.msk [vmem:[%s4388_s18 + $0x68] sm:$0xf] %vm2668_vm4, %v2662_v41  ;;  %v2186_v38 = vadd.f32 %v2185_v19, %v1958_v20  ;;  %v2274_v11 = vpop.f32.mrf.mxu3  ;;  %v4802_v9 = vrot.slane %v4801_v52, 1 }
 0x2d3   : > { %v2497_v53 = vadd.f32 %v2465_v4, %v2361_v29  ;;  %v1600_v5 = vpop.f32.mrf.mxu1  ;;  %v3220_v4 = vsel %vm1800_vm6, 1.0, %v4773_v51 }
 0x2d4   : > { %v2275_v22 = vadd.f32 %v2274_v11, %v2186_v38  ;;  %v1601_v31 = vadd.f32 %v1600_v5, %v4795_v47 }
 0x2d5   : > { %v2533_v21 = vadd.f32 %v4650_v10, %v2497_v53 }
 0x2d6   : > { %v2364_v44 = vadd.f32 %v2363_v48, %v2275_v22  ;;  %v2402_v60 = vrot.slane %v1601_v31, 1  ;;  %v2365_v6 = vpop.f32.mrf.mxu0  ;;  %v4800_v48 = vld [vmem:[#allocation32_spill] sm:$0xff] }
 0x2d7   : > { %vm2566_vm1 = vcmp.ge.f32.partialorder %v2533_v21, 0.0  ;;  %v2599_v42 = vmul.f32 %v4373_v12, %v2533_v21 }
 0x2d8   : > { %v2408_v49 = vsel %vm2405_vm2, %v2401_v3, %v2402_v60 }
 0x2d9   : > { %v2631_v1 = vsel %vm2566_vm1, %v2533_v21, %v2599_v42  ;;  %v2498_v61 = vadd.f32 %v2408_v49, %v2364_v44  ;;  %v2187_v40 = vpop.f32.mrf.mxu2 }
 0x2da   : > { %v2663_v63 = vpack.c.bf16 %v2631_v1, %v2631_v1  ;;  %v2188_v46 = vadd.f32 %v2187_v40, %v4796_v30  ;;  %v2276_v28 = vpop.f32.mrf.mxu3 }
 0x2db   : > { %v2534_v8 = vadd.f32 %v4650_v10, %v2498_v61  ;;  %v1603_v18 = vpop.f32.mrf.mxu1 }
 0x2dc   : > { %2696 = vst.msk [vmem:[%s4388_s18 + $0x6c] sm:$0xf] %vm2668_vm4, %v2663_v63  ;;  %v2277_v62 = vadd.f32 %v2276_v28, %v2188_v46  ;;  %v1604_v35 = vadd.f32 %v1603_v18, %v4797_v2 }
 0x2dd   : > { %vm2567_vm3 = vcmp.ge.f32.partialorder %v2534_v8, 0.0  ;;  %v2600_v24 = vmul.f32 %v4373_v12, %v2534_v8 }
 0x2de   : > { %v2366_v59 = vadd.f32 %v2365_v6, %v2277_v62  ;;  %v2403_v58 = vrot.slane %v1604_v35, 1  ;;  %v2368_v14 = vpop.f32.mrf.mxu0 }
 0x2df   : > { %v2632_v54 = vsel %vm2567_vm3, %v2534_v8, %v2600_v24 }
 0x2e0   : > { %v2664_v45 = vpack.c.bf16 %v2632_v54, %v2632_v54  ;;  %v2407_v32 = vsel %vm2405_vm2, %v2402_v60, %v2403_v58 }
 0x2e1   : > { %v2499_v33 = vadd.f32 %v2407_v32, %v2366_v59  ;;  %v2190_v16 = vpop.f32.mrf.mxu2 }
 0x2e2   : > { %2697 = vst.msk [vmem:[%s4388_s18 + $0x70] sm:$0xf] %vm2668_vm4, %v2664_v45  ;;  %v2191_v34 = vadd.f32 %v2190_v16, %v4798_v36  ;;  %v2279_v26 = vpop.f32.mrf.mxu3 }
 0x2e3   : > { %v2535_v57 = vadd.f32 %v4650_v10, %v2499_v33  ;;  %v1605_v7 = vpop.f32.mrf.mxu1 }
 0x2e4   : > { %v2280_v23 = vadd.f32 %v2279_v26, %v2191_v34  ;;  %v1606_v0 = vadd.f32 %v1605_v7, %v4799_v43 }
 0x2e5   : > { %vm2568_vm5 = vcmp.ge.f32.partialorder %v2535_v57, 0.0  ;;  %v2601_v17 = vmul.f32 %v4373_v12, %v2535_v57 }
 0x2e6   : > { %v2369_v25 = vadd.f32 %v2368_v14, %v2280_v23  ;;  %v2404_v15 = vrot.slane %v1606_v0, 1  ;;  %v2370_v53 = vpop.f32.mrf.mxu0 }
 0x2e7   : > { %v2633_v13 = vsel %vm2568_vm5, %v2535_v57, %v2601_v17 }
 0x2e8   : > { %v2665_v37 = vpack.c.bf16 %v2633_v13, %v2633_v13  ;;  %v2406_v56 = vsel %vm2405_vm2, %v2403_v58, %v2404_v15  ;;  %v2437_v20 = vsel %vm2405_vm2, %v2404_v15, %v4802_v9 }
 0x2e9   : > { %v2500_v3 = vadd.f32 %v2406_v56, %v2369_v25  ;;  %v2192_v50 = vpop.f32.mrf.mxu2  ;;  %v2469_v22 = vmul.f32 %v3220_v4, %v2437_v20 }
 0x2ea   : > { %2698 = vst.msk [vmem:[%s4388_s18 + $0x74] sm:$0xf] %vm2668_vm4, %v2665_v37  ;;  %v2193_v41 = vadd.f32 %v2192_v50, %v4800_v48  ;;  %v2281_v19 = vpop.f32.mrf.mxu3 }
 0x2eb   : > { %v2536_v29 = vadd.f32 %v4650_v10, %v2500_v3 }
 0x2ec   : > { %v2282_v38 = vadd.f32 %v2281_v19, %v2193_v41 }
 0x2ed   : > { %vm2569_vm7 = vcmp.ge.f32.partialorder %v2536_v29, 0.0  ;;  %v2602_v11 = vmul.f32 %v4373_v12, %v2536_v29 }
 0x2ee   : > { %v2371_v5 = vadd.f32 %v2370_v53, %v2282_v38 }
 0x2ef   : > { %v2634_v47 = vsel %vm2569_vm7, %v2536_v29, %v2602_v11 }
 0x2f0   : > { %v2666_v31 = vpack.c.bf16 %v2634_v47, %v2634_v47  ;;  %v2501_v21 = vadd.f32 %v2469_v22, %v2371_v5 }
 0x2f2   : > { %2699 = vst.msk [vmem:[%s4388_s18 + $0x78] sm:$0xf] %vm2668_vm4, %v2666_v31  ;;  %v2537_v55 = vadd.f32 %v4650_v10, %v2501_v21 }
 0x2f4   : > { %vm2570_vm2 = vcmp.ge.f32.partialorder %v2537_v55, 0.0  ;;  %v2603_v44 = vmul.f32 %v4373_v12, %v2537_v55 }
 0x2f6   : > { %v2635_v51 = vsel %vm2570_vm2, %v2537_v55, %v2603_v44 }
 0x2f7   : > { %v2667_v60 = vpack.c.bf16 %v2635_v51, %v2635_v51 }
 0x2f9   : > { %2700 = vst.msk [vmem:[%s4388_s18 + $0x7c] sm:$0xf] %vm2668_vm4, %v2667_v60 }
 0x2fa PF: > { %s17_s27 = sadd.s32 1, %s3542_s27   ;;  %s4803_s23 = smov %s3534_s25 }
 0x2fb   : > { %p14_p1 = scmp.ge.s32.totalorder %s17_s27, 10   ;;  %s4804_s24 = smov %s3538_s26 }
 0x2fc   : > { %s4805_s25 = smov %s4808_s5  ;;  %s4806_s26 = smov %s4812_s28 }
 0x2fd   :  { %16 = sbr.rel (!%p14_p1) target bundleno = 3 (0x3), region = 82 }

// kernel: dense_d_block.6
= control target key start
LH: loop header
LB: loop body
LE: loop exit
PB: predicated region body
PF: predicated region fallthrough
CT: control target
= control target key end

     0   :  { %s3291_s26 = smov 0   ;;  %s3293_s27 = smov 0   ;;  %s4463_s0 = inlined_call_operand.vmem [shape: bf16[2,1024,8], index: 0, kind: input, shape index: {}, may-alias: {0,1,2}]   ;;  %s4464_s1 = inlined_call_operand.vmem [shape: bf16[2,1024,8], index: 1, kind: input, shape index: {}, may-alias: {0,1,2}]   ;;  %s4465_s2 = inlined_call_operand.vmem [shape: bf16[2,1024,8], index: 2, kind: input, shape index: {}, may-alias: {0,1,2}]   ;;  %s4466_s3 = inlined_call_operand.vmem [shape: bf16[3,8,384], index: 3, kind: input, shape index: {}]   ;;  %s4467_s4 = inlined_call_operand.vmem [shape: f32[1,128], index: 4, kind: input, shape index: {}]   ;;  %s4468_s5 = inlined_call_operand.<no memory space> [shape: f32[1,1], index: 5, kind: input, shape index: {}]   ;;  %s4469_s6 = inlined_call_operand.vmem [shape: bf16[2,1024,128], index: 6, kind: input, shape index: {}]   ;;  %s4470_s7 = inlined_call_operand.vmem [shape: bf16[2,1024,128], index: 7, kind: output, shape index: {}]  }
   0x1   :  { %12 = sst [smem:[#allocation2]] %s4468_s5  ;;  %s3295_s28 = smov 0  }
   0x2   :  { %s3297_s29 = smov 0   ;;  %s3299_s30 = smov 0  }
   0x3 LB: > { %s27_s5 = sadd.s32 1, %s3237_s28  ;;  %s30_s8 = sadd.s32 1, %s3241_s29  ;;  %s3245_s30 = sphi %s3299_s30, %s18_s30   ;;  %s3241_s29 = sphi %s3297_s29, %s4634_s29   ;;  %s3237_s28 = sphi %s3295_s28, %s4633_s28   ;;  %s3233_s27 = sphi %s3293_s27, %s4632_s27   ;;  %s3229_s26 = sphi %s3291_s26, %s4631_s26  }
   0x4   : > { %p28_p0 = scmp.ge.s32.totalorder %s27_s5, 4  ;;  %p2697_p1 = scmp.ge.s32.totalorder %s3245_s30, 1 }
   0x5   : > { %p342_p2 = scmp.lt.s32.totalorder %s3245_s30, 9 }
   0x6   : > { %s4636_s5 = smov (%p28_p0, %s27_s5), 0  ;;  %s4638_s8 = smov (!%p28_p0, %s30_s8), %s3241_s29 }
   0x7   : > { %p343_p3 = pnand %p2697_p1, %p342_p2  ;;  %p32_p4 = scmp.ge.s32.totalorder %s4638_s8, 2 }
   0x9   : > { %s4640_s8 = smov (%p32_p4, %s4638_s8), 0  ;;  %346 = sbr.rel (%p343_p3) target bundleno = 747 (0x2eb), region = 48 }
   0xe   : > { %v2780_v0 = vld [vmem:[%s4466_s3 + $0xc] sm:$0xff]  ;;  %p422_p5 = scmp.lt.s32.totalorder %s3233_s27, 1  ;;  %s2703_s11 = sshll.u32 %s3229_s26, 5  ;;  %v684_v1 = vld [vmem:[%s4466_s3] sm:$0xff]  ;;  %v2781_v3 = vld [vmem:[%s4466_s3 + $0x14] sm:$0xf] }
   0xf   : > { %v691_v2 = vunpack.c.l.b16 %v2780_v0  ;;  %p438_p6 = scmp.lt.s32.totalorder %s2703_s11, 127  ;;  %v1025_v4 = vunpack.c.l.b16 %v684_v1  ;;  %v692_v5 = vunpack.c.h.b16 %v2780_v0  ;;  %v1026_v6 = vunpack.c.h.b16 %v684_v1  ;;  %p484_p7 = scmp.gt.s32.totalorder %s3229_s26, 0  ;;  %v2878_v30 = vld [vmem:[%s4466_s3 + $0x18] sm:$0xff]  ;;  %v685_v31 = vld [vmem:[%s4466_s3 + $0x8] sm:$0xf] }
  0x10   : > { %vm746_vm0 = vcmask 1043456   ;;  %s4642_s27 = smov (!%p422_p5, %s3233_s27), 1  ;;  %v693_v7 = vunpack.c.l.b16 %v2781_v3  ;;  %vm697_vm1 = vcmask 64512   ;;  %s2698_s22 = sshll.u32 %s3229_s26, 3  ;;  %v2879_v32 = vld [vmem:[%s4466_s3 + $0x20] sm:$0xf]  ;;  %v1318_v33 = vunpack.c.l.b16 %v2878_v30 }
  0x11   : > { %v694_v8 = vpack.c.b16 %v691_v2, %v691_v2  ;;  %s4644_s11 = smov (!%p438_p6, %s2703_s11), 127  ;;  %v1028_v9 = vpack.c.b16 %v1025_v4, %v1025_v4  ;;  %v695_v10 = vpack.c.b16 %v692_v5, %v692_v5  ;;  %v1029_v11 = vpack.c.b16 %v1026_v6, %v1026_v6  ;;  %s3333_s16 = sshll.u32 %s4642_s27, 7 }
  0x12   : > { %v696_v12 = vpack.c.b16 %v693_v7, %v693_v7  ;;  %s441_s17 = sadd.s32 %s3333_s16, %s4644_s11  ;;  %s2699_s24 = sadd.s32 4294967295, %s2698_s22  ;;  %v1319_v34 = vunpack.c.h.b16 %v2878_v30  ;;  %v1027_v35 = vunpack.c.l.b16 %v685_v31  ;;  %v1320_v36 = vunpack.c.l.b16 %v2879_v32 }
  0x13   : > { %v748_v13 = vsel %vm746_vm0, %v694_v8, 0  ;;  %v1038_v14 = vsel %vm746_vm0, %v1028_v9, 0  ;;  %s3338_s18 = sshll.u32 %s441_s17, 2  ;;  %v751_v16 = vsel %vm746_vm0, %v695_v10, 0  ;;  %v1041_v17 = vsel %vm746_vm0, %v1029_v11, 0  ;;  %p419_p8 = scmp.gt.s32.totalorder %s2699_s24, 0 }
  0x14   : > { %763 = vmatpush.bf16.msra.mxu0 %v748_v13  ;;  %3154 = vmatpush.bf16.msra.mxu1 %v748_v13  ;;  %v754_v15 = vsel %vm746_vm0, %v696_v12, 0  ;;  %s3347_s21 = scalar_lea.vmem %s4464_s1, %s3338_s18  ;;  %v1321_v37 = vpack.c.b16 %v1318_v33, %v1318_v33  ;;  %v1322_v38 = vpack.c.b16 %v1319_v34, %v1319_v34  ;;  %v1030_v39 = vpack.c.b16 %v1027_v35, %v1027_v35  ;;  %p497_p11 = scmp.lt.s32.totalorder %s3229_s26, 3 }
  0x15   : > { %3155 = vmatpush.bf16.msra.mxu2 %v748_v13  ;;  %3156 = vmatpush.bf16.msra.mxu3 %v748_v13  ;;  %v3350_v18 = vld [vmem:[%s3347_s21] sm:$0xff]  ;;  %s485_s23 = scalar_select %p484_p7, 1, 0  ;;  %v3374_v22 = vld [vmem:[%s3347_s21 + $0x8] sm:$0xff]  ;;  %v3394_v26 = vld [vmem:[%s3347_s21 + $0x10] sm:$0xff]  ;;  %v1323_v40 = vpack.c.b16 %v1320_v36, %v1320_v36 }
  0x16   : > { %v3353_v19 = vld [vmem:[%s3347_s21 + $0x20] sm:$0xff]  ;;  %v3377_v23 = vld [vmem:[%s3347_s21 + $0x28] sm:$0xff]  ;;  %s4646_s24 = smov (!%p419_p8, %s2699_s24), 0  ;;  %v3397_v27 = vld [vmem:[%s3347_s21 + $0x30] sm:$0xff]  ;;  %v1331_v41 = vsel %vm746_vm0, %v1321_v37, 0  ;;  %v1334_v42 = vsel %vm746_vm0, %v1322_v38, 0  ;;  %s3970_s19 = scalar_lea.vmem %s4469_s6, %s3338_s18 }
  0x17   : > { %v3356_v20 = vld [vmem:[%s3347_s21 + $0x40] sm:$0xff]  ;;  %2782 = vmatmul.msk.bf16.vlgmr.msra.gmra.mxu0 %vm697_vm1, %v3350_v18  ;;  %2786 = vmatmul.msk.bf16.vlgmr.msra.gmra.mxu1 %vm697_vm1, %v3353_v19  ;;  %s486_s25 = scvt.s32.f32 %s485_s23  ;;  %v3380_v24 = vld [vmem:[%s3347_s21 + $0x48] sm:$0xff]  ;;  %s2700_s11 = sshll.u32 %s4646_s24, 2  ;;  %v3400_v28 = vld [vmem:[%s3347_s21 + $0x50] sm:$0xff]  ;;  %v1044_v43 = vsel %vm746_vm0, %v1030_v39, 0  ;;  %v1337_v44 = vsel %vm746_vm0, %v1323_v40, 0 }
  0x18   : > { %v3359_v21 = vld [vmem:[%s3347_s21 + $0x60] sm:$0xff]  ;;  %852 = vmatpush.bf16.msrb.mxu1 %v751_v16  ;;  %1142 = vmatpush.bf16.msrb.mxu0 %v1041_v17  ;;  %v3383_v25 = vld [vmem:[%s3347_s21 + $0x68] sm:$0xff]  ;;  %p424_p9 = scmp.lt.s32.totalorder %s2700_s11, 127  ;;  %v3403_v29 = vld [vmem:[%s3347_s21 + $0x70] sm:$0xff] }
  0x19   : > { %941 = vmatpush.bf16.msrb.mxu2 %v754_v15  ;;  %1053 = vmatpush.bf16.msrb.mxu3 %v1038_v14  ;;  %s489_s27 = sshrl.u32 %s486_s25, 16  ;;  %p488_p10 = scmp.ne.f32.partialorder %s486_s25, %s486_s25  ;;  %v3431_v47 = vld [vmem:[%s3347_s21 + $0x18] sm:$0xff] }
  0x1a   : > { %2790 = vmatmul.msk.bf16.vlgmr.msra.gmra.mxu2 %vm697_vm1, %v3356_v20  ;;  %2794 = vmatmul.msk.bf16.vlgmr.msra.gmra.mxu3 %vm697_vm1, %v3359_v21  ;;  %s490_s9 = sand.u32 1, %s489_s27  ;;  %s4648_s11 = smov (!%p424_p9, %s2700_s11), 127  ;;  %v3434_v48 = vld [vmem:[%s3347_s21 + $0x38] sm:$0xff] }
  0x1b   : > { %s491_s10 = sadd.s32 32767, %s490_s9  ;;  %s427_s14 = sadd.s32 %s3333_s16, %s4648_s11  ;;  %v3437_v52 = vld [vmem:[%s3347_s21 + $0x58] sm:$0xff] }
  0x1c   : > { %s492_s12 = sadd.s32 %s491_s10, %s486_s25  ;;  %s2702_s27 = sshll.u32 %s427_s14, 2  ;;  %1231 = vmatpush.bf16.msra.mxu1 %v1044_v43  ;;  %1524 = vmatpush.bf16.msra.mxu0 %v1337_v44  ;;  %v3440_v53 = vld [vmem:[%s3347_s21 + $0x78] sm:$0xff] }
  0x1d   : > { %s493_s13 = sand.u32 4294901760, %s492_s12  ;;  %s429_s12 = scalar_lea.vmem %s4463_s0, %s2702_s27  ;;  %1346 = vmatpush.bf16.msra.mxu2 %v1331_v41  ;;  %1435 = vmatpush.bf16.msra.mxu3 %v1334_v42 }
  0x1e   : > { %s4650_s13 = smov (%p488_p10, %s493_s13), 2143289344  ;;  %v2963_v45 = vld [vmem:[%s429_s12] sm:$0xff]   ;;  %v3122_v60 = vld [vmem:[%s429_s12 + $0x8] sm:$0xff]   ;;  %s3957_s14 = sld [smem:[#allocation2]] }
  0x1f   : > { %s496_s15 = sshrl.u32 %s4650_s13, 16  ;;  %v2964_v49 = vunpack.c.l.bf16 %v2963_v45  ;;  %v2965_v50 = vunpack.c.h.bf16 %v2963_v45  ;;  %v2968_v62 = vunpack.c.l.bf16 %v3122_v60  ;;  %v2969_v63 = vunpack.c.h.bf16 %v3122_v60  ;;  %s446_s25 = sadd.s32 8, %s2698_s22 }
  0x20   : > { %s546_s9 = sshll.u32 %s496_s15, 16  ;;  %p447_p12 = scmp.lt.s32.totalorder %s446_s25, 31 }
  0x21   : > { %s547_s13 = sor.u32 %s546_s9, %s496_s15  ;;  %s4018_s10 = scalar_lea.vmem %s4470_s7, %s3338_s18 }
  0x22   : > { %v548_v46 = vstv %s547_s13  ;;  %s498_s24 = scalar_select %p497_p11, 1, 0 }
  0x23   : > { %v554_v51 = vunpack.c.l.bf16 %v548_v46  ;;  %s4652_s25 = smov (!%p447_p12, %s446_s25), 31 }
  0x24   : > { %s3999_s27 = scvt.s32.f32 %s498_s24  ;;  %s2707_s18 = sshll.u32 %s4652_s25, 2 }
  0x25   : > { %v555_v54 = vmul.f32 %v2964_v49, %v554_v51  ;;  %v556_v55 = vmul.f32 %v2965_v50, %v554_v51  ;;  %v557_v0 = vmul.f32 %v2968_v62, %v554_v51  ;;  %v558_v1 = vmul.f32 %v2969_v63, %v554_v51  ;;  %p4045_p13 = scmp.lt.s32.totalorder %s2707_s18, 127 }
  0x26   : > { %s502_s26 = sshrl.u32 %s3999_s27, 16  ;;  %p501_p0 = scmp.ne.f32.partialorder %s3999_s27, %s3999_s27 }
  0x27   : > { %2783 = vmatmul.msk.bf16.gmra.mxu0 %vm697_vm1, %v3374_v22  ;;  %2787 = vmatmul.msk.bf16.gmra.mxu1 %vm697_vm1, %v3377_v23  ;;  %v559_v56 = vpack.c.bf16 %v555_v54, %v555_v54  ;;  %v560_v57 = vpack.c.bf16 %v556_v55, %v556_v55  ;;  %v561_v2 = vpack.c.bf16 %v557_v0, %v557_v0  ;;  %s4020_s11 = sand.u32 1, %s502_s26  ;;  %s4654_s18 = smov (!%p4045_p13, %s2707_s18), 127 }
  0x28   : > { %v562_v3 = vpack.c.bf16 %v558_v1, %v558_v1  ;;  %s504_s12 = sadd.s32 32767, %s4020_s11  ;;  %s455_s17 = sadd.s32 %s3333_s16, %s4654_s18 }
  0x29   : > { %v567_v58 = vunpack.c.l.b16 %v559_v56  ;;  %v568_v59 = vunpack.c.l.b16 %v560_v57  ;;  %v569_v4 = vunpack.c.l.b16 %v561_v2  ;;  %s2709_s16 = sshll.u32 %s455_s17, 2 }
  0x2a   : > { %2791 = vmatmul.msk.bf16.gmra.mxu2 %vm697_vm1, %v3380_v24  ;;  %2795 = vmatmul.msk.bf16.gmra.mxu3 %vm697_vm1, %v3383_v25  ;;  %v570_v5 = vunpack.c.l.b16 %v562_v3 }
  0x2b   : > { %v3450_v61 = vpack.c.b16 %v568_v59, %v567_v58 }
  0x2c   : > { %v3460_v6 = vpack.c.b16 %v570_v5, %v569_v4 }
  0x37   : > { %2784 = vmatmul.msk.bf16.gmra.mxu0 %vm697_vm1, %v3394_v26  ;;  %2788 = vmatmul.msk.bf16.gmra.mxu1 %vm697_vm1, %v3397_v27 }
  0x3a   : > { %2792 = vmatmul.msk.bf16.gmra.mxu2 %vm697_vm1, %v3400_v28  ;;  %2796 = vmatmul.msk.bf16.gmra.mxu3 %vm697_vm1, %v3403_v29 }
  0x47   : > { %2785 = vmatmul.msk.bf16.gmra.mxu0 %vm697_vm1, %v3431_v47  ;;  %2789 = vmatmul.msk.bf16.gmra.mxu1 %vm697_vm1, %v3434_v48 }
  0x4a   : > { %2793 = vmatmul.msk.bf16.gmra.mxu2 %vm697_vm1, %v3437_v52  ;;  %2797 = vmatmul.msk.bf16.gmra.mxu3 %vm697_vm1, %v3440_v53 }
  0x57   : > { %2798 = vmatmul.msk.bf16.vlgmr.msrb.gmra.mxu1 %vm697_vm1, %v3350_v18  ;;  %2846 = vmatmul.msk.bf16.vlgmr.msrb.gmra.mxu0 %vm697_vm1, %v3450_v61 }
  0x5a   : > { %2814 = vmatmul.msk.bf16.vlgmr.msrb.gmra.mxu2 %vm697_vm1, %v3350_v18  ;;  %2830 = vmatmul.msk.bf16.vlgmr.msrb.gmra.mxu3 %vm697_vm1, %v3450_v61 }
  0x67   : > { %2799 = vmatmul.msk.bf16.gmra.mxu1 %vm697_vm1, %v3374_v22  ;;  %2847 = vmatmul.msk.bf16.gmra.mxu0 %vm697_vm1, %v3460_v6 }
  0x6a   : > { %2815 = vmatmul.msk.bf16.gmra.mxu2 %vm697_vm1, %v3374_v22  ;;  %2831 = vmatmul.msk.bf16.gmra.mxu3 %vm697_vm1, %v3460_v6 }
  0x77   : > { %2800 = vmatmul.msk.bf16.gmra.mxu1 %vm697_vm1, %v3394_v26  ;;  %2848 = vmatmul.msk.bf16.gmra.mxu0 %vm697_vm1, %v3350_v18 }
  0x7a   : > { %2816 = vmatmul.msk.bf16.gmra.mxu2 %vm697_vm1, %v3394_v26  ;;  %2832 = vmatmul.msk.bf16.gmra.mxu3 %vm697_vm1, %v3350_v18 }
  0x87   : > { %2801 = vmatmul.msk.bf16.gmra.mxu1 %vm697_vm1, %v3431_v47  ;;  %2849 = vmatmul.msk.bf16.gmra.mxu0 %vm697_vm1, %v3374_v22 }
  0x8a   : > { %2817 = vmatmul.msk.bf16.gmra.mxu2 %vm697_vm1, %v3431_v47  ;;  %2833 = vmatmul.msk.bf16.gmra.mxu3 %vm697_vm1, %v3374_v22 }
  0x94   : > { %v765_v7 = vpop.f32.mrf.mxu0  ;;  %v3486_v8 = vpop.f32.mrf.mxu1 }
  0x97   : > { %2802 = vmatmul.msk.bf16.gmra.mxu1 %vm697_vm1, %v3353_v19  ;;  %2850 = vmatmul.msk.bf16.gmra.mxu0 %vm697_vm1, %v3394_v26 }
  0x9a   : > { %2818 = vmatmul.msk.bf16.gmra.mxu2 %vm697_vm1, %v3353_v19  ;;  %2834 = vmatmul.msk.bf16.gmra.mxu3 %vm697_vm1, %v3394_v26 }
  0x9c   : > { %v767_v11 = vpop.f32.mrf.mxu0  ;;  %v3500_v12 = vpop.f32.mrf.mxu1 }
  0x9d   : > { %v3496_v9 = vpop.f32.mrf.mxu2  ;;  %v3498_v10 = vpop.f32.mrf.mxu3 }
  0x9e   : > { %4474 = vst [vmem:[#allocation3_spill] sm:$0xff] %v3496_v9 }
  0x9f   : > { %4475 = vst [vmem:[#allocation4_spill] sm:$0xff] %v3498_v10 }
  0xa4   : > { %v770_v15 = vpop.f32.mrf.mxu0  ;;  %v3506_v16 = vpop.f32.mrf.mxu1 }
  0xa5   : > { %v3502_v13 = vpop.f32.mrf.mxu2  ;;  %v3504_v14 = vpop.f32.mrf.mxu3 }
  0xa6   : > { %4476 = vst [vmem:[#allocation5_spill] sm:$0xff] %v3502_v13 }
  0xa7   : > { %4477 = vst [vmem:[#allocation6_spill] sm:$0xff] %v3504_v14  ;;  %2803 = vmatmul.msk.bf16.gmra.mxu1 %vm697_vm1, %v3377_v23  ;;  %2851 = vmatmul.msk.bf16.gmra.mxu0 %vm697_vm1, %v3431_v47 }
  0xaa   : > { %2819 = vmatmul.msk.bf16.gmra.mxu2 %vm697_vm1, %v3377_v23  ;;  %2835 = vmatmul.msk.bf16.gmra.mxu3 %vm697_vm1, %v3431_v47 }
  0xac   : > { %v772_v31 = vpop.f32.mrf.mxu0  ;;  %v3520_v32 = vpop.f32.mrf.mxu1 }
  0xad   : > { %v3516_v17 = vpop.f32.mrf.mxu2  ;;  %v3518_v30 = vpop.f32.mrf.mxu3  ;;  %4480 = vst [vmem:[#allocation9_spill] sm:$0xff] %v3520_v32 }
  0xae   : > { %4478 = vst [vmem:[#allocation7_spill] sm:$0xff] %v3516_v17 }
  0xaf   : > { %4479 = vst [vmem:[#allocation8_spill] sm:$0xff] %v3518_v30 }
  0xb4   : > { %v3526_v35 = vpop.f32.mrf.mxu0  ;;  %v3528_v36 = vpop.f32.mrf.mxu1 }
  0xb5   : > { %v3522_v33 = vpop.f32.mrf.mxu2  ;;  %v3524_v34 = vpop.f32.mrf.mxu3  ;;  %4483 = vst [vmem:[#allocation12_spill] sm:$0xff] %v3528_v36 }
  0xb6   : > { %4481 = vst [vmem:[#allocation10_spill] sm:$0xff] %v3522_v33 }
  0xb7   : > { %4482 = vst [vmem:[#allocation11_spill] sm:$0xff] %v3524_v34  ;;  %2804 = vmatmul.msk.bf16.gmra.mxu1 %vm697_vm1, %v3397_v27  ;;  %2852 = vmatmul.msk.bf16.gmra.mxu0 %vm697_vm1, %v3353_v19 }
  0xba   : > { %2820 = vmatmul.msk.bf16.gmra.mxu2 %vm697_vm1, %v3397_v27  ;;  %2836 = vmatmul.msk.bf16.gmra.mxu3 %vm697_vm1, %v3353_v19 }
  0xbc   : > { %v3542_v39 = vpop.f32.mrf.mxu0  ;;  %v3544_v40 = vpop.f32.mrf.mxu1 }
  0xbd   : > { %v3538_v37 = vpop.f32.mrf.mxu2  ;;  %v3540_v38 = vpop.f32.mrf.mxu3  ;;  %4486 = vst [vmem:[#allocation15_spill] sm:$0xff] %v3544_v40 }
  0xbe   : > { %4484 = vst [vmem:[#allocation13_spill] sm:$0xff] %v3538_v37 }
  0xbf   : > { %4485 = vst [vmem:[#allocation14_spill] sm:$0xff] %v3540_v38 }
  0xc4   : > { %v3550_v43 = vpop.f32.mrf.mxu0  ;;  %v3552_v44 = vpop.f32.mrf.mxu1 }
  0xc5   : > { %v3546_v41 = vpop.f32.mrf.mxu2  ;;  %v3548_v42 = vpop.f32.mrf.mxu3  ;;  %4489 = vst [vmem:[#allocation18_spill] sm:$0xff] %v3552_v44 }
  0xc6   : > { %4487 = vst [vmem:[#allocation16_spill] sm:$0xff] %v3546_v41 }
  0xc7   : > { %4488 = vst [vmem:[#allocation17_spill] sm:$0xff] %v3548_v42  ;;  %2805 = vmatmul.msk.bf16.gmra.mxu1 %vm697_vm1, %v3434_v48  ;;  %2853 = vmatmul.msk.bf16.gmra.mxu0 %vm697_vm1, %v3377_v23 }
  0xca   : > { %2821 = vmatmul.msk.bf16.gmra.mxu2 %vm697_vm1, %v3434_v48  ;;  %2837 = vmatmul.msk.bf16.gmra.mxu3 %vm697_vm1, %v3377_v23 }
  0xcc   : > { %v3566_v49 = vpop.f32.mrf.mxu0  ;;  %v3568_v50 = vpop.f32.mrf.mxu1 }
  0xcd   : > { %v3562_v45 = vpop.f32.mrf.mxu2  ;;  %v3564_v46 = vpop.f32.mrf.mxu3  ;;  %4492 = vst [vmem:[#allocation21_spill] sm:$0xff] %v3568_v50 }
  0xce   : > { %4490 = vst [vmem:[#allocation19_spill] sm:$0xff] %v3562_v45 }
  0xcf   : > { %4491 = vst [vmem:[#allocation20_spill] sm:$0xff] %v3564_v46 }
  0xd4   : > { %v854_v55 = vpop.f32.mrf.mxu1  ;;  %v1144_v56 = vpop.f32.mrf.mxu0 }
  0xd5   : > { %v3570_v51 = vpop.f32.mrf.mxu2  ;;  %v3572_v54 = vpop.f32.mrf.mxu3  ;;  %v3574_v57 = vadd.f32 %v1144_v56, %v854_v55 }
  0xd6   : > { %4493 = vst [vmem:[#allocation22_spill] sm:$0xff] %v3570_v51 }
  0xd7   : > { %4494 = vst [vmem:[#allocation23_spill] sm:$0xff] %v3572_v54  ;;  %2806 = vmatmul.msk.bf16.gmra.mxu1 %vm697_vm1, %v3356_v20  ;;  %2854 = vmatmul.msk.bf16.gmra.mxu0 %vm697_vm1, %v3397_v27 }
  0xda   : > { %2822 = vmatmul.msk.bf16.gmra.mxu2 %vm697_vm1, %v3356_v20  ;;  %2838 = vmatmul.msk.bf16.gmra.mxu3 %vm697_vm1, %v3397_v27 }
  0xdc   : > { %v856_v62 = vpop.f32.mrf.mxu1  ;;  %v1146_v63 = vpop.f32.mrf.mxu0 }
  0xdd   : > { %v3584_v58 = vpop.f32.mrf.mxu2  ;;  %v1055_v59 = vpop.f32.mrf.mxu3  ;;  %v3588_v0 = vadd.f32 %v1146_v63, %v856_v62 }
  0xde   : > { %v3586_v60 = vadd.f32 %v1055_v59, %v765_v7 }
  0xe4   : > { %v859_v4 = vpop.f32.mrf.mxu1  ;;  %v1149_v5 = vpop.f32.mrf.mxu0 }
  0xe5   : > { %v3590_v1 = vpop.f32.mrf.mxu2  ;;  %v1057_v2 = vpop.f32.mrf.mxu3  ;;  %v3594_v55 = vadd.f32 %v1149_v5, %v859_v4 }
  0xe6   : > { %v3592_v3 = vadd.f32 %v1057_v2, %v767_v11 }
  0xe7   : > { %2807 = vmatmul.msk.bf16.gmra.mxu1 %vm697_vm1, %v3380_v24  ;;  %2855 = vmatmul.msk.bf16.gmra.mxu0 %vm697_vm1, %v3434_v48 }
  0xea   : > { %2823 = vmatmul.msk.bf16.gmra.mxu2 %vm697_vm1, %v3380_v24  ;;  %2839 = vmatmul.msk.bf16.gmra.mxu3 %vm697_vm1, %v3434_v48 }
  0xec   : > { %v861_v59 = vpop.f32.mrf.mxu1  ;;  %v1151_v62 = vpop.f32.mrf.mxu0 }
  0xed   : > { %v3604_v7 = vpop.f32.mrf.mxu2  ;;  %v1060_v11 = vpop.f32.mrf.mxu3  ;;  %v3608_v63 = vadd.f32 %v1151_v62, %v861_v59 }
  0xee   : > { %v3606_v56 = vadd.f32 %v1060_v11, %v770_v15 }
  0xf4   : > { %v864_v54 = vpop.f32.mrf.mxu1  ;;  %v1154_v46 = vpop.f32.mrf.mxu0 }
  0xf5   : > { %v3610_v2 = vpop.f32.mrf.mxu2  ;;  %v1062_v4 = vpop.f32.mrf.mxu3  ;;  %v3614_v42 = vadd.f32 %v1154_v46, %v864_v54 }
  0xf6   : > { %v3612_v5 = vadd.f32 %v1062_v4, %v772_v31 }
  0xf7   : > { %2808 = vmatmul.msk.bf16.gmra.mxu1 %vm697_vm1, %v3400_v28  ;;  %2856 = vmatmul.msk.bf16.gmra.mxu0 %vm697_vm1, %v3356_v20 }
  0xfa   : > { %2824 = vmatmul.msk.bf16.gmra.mxu2 %vm697_vm1, %v3400_v28  ;;  %2840 = vmatmul.msk.bf16.gmra.mxu3 %vm697_vm1, %v3356_v20 }
  0xfc   : > { %v866_v46 = vpop.f32.mrf.mxu1  ;;  %v1156_v54 = vpop.f32.mrf.mxu0 }
  0xfd   : > { %v3624_v15 = vpop.f32.mrf.mxu2  ;;  %v1065_v31 = vpop.f32.mrf.mxu3  ;;  %v3629_v59 = vadd.f32 %v1156_v54, %v866_v46 }
  0xfe   : > { %v3627_v11 = vadd.f32 %v1065_v31, %v3526_v35 }
 0x104   : > { %v869_v34 = vpop.f32.mrf.mxu1  ;;  %v1159_v30 = vpop.f32.mrf.mxu0 }
 0x105   : > { %v3631_v62 = vpop.f32.mrf.mxu2  ;;  %v1067_v4 = vpop.f32.mrf.mxu3  ;;  %v3636_v14 = vadd.f32 %v1159_v30, %v869_v34 }
 0x106   : > { %v3634_v38 = vadd.f32 %v1067_v4, %v3542_v39 }
 0x107   : > { %2809 = vmatmul.msk.bf16.gmra.mxu1 %vm697_vm1, %v3437_v52  ;;  %2857 = vmatmul.msk.bf16.gmra.mxu0 %vm697_vm1, %v3380_v24 }
 0x10a   : > { %2825 = vmatmul.msk.bf16.gmra.mxu2 %vm697_vm1, %v3437_v52  ;;  %2841 = vmatmul.msk.bf16.gmra.mxu3 %vm697_vm1, %v3380_v24 }
 0x10c   : > { %v871_v30 = vpop.f32.mrf.mxu1  ;;  %v1161_v34 = vpop.f32.mrf.mxu0 }
 0x10d   : > { %v3646_v35 = vpop.f32.mrf.mxu2  ;;  %v1070_v39 = vpop.f32.mrf.mxu3  ;;  %v3651_v46 = vadd.f32 %v1161_v34, %v871_v30 }
 0x10e   : > { %v3649_v31 = vadd.f32 %v1070_v39, %v3550_v43 }
 0x114   : > { %v874_v51 = vpop.f32.mrf.mxu1  ;;  %v1164_v45 = vpop.f32.mrf.mxu0 }
 0x115   : > { %v3653_v54 = vpop.f32.mrf.mxu2  ;;  %v1072_v4 = vpop.f32.mrf.mxu3  ;;  %v3658_v41 = vadd.f32 %v1164_v45, %v874_v51 }
 0x116   : > { %v3656_v10 = vadd.f32 %v1072_v4, %v3566_v49 }
 0x117   : > { %2810 = vmatmul.msk.bf16.gmra.mxu1 %vm697_vm1, %v3359_v21  ;;  %2858 = vmatmul.msk.bf16.gmra.mxu0 %vm697_vm1, %v3400_v28 }
 0x11a   : > { %2826 = vmatmul.msk.bf16.gmra.mxu2 %vm697_vm1, %v3359_v21  ;;  %2842 = vmatmul.msk.bf16.gmra.mxu3 %vm697_vm1, %v3400_v28 }
 0x11c   : > { %v876_v39 = vpop.f32.mrf.mxu1  ;;  %v1166_v30 = vpop.f32.mrf.mxu0 }
 0x11d   : > { %v3668_v43 = vpop.f32.mrf.mxu2  ;;  %v3670_v49 = vpop.f32.mrf.mxu3  ;;  %v3672_v45 = vadd.f32 %v1166_v30, %v876_v39 }
 0x124   : > { %v879_v4 = vpop.f32.mrf.mxu1  ;;  %v1169_v37 = vpop.f32.mrf.mxu0 }
 0x125   : > { %v3674_v51 = vpop.f32.mrf.mxu2  ;;  %v3676_v34 = vpop.f32.mrf.mxu3  ;;  %v3678_v33 = vadd.f32 %v1169_v37, %v879_v4 }
 0x127   : > { %4495 = vst [vmem:[#allocation24_spill] sm:$0xff] %v3678_v33  ;;  %2811 = vmatmul.msk.bf16.gmra.mxu1 %vm697_vm1, %v3383_v25  ;;  %2859 = vmatmul.msk.bf16.gmra.mxu0 %vm697_vm1, %v3437_v52 }
 0x12a   : > { %2827 = vmatmul.msk.bf16.gmra.mxu2 %vm697_vm1, %v3383_v25  ;;  %2843 = vmatmul.msk.bf16.gmra.mxu3 %vm697_vm1, %v3437_v52 }
 0x12c   : > { %v881_v17 = vpop.f32.mrf.mxu1  ;;  %v1171_v13 = vpop.f32.mrf.mxu0 }
 0x12d   : > { %v3688_v39 = vpop.f32.mrf.mxu2  ;;  %v3690_v30 = vpop.f32.mrf.mxu3  ;;  %v3692_v37 = vadd.f32 %v1171_v13, %v881_v17 }
 0x12f   : > { %4496 = vst [vmem:[#allocation25_spill] sm:$0xff] %v3692_v37 }
 0x134   : > { %v884_v50 = vpop.f32.mrf.mxu1  ;;  %v1174_v44 = vpop.f32.mrf.mxu0 }
 0x135   : > { %v3694_v4 = vpop.f32.mrf.mxu2  ;;  %v3696_v9 = vpop.f32.mrf.mxu3  ;;  %v3698_v40 = vadd.f32 %v1174_v44, %v884_v50 }
 0x136   : > { %4497 = vst [vmem:[#allocation26_spill] sm:$0xff] %v3696_v9 }
 0x137   : > { %4498 = vst [vmem:[#allocation27_spill] sm:$0xff] %v3698_v40  ;;  %2812 = vmatmul.msk.bf16.gmra.mxu1 %vm697_vm1, %v3403_v29  ;;  %2860 = vmatmul.msk.bf16.gmra.mxu0 %vm697_vm1, %v3359_v21 }
 0x13a   : > { %2828 = vmatmul.msk.bf16.gmra.mxu2 %vm697_vm1, %v3403_v29  ;;  %2844 = vmatmul.msk.bf16.gmra.mxu3 %vm697_vm1, %v3359_v21 }
 0x13c   : > { %v886_v36 = vpop.f32.mrf.mxu1  ;;  %v1176_v37 = vpop.f32.mrf.mxu0 }
 0x13d   : > { %v3708_v13 = vpop.f32.mrf.mxu2  ;;  %v3710_v17 = vpop.f32.mrf.mxu3  ;;  %v3712_v44 = vadd.f32 %v1176_v37, %v886_v36 }
 0x13e   : > { %4499 = vst [vmem:[#allocation28_spill] sm:$0xff] %v3710_v17 }
 0x13f   : > { %4500 = vst [vmem:[#allocation29_spill] sm:$0xff] %v3712_v44 }
 0x144   : > { %v889_v9 = vpop.f32.mrf.mxu1  ;;  %v1179_v32 = vpop.f32.mrf.mxu0 }
 0x145   : > { %v3714_v50 = vpop.f32.mrf.mxu2  ;;  %v3716_v40 = vpop.f32.mrf.mxu3  ;;  %v3718_v33 = vadd.f32 %v1179_v32, %v889_v9 }
 0x146   : > { %4501 = vst [vmem:[#allocation30_spill] sm:$0xff] %v3714_v50 }
 0x147   : > { %4502 = vst [vmem:[#allocation31_spill] sm:$0xff] %v3716_v40  ;;  %2813 = vmatmul.msk.bf16.gmra.mxu1 %vm697_vm1, %v3440_v53  ;;  %2861 = vmatmul.msk.bf16.gmra.mxu0 %vm697_vm1, %v3383_v25 }
 0x148   : > { %4503 = vst [vmem:[#allocation32_spill] sm:$0xff] %v3718_v33 }
 0x14a   : > { %2829 = vmatmul.msk.bf16.gmra.mxu2 %vm697_vm1, %v3440_v53  ;;  %2845 = vmatmul.msk.bf16.gmra.mxu3 %vm697_vm1, %v3383_v25 }
 0x14c   : > { %v891_v37 = vpop.f32.mrf.mxu1  ;;  %v1181_v44 = vpop.f32.mrf.mxu0 }
 0x14d   : > { %v3728_v29 = vpop.f32.mrf.mxu2  ;;  %v3730_v36 = vpop.f32.mrf.mxu3  ;;  %v3732_v9 = vadd.f32 %v1181_v44, %v891_v37 }
 0x14f   : > { %4504 = vst [vmem:[#allocation33_spill] sm:$0xff] %v3732_v9 }
 0x154   : > { %v894_v40 = vpop.f32.mrf.mxu1  ;;  %v1184_v50 = vpop.f32.mrf.mxu0 }
 0x155   : > { %v3734_v32 = vpop.f32.mrf.mxu2  ;;  %v3736_v33 = vpop.f32.mrf.mxu3  ;;  %v3738_v17 = vadd.f32 %v1184_v50, %v894_v40 }
 0x156   : > { %4505 = vst [vmem:[#allocation34_spill] sm:$0xff] %v3736_v33 }
 0x157   : > { %4506 = vst [vmem:[#allocation35_spill] sm:$0xff] %v3738_v17  ;;  %2862 = vmatmul.msk.bf16.vlgmr.msra.gmra.mxu1 %vm697_vm1, %v3450_v61  ;;  %2912 = vmatmul.msk.bf16.vlgmr.msra.gmra.mxu0 %vm697_vm1, %v3394_v26 }
 0x15a   : > { %2880 = vmatmul.msk.bf16.vlgmr.msra.gmra.mxu2 %vm697_vm1, %v3394_v26  ;;  %2896 = vmatmul.msk.bf16.vlgmr.msra.gmra.mxu3 %vm697_vm1, %v3394_v26 }
 0x15c   : > { %v896_v44 = vpop.f32.mrf.mxu1  ;;  %v1186_v37 = vpop.f32.mrf.mxu0 }
 0x15d   : > { %v3748_v25 = vpop.f32.mrf.mxu2  ;;  %v3750_v53 = vpop.f32.mrf.mxu3  ;;  %v3752_v40 = vadd.f32 %v1186_v37, %v896_v44 }
 0x15e   : > { %4507 = vst [vmem:[#allocation36_spill] sm:$0xff] %v3750_v53 }
 0x15f   : > { %4508 = vst [vmem:[#allocation37_spill] sm:$0xff] %v3752_v40 }
 0x164   : > { %v899_v17 = vpop.f32.mrf.mxu1  ;;  %v1189_v9 = vpop.f32.mrf.mxu0 }
 0x165   : > { %v3754_v50 = vpop.f32.mrf.mxu2  ;;  %v3756_v61 = vpop.f32.mrf.mxu3  ;;  %v3758_v33 = vadd.f32 %v1189_v9, %v899_v17 }
 0x166   : > { %4509 = vst [vmem:[#allocation38_spill] sm:$0xff] %v3754_v50 }
 0x167   : > { %4510 = vst [vmem:[#allocation39_spill] sm:$0xff] %v3756_v61  ;;  %2863 = vmatmul.msk.bf16.gmra.mxu1 %vm697_vm1, %v3460_v6  ;;  %2913 = vmatmul.msk.bf16.gmra.mxu0 %vm697_vm1, %v3431_v47 }
 0x168   : > { %4511 = vst [vmem:[#allocation40_spill] sm:$0xff] %v3758_v33 }
 0x16a   : > { %2881 = vmatmul.msk.bf16.gmra.mxu2 %vm697_vm1, %v3431_v47  ;;  %2897 = vmatmul.msk.bf16.gmra.mxu3 %vm697_vm1, %v3431_v47 }
 0x16c   : > { %v901_v40 = vpop.f32.mrf.mxu1  ;;  %v1191_v61 = vpop.f32.mrf.mxu0 }
 0x16d   : > { %v3768_v44 = vpop.f32.mrf.mxu2  ;;  %v3770_v37 = vpop.f32.mrf.mxu3  ;;  %v3772_v17 = vadd.f32 %v1191_v61, %v901_v40 }
 0x16e   : > { %4512 = vst [vmem:[#allocation41_spill] sm:$0xff] %v3770_v37 }
 0x16f   : > { %4513 = vst [vmem:[#allocation42_spill] sm:$0xff] %v3772_v17 }
 0x174   : > { %v904_v33 = vpop.f32.mrf.mxu1  ;;  %v1194_v50 = vpop.f32.mrf.mxu0 }
 0x175   : > { %v3774_v9 = vpop.f32.mrf.mxu2  ;;  %v3776_v6 = vpop.f32.mrf.mxu3  ;;  %v3778_v53 = vadd.f32 %v1194_v50, %v904_v33 }
 0x176   : > { %4514 = vst [vmem:[#allocation43_spill] sm:$0xff] %v3774_v9 }
 0x177   : > { %4515 = vst [vmem:[#allocation44_spill] sm:$0xff] %v3776_v6  ;;  %2864 = vmatmul.msk.bf16.gmra.mxu1 %vm697_vm1, %v3350_v18  ;;  %2914 = vmatmul.msk.bf16.gmra.mxu0 %vm697_vm1, %v3353_v19 }
 0x178   : > { %4516 = vst [vmem:[#allocation45_spill] sm:$0xff] %v3778_v53 }
 0x17a   : > { %2882 = vmatmul.msk.bf16.gmra.mxu2 %vm697_vm1, %v3353_v19  ;;  %2898 = vmatmul.msk.bf16.gmra.mxu3 %vm697_vm1, %v3353_v19 }
 0x17c   : > { %v906_v17 = vpop.f32.mrf.mxu1  ;;  %v1196_v6 = vpop.f32.mrf.mxu0 }
 0x17d   : > { %v3788_v40 = vpop.f32.mrf.mxu2  ;;  %v3790_v61 = vpop.f32.mrf.mxu3  ;;  %v3792_v33 = vadd.f32 %v1196_v6, %v906_v17 }
 0x17e   : > { %4517 = vst [vmem:[#allocation46_spill] sm:$0xff] %v3790_v61 }
 0x17f   : > { %4518 = vst [vmem:[#allocation47_spill] sm:$0xff] %v3792_v33 }
 0x184   : > { %v909_v53 = vpop.f32.mrf.mxu1  ;;  %v1199_v9 = vpop.f32.mrf.mxu0 }
 0x185   : > { %v3794_v50 = vpop.f32.mrf.mxu2  ;;  %v3796_v18 = vpop.f32.mrf.mxu3  ;;  %v3798_v37 = vadd.f32 %v1199_v9, %v909_v53 }
 0x186   : > { %4519 = vst [vmem:[#allocation48_spill] sm:$0xff] %v3794_v50 }
 0x187   : > { %4520 = vst [vmem:[#allocation49_spill] sm:$0xff] %v3796_v18  ;;  %2865 = vmatmul.msk.bf16.gmra.mxu1 %vm697_vm1, %v3374_v22  ;;  %2915 = vmatmul.msk.bf16.gmra.mxu0 %vm697_vm1, %v3377_v23 }
 0x188   : > { %4521 = vst [vmem:[#allocation50_spill] sm:$0xff] %v3798_v37 }
 0x18a   : > { %2883 = vmatmul.msk.bf16.gmra.mxu2 %vm697_vm1, %v3377_v23  ;;  %2899 = vmatmul.msk.bf16.gmra.mxu3 %vm697_vm1, %v3377_v23 }
 0x18c   : > { %v911_v33 = vpop.f32.mrf.mxu1  ;;  %v1201_v18 = vpop.f32.mrf.mxu0 }
 0x18d   : > { %v3808_v17 = vpop.f32.mrf.mxu2  ;;  %v3810_v6 = vpop.f32.mrf.mxu3  ;;  %v3812_v53 = vadd.f32 %v1201_v18, %v911_v33 }
 0x18e   : > { %4522 = vst [vmem:[#allocation51_spill] sm:$0xff] %v3810_v6 }
 0x18f   : > { %4523 = vst [vmem:[#allocation52_spill] sm:$0xff] %v3812_v53 }
 0x194   : > { %v914_v37 = vpop.f32.mrf.mxu1  ;;  %v1204_v50 = vpop.f32.mrf.mxu0 }
 0x195   : > { %v3814_v9 = vpop.f32.mrf.mxu2  ;;  %v3816_v22 = vpop.f32.mrf.mxu3  ;;  %v3818_v61 = vadd.f32 %v1204_v50, %v914_v37 }
 0x196   : > { %4524 = vst [vmem:[#allocation53_spill] sm:$0xff] %v3814_v9 }
 0x197   : > { %4525 = vst [vmem:[#allocation54_spill] sm:$0xff] %v3816_v22  ;;  %2866 = vmatmul.msk.bf16.gmra.mxu1 %vm697_vm1, %v3394_v26  ;;  %2916 = vmatmul.msk.bf16.gmra.mxu0 %vm697_vm1, %v3397_v27 }
 0x198   : > { %4526 = vst [vmem:[#allocation55_spill] sm:$0xff] %v3818_v61 }
 0x19a   : > { %2884 = vmatmul.msk.bf16.gmra.mxu2 %vm697_vm1, %v3397_v27  ;;  %2900 = vmatmul.msk.bf16.gmra.mxu3 %vm697_vm1, %v3397_v27 }
 0x19c   : > { %v916_v53 = vpop.f32.mrf.mxu1  ;;  %v1206_v22 = vpop.f32.mrf.mxu0 }
 0x19d   : > { %v3828_v33 = vpop.f32.mrf.mxu2  ;;  %v3830_v18 = vpop.f32.mrf.mxu3  ;;  %v3832_v37 = vadd.f32 %v1206_v22, %v916_v53 }
 0x19e   : > { %4527 = vst [vmem:[#allocation56_spill] sm:$0xff] %v3830_v18 }
 0x19f   : > { %4528 = vst [vmem:[#allocation57_spill] sm:$0xff] %v3832_v37 }
 0x1a4   : > { %v919_v61 = vpop.f32.mrf.mxu1  ;;  %v1209_v9 = vpop.f32.mrf.mxu0 }
 0x1a5   : > { %v3834_v50 = vpop.f32.mrf.mxu2  ;;  %v3836_v26 = vpop.f32.mrf.mxu3  ;;  %v3838_v6 = vadd.f32 %v1209_v9, %v919_v61 }
 0x1a6   : > { %4529 = vst [vmem:[#allocation58_spill] sm:$0xff] %v3834_v50 }
 0x1a7   : > { %4530 = vst [vmem:[#allocation59_spill] sm:$0xff] %v3836_v26  ;;  %2867 = vmatmul.msk.bf16.gmra.mxu1 %vm697_vm1, %v3431_v47  ;;  %2917 = vmatmul.msk.bf16.gmra.mxu0 %vm697_vm1, %v3434_v48 }
 0x1a8   : > { %4531 = vst [vmem:[#allocation60_spill] sm:$0xff] %v3838_v6 }
 0x1aa   : > { %2885 = vmatmul.msk.bf16.gmra.mxu2 %vm697_vm1, %v3434_v48  ;;  %2901 = vmatmul.msk.bf16.gmra.mxu3 %vm697_vm1, %v3434_v48 }
 0x1ac   : > { %v921_v37 = vpop.f32.mrf.mxu1  ;;  %v1211_v26 = vpop.f32.mrf.mxu0 }
 0x1ad   : > { %v3848_v53 = vpop.f32.mrf.mxu2  ;;  %v3850_v22 = vpop.f32.mrf.mxu3  ;;  %v3852_v61 = vadd.f32 %v1211_v26, %v921_v37 }
 0x1ae   : > { %4532 = vst [vmem:[#allocation61_spill] sm:$0xff] %v3850_v22 }
 0x1af   : > { %4533 = vst [vmem:[#allocation62_spill] sm:$0xff] %v3852_v61 }
 0x1b4   : > { %v924_v6 = vpop.f32.mrf.mxu1  ;;  %v1214_v50 = vpop.f32.mrf.mxu0 }
 0x1b5   : > { %v3854_v9 = vpop.f32.mrf.mxu2  ;;  %v3856_v47 = vpop.f32.mrf.mxu3  ;;  %v3858_v18 = vadd.f32 %v1214_v50, %v924_v6 }
 0x1b6   : > { %4534 = vst [vmem:[#allocation63_spill] sm:$0xff] %v3854_v9 }
 0x1b7   : > { %4535 = vst [vmem:[#allocation64_spill] sm:$0xff] %v3856_v47  ;;  %2868 = vmatmul.msk.bf16.gmra.mxu1 %vm697_vm1, %v3353_v19  ;;  %2918 = vmatmul.msk.bf16.gmra.mxu0 %vm697_vm1, %v3356_v20 }
 0x1b8   : > { %4536 = vst [vmem:[#allocation65_spill] sm:$0xff] %v3858_v18 }
 0x1ba   : > { %2886 = vmatmul.msk.bf16.gmra.mxu2 %vm697_vm1, %v3356_v20  ;;  %2902 = vmatmul.msk.bf16.gmra.mxu3 %vm697_vm1, %v3356_v20 }
 0x1bc   : > { %v926_v61 = vpop.f32.mrf.mxu1  ;;  %v1216_v47 = vpop.f32.mrf.mxu0 }
 0x1bd   : > { %v3868_v37 = vpop.f32.mrf.mxu2  ;;  %v3870_v26 = vpop.f32.mrf.mxu3  ;;  %v3872_v6 = vadd.f32 %v1216_v47, %v926_v61 }
 0x1be   : > { %4537 = vst [vmem:[#allocation66_spill] sm:$0xff] %v3868_v37 }
 0x1bf   : > { %4538 = vst [vmem:[#allocation67_spill] sm:$0xff] %v3870_v26 }
 0x1c0   : > { %4539 = vst [vmem:[#allocation68_spill] sm:$0xff] %v3872_v6 }
 0x1c4   : > { %v929_v18 = vpop.f32.mrf.mxu1  ;;  %v1219_v9 = vpop.f32.mrf.mxu0 }
 0x1c5   : > { %v3874_v50 = vpop.f32.mrf.mxu2  ;;  %v3876_v19 = vpop.f32.mrf.mxu3  ;;  %v3878_v22 = vadd.f32 %v1219_v9, %v929_v18 }
 0x1c6   : > { %4540 = vst [vmem:[#allocation69_spill] sm:$0xff] %v3874_v50 }
 0x1c7   : > { %4541 = vst [vmem:[#allocation70_spill] sm:$0xff] %v3876_v19  ;;  %2869 = vmatmul.msk.bf16.gmra.mxu1 %vm697_vm1, %v3377_v23  ;;  %2919 = vmatmul.msk.bf16.gmra.mxu0 %vm697_vm1, %v3380_v24 }
 0x1c8   : > { %4542 = vst [vmem:[#allocation71_spill] sm:$0xff] %v3878_v22 }
 0x1ca   : > { %2887 = vmatmul.msk.bf16.gmra.mxu2 %vm697_vm1, %v3380_v24  ;;  %2903 = vmatmul.msk.bf16.gmra.mxu3 %vm697_vm1, %v3380_v24  ;;  %v1702_v24 = vlaneseq }
 0x1cc   : > { %v931_v6 = vpop.f32.mrf.mxu1  ;;  %v1221_v19 = vpop.f32.mrf.mxu0 }
 0x1cd   : > { %v3888_v61 = vpop.f32.mrf.mxu2  ;;  %v3890_v47 = vpop.f32.mrf.mxu3  ;;  %v3892_v18 = vadd.f32 %v1221_v19, %v931_v6 }
 0x1cf   : > { %4543 = vst [vmem:[#allocation72_spill] sm:$0xff] %v3892_v18 }
 0x1d4   : > { %v1233_v22 = vpop.f32.mrf.mxu1  ;;  %v1526_v50 = vpop.f32.mrf.mxu0 }
 0x1d5   : > { %v3894_v9 = vpop.f32.mrf.mxu2  ;;  %v3896_v23 = vpop.f32.mrf.mxu3  ;;  %v1234_v26 = vadd.f32 %v1233_v22, %v3584_v58 }
 0x1d6   : > { %4544 = vst [vmem:[#allocation73_spill] sm:$0xff] %v3894_v9 }
 0x1d7   : > { %4545 = vst [vmem:[#allocation74_spill] sm:$0xff] %v3896_v23  ;;  %v3899_v37 = vadd.f32 %v1526_v50, %v1234_v26  ;;  %2870 = vmatmul.msk.bf16.gmra.mxu1 %vm697_vm1, %v3397_v27  ;;  %2920 = vmatmul.msk.bf16.gmra.mxu0 %vm697_vm1, %v3400_v28  ;;  %v3915_v26 = vshrl.u32 %v1702_v24, 7 }
 0x1d9   : > { %vm2120_vm2 = vcmp.lt.s32.totalorder %v3915_v26, 7  ;;  %vm1991_vm3 = vcmp.lt.s32.totalorder %v3915_v26, 1 }
 0x1da   : > { %2888 = vmatmul.msk.bf16.gmra.mxu2 %vm697_vm1, %v3400_v28  ;;  %2904 = vmatmul.msk.bf16.gmra.mxu3 %vm697_vm1, %v3400_v28  ;;  %v4472_v28 = vrot.slane %v3899_v37, 1 }
 0x1dc   : > { %v1235_v22 = vpop.f32.mrf.mxu1  ;;  %v1528_v27 = vpop.f32.mrf.mxu0 }
 0x1dd   : > { %v1348_v6 = vpop.f32.mrf.mxu2  ;;  %v1437_v19 = vpop.f32.mrf.mxu3  ;;  %v1236_v50 = vadd.f32 %v1235_v22, %v3590_v1 }
 0x1de   : > { %v3910_v18 = vadd.f32 %v1348_v6, %v3586_v60  ;;  %v3913_v58 = vadd.f32 %v1437_v19, %v3574_v57 }
 0x1df   : > { %v1611_v23 = vadd.f32 %v1528_v27, %v1236_v50 }
 0x1e0   : > { %4546 = vst [vmem:[#allocation75_spill] sm:$0xff] %v3910_v18 }
 0x1e1   : > { %4547 = vst [vmem:[#allocation76_spill] sm:$0xff] %v3913_v58  ;;  %v2089_v9 = vrot.slane %v1611_v23, 1  ;;  %v4471_v23 = vrot.slane %v3910_v18, 7 }
 0x1e3   : > { %v3924_v60 = vsel %vm2120_vm2, %v4472_v28, %v2089_v9 }
 0x1e4   : > { %4548 = vst [vmem:[#allocation77_spill] sm:$0xff] %v3924_v60  ;;  %v1238_v58 = vpop.f32.mrf.mxu1  ;;  %v1531_v1 = vpop.f32.mrf.mxu0  ;;  %v1706_v60 = vadd.s32 24, %v3915_v26 }
 0x1e5   : > { %v1350_v57 = vpop.f32.mrf.mxu2  ;;  %v1439_v6 = vpop.f32.mrf.mxu3  ;;  %v1239_v22 = vadd.f32 %v1238_v58, %v3604_v7 }
 0x1e6   : > { %v1609_v19 = vadd.f32 %v1350_v57, %v3592_v3  ;;  %v1610_v24 = vadd.f32 %v1439_v6, %v3588_v0  ;;  %v1738_v18 = vand.u32 31, %v1706_v60 }
 0x1e7   : > { %v1614_v50 = vadd.f32 %v1531_v1, %v1239_v22  ;;  %2871 = vmatmul.msk.bf16.gmra.mxu1 %vm697_vm1, %v3434_v48  ;;  %2921 = vmatmul.msk.bf16.gmra.mxu0 %vm697_vm1, %v3437_v52 }
 0x1e8   : > { %v1960_v27 = vrot.slane %v1609_v19, 7  ;;  %vm1866_vm4 = vcmp.lt.s32.totalorder %v1738_v18, 31  ;;  %v3247_v18 = vmov 0.0  }
 0x1e9   : > { %v2090_v7 = vrot.slane %v1614_v50, 1 }
 0x1ea   : > { %v2022_v0 = vsel %vm1991_vm3, %v4471_v23, %v1960_v27  ;;  %2889 = vmatmul.msk.bf16.gmra.mxu2 %vm697_vm1, %v3437_v52  ;;  %2905 = vmatmul.msk.bf16.gmra.mxu3 %vm697_vm1, %v3437_v52 }
 0x1eb   : > { %v2057_v3 = vadd.f32 %v2022_v0, %v1610_v24  ;;  %v2150_v58 = vsel %vm2120_vm2, %v2089_v9, %v2090_v7 }
 0x1ec   : > { %v1240_v1 = vpop.f32.mrf.mxu1  ;;  %v1533_v22 = vpop.f32.mrf.mxu0 }
 0x1ed   : > { %v1353_v48 = vpop.f32.mrf.mxu2  ;;  %v1442_v57 = vpop.f32.mrf.mxu3  ;;  %v3945_v6 = vadd.f32 %v2150_v58, %v2057_v3  ;;  %v1241_v23 = vadd.f32 %v1240_v1, %v3610_v2  ;;  %v1707_v2 = vadd.s32 32, %v3915_v26 }
 0x1ee   : > { %v1612_v19 = vadd.f32 %v1353_v48, %v3606_v56  ;;  %v1613_v52 = vadd.f32 %v1442_v57, %v3594_v55 }
 0x1ef   : > { %v1617_v24 = vadd.f32 %v1533_v22, %v1241_v23  ;;  %v1739_v1 = vand.u32 31, %v1707_v2  ;;  %v2936_v22 = vsel %vm1866_vm4, 1.0, %v3247_v18 }
 0x1f0   : > { %v1961_v28 = vrot.slane %v1612_v19, 7 }
 0x1f1   : > { %v2091_v0 = vrot.slane %v1617_v24, 1  ;;  %vm1771_vm5 = vcmp.gt.s32.totalorder %v1739_v1, 0 }
 0x1f2   : > { %v2021_v50 = vsel %vm1991_vm3, %v1960_v27, %v1961_v28 }
 0x1f3   : > { %v2058_v9 = vadd.f32 %v2021_v50, %v1613_v52  ;;  %v2149_v3 = vsel %vm2120_vm2, %v2090_v7, %v2091_v0 }
 0x1f4   : > { %v1243_v19 = vpop.f32.mrf.mxu1  ;;  %v1536_v55 = vpop.f32.mrf.mxu0 }
 0x1f5   : > { %v1355_v56 = vpop.f32.mrf.mxu2  ;;  %v1444_v58 = vpop.f32.mrf.mxu3  ;;  %v1244_v23 = vadd.f32 %v1243_v19, %v3624_v15  ;;  %v2187_v27 = vadd.f32 %v2149_v3, %v2058_v9 }
 0x1f6   : > { %v1615_v48 = vadd.f32 %v1355_v56, %v3612_v5  ;;  %v1616_v60 = vadd.f32 %v1444_v58, %v3608_v63  ;;  %v3975_v63 = vld [vmem:[%s4467_s4] ss:$0 sm:$0xff]  ;;  %v3124_v5 = vld [vmem:[%s3970_s19 + $0x8] sm:$0xff]  }
 0x1f7   : > { %v1620_v7 = vadd.f32 %v1536_v55, %v1244_v23  ;;  %2872 = vmatmul.msk.bf16.gmra.mxu1 %vm697_vm1, %v3356_v20  ;;  %2922 = vmatmul.msk.bf16.gmra.mxu0 %vm697_vm1, %v3359_v21  ;;  %v2223_v24 = vadd.f32 %v3975_v63, %v2187_v27  ;;  %v2984_v3 = vunpack.c.l.bf16 %v3124_v5  ;;  %v2985_v19 = vunpack.c.h.bf16 %v3124_v5 }
 0x1f8   : > { %v1962_v57 = vrot.slane %v1615_v48, 7  ;;  %v3992_v48 = vstv %s3957_s14  ;;  %s505_s14 = sadd.s32 %s504_s12, %s3999_s27  ;;  %s4102_s27 = scalar_lea.vmem %s4465_s2, %s2709_s16 }
 0x1f9   : > { %v2092_v52 = vrot.slane %v1620_v7, 1  ;;  %v2289_v23 = vmul.f32 %v3992_v48, %v2223_v24  ;;  %vm2256_vm6 = vcmp.ge.f32.partialorder %v2223_v24, 0.0  ;;  %s506_s15 = sand.u32 4294901760, %s505_s14 }
 0x1fa   : > { %v2020_v20 = vsel %vm1991_vm3, %v1961_v28, %v1962_v57  ;;  %2890 = vmatmul.msk.bf16.gmra.mxu2 %vm697_vm1, %v3359_v21  ;;  %2906 = vmatmul.msk.bf16.gmra.mxu3 %vm697_vm1, %v3359_v21  ;;  %s4656_s15 = smov (%p501_p0, %s506_s15), 2143289344 }
 0x1fb   : > { %v2059_v15 = vadd.f32 %v2020_v20, %v1616_v60  ;;  %v2148_v50 = vsel %vm2120_vm2, %v2091_v0, %v2092_v52  ;;  %v2929_v60 = vsel %vm1771_vm5, 1.0, %v3247_v18  ;;  %s509_s20 = sshrl.u32 %s4656_s15, 16 }
 0x1fc   : > { %v2156_v21 = vmul.f32 %v2936_v22, %v2148_v50  ;;  %v1245_v58 = vpop.f32.mrf.mxu1  ;;  %v1538_v2 = vpop.f32.mrf.mxu0  ;;  %v2321_v50 = vsel %vm2256_vm6, %v2223_v24, %v2289_v23  ;;  %s647_s23 = sshll.u32 %s509_s20, 16 }
 0x1fd   : > { %v1358_v9 = vpop.f32.mrf.mxu2  ;;  %v1447_v28 = vpop.f32.mrf.mxu3  ;;  %v1246_v55 = vadd.f32 %v1245_v58, %v3631_v62  ;;  %v2418_v62 = vmul.f32 -1.0, %v2985_v19  ;;  %s648_s26 = sor.u32 %s647_s23, %s509_s20 }
 0x1fe   : > { %v1618_v56 = vadd.f32 %v1358_v9, %v3627_v11  ;;  %v2188_v0 = vadd.f32 %v2156_v21, %v2059_v15  ;;  %v2417_v11 = vmul.f32 -1.0, %v2984_v3  ;;  %v1619_v5 = vadd.f32 %v1447_v28, %v3614_v42 }
 0x1ff   : > { %v1623_v7 = vadd.f32 %v1538_v2, %v1246_v55 }
 0x200   : > { %v1963_v27 = vrot.slane %v1618_v56, 7  ;;  %v2224_v1 = vadd.f32 %v3975_v63, %v2188_v0  ;;  %v2449_v19 = vadd.f32 %v2417_v11, %v2321_v50 }
 0x201   : > { %v2093_v22 = vrot.slane %v1623_v7, 1  ;;  %v3199_v7 = vld [vmem:[%s3347_s21 + $0x48] sm:$0xff] }
 0x202   : > { %v2019_v20 = vsel %vm1991_vm3, %v1962_v57, %v1963_v27  ;;  %vm2257_vm7 = vcmp.ge.f32.partialorder %v2224_v1, 0.0  ;;  %v2290_v9 = vmul.f32 %v3992_v48, %v2224_v1 }
 0x203   : > { %v2028_v15 = vmul.f32 %v2929_v60, %v2019_v20  ;;  %v2147_v3 = vsel %vm2120_vm2, %v2092_v52, %v2093_v22 }
 0x204   : > { %v2322_v57 = vsel %vm2257_vm7, %v2224_v1, %v2290_v9  ;;  %v1248_v42 = vpop.f32.mrf.mxu1  ;;  %v1541_v28 = vpop.f32.mrf.mxu0  ;;  %v3125_v1 = vld [vmem:[%s3970_s19 + $0x10] sm:$0xff]  }
 0x205   : > { %v2060_v21 = vadd.f32 %v2028_v15, %v1619_v5  ;;  %v1360_v56 = vpop.f32.mrf.mxu2  ;;  %v1449_v58 = vpop.f32.mrf.mxu3  ;;  %v2450_v24 = vadd.f32 %v2418_v62, %v2322_v57  ;;  %v1249_v23 = vadd.f32 %v1248_v42, %v3646_v35  ;;  %v4026_v35 = vld [vmem:[%s3347_s21 + $0x68] sm:$0xff]  ;;  %v2988_v5 = vunpack.c.l.bf16 %v3125_v1 }
 0x206   : > { %v1621_v2 = vadd.f32 %v1360_v56, %v3634_v38  ;;  %v1622_v0 = vadd.f32 %v1449_v58, %v3629_v59  ;;  %v2989_v50 = vunpack.c.h.bf16 %v3125_v1 }
 0x207   : > { %v2189_v55 = vadd.f32 %v2147_v3, %v2060_v21  ;;  %v3050_v38 = vpack.c.bf16 %v2450_v24, %v2449_v19  ;;  %v1626_v60 = vadd.f32 %v1541_v28, %v1249_v23  ;;  %2873 = vmatmul.msk.bf16.gmra.mxu1 %vm697_vm1, %v3199_v7  ;;  %2923 = vmatmul.msk.bf16.gmra.mxu0 %vm697_vm1, %v4026_v35  ;;  %v1710_v28 = vadd.s32 56, %v3915_v26 }
 0x208   : > { %v1964_v52 = vrot.slane %v1621_v2, 7  ;;  %v2420_v19 = vmul.f32 -1.0, %v2989_v50 }
 0x209   : > { %v2225_v11 = vadd.f32 %v3975_v63, %v2189_v55  ;;  %3139 = vst [vmem:[%s4018_s10 + $0x8] sm:$0xff] %v3050_v38   ;;  %v2094_v62 = vrot.slane %v1626_v60, 1  ;;  %v1742_v1 = vand.u32 31, %v1710_v28 }
 0x20a   : > { %v2018_v20 = vsel %vm1991_vm3, %v1963_v27, %v1964_v52  ;;  %2891 = vmatmul.msk.bf16.gmra.mxu2 %vm697_vm1, %v4026_v35  ;;  %2907 = vmatmul.msk.bf16.gmra.mxu3 %vm697_vm1, %v4026_v35 }
 0x20b   : > { %v2061_v59 = vadd.f32 %v2018_v20, %v1622_v0  ;;  %v2146_v15 = vsel %vm2120_vm2, %v2093_v22, %v2094_v62  ;;  %v2291_v21 = vmul.f32 %v3992_v48, %v2225_v11  ;;  %vm2258_vm8 = vcmp.ge.f32.partialorder %v2225_v11, 0.0 }
 0x20c   : > { %v1250_v58 = vpop.f32.mrf.mxu1  ;;  %v1543_v57 = vpop.f32.mrf.mxu0  ;;  %vm4075_vm10 = vcmp.lt.s32.totalorder %v1742_v1, 31 }
 0x20d   : > { %v1363_v9 = vpop.f32.mrf.mxu2  ;;  %v1452_v27 = vpop.f32.mrf.mxu3  ;;  %v2190_v3 = vadd.f32 %v2146_v15, %v2061_v59  ;;  %v1251_v22 = vadd.f32 %v1250_v58, %v3653_v54  ;;  %v2323_v23 = vsel %vm2258_vm8, %v2225_v11, %v2291_v21 }
 0x20e   : > { %v1624_v56 = vadd.f32 %v1363_v9, %v3649_v31  ;;  %v2419_v31 = vmul.f32 -1.0, %v2988_v5  ;;  %v1625_v24 = vadd.f32 %v1452_v27, %v3636_v14  ;;  %v1711_v5 = vadd.s32 64, %v3915_v26 }
 0x20f   : > { %v2226_v2 = vadd.f32 %v3975_v63, %v2190_v3  ;;  %v1629_v55 = vadd.f32 %v1543_v57, %v1251_v22  ;;  %v3202_v22 = vld [vmem:[%s3347_s21 + $0x70] sm:$0xff] }
 0x210   : > { %v1965_v42 = vrot.slane %v1624_v56, 7  ;;  %v2451_v14 = vadd.f32 %v2419_v31, %v2323_v23 }
 0x211   : > { %vm2259_vm9 = vcmp.ge.f32.partialorder %v2226_v2, 0.0  ;;  %v2292_v38 = vmul.f32 %v3992_v48, %v2226_v2  ;;  %v2095_v60 = vrot.slane %v1629_v55, 1 }
 0x212   : > { %v2017_v54 = vsel %vm1991_vm3, %v1964_v52, %v1965_v42 }
 0x213   : > { %v2062_v0 = vadd.f32 %v2017_v54, %v1625_v24  ;;  %v2324_v7 = vsel %vm2259_vm9, %v2226_v2, %v2292_v38  ;;  %v2145_v20 = vsel %vm2120_vm2, %v2094_v62, %v2095_v60  ;;  %v1743_v2 = vand.u32 31, %v1711_v5 }
 0x214   : > { %v2452_v11 = vadd.f32 %v2420_v19, %v2324_v7  ;;  %v1253_v50 = vpop.f32.mrf.mxu1  ;;  %v1546_v9 = vpop.f32.mrf.mxu0  ;;  %v1076_v24 = vadd.f32 %v3670_v49, %v3486_v8  ;;  %v1078_v49 = vadd.f32 %v3676_v34, %v3500_v12 }
 0x215   : > { %v1365_v52 = vpop.f32.mrf.mxu2  ;;  %v1454_v59 = vpop.f32.mrf.mxu3  ;;  %v1254_v21 = vadd.f32 %v1253_v50, %v3668_v43  ;;  %v2191_v3 = vadd.f32 %v2145_v20, %v2062_v0  ;;  %v3126_v43 = vld [vmem:[%s3970_s19 + $0x18] sm:$0xff]   ;;  %vm1775_vm11 = vcmp.gt.s32.totalorder %v1743_v2, 0  ;;  %v2971_v20 = vld [vmem:[%s4102_s27] sm:$0xff]  }
 0x216   : > { %v1627_v15 = vadd.f32 %v1365_v52, %v3656_v10  ;;  %v3055_v27 = vpack.c.bf16 %v2452_v11, %v2451_v14  ;;  %v1628_v62 = vadd.f32 %v1454_v59, %v3651_v46  ;;  %v3201_v10 = vld [vmem:[%s3347_s21 + $0x50] sm:$0xff]  ;;  %v2937_v46 = vsel %vm4075_vm10, 1.0, %v3247_v18 }
 0x217   : > { %v1632_v57 = vadd.f32 %v1546_v9, %v1254_v21  ;;  %2874 = vmatmul.msk.bf16.gmra.mxu1 %vm697_vm1, %v3201_v10  ;;  %2924 = vmatmul.msk.bf16.gmra.mxu0 %vm697_vm1, %v3202_v22  ;;  %v2227_v55 = vadd.f32 %v3975_v63, %v2191_v3  ;;  %v2993_v7 = vunpack.c.h.bf16 %v3126_v43  ;;  %v2930_v5 = vsel %vm1775_vm11, 1.0, %v3247_v18 }
 0x218   : > { %v1966_v56 = vrot.slane %v1627_v15, 7  ;;  %3140 = vst [vmem:[%s4018_s10 + $0x10] sm:$0xff] %v3055_v27   ;;  %v649_v9 = vstv %s648_s26  ;;  %v2972_v12 = vunpack.c.l.bf16 %v2971_v20 }
 0x219   : > { %v2096_v19 = vrot.slane %v1632_v57, 1  ;;  %v2293_v52 = vmul.f32 %v3992_v48, %v2227_v55  ;;  %vm2260_vm12 = vcmp.ge.f32.partialorder %v2227_v55, 0.0  ;;  %v2422_v21 = vmul.f32 -1.0, %v2993_v7 }
 0x21a   : > { %v2016_v28 = vsel %vm1991_vm3, %v1965_v42, %v1966_v56  ;;  %2892 = vmatmul.msk.bf16.gmra.mxu2 %vm697_vm1, %v3202_v22  ;;  %2908 = vmatmul.msk.bf16.gmra.mxu3 %vm697_vm1, %v3202_v22  ;;  %v2992_v42 = vunpack.c.l.bf16 %v3126_v43  ;;  %v4119_v22 = vunpack.c.l.bf16 %v649_v9 }
 0x21b   : > { %v2063_v31 = vadd.f32 %v2016_v28, %v1628_v62  ;;  %v2144_v23 = vsel %vm2120_vm2, %v2095_v60, %v2096_v19  ;;  %v2973_v62 = vunpack.c.h.bf16 %v2971_v20  ;;  %v2325_v57 = vsel %vm2260_vm12, %v2227_v55, %v2293_v52  ;;  %v3127_v20 = vld [vmem:[%s3970_s19 + $0x20] sm:$0xff]  }
 0x21c   : > { %v2160_v0 = vmul.f32 %v2937_v46, %v2144_v23  ;;  %v1255_v14 = vpop.f32.mrf.mxu1  ;;  %v1548_v8 = vpop.f32.mrf.mxu0  ;;  %v2421_v15 = vmul.f32 -1.0, %v2992_v42 }
 0x21d   : > { %v1368_v38 = vpop.f32.mrf.mxu2  ;;  %v1457_v54 = vpop.f32.mrf.mxu3  ;;  %v1256_v11 = vadd.f32 %v1255_v14, %v3674_v51 }
 0x21e   : > { %v1630_v1 = vadd.f32 %v1368_v38, %v1076_v24  ;;  %v2192_v59 = vadd.f32 %v2160_v0, %v2063_v31  ;;  %v1631_v51 = vadd.f32 %v1457_v54, %v3658_v41  ;;  %v2453_v42 = vadd.f32 %v2421_v15, %v2325_v57 }
 0x21f   : > { %v1635_v50 = vadd.f32 %v1548_v8, %v1256_v11  ;;  %v656_v0 = vmul.f32 %v2972_v12, %v4119_v22  ;;  %v3203_v8 = vld [vmem:[%s3347_s21 + $0x58] sm:$0xff] }
 0x220   : > { %v1967_v60 = vrot.slane %v1630_v1, 7  ;;  %v2228_v27 = vadd.f32 %v3975_v63, %v2192_v59  ;;  %v1081_v59 = vadd.f32 %v3690_v30, %v3506_v16  ;;  %v1714_v16 = vadd.s32 88, %v3915_v26 }
 0x221   : > { %v2097_v58 = vrot.slane %v1635_v50, 1  ;;  %v2996_v50 = vunpack.c.l.bf16 %v3127_v20 }
 0x222   : > { %v2015_v3 = vsel %vm1991_vm3, %v1966_v56, %v1967_v60  ;;  %vm2261_vm13 = vcmp.ge.f32.partialorder %v2228_v27, 0.0  ;;  %v2294_v10 = vmul.f32 %v3992_v48, %v2228_v27 }
 0x223   : > { %v2032_v34 = vmul.f32 %v2930_v5, %v2015_v3  ;;  %v2143_v43 = vsel %vm2120_vm2, %v2096_v19, %v2097_v58  ;;  %v657_v19 = vmul.f32 %v2973_v62, %v4119_v22  ;;  %v660_v5 = vpack.c.bf16 %v656_v0, %v656_v0 }
 0x224   : > { %v2326_v56 = vsel %vm2261_vm13, %v2228_v27, %v2294_v10  ;;  %v1258_v41 = vpop.f32.mrf.mxu1  ;;  %v1551_v24 = vpop.f32.mrf.mxu0  ;;  %v2997_v27 = vunpack.c.h.bf16 %v3127_v20 }
 0x225   : > { %v2064_v2 = vadd.f32 %v2032_v34, %v1631_v51  ;;  %v1370_v28 = vpop.f32.mrf.mxu2  ;;  %v1459_v31 = vpop.f32.mrf.mxu3  ;;  %v2454_v55 = vadd.f32 %v2422_v21, %v2326_v56  ;;  %v1259_v38 = vadd.f32 %v1258_v41, %v3688_v39  ;;  %v661_v15 = vpack.c.bf16 %v657_v19, %v657_v19  ;;  %v3123_v41 = vld [vmem:[%s4102_s27 + $0x8] sm:$0xff]  }
 0x226   : > { %v1633_v46 = vadd.f32 %v1370_v28, %v1078_v49  ;;  %v1634_v1 = vadd.f32 %v1459_v31, %v3672_v45  ;;  %v3204_v49 = vld [vmem:[%s3347_s21 + $0x78] sm:$0xff]  ;;  %v2424_v28 = vmul.f32 -1.0, %v2997_v27  ;;  %v4552_v31 = vld [vmem:[#allocation24_spill] sm:$0xff] }
 0x227   : > { %v2193_v23 = vadd.f32 %v2143_v43, %v2064_v2  ;;  %v3060_v7 = vpack.c.bf16 %v2454_v55, %v2453_v42  ;;  %v1638_v14 = vadd.f32 %v1551_v24, %v1259_v38  ;;  %2875 = vmatmul.msk.bf16.gmra.mxu1 %vm697_vm1, %v3203_v8  ;;  %2925 = vmatmul.msk.bf16.gmra.mxu0 %vm697_vm1, %v3204_v49  ;;  %v678_v2 = vunpack.c.l.b16 %v660_v5  ;;  %v4553_v55 = vld [vmem:[#allocation9_spill] sm:$0xff] }
 0x228   : > { %v1968_v54 = vrot.slane %v1633_v46, 7  ;;  %v2423_v43 = vmul.f32 -1.0, %v2996_v50  ;;  %v1715_v8 = vadd.s32 96, %v3915_v26 }
 0x229   : > { %v2229_v11 = vadd.f32 %v3975_v63, %v2193_v23  ;;  %3141 = vst [vmem:[%s4018_s10 + $0x18] sm:$0xff] %v3060_v7   ;;  %v2098_v45 = vrot.slane %v1638_v14, 1  ;;  %v4554_v23 = vld [vmem:[#allocation26_spill] sm:$0xff]  ;;  %v1746_v7 = vand.u32 31, %v1714_v16 }
 0x22a   : > { %v2014_v39 = vsel %vm1991_vm3, %v1967_v60, %v1968_v54  ;;  %2893 = vmatmul.msk.bf16.gmra.mxu2 %vm697_vm1, %v3204_v49  ;;  %2909 = vmatmul.msk.bf16.gmra.mxu3 %vm697_vm1, %v3204_v49  ;;  %v1083_v38 = vadd.f32 %v4554_v23, %v4553_v55  ;;  %v2976_v49 = vunpack.c.l.bf16 %v3123_v41 }
 0x22b   : > { %v2065_v52 = vadd.f32 %v2014_v39, %v1634_v1  ;;  %v2142_v9 = vsel %vm2120_vm2, %v2097_v58, %v2098_v45  ;;  %v2295_v60 = vmul.f32 %v3992_v48, %v2229_v11  ;;  %vm2262_vm14 = vcmp.ge.f32.partialorder %v2229_v11, 0.0 }
 0x22c   : > { %v1260_v34 = vpop.f32.mrf.mxu1  ;;  %v1553_v62 = vpop.f32.mrf.mxu0  ;;  %v679_v58 = vunpack.c.l.b16 %v661_v15  ;;  %vm4157_vm0 = vcmp.lt.s32.totalorder %v1746_v7, 31 }
 0x22d   : > { %v1373_v21 = vpop.f32.mrf.mxu2  ;;  %v1462_v3 = vpop.f32.mrf.mxu3  ;;  %v2194_v12 = vadd.f32 %v2142_v9, %v2065_v52  ;;  %v1261_v57 = vadd.f32 %v1260_v34, %v3694_v4  ;;  %v2327_v24 = vsel %vm2262_vm14, %v2229_v11, %v2295_v60 }
 0x22e   : > { %v1636_v51 = vadd.f32 %v1373_v21, %v1081_v59  ;;  %v1637_v56 = vadd.f32 %v1462_v3, %v4552_v31  ;;  %v682_v14 = vpack.c.b16 %v679_v58, %v678_v2  ;;  %v2455_v20 = vadd.f32 %v2423_v43, %v2327_v24  ;;  %v4559_v31 = vld [vmem:[#allocation28_spill] sm:$0xff] }
 0x22f   : > { %v2230_v30 = vadd.f32 %v3975_v63, %v2194_v12  ;;  %v1641_v46 = vadd.f32 %v1553_v62, %v1261_v57  ;;  %v2977_v59 = vunpack.c.h.bf16 %v3123_v41  ;;  %v1747_v12 = vand.u32 31, %v1715_v8  ;;  %v3205_v57 = vld [vmem:[%s3347_s21 + $0x60] sm:$0xff] }
 0x230   : > { %v1969_v10 = vrot.slane %v1636_v51, 7  ;;  %v4557_v51 = vld [vmem:[#allocation25_spill] sm:$0xff]  ;;  %v2938_v58 = vsel %vm4157_vm0, 1.0, %v3247_v18 }
 0x231   : > { %vm2263_vm15 = vcmp.ge.f32.partialorder %v2230_v30, 0.0  ;;  %v2296_v42 = vmul.f32 %v3992_v48, %v2230_v30  ;;  %v2099_v19 = vrot.slane %v1641_v46, 1  ;;  %vm1779_vm4 = vcmp.gt.s32.totalorder %v1747_v12, 0  ;;  %v4563_v12 = vld [vmem:[#allocation31_spill] sm:$0xff] }
 0x232   : > { %v2013_v4 = vsel %vm1991_vm3, %v1968_v54, %v1969_v10 }
 0x233   : > { %v2066_v0 = vadd.f32 %v2013_v4, %v1637_v56  ;;  %v2328_v1 = vsel %vm2263_vm15, %v2230_v30, %v2296_v42  ;;  %v2141_v39 = vsel %vm2120_vm2, %v2098_v45, %v2099_v19  ;;  %v658_v45 = vmul.f32 %v2976_v49, %v4119_v22  ;;  %v3128_v30 = vld [vmem:[%s3970_s19 + $0x28] sm:$0xff]  }
 0x234   : > { %v2456_v11 = vadd.f32 %v2424_v28, %v2328_v1  ;;  %v1263_v15 = vpop.f32.mrf.mxu1  ;;  %v1556_v50 = vpop.f32.mrf.mxu0  ;;  %v4558_v28 = vld [vmem:[#allocation12_spill] sm:$0xff]  ;;  %v3000_v4 = vunpack.c.l.bf16 %v3128_v30  ;;  %v3001_v7 = vunpack.c.h.bf16 %v3128_v30  ;;  %v4560_v1 = vld [vmem:[#allocation30_spill] sm:$0xff] }
 0x235   : > { %v1375_v52 = vpop.f32.mrf.mxu2  ;;  %v1464_v54 = vpop.f32.mrf.mxu3  ;;  %v1264_v27 = vadd.f32 %v1263_v15, %v3708_v13  ;;  %v2195_v3 = vadd.f32 %v2141_v39, %v2066_v0  ;;  %v659_v13 = vmul.f32 %v2977_v59, %v4119_v22  ;;  %v1086_v56 = vadd.f32 %v4559_v31, %v4558_v28 }
 0x236   : > { %v1639_v5 = vadd.f32 %v1375_v52, %v1083_v38  ;;  %v3065_v9 = vpack.c.bf16 %v2456_v11, %v2455_v20  ;;  %v1640_v34 = vadd.f32 %v1464_v54, %v4557_v51  ;;  %v662_v24 = vpack.c.bf16 %v658_v45, %v658_v45 }
 0x237   : > { %v1644_v62 = vadd.f32 %v1556_v50, %v1264_v27  ;;  %2876 = vmatmul.msk.bf16.gmra.mxu1 %vm697_vm1, %v3205_v57  ;;  %2926 = vmatmul.msk.bf16.gmra.mxu0 %vm697_vm1, %v682_v14  ;;  %v2231_v46 = vadd.f32 %v3975_v63, %v2195_v3  ;;  %v663_v42 = vpack.c.bf16 %v659_v13, %v659_v13  ;;  %v2931_v11 = vsel %vm1779_vm4, 1.0, %v3247_v18  ;;  %v4561_v50 = vld [vmem:[#allocation27_spill] sm:$0xff] }
 0x238   : > { %v1970_v60 = vrot.slane %v1639_v5, 7  ;;  %3142 = vst [vmem:[%s4018_s10 + $0x20] sm:$0xff] %v3065_v9   ;;  %v680_v39 = vunpack.c.l.b16 %v662_v24  ;;  %v2425_v54 = vmul.f32 -1.0, %v3000_v4  ;;  %v2426_v15 = vmul.f32 -1.0, %v3001_v7  ;;  %v4562_v3 = vld [vmem:[#allocation15_spill] sm:$0xff]  ;;  %v4564_v24 = vld [vmem:[#allocation29_spill] sm:$0xff] }
 0x239   : > { %v2100_v43 = vrot.slane %v1644_v62, 1  ;;  %v2297_v8 = vmul.f32 %v3992_v48, %v2231_v46  ;;  %vm2264_vm5 = vcmp.ge.f32.partialorder %v2231_v46, 0.0  ;;  %v681_v52 = vunpack.c.l.b16 %v663_v42 }
 0x23a   : > { %v2012_v16 = vsel %vm1991_vm3, %v1969_v10, %v1970_v60  ;;  %2894 = vmatmul.msk.bf16.gmra.mxu2 %vm697_vm1, %v682_v14  ;;  %2910 = vmatmul.msk.bf16.gmra.mxu3 %vm697_vm1, %v682_v14  ;;  %v1088_v45 = vadd.f32 %v4563_v12, %v4562_v3 }
 0x23b   : > { %v2067_v2 = vadd.f32 %v2012_v16, %v1640_v34  ;;  %v2140_v22 = vsel %vm2120_vm2, %v2099_v19, %v2100_v43  ;;  %v2329_v51 = vsel %vm2264_vm5, %v2231_v46, %v2297_v8  ;;  %v683_v30 = vpack.c.b16 %v681_v52, %v680_v39 }
 0x23c   : > { %v2164_v55 = vmul.f32 %v2938_v58, %v2140_v22  ;;  %v1265_v38 = vpop.f32.mrf.mxu1  ;;  %v1558_v0 = vpop.f32.mrf.mxu0  ;;  %v2457_v31 = vadd.f32 %v2425_v54, %v2329_v51 }
 0x23d   : > { %v1378_v10 = vpop.f32.mrf.mxu2  ;;  %v1467_v41 = vpop.f32.mrf.mxu3  ;;  %v1266_v14 = vadd.f32 %v1265_v38, %v4560_v1 }
 0x23e   : > { %v1642_v23 = vadd.f32 %v1378_v10, %v1086_v56  ;;  %v2196_v49 = vadd.f32 %v2164_v55, %v2067_v2  ;;  %v1643_v9 = vadd.f32 %v1467_v41, %v4561_v50  ;;  %v3129_v55 = vld [vmem:[%s3970_s19 + $0x30] sm:$0xff]  }
 0x23f   : > { %v1647_v19 = vadd.f32 %v1558_v0, %v1266_v14  ;;  %v4565_v0 = vld [vmem:[#allocation18_spill] sm:$0xff]  ;;  %v3004_v1 = vunpack.c.l.bf16 %v3129_v55  ;;  %v3005_v14 = vunpack.c.h.bf16 %v3129_v55 }
 0x240   : > { %v1971_v20 = vrot.slane %v1642_v23, 7  ;;  %v2232_v59 = vadd.f32 %v3975_v63, %v2196_v49  ;;  %v1091_v7 = vadd.f32 %v3730_v36, %v4565_v0  ;;  %v1718_v36 = vadd.s32 120, %v3915_v26 }
 0x241   : > { %v2101_v21 = vrot.slane %v1647_v19, 1  ;;  %v2428_v50 = vmul.f32 -1.0, %v3005_v14  ;;  %v4571_v14 = vld [vmem:[#allocation36_spill] sm:$0xff] }
 0x242   : > { %v2011_v5 = vsel %vm1991_vm3, %v1970_v60, %v1971_v20  ;;  %vm2265_vm6 = vcmp.ge.f32.partialorder %v2232_v59, 0.0  ;;  %v2298_v34 = vmul.f32 %v3992_v48, %v2232_v59 }
 0x243   : > { %v2036_v27 = vmul.f32 %v2931_v11, %v2011_v5  ;;  %v2139_v57 = vsel %vm2120_vm2, %v2100_v43, %v2101_v21 }
 0x244   : > { %v2330_v60 = vsel %vm2265_vm6, %v2232_v59, %v2298_v34  ;;  %v1268_v58 = vpop.f32.mrf.mxu1  ;;  %v1561_v28 = vpop.f32.mrf.mxu0 }
 0x245   : > { %v2068_v62 = vadd.f32 %v2036_v27, %v1643_v9  ;;  %v1380_v13 = vpop.f32.mrf.mxu2  ;;  %v1469_v16 = vpop.f32.mrf.mxu3  ;;  %v2458_v56 = vadd.f32 %v2426_v15, %v2330_v60  ;;  %v1269_v46 = vadd.f32 %v1268_v58, %v3728_v29  ;;  %v2427_v15 = vmul.f32 -1.0, %v3004_v1  ;;  %v4566_v9 = vld [vmem:[#allocation32_spill] sm:$0xff] }
 0x246   : > { %v1645_v2 = vadd.f32 %v1380_v13, %v1088_v45  ;;  %v1646_v42 = vadd.f32 %v1469_v16, %v4564_v24  ;;  %v1750_v16 = vand.u32 31, %v1718_v36  ;;  %v4572_v36 = vld [vmem:[#allocation38_spill] sm:$0xff] }
 0x247   : > { %v2197_v22 = vadd.f32 %v2139_v57, %v2068_v62  ;;  %v3070_v41 = vpack.c.bf16 %v2458_v56, %v2457_v31  ;;  %v1650_v4 = vadd.f32 %v1561_v28, %v1269_v46  ;;  %2877 = vmatmul.msk.bf16.gmra.mxu1 %vm697_vm1, %v4026_v35  ;;  %2927 = vmatmul.msk.bf16.gmra.mxu0 %vm697_vm1, %v683_v30  ;;  %v4568_v62 = vld [vmem:[#allocation34_spill] sm:$0xff]  ;;  %v1719_v31 = vadd.s32 128, %v3915_v26 }
 0x248   : > { %v1972_v10 = vrot.slane %v1645_v2, 7  ;;  %vm1878_vm8 = vcmp.lt.s32.totalorder %v1750_v16, 31  ;;  %v4574_v16 = vld [vmem:[#allocation5_spill] sm:$0xff] }
 0x249   : > { %v2233_v43 = vadd.f32 %v3975_v63, %v2197_v22  ;;  %3143 = vst [vmem:[%s4018_s10 + $0x28] sm:$0xff] %v3070_v41   ;;  %v2102_v38 = vrot.slane %v1650_v4, 1  ;;  %v4569_v4 = vld [vmem:[#allocation33_spill] sm:$0xff] }
 0x24a   : > { %v2010_v23 = vsel %vm1991_vm3, %v1971_v20, %v1972_v10  ;;  %2895 = vmatmul.msk.bf16.gmra.mxu2 %vm697_vm1, %v683_v30  ;;  %2911 = vmatmul.msk.bf16.gmra.mxu3 %vm697_vm1, %v683_v30 }
 0x24b   : > { %v2069_v29 = vadd.f32 %v2010_v23, %v1646_v42  ;;  %v2138_v35 = vsel %vm2120_vm2, %v2101_v21, %v2102_v38  ;;  %v2299_v11 = vmul.f32 %v3992_v48, %v2233_v43  ;;  %vm2266_vm1 = vcmp.ge.f32.partialorder %v2233_v43, 0.0 }
 0x24c   : > { %v1270_v39 = vpop.f32.mrf.mxu1  ;;  %v1563_v52 = vpop.f32.mrf.mxu0  ;;  %v1751_v23 = vand.u32 31, %v1719_v31 }
 0x24d   : > { %v1383_v8 = vpop.f32.mrf.mxu2  ;;  %v1472_v49 = vpop.f32.mrf.mxu3  ;;  %v2198_v20 = vadd.f32 %v2138_v35, %v2069_v29  ;;  %v1271_v54 = vadd.f32 %v1270_v39, %v3734_v32  ;;  %v2331_v3 = vsel %vm2266_vm1, %v2233_v43, %v2299_v11  ;;  %v4567_v32 = vld [vmem:[#allocation21_spill] sm:$0xff]  ;;  %v4570_v35 = vld [vmem:[#allocation3_spill] sm:$0xff] }
 0x24e   : > { %v1648_v19 = vadd.f32 %v1383_v8, %v1091_v7  ;;  %v1649_v27 = vadd.f32 %v1472_v49, %v4566_v9  ;;  %v1093_v57 = vadd.f32 %v4568_v62, %v4567_v32  ;;  %v2459_v30 = vadd.f32 %v2427_v15, %v2331_v3  ;;  %v4573_v32 = vld [vmem:[#allocation35_spill] sm:$0xff] }
 0x24f   : > { %v2234_v59 = vadd.f32 %v3975_v63, %v2198_v20  ;;  %v1653_v21 = vadd.f32 %v1563_v52, %v1271_v54  ;;  %v2939_v7 = vsel %vm1878_vm8, 1.0, %v3247_v18  ;;  %v1096_v8 = vadd.f32 %v4571_v14, %v4570_v35  ;;  %v3131_v35 = vld [vmem:[%s3970_s19 + $0x40] sm:$0xff]  }
 0x250   : > { %v1973_v5 = vrot.slane %v1648_v19, 7  ;;  %vm1783_vm9 = vcmp.gt.s32.totalorder %v1751_v23, 0 }
 0x251   : > { %vm2267_vm7 = vcmp.ge.f32.partialorder %v2234_v59, 0.0  ;;  %v2300_v12 = vmul.f32 %v3992_v48, %v2234_v59  ;;  %v2103_v34 = vrot.slane %v1653_v21, 1  ;;  %v2932_v21 = vsel %vm1783_vm9, 1.0, %v3247_v18 }
 0x252   : > { %v2009_v45 = vsel %vm1991_vm3, %v1972_v10, %v1973_v5 }
 0x253   : > { %v2070_v51 = vadd.f32 %v2009_v45, %v1649_v27  ;;  %v2332_v13 = vsel %vm2267_vm7, %v2234_v59, %v2300_v12  ;;  %v2137_v2 = vsel %vm2120_vm2, %v2102_v38, %v2103_v34  ;;  %v3130_v38 = vld [vmem:[%s3970_s19 + $0x38] sm:$0xff]  }
 0x254   : > { %v2460_v60 = vadd.f32 %v2428_v50, %v2332_v13  ;;  %v1273_v22 = vpop.f32.mrf.mxu1  ;;  %v1566_v46 = vpop.f32.mrf.mxu0  ;;  %v3008_v19 = vunpack.c.l.bf16 %v3130_v38 }
 0x255   : > { %v1385_v58 = vpop.f32.mrf.mxu2  ;;  %v1474_v28 = vpop.f32.mrf.mxu3  ;;  %v1274_v41 = vadd.f32 %v1273_v22, %v3748_v25  ;;  %v2199_v24 = vadd.f32 %v2137_v2, %v2070_v51 }
 0x256   : > { %v1651_v56 = vadd.f32 %v1385_v58, %v1093_v57  ;;  %v3075_v10 = vpack.c.bf16 %v2460_v60, %v2459_v30  ;;  %v1652_v43 = vadd.f32 %v1474_v28, %v4569_v4  ;;  %v2429_v12 = vmul.f32 -1.0, %v3008_v19  ;;  %v4575_v30 = vld [vmem:[#allocation39_spill] sm:$0xff] }
 0x257   : > { %v1656_v55 = vadd.f32 %v1566_v46, %v1274_v41  ;;  %v2235_v25 = vadd.f32 %v3975_v63, %v2199_v24  ;;  %v1098_v60 = vadd.f32 %v4575_v30, %v4574_v16  ;;  %v3012_v19 = vunpack.c.l.bf16 %v3131_v35 }
 0x258   : > { %v1974_v42 = vrot.slane %v1651_v56, 7  ;;  %3144 = vst [vmem:[%s4018_s10 + $0x30] sm:$0xff] %v3075_v10  }
 0x259   : > { %v2104_v1 = vrot.slane %v1656_v55, 1  ;;  %v2301_v50 = vmul.f32 %v3992_v48, %v2235_v25  ;;  %vm2268_vm10 = vcmp.ge.f32.partialorder %v2235_v25, 0.0 }
 0x25a   : > { %v2008_v29 = vsel %vm1991_vm3, %v1973_v5, %v1974_v42  ;;  %v3009_v5 = vunpack.c.h.bf16 %v3130_v38  ;;  %v4576_v38 = vld [vmem:[#allocation37_spill] sm:$0xff] }
 0x25b   : > { %v2071_v0 = vadd.f32 %v2008_v29, %v1652_v43  ;;  %v2136_v49 = vsel %vm2120_vm2, %v2103_v34, %v2104_v1  ;;  %v2333_v2 = vsel %vm2268_vm10, %v2235_v25, %v2301_v50 }
 0x25c   : > { %v2168_v39 = vmul.f32 %v2939_v7, %v2136_v49  ;;  %v1275_v54 = vpop.f32.mrf.mxu1  ;;  %v1568_v59 = vpop.f32.mrf.mxu0  ;;  %v2430_v34 = vmul.f32 -1.0, %v3009_v5  ;;  %v4577_v49 = vld [vmem:[#allocation7_spill] sm:$0xff] }
 0x25d   : > { %v1388_v11 = vpop.f32.mrf.mxu2  ;;  %v1477_v20 = vpop.f32.mrf.mxu3  ;;  %v1276_v15 = vadd.f32 %v1275_v54, %v4572_v36 }
 0x25e   : > { %v1654_v52 = vadd.f32 %v1388_v11, %v1096_v8  ;;  %v2200_v9 = vadd.f32 %v2168_v39, %v2071_v0  ;;  %v1655_v62 = vadd.f32 %v1477_v20, %v4573_v32  ;;  %v4578_v11 = vld [vmem:[#allocation41_spill] sm:$0xff]  ;;  %v3013_v39 = vunpack.c.h.bf16 %v3131_v35 }
 0x25f   : > { %v1659_v3 = vadd.f32 %v1568_v59, %v1276_v15  ;;  %v1101_v20 = vadd.f32 %v4578_v11, %v4577_v49 }
 0x260   : > { %v1975_v27 = vrot.slane %v1654_v52, 7  ;;  %v2236_v45 = vadd.f32 %v3975_v63, %v2200_v9  ;;  %v4579_v9 = vld [vmem:[#allocation43_spill] sm:$0xff] }
 0x261   : > { %v2105_v13 = vrot.slane %v1659_v3, 1 }
 0x262   : > { %v2007_v51 = vsel %vm1991_vm3, %v1974_v42, %v1975_v27  ;;  %vm2269_vm11 = vcmp.ge.f32.partialorder %v2236_v45, 0.0  ;;  %v2302_v58 = vmul.f32 %v3992_v48, %v2236_v45  ;;  %v2461_v42 = vadd.f32 %v2429_v12, %v2333_v2  ;;  %v4581_v2 = vld [vmem:[#allocation10_spill] sm:$0xff] }
 0x263   : > { %v2040_v57 = vmul.f32 %v2932_v21, %v2007_v51  ;;  %v2135_v31 = vsel %vm2120_vm2, %v2104_v1, %v2105_v13  ;;  %v1722_v12 = vadd.s32 152, %v3915_v26  ;;  %v2432_v51 = vmul.f32 -1.0, %v3013_v39 }
 0x264   : > { %v2334_v46 = vsel %vm2269_vm11, %v2236_v45, %v2302_v58  ;;  %v1278_v41 = vpop.f32.mrf.mxu1  ;;  %v1571_v24 = vpop.f32.mrf.mxu0  ;;  %v2431_v45 = vmul.f32 -1.0, %v3012_v19  ;;  %v4582_v58 = vld [vmem:[#allocation44_spill] sm:$0xff]  ;;  %v4584_v19 = vld [vmem:[#allocation13_spill] sm:$0xff] }
 0x265   : > { %v2072_v28 = vadd.f32 %v2040_v57, %v1655_v62  ;;  %v1390_v56 = vpop.f32.mrf.mxu2  ;;  %v1479_v22 = vpop.f32.mrf.mxu3  ;;  %v2462_v4 = vadd.f32 %v2430_v34, %v2334_v46  ;;  %v1279_v55 = vadd.f32 %v1278_v41, %v3768_v44  ;;  %v4580_v34 = vld [vmem:[#allocation40_spill] sm:$0xff] }
 0x266   : > { %v1657_v10 = vadd.f32 %v1390_v56, %v1098_v60  ;;  %v1658_v0 = vadd.f32 %v1479_v22, %v4576_v38  ;;  %v1754_v56 = vand.u32 31, %v1722_v12 }
 0x267   : > { %v2201_v43 = vadd.f32 %v2135_v31, %v2072_v28  ;;  %v3080_v29 = vpack.c.bf16 %v2462_v4, %v2461_v42  ;;  %v1662_v7 = vadd.f32 %v1571_v24, %v1279_v55  ;;  %v1103_v28 = vadd.f32 %v4582_v58, %v4581_v2 }
 0x268   : > { %v1976_v23 = vrot.slane %v1657_v10, 7  ;;  %v1723_v42 = vadd.s32 160, %v3915_v26  ;;  %vm1882_vm14 = vcmp.lt.s32.totalorder %v1754_v56, 31 }
 0x269   : > { %v2237_v1 = vadd.f32 %v3975_v63, %v2201_v43  ;;  %3145 = vst [vmem:[%s4018_s10 + $0x38] sm:$0xff] %v3080_v29   ;;  %v2106_v25 = vrot.slane %v1662_v7, 1  ;;  %v4583_v7 = vld [vmem:[#allocation42_spill] sm:$0xff]  ;;  %v2940_v11 = vsel %vm1882_vm14, 1.0, %v3247_v18 }
 0x26a   : > { %v2006_v14 = vsel %vm1991_vm3, %v1975_v27, %v1976_v23 }
 0x26b   : > { %v2073_v8 = vadd.f32 %v2006_v14, %v1658_v0  ;;  %v2134_v44 = vsel %vm2120_vm2, %v2105_v13, %v2106_v25  ;;  %v2303_v59 = vmul.f32 %v3992_v48, %v2237_v1  ;;  %vm2270_vm12 = vcmp.ge.f32.partialorder %v2237_v1, 0.0 }
 0x26c   : > { %v1280_v15 = vpop.f32.mrf.mxu1  ;;  %v1573_v50 = vpop.f32.mrf.mxu0  ;;  %v1755_v14 = vand.u32 31, %v1723_v42 }
 0x26d   : > { %v1393_v52 = vpop.f32.mrf.mxu2  ;;  %v1482_v54 = vpop.f32.mrf.mxu3  ;;  %v2202_v5 = vadd.f32 %v2134_v44, %v2073_v8  ;;  %v1281_v27 = vadd.f32 %v1280_v15, %v4579_v9  ;;  %v2335_v57 = vsel %vm2270_vm12, %v2237_v1, %v2303_v59  ;;  %v4585_v44 = vld [vmem:[#allocation46_spill] sm:$0xff] }
 0x26e   : > { %v1660_v36 = vadd.f32 %v1393_v52, %v1101_v20  ;;  %v1661_v32 = vadd.f32 %v1482_v54, %v4580_v34  ;;  %v2463_v22 = vadd.f32 %v2431_v45, %v2335_v57  ;;  %v1106_v39 = vadd.f32 %v4585_v44, %v4584_v19 }
 0x26f   : > { %v2238_v21 = vadd.f32 %v3975_v63, %v2202_v5  ;;  %v1665_v62 = vadd.f32 %v1573_v50, %v1281_v27  ;;  %vm1787_vm15 = vcmp.gt.s32.totalorder %v1755_v14, 0 }
 0x270   : > { %v1977_v3 = vrot.slane %v1660_v36, 7  ;;  %v2933_v34 = vsel %vm1787_vm15, 1.0, %v3247_v18 }
 0x271   : > { %vm2271_vm13 = vcmp.ge.f32.partialorder %v2238_v21, 0.0  ;;  %v2304_v13 = vmul.f32 %v3992_v48, %v2238_v21  ;;  %v2107_v60 = vrot.slane %v1665_v62, 1 }
 0x272   : > { %v2005_v16 = vsel %vm1991_vm3, %v1976_v23, %v1977_v3 }
 0x273   : > { %v2074_v30 = vadd.f32 %v2005_v16, %v1661_v32  ;;  %v2336_v31 = vsel %vm2271_vm13, %v2238_v21, %v2304_v13  ;;  %v2133_v10 = vsel %vm2120_vm2, %v2106_v25, %v2107_v60  ;;  %v3132_v25 = vld [vmem:[%s3970_s19 + $0x48] sm:$0xff]  }
 0x274   : > { %v2464_v46 = vadd.f32 %v2432_v51, %v2336_v31  ;;  %v1283_v43 = vpop.f32.mrf.mxu1  ;;  %v1576_v55 = vpop.f32.mrf.mxu0  ;;  %v3016_v5 = vunpack.c.l.bf16 %v3132_v25  ;;  %v3017_v27 = vunpack.c.h.bf16 %v3132_v25  ;;  %v4586_v21 = vld [vmem:[#allocation48_spill] sm:$0xff]  ;;  %v4589_v31 = vld [vmem:[#allocation49_spill] sm:$0xff]  ;;  %v4299_v25 = vld [vmem:[%s4467_s4] ss:$0 sm:$0xff] }
 0x275   : > { %v1395_v41 = vpop.f32.mrf.mxu2  ;;  %v1484_v24 = vpop.f32.mrf.mxu3  ;;  %v1284_v29 = vadd.f32 %v1283_v43, %v3788_v40  ;;  %v2203_v38 = vadd.f32 %v2133_v10, %v2074_v30  ;;  %v4587_v30 = vld [vmem:[#allocation45_spill] sm:$0xff] }
 0x276   : > { %v1663_v4 = vadd.f32 %v1395_v41, %v1103_v28  ;;  %v3085_v23 = vpack.c.bf16 %v2464_v46, %v2463_v22  ;;  %v1664_v1 = vadd.f32 %v1484_v24, %v4583_v7  ;;  %v2433_v62 = vmul.f32 -1.0, %v3016_v5  ;;  %v4588_v28 = vld [vmem:[#allocation16_spill] sm:$0xff] }
 0x277   : > { %v1668_v35 = vadd.f32 %v1576_v55, %v1284_v29  ;;  %v2239_v40 = vadd.f32 %v3975_v63, %v2203_v38  ;;  %v2434_v16 = vmul.f32 -1.0, %v3017_v27  ;;  %v1108_v56 = vadd.f32 %v4589_v31, %v4588_v28  ;;  %v4595_v31 = vld [vmem:[#allocation22_spill] sm:$0xff] }
 0x278   : > { %v1978_v0 = vrot.slane %v1663_v4, 7  ;;  %3146 = vst [vmem:[%s4018_s10 + $0x40] sm:$0xff] %v3085_v23  }
 0x279   : > { %v2108_v20 = vrot.slane %v1668_v35, 1  ;;  %v2305_v12 = vmul.f32 %v3992_v48, %v2239_v40  ;;  %vm2272_vm0 = vcmp.ge.f32.partialorder %v2239_v40, 0.0  ;;  %v4590_v35 = vld [vmem:[#allocation47_spill] sm:$0xff] }
 0x27a   : > { %v2004_v8 = vsel %vm1991_vm3, %v1977_v3, %v1978_v0 }
 0x27b   : > { %v2075_v49 = vadd.f32 %v2004_v8, %v1664_v1  ;;  %v2132_v52 = vsel %vm2120_vm2, %v2107_v60, %v2108_v20  ;;  %v2337_v22 = vsel %vm2272_vm0, %v2239_v40, %v2305_v12 }
 0x27c   : > { %v2172_v36 = vmul.f32 %v2940_v11, %v2132_v52  ;;  %v1285_v50 = vpop.f32.mrf.mxu1  ;;  %v1578_v9 = vpop.f32.mrf.mxu0  ;;  %v2465_v23 = vadd.f32 %v2433_v62, %v2337_v22  ;;  %v3133_v11 = vld [vmem:[%s3970_s19 + $0x50] sm:$0xff]  }
 0x27d   : > { %v1398_v54 = vpop.f32.mrf.mxu2  ;;  %v1487_v59 = vpop.f32.mrf.mxu3  ;;  %v1286_v3 = vadd.f32 %v1285_v50, %v4586_v21  ;;  %v3020_v52 = vunpack.c.l.bf16 %v3133_v11 }
 0x27e   : > { %v1666_v15 = vadd.f32 %v1398_v54, %v1106_v39  ;;  %v2204_v45 = vadd.f32 %v2172_v36, %v2075_v49  ;;  %v1667_v60 = vadd.f32 %v1487_v59, %v4587_v30  ;;  %v4592_v39 = vld [vmem:[#allocation51_spill] sm:$0xff]  ;;  %v3021_v59 = vunpack.c.h.bf16 %v3133_v11 }
 0x27f   : > { %v1671_v32 = vadd.f32 %v1578_v9, %v1286_v3  ;;  %v4593_v3 = vld [vmem:[#allocation53_spill] sm:$0xff] }
 0x280   : > { %v1979_v51 = vrot.slane %v1666_v15, 7  ;;  %v2240_v57 = vadd.f32 %v3975_v63, %v2204_v45  ;;  %v2436_v62 = vmul.f32 -1.0, %v3021_v59 }
 0x281   : > { %v2109_v58 = vrot.slane %v1671_v32, 1  ;;  %v2435_v32 = vmul.f32 -1.0, %v3020_v52 }
 0x282   : > { %v2003_v13 = vsel %vm1991_vm3, %v1978_v0, %v1979_v51  ;;  %vm2273_vm4 = vcmp.ge.f32.partialorder %v2240_v57, 0.0  ;;  %v2306_v46 = vmul.f32 %v3992_v48, %v2240_v57 }
 0x283   : > { %v2044_v2 = vmul.f32 %v2933_v34, %v2003_v13  ;;  %v2131_v41 = vsel %vm2120_vm2, %v2108_v20, %v2109_v58  ;;  %v1726_v34 = vadd.s32 184, %v3915_v26 }
 0x284   : > { %v2338_v42 = vsel %vm2273_vm4, %v2240_v57, %v2306_v46  ;;  %v1288_v43 = vpop.f32.mrf.mxu1  ;;  %v1581_v55 = vpop.f32.mrf.mxu0  ;;  %v4594_v57 = vld [vmem:[#allocation50_spill] sm:$0xff] }
 0x285   : > { %v2076_v10 = vadd.f32 %v2044_v2, %v1667_v60  ;;  %v1400_v63 = vpop.f32.mrf.mxu2  ;;  %v1489_v24 = vpop.f32.mrf.mxu3  ;;  %v2466_v29 = vadd.f32 %v2434_v16, %v2338_v42  ;;  %v1289_v0 = vadd.f32 %v1288_v43, %v3808_v17  ;;  %v4591_v17 = vld [vmem:[#allocation19_spill] sm:$0xff]  ;;  %v1727_v43 = vadd.s32 192, %v3915_v26 }
 0x286   : > { %v1669_v4 = vadd.f32 %v1400_v63, %v1108_v56  ;;  %v1670_v14 = vadd.f32 %v1489_v24, %v4590_v35  ;;  %v1111_v40 = vadd.f32 %v4592_v39, %v4591_v17  ;;  %v4596_v56 = vld [vmem:[#allocation54_spill] sm:$0xff]  ;;  %v4597_v35 = vld [vmem:[#allocation52_spill] sm:$0xff] }
 0x287   : > { %v2205_v38 = vadd.f32 %v2131_v41, %v2076_v10  ;;  %v3090_v1 = vpack.c.bf16 %v2466_v29, %v2465_v23  ;;  %v1674_v8 = vadd.f32 %v1581_v55, %v1289_v0  ;;  %v1113_v22 = vadd.f32 %v4596_v56, %v4595_v31  ;;  %v4598_v39 = vld [vmem:[#allocation4_spill] sm:$0xff]  ;;  %v4602_v31 = vld [vmem:[#allocation6_spill] sm:$0xff]  ;;  %v4603_v56 = vld [vmem:[#allocation59_spill] sm:$0xff] }
 0x288   : > { %v1980_v7 = vrot.slane %v1669_v4, 7  ;;  %v1758_v10 = vand.u32 31, %v1726_v34 }
 0x289   : > { %v2241_v49 = vadd.f32 %v4299_v25, %v2205_v38  ;;  %3147 = vst [vmem:[%s4018_s10 + $0x48] sm:$0xff] %v3090_v1   ;;  %v2110_v44 = vrot.slane %v1674_v8, 1 }
 0x28a   : > { %v2002_v20 = vsel %vm1991_vm3, %v1979_v51, %v1980_v7  ;;  %vm1886_vm1 = vcmp.lt.s32.totalorder %v1758_v10, 31 }
 0x28b   : > { %v2077_v19 = vadd.f32 %v2002_v20, %v1670_v14  ;;  %v2130_v54 = vsel %vm2120_vm2, %v2109_v58, %v2110_v44  ;;  %v2307_v15 = vmul.f32 %v3992_v48, %v2241_v49  ;;  %vm2274_vm5 = vcmp.ge.f32.partialorder %v2241_v49, 0.0  ;;  %v3134_v20 = vld [vmem:[%s3970_s19 + $0x58] sm:$0xff]  }
 0x28c   : > { %v1290_v27 = vpop.f32.mrf.mxu1  ;;  %v1583_v21 = vpop.f32.mrf.mxu0 }
 0x28d   : > { %v1403_v5 = vpop.f32.mrf.mxu2  ;;  %v1492_v36 = vpop.f32.mrf.mxu3  ;;  %v2206_v50 = vadd.f32 %v2130_v54, %v2077_v19  ;;  %v1291_v12 = vadd.f32 %v1290_v27, %v4593_v3  ;;  %v2339_v30 = vsel %vm2274_vm5, %v2241_v49, %v2307_v15  ;;  %v1759_v49 = vand.u32 31, %v1727_v43  ;;  %v4600_v3 = vld [vmem:[#allocation58_spill] sm:$0xff] }
 0x28e   : > { %v1672_v9 = vadd.f32 %v1403_v5, %v1111_v40  ;;  %v1673_v13 = vadd.f32 %v1492_v36, %v4594_v57  ;;  %v2467_v41 = vadd.f32 %v2435_v32, %v2339_v30  ;;  %v4599_v40 = vld [vmem:[#allocation56_spill] sm:$0xff]  ;;  %v3024_v36 = vunpack.c.l.bf16 %v3134_v20 }
 0x28f   : > { %v2242_v45 = vadd.f32 %v4299_v25, %v2206_v50  ;;  %v1677_v16 = vadd.f32 %v1583_v21, %v1291_v12  ;;  %v1116_v52 = vadd.f32 %v4599_v40, %v4598_v39  ;;  %vm1791_vm7 = vcmp.gt.s32.totalorder %v1759_v49, 0  ;;  %v4605_v39 = vld [vmem:[#allocation8_spill] sm:$0xff]  ;;  %v4606_v40 = vld [vmem:[#allocation61_spill] sm:$0xff] }
 0x290   : > { %v1981_v51 = vrot.slane %v1672_v9, 7  ;;  %v3025_v21 = vunpack.c.h.bf16 %v3134_v20  ;;  %v2934_v32 = vsel %vm1791_vm7, 1.0, %v3247_v18  ;;  %v2437_v57 = vmul.f32 -1.0, %v3024_v36  ;;  %v3135_v20 = vld [vmem:[%s3970_s19 + $0x60] sm:$0xff]  }
 0x291   : > { %vm2275_vm6 = vcmp.ge.f32.partialorder %v2242_v45, 0.0  ;;  %v2308_v60 = vmul.f32 %v3992_v48, %v2242_v45  ;;  %v2111_v28 = vrot.slane %v1677_v16, 1 }
 0x292   : > { %v2001_v2 = vsel %vm1991_vm3, %v1980_v7, %v1981_v51  ;;  %v2438_v30 = vmul.f32 -1.0, %v3025_v21  ;;  %v4607_v21 = vld [vmem:[#allocation63_spill] sm:$0xff] }
 0x293   : > { %v2078_v58 = vadd.f32 %v2001_v2, %v1673_v13  ;;  %v2340_v46 = vsel %vm2275_vm6, %v2242_v45, %v2308_v60  ;;  %v2129_v24 = vsel %vm2120_vm2, %v2110_v44, %v2111_v28  ;;  %v2941_v44 = vsel %vm1886_vm1, 1.0, %v3247_v18  ;;  %v4601_v60 = vld [vmem:[#allocation55_spill] sm:$0xff] }
 0x294   : > { %v2468_v63 = vadd.f32 %v2436_v62, %v2340_v46  ;;  %v1293_v23 = vpop.f32.mrf.mxu1  ;;  %v1586_v29 = vpop.f32.mrf.mxu0 }
 0x295   : > { %v1405_v42 = vpop.f32.mrf.mxu2  ;;  %v1494_v4 = vpop.f32.mrf.mxu3  ;;  %v1294_v0 = vadd.f32 %v1293_v23, %v3828_v33  ;;  %v2207_v7 = vadd.f32 %v2129_v24, %v2078_v58 }
 0x296   : > { %v1675_v55 = vadd.f32 %v1405_v42, %v1113_v22  ;;  %v3095_v38 = vpack.c.bf16 %v2468_v63, %v2467_v41  ;;  %v1676_v14 = vadd.f32 %v1494_v4, %v4597_v35  ;;  %v1118_v22 = vadd.f32 %v4603_v56, %v4602_v31  ;;  %v4610_v31 = vld [vmem:[#allocation64_spill] sm:$0xff] }
 0x297   : > { %v1680_v8 = vadd.f32 %v1586_v29, %v1294_v0  ;;  %v2243_v33 = vadd.f32 %v4299_v25, %v2207_v7 }
 0x298   : > { %v1982_v1 = vrot.slane %v1675_v55, 7  ;;  %3148 = vst [vmem:[%s4018_s10 + $0x50] sm:$0xff] %v3095_v38  }
 0x299   : > { %v2112_v17 = vrot.slane %v1680_v8, 1  ;;  %v2309_v45 = vmul.f32 %v3992_v48, %v2243_v33  ;;  %vm2276_vm8 = vcmp.ge.f32.partialorder %v2243_v33, 0.0 }
 0x29a   : > { %v2000_v11 = vsel %vm1991_vm3, %v1981_v51, %v1982_v1 }
 0x29b   : > { %v2079_v19 = vadd.f32 %v2000_v11, %v1676_v14  ;;  %v2128_v54 = vsel %vm2120_vm2, %v2111_v28, %v2112_v17  ;;  %v2341_v46 = vsel %vm2276_vm8, %v2243_v33, %v2309_v45  ;;  %v4604_v14 = vld [vmem:[#allocation57_spill] sm:$0xff]  ;;  %v3028_v33 = vunpack.c.l.bf16 %v3135_v20 }
 0x29c   : > { %v2176_v15 = vmul.f32 %v2941_v44, %v2128_v54  ;;  %v1295_v9 = vpop.f32.mrf.mxu1  ;;  %v1588_v27 = vpop.f32.mrf.mxu0  ;;  %v2469_v29 = vadd.f32 %v2437_v57, %v2341_v46  ;;  %v3029_v54 = vunpack.c.h.bf16 %v3135_v20  ;;  %v3136_v20 = vld [vmem:[%s3970_s19 + $0x68] sm:$0xff]  }
 0x29d   : > { %v1408_v59 = vpop.f32.mrf.mxu2  ;;  %v1497_v5 = vpop.f32.mrf.mxu3  ;;  %v1296_v12 = vadd.f32 %v1295_v9, %v4600_v3 }
 0x29e   : > { %v1678_v50 = vadd.f32 %v1408_v59, %v1116_v52  ;;  %v2208_v51 = vadd.f32 %v2176_v15, %v2079_v19  ;;  %v1679_v2 = vadd.f32 %v1497_v5, %v4601_v60  ;;  %v1121_v52 = vadd.f32 %v4606_v40, %v4605_v39  ;;  %v4613_v39 = vld [vmem:[#allocation14_spill] sm:$0xff]  ;;  %v4614_v40 = vld [vmem:[#allocation67_spill] sm:$0xff] }
 0x29f   : > { %v1683_v62 = vadd.f32 %v1588_v27, %v1296_v12 }
 0x2a0   : > { %v1983_v34 = vrot.slane %v1678_v50, 7  ;;  %v2244_v13 = vadd.f32 %v4299_v25, %v2208_v51  ;;  %v1730_v51 = vadd.s32 216, %v3915_v26 }
 0x2a1   : > { %v2113_v28 = vrot.slane %v1683_v62, 1  ;;  %v4608_v62 = vld [vmem:[#allocation60_spill] sm:$0xff] }
 0x2a2   : > { %v1999_v16 = vsel %vm1991_vm3, %v1982_v1, %v1983_v34  ;;  %vm2277_vm9 = vcmp.ge.f32.partialorder %v2244_v13, 0.0  ;;  %v2310_v10 = vmul.f32 %v3992_v48, %v2244_v13  ;;  %v1762_v46 = vand.u32 31, %v1730_v51 }
 0x2a3   : > { %v2048_v58 = vmul.f32 %v2934_v32, %v1999_v16  ;;  %v2127_v63 = vsel %vm2120_vm2, %v2112_v17, %v2113_v28  ;;  %v2440_v32 = vmul.f32 -1.0, %v3029_v54 }
 0x2a4   : > { %v2342_v4 = vsel %vm2277_vm9, %v2244_v13, %v2310_v10  ;;  %v1298_v55 = vpop.f32.mrf.mxu1  ;;  %v1591_v23 = vpop.f32.mrf.mxu0  ;;  %vm1890_vm12 = vcmp.lt.s32.totalorder %v1762_v46, 31 }
 0x2a5   : > { %v2080_v41 = vadd.f32 %v2048_v58, %v1679_v2  ;;  %v1410_v24 = vpop.f32.mrf.mxu2  ;;  %v1499_v42 = vpop.f32.mrf.mxu3  ;;  %v2470_v38 = vadd.f32 %v2438_v30, %v2342_v4  ;;  %v1299_v7 = vadd.f32 %v1298_v55, %v3848_v53  ;;  %v1731_v4 = vadd.s32 224, %v3915_v26 }
 0x2a6   : > { %v1681_v43 = vadd.f32 %v1410_v24, %v1118_v22  ;;  %v1682_v8 = vadd.f32 %v1499_v42, %v4604_v14 }
 0x2a7   : > { %v2209_v0 = vadd.f32 %v2127_v63, %v2080_v41  ;;  %v3100_v35 = vpack.c.bf16 %v2470_v38, %v2469_v29  ;;  %v1686_v49 = vadd.f32 %v1591_v23, %v1299_v7  ;;  %v4611_v38 = vld [vmem:[#allocation66_spill] sm:$0xff] }
 0x2a8   : > { %v1984_v1 = vrot.slane %v1681_v43, 7 }
 0x2a9   : > { %v2245_v11 = vadd.f32 %v4299_v25, %v2209_v0  ;;  %3149 = vst [vmem:[%s4018_s10 + $0x58] sm:$0xff] %v3100_v35   ;;  %v2114_v17 = vrot.slane %v1686_v49, 1  ;;  %v4612_v35 = vld [vmem:[#allocation62_spill] sm:$0xff]  ;;  %v1763_v49 = vand.u32 31, %v1731_v4 }
 0x2aa   : > { %v1998_v19 = vsel %vm1991_vm3, %v1983_v34, %v1984_v1  ;;  %v2439_v34 = vmul.f32 -1.0, %v3028_v33 }
 0x2ab   : > { %v2081_v44 = vadd.f32 %v1998_v19, %v1682_v8  ;;  %v2126_v53 = vsel %vm2120_vm2, %v2113_v28, %v2114_v17  ;;  %v2311_v36 = vmul.f32 %v3992_v48, %v2245_v11  ;;  %vm2278_vm10 = vcmp.ge.f32.partialorder %v2245_v11, 0.0  ;;  %v4609_v28 = vld [vmem:[#allocation11_spill] sm:$0xff] }
 0x2ac   : > { %v1300_v9 = vpop.f32.mrf.mxu1  ;;  %v1593_v27 = vpop.f32.mrf.mxu0  ;;  %v1123_v56 = vadd.f32 %v4610_v31, %v4609_v28  ;;  %vm1795_vm13 = vcmp.gt.s32.totalorder %v1763_v49, 0  ;;  %v4617_v28 = vld [vmem:[#allocation17_spill] sm:$0xff]  ;;  %v4618_v31 = vld [vmem:[#allocation70_spill] sm:$0xff] }
 0x2ad   : > { %v1413_v59 = vpop.f32.mrf.mxu2  ;;  %v1502_v5 = vpop.f32.mrf.mxu3  ;;  %v2210_v15 = vadd.f32 %v2126_v53, %v2081_v44  ;;  %v1301_v3 = vadd.f32 %v1300_v9, %v4607_v21  ;;  %v2343_v16 = vsel %vm2278_vm10, %v2245_v11, %v2311_v36  ;;  %v2942_v44 = vsel %vm1890_vm12, 1.0, %v3247_v18  ;;  %v4615_v21 = vld [vmem:[#allocation69_spill] sm:$0xff] }
 0x2ae   : > { %v1684_v50 = vadd.f32 %v1413_v59, %v1121_v52  ;;  %v1685_v57 = vadd.f32 %v1502_v5, %v4608_v62  ;;  %v2471_v10 = vadd.f32 %v2439_v34, %v2343_v16  ;;  %v1126_v52 = vadd.f32 %v4614_v40, %v4613_v39 }
 0x2af   : > { %v2246_v12 = vadd.f32 %v4299_v25, %v2210_v15  ;;  %v1689_v13 = vadd.f32 %v1593_v27, %v1301_v3  ;;  %v3032_v5 = vunpack.c.l.bf16 %v3136_v20  ;;  %v3033_v27 = vunpack.c.h.bf16 %v3136_v20 }
 0x2b0   : > { %v1985_v45 = vrot.slane %v1684_v50, 7  ;;  %v2935_v34 = vsel %vm1795_vm13, 1.0, %v3247_v18 }
 0x2b1   : > { %vm2279_vm11 = vcmp.ge.f32.partialorder %v2246_v12, 0.0  ;;  %v2312_v30 = vmul.f32 %v3992_v48, %v2246_v12  ;;  %v2115_v58 = vrot.slane %v1689_v13, 1  ;;  %v2441_v62 = vmul.f32 -1.0, %v3032_v5 }
 0x2b2   : > { %v1997_v60 = vsel %vm1991_vm3, %v1984_v1, %v1985_v45  ;;  %v2442_v16 = vmul.f32 -1.0, %v3033_v27 }
 0x2b3   : > { %v2082_v2 = vadd.f32 %v1997_v60, %v1685_v57  ;;  %v2344_v22 = vsel %vm2279_vm11, %v2246_v12, %v2312_v30  ;;  %v2125_v63 = vsel %vm2120_vm2, %v2114_v17, %v2115_v58  ;;  %v4616_v30 = vld [vmem:[#allocation65_spill] sm:$0xff] }
 0x2b4   : > { %v2472_v41 = vadd.f32 %v2440_v32, %v2344_v22  ;;  %v1303_v55 = vpop.f32.mrf.mxu1  ;;  %v1596_v23 = vpop.f32.mrf.mxu0 }
 0x2b5   : > { %v1415_v24 = vpop.f32.mrf.mxu2  ;;  %v1504_v42 = vpop.f32.mrf.mxu3  ;;  %v1304_v0 = vadd.f32 %v1303_v55, %v4611_v38  ;;  %v2211_v7 = vadd.f32 %v2125_v63, %v2082_v2 }
 0x2b6   : > { %v1687_v43 = vadd.f32 %v1415_v24, %v1123_v56  ;;  %v3105_v29 = vpack.c.bf16 %v2472_v41, %v2471_v10  ;;  %v1688_v14 = vadd.f32 %v1504_v42, %v4612_v35  ;;  %v1128_v56 = vadd.f32 %v4618_v31, %v4617_v28  ;;  %v3137_v35 = vld [vmem:[%s3970_s19 + $0x70] sm:$0xff]  }
 0x2b7   : > { %v1692_v8 = vadd.f32 %v1596_v23, %v1304_v0  ;;  %v2247_v33 = vadd.f32 %v4299_v25, %v2211_v7  ;;  %v3036_v40 = vunpack.c.l.bf16 %v3137_v35 }
 0x2b8   : > { %v1986_v1 = vrot.slane %v1687_v43, 7  ;;  %3150 = vst [vmem:[%s4018_s10 + $0x60] sm:$0xff] %v3105_v29  }
 0x2b9   : > { %v2116_v17 = vrot.slane %v1692_v8, 1  ;;  %v2313_v12 = vmul.f32 %v3992_v48, %v2247_v33  ;;  %vm2280_vm14 = vcmp.ge.f32.partialorder %v2247_v33, 0.0  ;;  %v2443_v27 = vmul.f32 -1.0, %v3036_v40  ;;  %v4629_v40 = vld [vmem:[#allocation76_spill] sm:$0xff] }
 0x2ba   : > { %v1996_v11 = vsel %vm1991_vm3, %v1985_v45, %v1986_v1 }
 0x2bb   : > { %v2083_v19 = vadd.f32 %v1996_v11, %v1688_v14  ;;  %v2124_v53 = vsel %vm2120_vm2, %v2115_v58, %v2116_v17  ;;  %v2345_v22 = vsel %vm2280_vm14, %v2247_v33, %v2313_v12  ;;  %v4619_v14 = vld [vmem:[#allocation68_spill] sm:$0xff]  ;;  %v3037_v33 = vunpack.c.h.bf16 %v3137_v35  ;;  %v4627_v35 = vld [vmem:[#allocation75_spill] sm:$0xff] }
 0x2bc   : > { %v2180_v36 = vmul.f32 %v2942_v44, %v2124_v53  ;;  %v1305_v50 = vpop.f32.mrf.mxu1  ;;  %v1598_v9 = vpop.f32.mrf.mxu0  ;;  %v2473_v23 = vadd.f32 %v2441_v62, %v2345_v22  ;;  %v1735_v62 = vand.u32 31, %v3915_v26 }
 0x2bd   : > { %v1418_v54 = vpop.f32.mrf.mxu2  ;;  %v1507_v59 = vpop.f32.mrf.mxu3  ;;  %v1306_v3 = vadd.f32 %v1305_v50, %v4615_v21  ;;  %v4621_v50 = vld [vmem:[#allocation73_spill] sm:$0xff] }
 0x2be   : > { %v1690_v15 = vadd.f32 %v1418_v54, %v1126_v52  ;;  %v2212_v45 = vadd.f32 %v2180_v36, %v2083_v19  ;;  %v1691_v60 = vadd.f32 %v1507_v59, %v4616_v30  ;;  %vm1767_vm6 = vcmp.gt.s32.totalorder %v1735_v62, 0 }
 0x2bf   : > { %v1695_v32 = vadd.f32 %v1598_v9, %v1306_v3 }
 0x2c0   : > { %v1987_v51 = vrot.slane %v1690_v15, 7  ;;  %v2248_v57 = vadd.f32 %v4299_v25, %v2212_v45  ;;  %v2444_v45 = vmul.f32 -1.0, %v3037_v33 }
 0x2c1   : > { %v2117_v58 = vrot.slane %v1695_v32, 1 }
 0x2c2   : > { %v1995_v13 = vsel %vm1991_vm3, %v1986_v1, %v1987_v51  ;;  %vm2281_vm15 = vcmp.ge.f32.partialorder %v2248_v57, 0.0  ;;  %v2314_v46 = vmul.f32 %v3992_v48, %v2248_v57 }
 0x2c3   : > { %v2052_v2 = vmul.f32 %v2935_v34, %v1995_v13  ;;  %v2123_v41 = vsel %vm2120_vm2, %v2116_v17, %v2117_v58  ;;  %v4620_v17 = vld [vmem:[#allocation20_spill] sm:$0xff] }
 0x2c4   : > { %v2346_v42 = vsel %vm2281_vm15, %v2248_v57, %v2314_v46  ;;  %v1308_v43 = vpop.f32.mrf.mxu1  ;;  %v1601_v55 = vpop.f32.mrf.mxu0  ;;  %v1131_v39 = vadd.f32 %v3890_v47, %v4620_v17 }
 0x2c5   : > { %v2084_v10 = vadd.f32 %v2052_v2, %v1691_v60  ;;  %v1420_v63 = vpop.f32.mrf.mxu2  ;;  %v1509_v24 = vpop.f32.mrf.mxu3  ;;  %v2474_v29 = vadd.f32 %v2442_v16, %v2346_v42  ;;  %v1309_v0 = vadd.f32 %v1308_v43, %v3888_v61  ;;  %v1734_v61 = vadd.s32 248, %v3915_v26  ;;  %v4623_v2 = vld [vmem:[#allocation23_spill] sm:$0xff] }
 0x2c6   : > { %v1693_v4 = vadd.f32 %v1420_v63, %v1128_v56  ;;  %v1694_v8 = vadd.f32 %v1509_v24, %v4619_v14  ;;  %v4628_v14 = vrot.slane %v4627_v35, 7 }
 0x2c7   : > { %v2213_v38 = vadd.f32 %v2123_v41, %v2084_v10  ;;  %v3110_v1 = vpack.c.bf16 %v2474_v29, %v2473_v23  ;;  %v1698_v49 = vadd.f32 %v1601_v55, %v1309_v0  ;;  %v1766_v12 = vand.u32 31, %v1734_v61  ;;  %v3138_v0 = vld [vmem:[%s3970_s19 + $0x78] sm:$0xff]  }
 0x2c8   : > { %v1988_v7 = vrot.slane %v1693_v4, 7  ;;  %v4625_v4 = vrot.slane %v3899_v37, 1  ;;  %v2928_v55 = vsel %vm1767_vm6, 1.0, %v3247_v18  ;;  %v3041_v17 = vunpack.c.h.bf16 %v3138_v0 }
 0x2c9   : > { %v2249_v11 = vadd.f32 %v4299_v25, %v2213_v38  ;;  %3151 = vst [vmem:[%s4018_s10 + $0x68] sm:$0xff] %v3110_v1   ;;  %v2118_v44 = vrot.slane %v1698_v49, 1  ;;  %vm1894_vm5 = vcmp.lt.s32.totalorder %v1766_v12, 31  ;;  %v2222_v49 = vadd.f32 %v4299_v25, %v3945_v6 }
 0x2ca   : > { %v1994_v20 = vsel %vm1991_vm3, %v1987_v51, %v1988_v7  ;;  %v4622_v51 = vld [vmem:[#allocation71_spill] sm:$0xff]  ;;  %v2943_v29 = vsel %vm1894_vm5, 1.0, %v3247_v18 }
 0x2cb   : > { %v2085_v19 = vadd.f32 %v1994_v20, %v1694_v8  ;;  %v2122_v52 = vsel %vm2120_vm2, %v2117_v58, %v2118_v44  ;;  %v2315_v59 = vmul.f32 %v3992_v48, %v2249_v11  ;;  %vm2282_vm0 = vcmp.ge.f32.partialorder %v2249_v11, 0.0  ;;  %v4624_v58 = vld [vmem:[#allocation74_spill] sm:$0xff] }
 0x2cc   : > { %v1310_v15 = vpop.f32.mrf.mxu1  ;;  %v1603_v3 = vpop.f32.mrf.mxu0  ;;  %v1133_v28 = vadd.f32 %v4624_v58, %v4623_v2  ;;  %v2288_v26 = vmul.f32 %v3992_v48, %v2222_v49 }
 0x2cd   : > { %v1423_v53 = vpop.f32.mrf.mxu2  ;;  %v1512_v54 = vpop.f32.mrf.mxu3  ;;  %v2214_v5 = vadd.f32 %v2122_v52, %v2085_v19  ;;  %v1311_v9 = vadd.f32 %v1310_v15, %v4621_v50  ;;  %v2347_v57 = vsel %vm2282_vm0, %v2249_v11, %v2315_v59  ;;  %v2979_v11 = vld [vmem:[%s3970_s19] sm:$0xff]  }
 0x2ce   : > { %v1696_v36 = vadd.f32 %v1423_v53, %v1131_v39  ;;  %v1697_v34 = vadd.f32 %v1512_v54, %v4622_v51  ;;  %v2475_v56 = vadd.f32 %v2443_v27, %v2347_v57  ;;  %v2980_v33 = vunpack.c.l.bf16 %v2979_v11  ;;  %v4630_v54 = vld [vmem:[#allocation77_spill] sm:$0xff] }
 0x2cf   : > { %v2250_v47 = vadd.f32 %v4299_v25, %v2214_v5  ;;  %v1701_v32 = vadd.f32 %v1603_v3, %v1311_v9  ;;  %v2981_v53 = vunpack.c.h.bf16 %v2979_v11 }
 0x2d0   : > { %v1989_v21 = vrot.slane %v1696_v36, 7  ;;  %v2446_v36 = vmul.f32 -1.0, %v3041_v17  ;;  %v2415_v27 = vmul.f32 -1.0, %v2980_v33 }
 0x2d1   : > { %vm2283_vm4 = vcmp.ge.f32.partialorder %v2250_v47, 0.0  ;;  %v2316_v13 = vmul.f32 %v3992_v48, %v2250_v47  ;;  %v2119_v60 = vrot.slane %v1701_v32, 1 }
 0x2d2   : > { %v1993_v16 = vsel %vm1991_vm3, %v1988_v7, %v1989_v21  ;;  %v4626_v7 = vld [vmem:[#allocation72_spill] sm:$0xff] }
 0x2d3   : > { %v2086_v30 = vadd.f32 %v1993_v16, %v1697_v34  ;;  %v2348_v31 = vsel %vm2283_vm4, %v2250_v47, %v2316_v13  ;;  %v2121_v46 = vsel %vm2120_vm2, %v2118_v44, %v2119_v60  ;;  %v2152_v43 = vsel %vm2120_vm2, %v2119_v60, %v4625_v4 }
 0x2d4   : > { %v2476_v22 = vadd.f32 %v2444_v45, %v2348_v31  ;;  %v2184_v19 = vmul.f32 %v2943_v29, %v2152_v43  ;;  %v3040_v44 = vunpack.c.l.bf16 %v3138_v0  ;;  %v2416_v47 = vmul.f32 -1.0, %v2981_v53 }
 0x2d5   : > { %v1425_v10 = vpop.f32.mrf.mxu2  ;;  %v2215_v41 = vadd.f32 %v2121_v46, %v2086_v30  ;;  %v1514_v24 = vpop.f32.mrf.mxu3 }
 0x2d6   : > { %v1699_v63 = vadd.f32 %v1425_v10, %v1133_v28  ;;  %v3115_v42 = vpack.c.bf16 %v2476_v22, %v2475_v56  ;;  %v1700_v1 = vadd.f32 %v1514_v24, %v4626_v7  ;;  %v2445_v5 = vmul.f32 -1.0, %v3040_v44 }
 0x2d7   : > { %v2251_v38 = vadd.f32 %v4299_v25, %v2215_v41 }
 0x2d8   : > { %v1990_v23 = vrot.slane %v1699_v63, 7  ;;  %3152 = vst [vmem:[%s4018_s10 + $0x70] sm:$0xff] %v3115_v42  }
 0x2d9   : > { %v2317_v39 = vmul.f32 %v3992_v48, %v2251_v38  ;;  %vm2284_vm2 = vcmp.ge.f32.partialorder %v2251_v38, 0.0 }
 0x2da   : > { %v2023_v8 = vsel %vm1991_vm3, %v1990_v23, %v4628_v14  ;;  %v1992_v37 = vsel %vm1991_vm3, %v1989_v21, %v1990_v23  ;;  %vm2255_vm3 = vcmp.ge.f32.partialorder %v2222_v49, 0.0 }
 0x2db   : > { %v2024_v20 = vmul.f32 %v2928_v55, %v2023_v8  ;;  %v2087_v18 = vadd.f32 %v1992_v37, %v1700_v1  ;;  %v2349_v15 = vsel %vm2284_vm2, %v2251_v38, %v2317_v39  ;;  %v2320_v21 = vsel %vm2255_vm3, %v2222_v49, %v2288_v26 }
 0x2dc   : > { %v2477_v45 = vadd.f32 %v2445_v5, %v2349_v15  ;;  %v2448_v32 = vadd.f32 %v2416_v47, %v2320_v21 }
 0x2dd   : > { %v2056_v61 = vadd.f32 %v2024_v20, %v4629_v40  ;;  %v2216_v52 = vadd.f32 %v2184_v19, %v2087_v18 }
 0x2df   : > { %v2185_v59 = vadd.f32 %v4630_v54, %v2056_v61  ;;  %v2252_v6 = vadd.f32 %v4299_v25, %v2216_v52 }
 0x2e1   : > { %v2221_v50 = vadd.f32 %v4299_v25, %v2185_v59  ;;  %vm2285_vm1 = vcmp.ge.f32.partialorder %v2252_v6, 0.0  ;;  %v2318_v9 = vmul.f32 %v3992_v48, %v2252_v6 }
 0x2e3   : > { %vm2254_vm7 = vcmp.ge.f32.partialorder %v2221_v50, 0.0  ;;  %v2287_v3 = vmul.f32 %v3992_v48, %v2221_v50  ;;  %v2350_v12 = vsel %vm2285_vm1, %v2252_v6, %v2318_v9 }
 0x2e4   : > { %v2478_v51 = vadd.f32 %v2446_v36, %v2350_v12 }
 0x2e5   : > { %v2319_v34 = vsel %vm2254_vm7, %v2221_v50, %v2287_v3 }
 0x2e6   : > { %v2447_v62 = vadd.f32 %v2415_v27, %v2319_v34  ;;  %v3120_v57 = vpack.c.bf16 %v2478_v51, %v2477_v45 }
 0x2e8   : > { %v3045_v13 = vpack.c.bf16 %v2448_v32, %v2447_v62  ;;  %3153 = vst [vmem:[%s4018_s10 + $0x78] sm:$0xff] %v3120_v57  }
 0x2ea   : > { %3046 = vst [vmem:[%s4018_s10] sm:$0xff] %v3045_v13  }
 0x2eb PF: > { %s18_s30 = sadd.s32 1, %s3245_s30   ;;  %s4631_s26 = smov %s3237_s28 }
 0x2ec   : > { %p15_p1 = scmp.ge.s32.totalorder %s18_s30, 10   ;;  %s4632_s27 = smov %s3241_s29 }
 0x2ed   : > { %s4633_s28 = smov %s4636_s5  ;;  %s4634_s29 = smov %s4640_s8 }
 0x2ee   :  { %17 = sbr.rel (!%p15_p1) target bundleno = 3 (0x3), region = 89 }

// kernel: dense_d_block.7
= control target key start
LH: loop header
LB: loop body
LE: loop exit
PB: predicated region body
PF: predicated region fallthrough
CT: control target
= control target key end

     0   :  { %s3815_s26 = smov 0   ;;  %s3817_s27 = smov 0   ;;  %s4981_s0 = inlined_call_operand.vmem [shape: bf16[2,1024,128], index: 0, kind: input, shape index: {}, may-alias: {0,1,2}]   ;;  %s4982_s1 = inlined_call_operand.vmem [shape: bf16[2,1024,128], index: 1, kind: input, shape index: {}, may-alias: {0,1,2}]   ;;  %s4983_s2 = inlined_call_operand.vmem [shape: bf16[2,1024,128], index: 2, kind: input, shape index: {}, may-alias: {0,1,2}]   ;;  %s4984_s3 = inlined_call_operand.vmem [shape: bf16[3,384,8], index: 3, kind: input, shape index: {}]   ;;  %s4985_s4 = inlined_call_operand.vmem [shape: f32[1,8], index: 4, kind: input, shape index: {}]   ;;  %s4986_s5 = inlined_call_operand.<no memory space> [shape: f32[1,1], index: 5, kind: input, shape index: {}]   ;;  %s4987_s6 = inlined_call_operand.vmem [shape: bf16[2,1024,8], index: 6, kind: input, shape index: {}]   ;;  %s4988_s7 = inlined_call_operand.vmem [shape: f32[2,1024,8], index: 7, kind: output, shape index: {}]  }
   0x1   :  { %12 = sst [smem:[#allocation2]] %s4986_s5  ;;  %s3819_s28 = smov 0  }
   0x2   :  { %s3821_s29 = smov 0   ;;  %s3823_s30 = smov 0  }
   0x3 LB: > { %s27_s5 = sadd.s32 1, %s3761_s28  ;;  %s30_s8 = sadd.s32 1, %s3765_s29  ;;  %s3769_s30 = sphi %s3823_s30, %s18_s30   ;;  %s3765_s29 = sphi %s3821_s29, %s5066_s29   ;;  %s3761_s28 = sphi %s3819_s28, %s5065_s28   ;;  %s3757_s27 = sphi %s3817_s27, %s5064_s27   ;;  %s3753_s26 = sphi %s3815_s26, %s5063_s26  }
   0x4   : > { %p28_p0 = scmp.ge.s32.totalorder %s27_s5, 4  ;;  %p2982_p1 = scmp.ge.s32.totalorder %s3769_s30, 1 }
   0x5   : > { %p342_p2 = scmp.lt.s32.totalorder %s3769_s30, 9 }
   0x6   : > { %s5068_s5 = smov (%p28_p0, %s27_s5), 0  ;;  %s5070_s8 = smov (!%p28_p0, %s30_s8), %s3765_s29 }
   0x7   : > { %p343_p3 = pnand %p2982_p1, %p342_p2  ;;  %p32_p4 = scmp.ge.s32.totalorder %s5070_s8, 2 }
   0x9   : > { %s5072_s8 = smov (%p32_p4, %s5070_s8), 0  ;;  %346 = sbr.rel (%p343_p3) target bundleno = 762 (0x2fa), region = 48 }
   0xe   : > { %v3490_v0 = vld [vmem:[%s4984_s3 + $0x38] sm:$0xff]  ;;  %p422_p5 = scmp.lt.s32.totalorder %s3757_s27, 1  ;;  %s2988_s11 = sshll.u32 %s3753_s26, 5  ;;  %v3489_v1 = vld [vmem:[%s4984_s3 + $0x30] sm:$0xff]  ;;  %v3488_v2 = vld [vmem:[%s4984_s3 + $0x28] sm:$0xff]  ;;  %vm2795_vm4 = vcmask 64512  }
   0xf   : > { %s2983_s12 = sshll.u32 %s3753_s26, 3  ;;  %3652 = vmatpush.bf16.msra.mxu1 %v3490_v0  ;;  %3653 = vmatpush.bf16.msra.mxu2 %v3490_v0  ;;  %p438_p6 = scmp.lt.s32.totalorder %s2988_s11, 127  ;;  %v3487_v3 = vld [vmem:[%s4984_s3 + $0x20] sm:$0xff]  ;;  %v3486_v4 = vld [vmem:[%s4984_s3 + $0x18] sm:$0xff]  ;;  %v3485_v5 = vld [vmem:[%s4984_s3 + $0x10] sm:$0xff] }
  0x10   : > { %3654 = vmatpush.bf16.msra.mxu3 %v3490_v0  ;;  %895 = vmatpush.bf16.msra.mxu0 %v3490_v0  ;;  %s5074_s27 = smov (!%p422_p5, %s3757_s27), 1  ;;  %s2984_s15 = sadd.s32 4294967295, %s2983_s12  ;;  %v3484_v7 = vld [vmem:[%s4984_s3 + $0x8] sm:$0xff]  ;;  %v3483_v12 = vld [vmem:[%s4984_s3] sm:$0xff]  ;;  %v3506_v15 = vld [vmem:[%s4984_s3 + $0xb8] sm:$0xff] }
  0x11   : > { %p419_p7 = scmp.gt.s32.totalorder %s2984_s15, 0  ;;  %p483_p8 = scmp.gt.s32.totalorder %s3753_s26, 0  ;;  %v3538_v16 = vld [vmem:[%s4984_s3 + $0x1b8] sm:$0xff]  ;;  %v3505_v28 = vld [vmem:[%s4984_s3 + $0xb0] sm:$0xff]  ;;  %v3504_v35 = vld [vmem:[%s4984_s3 + $0xa8] sm:$0xff] }
  0x12   : > { %s5076_s11 = smov (!%p438_p6, %s2988_s11), 127  ;;  %s3866_s23 = sshll.u32 %s5074_s27, 7  ;;  %v3498_v23 = vld [vmem:[%s4984_s3 + $0x78] sm:$0xff]  ;;  %v3537_v29 = vld [vmem:[%s4984_s3 + $0x1b0] sm:$0xff]  ;;  %v3536_v36 = vld [vmem:[%s4984_s3 + $0x1a8] sm:$0xff] }
  0x13   : > { %3655 = vmatpush.bf16.msra.mxu1 %v3489_v1  ;;  %3656 = vmatpush.bf16.msra.mxu2 %v3489_v1  ;;  %s5078_s15 = smov (!%p419_p7, %s2984_s15), 0  ;;  %v3546_v31 = vld [vmem:[%s4984_s3 + $0x1f8] sm:$0xff]  ;;  %v3497_v32 = vld [vmem:[%s4984_s3 + $0x70] sm:$0xff]  ;;  %v3496_v38 = vld [vmem:[%s4984_s3 + $0x68] sm:$0xff]  ;;  %p496_p11 = scmp.lt.s32.totalorder %s3753_s26, 3 }
  0x14   : > { %3657 = vmatpush.bf16.msra.mxu3 %v3489_v1  ;;  %896 = vmatpush.bf16.msra.mxu0 %v3489_v1  ;;  %s484_s18 = scalar_select %p483_p8, 1, 0  ;;  %v3545_v37 = vld [vmem:[%s4984_s3 + $0x1f0] sm:$0xff]  ;;  %v3503_v41 = vld [vmem:[%s4984_s3 + $0xa0] sm:$0xff]  ;;  %v3544_v43 = vld [vmem:[%s4984_s3 + $0x1e8] sm:$0xff] }
  0x15   : > { %s2985_s21 = sshll.u32 %s5078_s15, 2  ;;  %v3535_v42 = vld [vmem:[%s4984_s3 + $0x1a0] sm:$0xff]  ;;  %v3502_v47 = vld [vmem:[%s4984_s3 + $0x98] sm:$0xff]  ;;  %v3501_v55 = vld [vmem:[%s4984_s3 + $0x90] sm:$0xff] }
  0x16   : > { %p424_p9 = scmp.lt.s32.totalorder %s2985_s21, 127  ;;  %s485_s22 = scvt.s32.f32 %s484_s18  ;;  %v3495_v44 = vld [vmem:[%s4984_s3 + $0x60] sm:$0xff]  ;;  %v3534_v48 = vld [vmem:[%s4984_s3 + $0x198] sm:$0xff]  ;;  %v3533_v56 = vld [vmem:[%s4984_s3 + $0x190] sm:$0xff] }
  0x17   : > { %3658 = vmatpush.bf16.msra.mxu1 %v3488_v2  ;;  %3659 = vmatpush.bf16.msra.mxu2 %v3488_v2  ;;  %v3543_v52 = vld [vmem:[%s4984_s3 + $0x1e0] sm:$0xff]  ;;  %v3494_v54 = vld [vmem:[%s4984_s3 + $0x58] sm:$0xff]  ;;  %v3493_v58 = vld [vmem:[%s4984_s3 + $0x50] sm:$0xff]  ;;  %s497_s16 = scalar_select %p496_p11, 1, 0 }
  0x18   : > { %3660 = vmatpush.bf16.msra.mxu3 %v3488_v2  ;;  %897 = vmatpush.bf16.msra.mxu0 %v3488_v2  ;;  %s5080_s21 = smov (!%p424_p9, %s2985_s21), 127  ;;  %p487_p10 = scmp.ne.f32.partialorder %s485_s22, %s485_s22  ;;  %v3542_v57 = vld [vmem:[%s4984_s3 + $0x1d8] sm:$0xff]  ;;  %v3500_v59 = vld [vmem:[%s4984_s3 + $0x88] sm:$0xff]  ;;  %v3541_v61 = vld [vmem:[%s4984_s3 + $0x1d0] sm:$0xff] }
  0x19   : > { %s488_s9 = sshrl.u32 %s485_s22, 16  ;;  %s427_s10 = sadd.s32 %s3866_s23, %s5080_s21  ;;  %v3532_v60 = vld [vmem:[%s4984_s3 + $0x188] sm:$0xff]  ;;  %v3499_v63 = vld [vmem:[%s4984_s3 + $0x80] sm:$0xff] }
  0x1a   : > { %s489_s13 = sand.u32 1, %s488_s9  ;;  %s2987_s14 = sshll.u32 %s427_s10, 2  ;;  %v3492_v62 = vld [vmem:[%s4984_s3 + $0x48] sm:$0xff]  ;;  %v3531_v0 = vld [vmem:[%s4984_s3 + $0x180] sm:$0xff] }
  0x1b   : > { %3661 = vmatpush.bf16.msra.mxu1 %v3487_v3  ;;  %3662 = vmatpush.bf16.msra.mxu2 %v3487_v3  ;;  %s490_s15 = sadd.s32 32767, %s489_s13  ;;  %s3875_s17 = scalar_lea.vmem %s4981_s0, %s2987_s14  ;;  %v3540_v1 = vld [vmem:[%s4984_s3 + $0x1c8] sm:$0xff]  ;;  %v3491_v2 = vld [vmem:[%s4984_s3 + $0x40] sm:$0xff] }
  0x1c   : > { %3663 = vmatpush.bf16.msra.mxu3 %v3487_v3  ;;  %898 = vmatpush.bf16.msra.mxu0 %v3487_v3  ;;  %s491_s18 = sadd.s32 %s490_s15, %s485_s22  ;;  %s3883_s21 = sadd.s32 %s3866_s23, %s5076_s11  ;;  %v3556_v6 = vld [vmem:[%s3875_s17] sm:$0xff]   ;;  %v3635_v17 = vld [vmem:[%s3875_s17 + $0x8] sm:$0xff]  }
  0x1d   : > { %s492_s24 = sand.u32 4294901760, %s491_s18  ;;  %s2990_s14 = sshll.u32 %s3883_s21, 2  ;;  %v3557_v8 = vunpack.c.l.bf16 %v3556_v6  ;;  %v3558_v9 = vunpack.c.h.bf16 %v3556_v6  ;;  %v3561_v26 = vunpack.c.l.bf16 %v3635_v17  ;;  %v3562_v27 = vunpack.c.h.bf16 %v3635_v17  ;;  %v3539_v6 = vld [vmem:[%s4984_s3 + $0x1c0] sm:$0xff]  ;;  %v3521_v17 = vld [vmem:[%s4984_s3 + $0x130] sm:$0xff] }
  0x1e   : > { %s5082_s24 = smov (%p487_p10, %s492_s24), 2143289344  ;;  %s3898_s18 = scalar_lea.vmem %s4982_s1, %s2990_s14 }
  0x1f   : > { %3664 = vmatpush.bf16.msra.mxu1 %v3486_v4  ;;  %3665 = vmatpush.bf16.msra.mxu2 %v3486_v4  ;;  %s495_s25 = sshrl.u32 %s5082_s24, 16  ;;  %v3908_v18 = vld [vmem:[%s3898_s18 + $0x10] sm:$0xff]  ;;  %v3968_v49 = vld [vmem:[%s3898_s18 + $0x18] sm:$0xff]  ;;  %v4025_v3 = vld [vmem:[%s3898_s18 + $0x20] sm:$0xff]  ;;  %s446_s9 = sadd.s32 8, %s2983_s12 }
  0x20   : > { %3666 = vmatpush.bf16.msra.mxu3 %v3486_v4  ;;  %899 = vmatpush.bf16.msra.mxu0 %v3486_v4  ;;  %s545_s13 = sshll.u32 %s495_s25, 16  ;;  %v3911_v19 = vld [vmem:[%s3898_s18 + $0x30] sm:$0xff]  ;;  %v3971_v50 = vld [vmem:[%s3898_s18 + $0x38] sm:$0xff]  ;;  %v4028_v4 = vld [vmem:[%s3898_s18 + $0x40] sm:$0xff]  ;;  %s4294_s10 = scvt.s32.f32 %s497_s16 }
  0x21   : > { %s546_s22 = sor.u32 %s545_s13, %s495_s25  ;;  %v3914_v22 = vld [vmem:[%s3898_s18 + $0x50] sm:$0xff]  ;;  %v3974_v51 = vld [vmem:[%s3898_s18 + $0x58] sm:$0xff]  ;;  %p447_p12 = scmp.lt.s32.totalorder %s446_s9, 31 }
  0x22   : > { %v547_v10 = vstv %s546_s22  ;;  %s501_s17 = sshrl.u32 %s4294_s10, 16  ;;  %p500_p0 = scmp.ne.f32.partialorder %s4294_s10, %s4294_s10 }
  0x23   : > { %3667 = vmatpush.bf16.msra.mxu1 %v3485_v5  ;;  %3668 = vmatpush.bf16.msra.mxu2 %v3485_v5  ;;  %v553_v11 = vunpack.c.l.bf16 %v547_v10  ;;  %v3554_v10 = vld [vmem:[%s4984_s3 + $0x238] sm:$0xff]  ;;  %s5084_s9 = smov (!%p447_p12, %s446_s9), 31  ;;  %s502_s26 = sand.u32 1, %s501_s17 }
  0x24   : > { %3669 = vmatpush.bf16.msra.mxu3 %v3485_v5  ;;  %900 = vmatpush.bf16.msra.mxu0 %v3485_v5  ;;  %v4031_v5 = vld [vmem:[%s3898_s18 + $0x60] sm:$0xff]  ;;  %s503_s12 = sadd.s32 32767, %s502_s26  ;;  %s2992_s13 = sshll.u32 %s5084_s9, 2 }
  0x25   : > { %v554_v13 = vmul.f32 %v3557_v8, %v553_v11  ;;  %v555_v14 = vmul.f32 %v3558_v9, %v553_v11  ;;  %v556_v33 = vmul.f32 %v3561_v26, %v553_v11  ;;  %v557_v34 = vmul.f32 %v3562_v27, %v553_v11  ;;  %v3514_v8 = vld [vmem:[%s4984_s3 + $0xf8] sm:$0xff]  ;;  %v3528_v26 = vld [vmem:[%s4984_s3 + $0x168] sm:$0xff]  ;;  %s504_s22 = sadd.s32 %s503_s12, %s4294_s10  ;;  %p452_p13 = scmp.lt.s32.totalorder %s2992_s13, 127 }
  0x26   : > { %v3522_v9 = vld [vmem:[%s4984_s3 + $0x138] sm:$0xff]  ;;  %s505_s11 = sand.u32 4294901760, %s504_s22  ;;  %s4603_s19 = scalar_lea.vmem %s4987_s6, %s2990_s14 }
  0x27   : > { %3670 = vmatpush.bf16.msra.mxu1 %v3484_v7  ;;  %3671 = vmatpush.bf16.msra.mxu2 %v3484_v7  ;;  %v558_v20 = vpack.c.bf16 %v554_v13, %v554_v13  ;;  %v559_v21 = vpack.c.bf16 %v555_v14, %v555_v14  ;;  %v560_v39 = vpack.c.bf16 %v556_v33, %v556_v33  ;;  %v3530_v11 = vld [vmem:[%s4984_s3 + $0x178] sm:$0xff]  ;;  %v4059_v13 = vld [vmem:[%s3898_s18 + $0x48] sm:$0xff]  ;;  %s5086_s13 = smov (!%p452_p13, %s2992_s13), 127  ;;  %s5088_s11 = smov (%p500_p0, %s505_s11), 2143289344 }
  0x28   : > { %3672 = vmatpush.bf16.msra.mxu3 %v3484_v7  ;;  %901 = vmatpush.bf16.msra.mxu0 %v3484_v7  ;;  %v561_v40 = vpack.c.bf16 %v557_v34, %v557_v34  ;;  %v4037_v7 = vld [vmem:[%s3898_s18] sm:$0xff]  ;;  %v4062_v14 = vld [vmem:[%s3898_s18 + $0x68] sm:$0xff]  ;;  %s455_s15 = sadd.s32 %s3866_s23, %s5086_s13  ;;  %s508_s27 = sshrl.u32 %s5088_s11, 16 }
  0x29   : > { %v566_v24 = vunpack.c.l.b16 %v558_v20  ;;  %v567_v25 = vunpack.c.l.b16 %v559_v21  ;;  %v568_v45 = vunpack.c.l.b16 %v560_v39  ;;  %v3553_v20 = vld [vmem:[%s4984_s3 + $0x230] sm:$0xff]  ;;  %s2994_s23 = sshll.u32 %s455_s15, 2  ;;  %s662_s25 = sshll.u32 %s508_s27, 16 }
  0x2a   : > { %v569_v46 = vunpack.c.l.b16 %v561_v40  ;;  %v3529_v21 = vld [vmem:[%s4984_s3 + $0x170] sm:$0xff]  ;;  %s4344_s17 = scalar_lea.vmem %s4983_s2, %s2994_s23  ;;  %s663_s26 = sor.u32 %s662_s25, %s508_s27 }
  0x2b   : > { %3673 = vmatpush.bf16.msra.mxu1 %v3483_v12  ;;  %3674 = vmatpush.bf16.msra.mxu2 %v3483_v12  ;;  %v3927_v30 = vpack.c.b16 %v567_v25, %v566_v24  ;;  %v3520_v24 = vld [vmem:[%s4984_s3 + $0x128] sm:$0xff]  ;;  %s2601_s15 = sld [smem:[#allocation2]]  ;;  %s3000_s14 = sshll.u32 %s3883_s21, 3 }
  0x2c   : > { %3675 = vmatpush.bf16.msra.mxu3 %v3483_v12  ;;  %902 = vmatpush.bf16.msra.mxu0 %v3483_v12  ;;  %v3979_v53 = vpack.c.b16 %v569_v46, %v568_v45  ;;  %v4056_v12 = vld [vmem:[%s3898_s18 + $0x28] sm:$0xff]  ;;  %s4630_s21 = scalar_lea.vmem %s4988_s7, %s3000_s14 }
  0x2d   : > { %v3552_v25 = vld [vmem:[%s4984_s3 + $0x228] sm:$0xff] }
  0x2e   : > { %923 = vmatmul.bf16.vlgmr.msra.gmra.mxu1 %v3908_v18  ;;  %943 = vmatmul.bf16.vlgmr.msra.gmra.mxu2 %v3911_v19 }
  0x2f   : > { %1073 = vmatpush.bf16.msrb.mxu2 %v3506_v15  ;;  %963 = vmatmul.bf16.vlgmr.msra.gmra.mxu3 %v3914_v22  ;;  %v4065_v15 = vld [vmem:[%s3898_s18 + $0x8] sm:$0xff] }
  0x30   : > { %1404 = vmatpush.bf16.msrb.mxu3 %v3538_v16  ;;  %984 = vmatpush.bf16.msrb.mxu1 %v3498_v23  ;;  %v3513_v16 = vld [vmem:[%s4984_s3 + $0xf0] sm:$0xff]  ;;  %v3512_v23 = vld [vmem:[%s4984_s3 + $0xe8] sm:$0xff] }
  0x31   : > { %903 = vmatmul.bf16.vlgmr.msra.gmra.mxu0 %v3927_v30 }
  0x32   : > { %1493 = vmatpush.bf16.msrb.mxu0 %v3546_v31  ;;  %v3519_v31 = vld [vmem:[%s4984_s3 + $0x120] sm:$0xff] }
  0x33   : > { %1074 = vmatpush.bf16.msrb.mxu2 %v3505_v28 }
  0x34   : > { %1405 = vmatpush.bf16.msrb.mxu3 %v3537_v29  ;;  %985 = vmatpush.bf16.msrb.mxu1 %v3497_v32  ;;  %v3511_v29 = vld [vmem:[%s4984_s3 + $0xe0] sm:$0xff] }
  0x36   : > { %1494 = vmatpush.bf16.msrb.mxu0 %v3545_v37  ;;  %v3527_v37 = vld [vmem:[%s4984_s3 + $0x160] sm:$0xff] }
  0x37   : > { %1075 = vmatpush.bf16.msrb.mxu2 %v3504_v35  ;;  %v3551_v35 = vld [vmem:[%s4984_s3 + $0x220] sm:$0xff] }
  0x38   : > { %1406 = vmatpush.bf16.msrb.mxu3 %v3536_v36  ;;  %986 = vmatpush.bf16.msrb.mxu1 %v3496_v38 }
  0x3a   : > { %1495 = vmatpush.bf16.msrb.mxu0 %v3544_v43 }
  0x3b   : > { %1076 = vmatpush.bf16.msrb.mxu2 %v3503_v41 }
  0x3c   : > { %1407 = vmatpush.bf16.msrb.mxu3 %v3535_v42  ;;  %987 = vmatpush.bf16.msrb.mxu1 %v3495_v44 }
  0x3e   : > { %928 = vmatmul.bf16.gmra.mxu1 %v3968_v49  ;;  %948 = vmatmul.bf16.gmra.mxu2 %v3971_v50 }
  0x3f   : > { %1077 = vmatpush.bf16.msrb.mxu2 %v3502_v47  ;;  %968 = vmatmul.bf16.gmra.mxu3 %v3974_v51 }
  0x40   : > { %1408 = vmatpush.bf16.msrb.mxu3 %v3534_v48  ;;  %1496 = vmatpush.bf16.msrb.mxu0 %v3543_v52 }
  0x41   : > { %908 = vmatmul.bf16.gmra.mxu0 %v3979_v53  ;;  %988 = vmatpush.bf16.msrb.mxu1 %v3494_v54  ;;  %v3510_v54 = vld [vmem:[%s4984_s3 + $0xd8] sm:$0xff] }
  0x43   : > { %1078 = vmatpush.bf16.msrb.mxu2 %v3501_v55  ;;  %v3518_v55 = vld [vmem:[%s4984_s3 + $0x118] sm:$0xff] }
  0x44   : > { %1409 = vmatpush.bf16.msrb.mxu3 %v3533_v56  ;;  %1497 = vmatpush.bf16.msrb.mxu0 %v3542_v57 }
  0x45   : > { %989 = vmatpush.bf16.msrb.mxu1 %v3493_v58 }
  0x47   : > { %1079 = vmatpush.bf16.msrb.mxu2 %v3500_v59  ;;  %v3550_v59 = vld [vmem:[%s4984_s3 + $0x218] sm:$0xff] }
  0x48   : > { %1410 = vmatpush.bf16.msrb.mxu3 %v3532_v60  ;;  %1498 = vmatpush.bf16.msrb.mxu0 %v3541_v61  ;;  %v3526_v61 = vld [vmem:[%s4984_s3 + $0x158] sm:$0xff] }
  0x49   : > { %990 = vmatpush.bf16.msrb.mxu1 %v3492_v62 }
  0x4b   : > { %1080 = vmatpush.bf16.msrb.mxu2 %v3499_v63 }
  0x4c   : > { %1411 = vmatpush.bf16.msrb.mxu3 %v3531_v0  ;;  %1499 = vmatpush.bf16.msrb.mxu0 %v3540_v1 }
  0x4d   : > { %991 = vmatpush.bf16.msrb.mxu1 %v3491_v2 }
  0x4e   : > { %933 = vmatmul.bf16.gmra.mxu1 %v4025_v3  ;;  %953 = vmatmul.bf16.gmra.mxu2 %v4028_v4 }
  0x4f   : > { %973 = vmatmul.bf16.gmra.mxu3 %v4031_v5  ;;  %2169 = vmatpush.bf16.msra.mxu2 %v3514_v8 }
  0x50   : > { %1500 = vmatpush.bf16.msrb.mxu0 %v3539_v6  ;;  %2258 = vmatpush.bf16.msra.mxu3 %v3522_v9 }
  0x51   : > { %913 = vmatmul.bf16.gmra.mxu0 %v4037_v7  ;;  %1582 = vmatpush.bf16.msra.mxu1 %v3554_v10 }
  0x53   : > { %2170 = vmatpush.bf16.msra.mxu2 %v3513_v16 }
  0x54   : > { %2347 = vmatpush.bf16.msra.mxu0 %v3530_v11  ;;  %2259 = vmatpush.bf16.msra.mxu3 %v3521_v17 }
  0x55   : > { %1583 = vmatpush.bf16.msra.mxu1 %v3553_v20 }
  0x57   : > { %2171 = vmatpush.bf16.msra.mxu2 %v3512_v23  ;;  %v3517_v23 = vld [vmem:[%s4984_s3 + $0x110] sm:$0xff] }
  0x58   : > { %2348 = vmatpush.bf16.msra.mxu0 %v3529_v21  ;;  %2260 = vmatpush.bf16.msra.mxu3 %v3520_v24  ;;  %v3509_v21 = vld [vmem:[%s4984_s3 + $0xd0] sm:$0xff] }
  0x59   : > { %1584 = vmatpush.bf16.msra.mxu1 %v3552_v25 }
  0x5b   : > { %2172 = vmatpush.bf16.msra.mxu2 %v3511_v29 }
  0x5c   : > { %2349 = vmatpush.bf16.msra.mxu0 %v3528_v26  ;;  %2261 = vmatpush.bf16.msra.mxu3 %v3519_v31 }
  0x5d   : > { %1585 = vmatpush.bf16.msra.mxu1 %v3551_v35  ;;  %v3549_v35 = vld [vmem:[%s4984_s3 + $0x210] sm:$0xff] }
  0x5e   : > { %938 = vmatmul.bf16.gmra.mxu1 %v4056_v12  ;;  %958 = vmatmul.bf16.gmra.mxu2 %v4059_v13 }
  0x5f   : > { %978 = vmatmul.bf16.gmra.mxu3 %v4062_v14  ;;  %2173 = vmatpush.bf16.msra.mxu2 %v3510_v54  ;;  %v3525_v54 = vld [vmem:[%s4984_s3 + $0x150] sm:$0xff] }
  0x60   : > { %2350 = vmatpush.bf16.msra.mxu0 %v3527_v37  ;;  %2262 = vmatpush.bf16.msra.mxu3 %v3518_v55 }
  0x61   : > { %918 = vmatmul.bf16.gmra.mxu0 %v4065_v15  ;;  %1586 = vmatpush.bf16.msra.mxu1 %v3550_v59 }
  0x63   : > { %2174 = vmatpush.bf16.msra.mxu2 %v3509_v21 }
  0x64   : > { %2351 = vmatpush.bf16.msra.mxu0 %v3526_v61  ;;  %2263 = vmatpush.bf16.msra.mxu3 %v3517_v23 }
  0x65   : > { %1587 = vmatpush.bf16.msra.mxu1 %v3549_v35 }
  0x68   : > { %2352 = vmatpush.bf16.msra.mxu0 %v3525_v54 }
  0x6e   : > { %992 = vmatmul.bf16.vlgmr.msrb.gmra.mxu1 %v4037_v7  ;;  %1081 = vmatmul.bf16.vlgmr.msrb.gmra.mxu2 %v3908_v18 }
  0x6f   : > { %1412 = vmatmul.bf16.vlgmr.msrb.gmra.mxu3 %v3927_v30 }
  0x71   : > { %1501 = vmatmul.bf16.vlgmr.msrb.gmra.mxu0 %v4037_v7 }
  0x7e   : > { %997 = vmatmul.bf16.gmra.mxu1 %v4065_v15  ;;  %1086 = vmatmul.bf16.gmra.mxu2 %v3968_v49 }
  0x7f   : > { %1417 = vmatmul.bf16.gmra.mxu3 %v3979_v53 }
  0x81   : > { %1506 = vmatmul.bf16.gmra.mxu0 %v4065_v15 }
  0x8e   : > { %1002 = vmatmul.bf16.gmra.mxu1 %v3908_v18  ;;  %1091 = vmatmul.bf16.gmra.mxu2 %v4025_v3 }
  0x8f   : > { %1422 = vmatmul.bf16.gmra.mxu3 %v4037_v7 }
  0x91   : > { %1511 = vmatmul.bf16.gmra.mxu0 %v3908_v18 }
  0x9e   : > { %1007 = vmatmul.bf16.gmra.mxu1 %v3968_v49  ;;  %1096 = vmatmul.bf16.gmra.mxu2 %v4056_v12 }
  0x9f   : > { %1427 = vmatmul.bf16.gmra.mxu3 %v4065_v15 }
  0xa1   : > { %1516 = vmatmul.bf16.gmra.mxu0 %v3968_v49 }
  0xab   : > { %v4111_v27 = vpop.f32.mrf.mxu1 }
  0xae   : > { %v4113_v28 = vpop.f32.mrf.mxu0  ;;  %1012 = vmatmul.bf16.gmra.mxu1 %v4025_v3  ;;  %1101 = vmatmul.bf16.gmra.mxu2 %v3911_v19 }
  0xaf   : > { %1432 = vmatmul.bf16.gmra.mxu3 %v3908_v18 }
  0xb1   : > { %1521 = vmatmul.bf16.gmra.mxu0 %v4025_v3  ;;  %v4125_v32 = vpop.f32.mrf.mxu2 }
  0xb2   : > { %v4127_v33 = vpop.f32.mrf.mxu3 }
  0xb3   : > { %v4129_v34 = vpop.f32.mrf.mxu1 }
  0xb6   : > { %v4134_v36 = vpop.f32.mrf.mxu0 }
  0xb9   : > { %v4139_v38 = vpop.f32.mrf.mxu2 }
  0xba   : > { %v4141_v39 = vpop.f32.mrf.mxu3 }
  0xbb   : > { %v4143_v40 = vpop.f32.mrf.mxu1 }
  0xbe   : > { %v4145_v41 = vpop.f32.mrf.mxu0  ;;  %1017 = vmatmul.bf16.gmra.mxu1 %v4056_v12  ;;  %1106 = vmatmul.bf16.gmra.mxu2 %v3971_v50 }
  0xbf   : > { %1437 = vmatmul.bf16.gmra.mxu3 %v3968_v49 }
  0xc1   : > { %1526 = vmatmul.bf16.gmra.mxu0 %v4056_v12  ;;  %v4151_v42 = vpop.f32.mrf.mxu2 }
  0xc2   : > { %v4153_v43 = vpop.f32.mrf.mxu3 }
  0xc3   : > { %v4155_v44 = vpop.f32.mrf.mxu1 }
  0xc6   : > { %v4157_v45 = vpop.f32.mrf.mxu0 }
  0xc9   : > { %v4159_v46 = vpop.f32.mrf.mxu2 }
  0xca   : > { %v4161_v47 = vpop.f32.mrf.mxu3 }
  0xcb   : > { %v4163_v48 = vpop.f32.mrf.mxu1 }
  0xce   : > { %v4165_v52 = vpop.f32.mrf.mxu0  ;;  %1022 = vmatmul.bf16.gmra.mxu1 %v3911_v19  ;;  %1111 = vmatmul.bf16.gmra.mxu2 %v4028_v4 }
  0xcf   : > { %1442 = vmatmul.bf16.gmra.mxu3 %v4025_v3 }
  0xd1   : > { %1531 = vmatmul.bf16.gmra.mxu0 %v3911_v19  ;;  %v4177_v56 = vpop.f32.mrf.mxu2 }
  0xd2   : > { %v4179_v57 = vpop.f32.mrf.mxu3 }
  0xd3   : > { %v4181_v58 = vpop.f32.mrf.mxu1 }
  0xd6   : > { %v4186_v60 = vpop.f32.mrf.mxu0 }
  0xd9   : > { %v4191_v62 = vpop.f32.mrf.mxu2 }
  0xda   : > { %v4193_v63 = vpop.f32.mrf.mxu3 }
  0xdb   : > { %v4195_v0 = vpop.f32.mrf.mxu1 }
  0xde   : > { %v4197_v1 = vpop.f32.mrf.mxu0  ;;  %1027 = vmatmul.bf16.gmra.mxu1 %v3971_v50  ;;  %1116 = vmatmul.bf16.gmra.mxu2 %v4059_v13 }
  0xdf   : > { %1447 = vmatmul.bf16.gmra.mxu3 %v4056_v12 }
  0xe1   : > { %1536 = vmatmul.bf16.gmra.mxu0 %v3971_v50  ;;  %v4203_v2 = vpop.f32.mrf.mxu2 }
  0xe2   : > { %v4205_v6 = vpop.f32.mrf.mxu3 }
  0xe3   : > { %v4207_v8 = vpop.f32.mrf.mxu1 }
  0xe6   : > { %v4209_v9 = vpop.f32.mrf.mxu0 }
  0xe9   : > { %v4211_v10 = vpop.f32.mrf.mxu2 }
  0xea   : > { %v4213_v11 = vpop.f32.mrf.mxu3 }
  0xeb   : > { %v993_v16 = vpop.f32.mrf.mxu1 }
  0xec   : > { %v994_v17 = vadd.f32 %v993_v16, %v4113_v28 }
  0xee   : > { %v1502_v20 = vpop.f32.mrf.mxu0  ;;  %1032 = vmatmul.bf16.gmra.mxu1 %v4028_v4  ;;  %1121 = vmatmul.bf16.gmra.mxu2 %v3914_v22 }
  0xef   : > { %1452 = vmatmul.bf16.gmra.mxu3 %v3911_v19  ;;  %v1671_v19 = vlaneseq }
  0xf1   : > { %1541 = vmatmul.bf16.gmra.mxu0 %v4028_v4  ;;  %v1082_v24 = vpop.f32.mrf.mxu2  ;;  %v4237_v55 = vshrl.u32 %v1671_v19, 7 }
  0xf2   : > { %v4226_v25 = vadd.f32 %v1082_v24, %v994_v17  ;;  %v1413_v26 = vpop.f32.mrf.mxu3 }
  0xf3   : > { %v4228_v28 = vadd.f32 %v1502_v20, %v1413_v26  ;;  %v995_v29 = vpop.f32.mrf.mxu1  ;;  %vm1960_vm0 = vcmp.lt.s32.totalorder %v4237_v55, 1  ;;  %vm2468_vm2 = vcmp.lt.s32.totalorder %v4237_v55, 7 }
  0xf4   : > { %v996_v31 = vadd.f32 %v995_v29, %v4134_v36  ;;  %v4989_v36 = vrot.slane %v4226_v25, 7 }
  0xf6   : > { %v1504_v37 = vpop.f32.mrf.mxu0 }
  0xf9   : > { %v1084_v59 = vpop.f32.mrf.mxu2 }
  0xfa   : > { %v1085_v61 = vadd.f32 %v1084_v59, %v996_v31  ;;  %v1415_v16 = vpop.f32.mrf.mxu3 }
  0xfb   : > { %v4239_v17 = vadd.f32 %v1504_v37, %v1415_v16  ;;  %v998_v20 = vpop.f32.mrf.mxu1 }
  0xfc   : > { %v1929_v21 = vrot.slane %v1085_v61, 7  ;;  %v999_v23 = vadd.f32 %v998_v20, %v4145_v41 }
  0xfe   : > { %v1507_v24 = vpop.f32.mrf.mxu0  ;;  %1037 = vmatmul.bf16.gmra.mxu1 %v4059_v13  ;;  %1126 = vmatmul.bf16.gmra.mxu2 %v3974_v51  ;;  %v4250_v26 = vsel %vm1960_vm0, %v4989_v36, %v1929_v21 }
  0xff   : > { %4996 = vst [vmem:[#allocation3_spill] sm:$0xff] %v4250_v26  ;;  %1457 = vmatmul.bf16.gmra.mxu3 %v3971_v50 }
 0x101   : > { %1546 = vmatmul.bf16.gmra.mxu0 %v4059_v13  ;;  %v1087_v29 = vpop.f32.mrf.mxu2 }
 0x102   : > { %v1088_v19 = vadd.f32 %v1087_v29, %v999_v23  ;;  %v1418_v31 = vpop.f32.mrf.mxu3 }
 0x103   : > { %v4254_v35 = vadd.f32 %v1507_v24, %v1418_v31  ;;  %v1000_v41 = vpop.f32.mrf.mxu1 }
 0x104   : > { %v1930_v37 = vrot.slane %v1088_v19, 7  ;;  %v1001_v54 = vadd.f32 %v1000_v41, %v4157_v45 }
 0x106   : > { %v1509_v59 = vpop.f32.mrf.mxu0  ;;  %v4259_v61 = vsel %vm1960_vm0, %v1929_v21, %v1930_v37  ;;  %v3508_v21 = vld [vmem:[%s4984_s3 + $0xc8] sm:$0xff] }
 0x107   : > { %2175 = vmatpush.bf16.msra.mxu2 %v3508_v21 }
 0x109   : > { %v1089_v16 = vpop.f32.mrf.mxu2 }
 0x10a   : > { %v1090_v20 = vadd.f32 %v1089_v16, %v1001_v54  ;;  %v1420_v50 = vpop.f32.mrf.mxu3  ;;  %v3548_v16 = vld [vmem:[%s4984_s3 + $0x208] sm:$0xff] }
 0x10b   : > { %v4261_v36 = vadd.f32 %v1509_v59, %v1420_v50  ;;  %v1003_v26 = vpop.f32.mrf.mxu1  ;;  %v3524_v50 = vld [vmem:[%s4984_s3 + $0x148] sm:$0xff]  ;;  %1588 = vmatpush.bf16.msra.mxu1 %v3548_v16 }
 0x10c   : > { %v1931_v23 = vrot.slane %v1090_v20, 7  ;;  %v1004_v24 = vadd.f32 %v1003_v26, %v4165_v52  ;;  %v3516_v52 = vld [vmem:[%s4984_s3 + $0x108] sm:$0xff]  ;;  %2353 = vmatpush.bf16.msra.mxu0 %v3524_v50 }
 0x10d   : > { %2264 = vmatpush.bf16.msra.mxu3 %v3516_v52 }
 0x10e   : > { %v1512_v29 = vpop.f32.mrf.mxu0  ;;  %1042 = vmatmul.bf16.gmra.mxu1 %v3914_v22  ;;  %1131 = vmatmul.bf16.gmra.mxu2 %v4031_v5  ;;  %v4268_v45 = vsel %vm1960_vm0, %v1930_v37, %v1931_v23 }
 0x10f   : > { %4997 = vst [vmem:[#allocation4_spill] sm:$0xff] %v4268_v45  ;;  %1462 = vmatmul.bf16.gmra.mxu3 %v4028_v4 }
 0x111   : > { %1551 = vmatmul.bf16.gmra.mxu0 %v3914_v22  ;;  %v1092_v26 = vpop.f32.mrf.mxu2 }
 0x112   : > { %v1093_v19 = vadd.f32 %v1092_v26, %v1004_v24  ;;  %v1423_v31 = vpop.f32.mrf.mxu3 }
 0x113   : > { %v4279_v41 = vadd.f32 %v1512_v29, %v1423_v31  ;;  %v1005_v37 = vpop.f32.mrf.mxu1 }
 0x114   : > { %v1932_v54 = vrot.slane %v1093_v19, 7  ;;  %v1006_v59 = vadd.f32 %v1005_v37, %v4186_v60 }
 0x115   : > { %4998 = vst [vmem:[#allocation5_spill] sm:$0xff] %v4279_v41 }
 0x116   : > { %v1514_v20 = vpop.f32.mrf.mxu0  ;;  %v4292_v24 = vsel %vm1960_vm0, %v1931_v23, %v1932_v54 }
 0x117   : > { %4999 = vst [vmem:[#allocation6_spill] sm:$0xff] %v4292_v24 }
 0x119   : > { %v1094_v60 = vpop.f32.mrf.mxu2 }
 0x11a   : > { %v1095_v29 = vadd.f32 %v1094_v60, %v1006_v59  ;;  %v1425_v21 = vpop.f32.mrf.mxu3 }
 0x11b   : > { %v4296_v52 = vadd.f32 %v1514_v20, %v1425_v21  ;;  %v1008_v26 = vpop.f32.mrf.mxu1 }
 0x11c   : > { %v1933_v19 = vrot.slane %v1095_v29, 7  ;;  %v1009_v31 = vadd.f32 %v1008_v26, %v4197_v1 }
 0x11d   : > { %5000 = vst [vmem:[#allocation7_spill] sm:$0xff] %v4296_v52 }
 0x11e   : > { %v1517_v37 = vpop.f32.mrf.mxu0  ;;  %1047 = vmatmul.bf16.gmra.mxu1 %v3974_v51  ;;  %1136 = vmatmul.bf16.gmra.mxu2 %v4062_v14  ;;  %v4304_v23 = vsel %vm1960_vm0, %v1932_v54, %v1933_v19 }
 0x11f   : > { %5001 = vst [vmem:[#allocation8_spill] sm:$0xff] %v4304_v23  ;;  %1467 = vmatmul.bf16.gmra.mxu3 %v4059_v13 }
 0x121   : > { %1556 = vmatmul.bf16.gmra.mxu0 %v3974_v51  ;;  %v1097_v59 = vpop.f32.mrf.mxu2 }
 0x122   : > { %v1098_v1 = vadd.f32 %v1097_v59, %v1009_v31  ;;  %v1428_v16 = vpop.f32.mrf.mxu3  ;;  %v4319_v59 = vld [vmem:[%s3898_s18 + $0x70] sm:$0xff] }
 0x123   : > { %v4308_v20 = vadd.f32 %v1517_v37, %v1428_v16  ;;  %v1010_v50 = vpop.f32.mrf.mxu1 }
 0x124   : > { %v1934_v60 = vrot.slane %v1098_v1, 7  ;;  %v1011_v29 = vadd.f32 %v1010_v50, %v4209_v9 }
 0x125   : > { %5002 = vst [vmem:[#allocation9_spill] sm:$0xff] %v4308_v20 }
 0x126   : > { %v1519_v21 = vpop.f32.mrf.mxu0  ;;  %v4316_v54 = vsel %vm1960_vm0, %v1933_v19, %v1934_v60 }
 0x127   : > { %5003 = vst [vmem:[#allocation10_spill] sm:$0xff] %v4316_v54  ;;  %v4359_v54 = vld [vmem:[%s3898_s18 + $0x78] sm:$0xff] }
 0x129   : > { %v1099_v26 = vpop.f32.mrf.mxu2 }
 0x12a   : > { %v1100_v31 = vadd.f32 %v1099_v26, %v1011_v29  ;;  %v1430_v37 = vpop.f32.mrf.mxu3  ;;  %v3507_v29 = vld [vmem:[%s4984_s3 + $0xc0] sm:$0xff] }
 0x12b   : > { %v4321_v1 = vadd.f32 %v1519_v21, %v1430_v37  ;;  %v1013_v9 = vpop.f32.mrf.mxu1  ;;  %v3515_v26 = vld [vmem:[%s4984_s3 + $0x100] sm:$0xff]  ;;  %2176 = vmatpush.bf16.msra.mxu2 %v3507_v29 }
 0x12c   : > { %v1935_v16 = vrot.slane %v1100_v31, 7  ;;  %v1014_v21 = vadd.f32 %v1013_v9, %v4111_v27  ;;  %2265 = vmatpush.bf16.msra.mxu3 %v3515_v26  ;;  %v3547_v27 = vld [vmem:[%s4984_s3 + $0x200] sm:$0xff]  ;;  %v664_v26 = vstv %s663_s26 }
 0x12d   : > { %5004 = vst [vmem:[#allocation11_spill] sm:$0xff] %v4321_v1  ;;  %1589 = vmatpush.bf16.msra.mxu1 %v3547_v27  ;;  %v670_v52 = vunpack.c.l.bf16 %v664_v26 }
 0x12e   : > { %v1522_v50 = vpop.f32.mrf.mxu0  ;;  %1052 = vmatmul.bf16.gmra.mxu1 %v4031_v5  ;;  %1141 = vmatmul.bf16.gmra.mxu2 %v4319_v59  ;;  %v4328_v19 = vsel %vm1960_vm0, %v1934_v60, %v1935_v16 }
 0x12f   : > { %5005 = vst [vmem:[#allocation12_spill] sm:$0xff] %v4328_v19  ;;  %1472 = vmatmul.bf16.gmra.mxu3 %v3914_v22 }
 0x131   : > { %1561 = vmatmul.bf16.gmra.mxu0 %v4031_v5  ;;  %v1102_v31 = vpop.f32.mrf.mxu2 }
 0x132   : > { %v1103_v60 = vadd.f32 %v1102_v31, %v1014_v21  ;;  %v1433_v37 = vpop.f32.mrf.mxu3  ;;  %v3564_v21 = vld [vmem:[%s4344_s17] sm:$0xff]  }
 0x133   : > { %v4339_v22 = vadd.f32 %v1522_v50, %v1433_v37  ;;  %v1015_v19 = vpop.f32.mrf.mxu1  ;;  %v3523_v50 = vld [vmem:[%s4984_s3 + $0x140] sm:$0xff]  ;;  %v3565_v20 = vunpack.c.l.bf16 %v3564_v21  ;;  %v3566_v23 = vunpack.c.h.bf16 %v3564_v21 }
 0x134   : > { %v1936_v1 = vrot.slane %v1103_v60, 7  ;;  %2354 = vmatpush.bf16.msra.mxu0 %v3523_v50  ;;  %v1016_v31 = vadd.f32 %v1015_v19, %v4129_v34 }
 0x135   : > { %5006 = vst [vmem:[#allocation13_spill] sm:$0xff] %v4339_v22  ;;  %v672_v50 = vmul.f32 %v3566_v23, %v670_v52 }
 0x136   : > { %v1524_v9 = vpop.f32.mrf.mxu0  ;;  %v4354_v29 = vsel %vm1960_vm0, %v1935_v16, %v1936_v1  ;;  %v671_v16 = vmul.f32 %v3565_v20, %v670_v52 }
 0x137   : > { %5007 = vst [vmem:[#allocation14_spill] sm:$0xff] %v4354_v29 }
 0x138   : > { %v675_v26 = vpack.c.bf16 %v671_v16, %v671_v16 }
 0x139   : > { %v1104_v60 = vpop.f32.mrf.mxu2 }
 0x13a   : > { %v1105_v37 = vadd.f32 %v1104_v60, %v1016_v31  ;;  %v1435_v22 = vpop.f32.mrf.mxu3  ;;  %v676_v31 = vpack.c.bf16 %v672_v50, %v672_v50 }
 0x13b   : > { %v4361_v24 = vadd.f32 %v1524_v9, %v1435_v22  ;;  %v1018_v27 = vpop.f32.mrf.mxu1 }
 0x13c   : > { %v1937_v41 = vrot.slane %v1105_v37, 7  ;;  %v1019_v19 = vadd.f32 %v1018_v27, %v4143_v40 }
 0x13d   : > { %5008 = vst [vmem:[#allocation15_spill] sm:$0xff] %v4361_v24  ;;  %v695_v24 = vunpack.c.l.b16 %v675_v26 }
 0x13e   : > { %v1527_v45 = vpop.f32.mrf.mxu0  ;;  %1057 = vmatmul.bf16.gmra.mxu1 %v4062_v14  ;;  %1146 = vmatmul.bf16.gmra.mxu2 %v4359_v54  ;;  %v4367_v34 = vsel %vm1960_vm0, %v1936_v1, %v1937_v41  ;;  %v696_v1 = vunpack.c.l.b16 %v676_v31 }
 0x13f   : > { %5009 = vst [vmem:[#allocation16_spill] sm:$0xff] %v4367_v34  ;;  %1477 = vmatmul.bf16.gmra.mxu3 %v3974_v51  ;;  %v3636_v51 = vld [vmem:[%s4344_s17 + $0x8] sm:$0xff]  }
 0x140   : > { %v3569_v16 = vunpack.c.l.bf16 %v3636_v51 }
 0x141   : > { %1566 = vmatmul.bf16.gmra.mxu0 %v4062_v14  ;;  %v1107_v22 = vpop.f32.mrf.mxu2 }
 0x142   : > { %v1108_v9 = vadd.f32 %v1107_v22, %v1019_v19  ;;  %v1438_v21 = vpop.f32.mrf.mxu3  ;;  %v4380_v22 = vpack.c.b16 %v696_v1, %v695_v24 }
 0x143   : > { %v4372_v60 = vadd.f32 %v1527_v45, %v1438_v21  ;;  %v1020_v20 = vpop.f32.mrf.mxu1  ;;  %v3570_v45 = vunpack.c.h.bf16 %v3636_v51 }
 0x144   : > { %v1938_v23 = vrot.slane %v1108_v9, 7  ;;  %v1021_v40 = vadd.f32 %v1020_v20, %v4155_v44  ;;  %5010 = vst [vmem:[#allocation17_spill] sm:$0xff] %v4380_v22 }
 0x145   : > { %v674_v31 = vmul.f32 %v3570_v45, %v670_v52 }
 0x146   : > { %v1529_v37 = vpop.f32.mrf.mxu0  ;;  %v4376_v34 = vsel %vm1960_vm0, %v1937_v41, %v1938_v23  ;;  %v673_v41 = vmul.f32 %v3569_v16, %v670_v52 }
 0x147   : > { %v678_v51 = vpack.c.bf16 %v674_v31, %v674_v31 }
 0x148   : > { %v677_v1 = vpack.c.bf16 %v673_v41, %v673_v41 }
 0x149   : > { %v1109_v27 = vpop.f32.mrf.mxu2  ;;  %v698_v45 = vunpack.c.l.b16 %v678_v51 }
 0x14a   : > { %v1110_v29 = vadd.f32 %v1109_v27, %v1021_v40  ;;  %v1440_v19 = vpop.f32.mrf.mxu3  ;;  %v697_v16 = vunpack.c.l.b16 %v677_v1 }
 0x14b   : > { %v4382_v50 = vadd.f32 %v1529_v37, %v1440_v19  ;;  %v1023_v9 = vpop.f32.mrf.mxu1 }
 0x14c   : > { %v1939_v21 = vrot.slane %v1110_v29, 7  ;;  %v1024_v24 = vadd.f32 %v1023_v9, %v4163_v48 }
 0x14e   : > { %v1532_v26 = vpop.f32.mrf.mxu0  ;;  %1062 = vmatmul.bf16.gmra.mxu1 %v4319_v59  ;;  %1151 = vmatmul.bf16.gmra.mxu2 %v4380_v22  ;;  %v4388_v44 = vsel %vm1960_vm0, %v1938_v23, %v1939_v21 }
 0x14f   : > { %1482 = vmatmul.bf16.gmra.mxu3 %v4031_v5 }
 0x151   : > { %1571 = vmatmul.bf16.gmra.mxu0 %v4319_v59  ;;  %v1112_v20 = vpop.f32.mrf.mxu2 }
 0x152   : > { %v1113_v37 = vadd.f32 %v1112_v20, %v1024_v24  ;;  %v1443_v29 = vpop.f32.mrf.mxu3  ;;  %v4400_v24 = vpack.c.b16 %v698_v45, %v697_v16 }
 0x153   : > { %v4393_v40 = vadd.f32 %v1532_v26, %v1443_v29  ;;  %v1025_v27 = vpop.f32.mrf.mxu1 }
 0x154   : > { %v1940_v19 = vrot.slane %v1113_v37, 7  ;;  %v1026_v5 = vadd.f32 %v1025_v27, %v4181_v58 }
 0x156   : > { %v1534_v52 = vpop.f32.mrf.mxu0  ;;  %v4397_v23 = vsel %vm1960_vm0, %v1939_v21, %v1940_v19 }
 0x159   : > { %v1114_v48 = vpop.f32.mrf.mxu2 }
 0x15a   : > { %v1115_v9 = vadd.f32 %v1114_v48, %v1026_v5  ;;  %v1445_v22 = vpop.f32.mrf.mxu3 }
 0x15b   : > { %v4402_v41 = vadd.f32 %v1534_v52, %v1445_v22  ;;  %v1028_v26 = vpop.f32.mrf.mxu1 }
 0x15c   : > { %v1941_v31 = vrot.slane %v1115_v9, 7  ;;  %v1029_v58 = vadd.f32 %v1028_v26, %v4195_v0 }
 0x15e   : > { %v1537_v20 = vpop.f32.mrf.mxu0  ;;  %1067 = vmatmul.bf16.gmra.mxu1 %v4359_v54  ;;  %1156 = vmatmul.bf16.gmra.mxu2 %v4400_v24  ;;  %v4408_v21 = vsel %vm1960_vm0, %v1940_v19, %v1941_v31 }
 0x15f   : > { %1487 = vmatmul.bf16.gmra.mxu3 %v4062_v14 }
 0x161   : > { %1576 = vmatmul.bf16.gmra.mxu0 %v4359_v54  ;;  %v1117_v37 = vpop.f32.mrf.mxu2 }
 0x162   : > { %v1118_v22 = vadd.f32 %v1117_v37, %v1029_v58  ;;  %v1448_v29 = vpop.f32.mrf.mxu3 }
 0x163   : > { %v4413_v1 = vadd.f32 %v1537_v20, %v1448_v29  ;;  %v1030_v51 = vpop.f32.mrf.mxu1 }
 0x164   : > { %v1942_v27 = vrot.slane %v1118_v22, 7  ;;  %v1031_v19 = vadd.f32 %v1030_v51, %v4207_v8 }
 0x166   : > { %v1539_v52 = vpop.f32.mrf.mxu0  ;;  %v4417_v16 = vsel %vm1960_vm0, %v1941_v31, %v1942_v27 }
 0x169   : > { %v1119_v45 = vpop.f32.mrf.mxu2 }
 0x16a   : > { %v1120_v14 = vadd.f32 %v1119_v45, %v1031_v19  ;;  %v1450_v5 = vpop.f32.mrf.mxu3 }
 0x16b   : > { %v4420_v0 = vadd.f32 %v1539_v52, %v1450_v5  ;;  %v1033_v48 = vpop.f32.mrf.mxu1 }
 0x16c   : > { %v1943_v9 = vrot.slane %v1120_v14, 7  ;;  %v1034_v8 = vadd.f32 %v1033_v48, %v4125_v32 }
 0x16e   : > { %v1542_v26 = vpop.f32.mrf.mxu0  ;;  %1590 = vmatmul.bf16.vlgmr.msra.gmra.mxu1 %v3908_v18  ;;  %2177 = vmatmul.bf16.vlgmr.msra.gmra.mxu2 %v3927_v30  ;;  %v4426_v20 = vsel %vm1960_vm0, %v1942_v27, %v1943_v9 }
 0x16f   : > { %2266 = vmatmul.bf16.vlgmr.msra.gmra.mxu3 %v4037_v7 }
 0x171   : > { %2355 = vmatmul.bf16.vlgmr.msra.gmra.mxu0 %v3908_v18  ;;  %v1122_v31 = vpop.f32.mrf.mxu2 }
 0x172   : > { %v1123_v58 = vadd.f32 %v1122_v31, %v1034_v8  ;;  %v1453_v37 = vpop.f32.mrf.mxu3 }
 0x173   : > { %v4431_v22 = vadd.f32 %v1542_v26, %v1453_v37  ;;  %v1035_v29 = vpop.f32.mrf.mxu1 }
 0x174   : > { %v1944_v51 = vrot.slane %v1123_v58, 7  ;;  %v1036_v27 = vadd.f32 %v1035_v29, %v4139_v38 }
 0x176   : > { %v1544_v52 = vpop.f32.mrf.mxu0  ;;  %v4435_v30 = vsel %vm1960_vm0, %v1943_v9, %v1944_v51 }
 0x179   : > { %v1124_v19 = vpop.f32.mrf.mxu2 }
 0x17a   : > { %v1125_v45 = vadd.f32 %v1124_v19, %v1036_v27  ;;  %v1455_v14 = vpop.f32.mrf.mxu3 }
 0x17b   : > { %v4438_v32 = vadd.f32 %v1544_v52, %v1455_v14  ;;  %v1038_v5 = vpop.f32.mrf.mxu1 }
 0x17c   : > { %v1945_v48 = vrot.slane %v1125_v45, 7  ;;  %v1039_v38 = vadd.f32 %v1038_v5, %v4151_v42 }
 0x17e   : > { %v1547_v8 = vpop.f32.mrf.mxu0  ;;  %1595 = vmatmul.bf16.gmra.mxu1 %v3968_v49  ;;  %2182 = vmatmul.bf16.gmra.mxu2 %v3979_v53  ;;  %v4444_v26 = vsel %vm1960_vm0, %v1944_v51, %v1945_v48 }
 0x17f   : > { %5011 = vst [vmem:[#allocation18_spill] sm:$0xff] %v4444_v26  ;;  %2271 = vmatmul.bf16.gmra.mxu3 %v4065_v15 }
 0x181   : > { %2360 = vmatmul.bf16.gmra.mxu0 %v3968_v49  ;;  %v1127_v9 = vpop.f32.mrf.mxu2 }
 0x182   : > { %v1128_v31 = vadd.f32 %v1127_v9, %v1039_v38  ;;  %v1458_v58 = vpop.f32.mrf.mxu3 }
 0x183   : > { %v4449_v37 = vadd.f32 %v1547_v8, %v1458_v58  ;;  %v1040_v29 = vpop.f32.mrf.mxu1 }
 0x184   : > { %v1946_v52 = vrot.slane %v1128_v31, 7  ;;  %v1041_v51 = vadd.f32 %v1040_v29, %v4159_v46 }
 0x186   : > { %v1549_v27 = vpop.f32.mrf.mxu0  ;;  %v4453_v53 = vsel %vm1960_vm0, %v1945_v48, %v1946_v52 }
 0x189   : > { %v1129_v19 = vpop.f32.mrf.mxu2 }
 0x18a   : > { %v1130_v45 = vadd.f32 %v1129_v19, %v1041_v51  ;;  %v1460_v14 = vpop.f32.mrf.mxu3 }
 0x18b   : > { %v4456_v42 = vadd.f32 %v1549_v27, %v1460_v14  ;;  %v1043_v5 = vpop.f32.mrf.mxu1 }
 0x18c   : > { %v1947_v26 = vrot.slane %v1130_v45, 7  ;;  %v1044_v46 = vadd.f32 %v1043_v5, %v4177_v56 }
 0x18e   : > { %v1552_v38 = vpop.f32.mrf.mxu0  ;;  %1600 = vmatmul.bf16.gmra.mxu1 %v4025_v3  ;;  %2187 = vmatmul.bf16.gmra.mxu2 %v4037_v7  ;;  %v4462_v8 = vsel %vm1960_vm0, %v1946_v52, %v1947_v26 }
 0x18f   : > { %2276 = vmatmul.bf16.gmra.mxu3 %v3908_v18 }
 0x191   : > { %2365 = vmatmul.bf16.gmra.mxu0 %v4025_v3  ;;  %v1132_v48 = vpop.f32.mrf.mxu2 }
 0x192   : > { %v1133_v9 = vadd.f32 %v1132_v48, %v1044_v46  ;;  %v1463_v31 = vpop.f32.mrf.mxu3 }
 0x193   : > { %v4467_v58 = vadd.f32 %v1552_v38, %v1463_v31  ;;  %v1045_v29 = vpop.f32.mrf.mxu1 }
 0x194   : > { %v1948_v27 = vrot.slane %v1133_v9, 7  ;;  %v1046_v52 = vadd.f32 %v1045_v29, %v4191_v62 }
 0x196   : > { %v1554_v51 = vpop.f32.mrf.mxu0  ;;  %v4471_v7 = vsel %vm1960_vm0, %v1947_v26, %v1948_v27 }
 0x199   : > { %v1134_v19 = vpop.f32.mrf.mxu2 }
 0x19a   : > { %v1135_v18 = vadd.f32 %v1134_v19, %v1046_v52  ;;  %v1465_v45 = vpop.f32.mrf.mxu3 }
 0x19b   : > { %v4474_v56 = vadd.f32 %v1554_v51, %v1465_v45  ;;  %v1048_v14 = vpop.f32.mrf.mxu1 }
 0x19c   : > { %v1949_v5 = vrot.slane %v1135_v18, 7  ;;  %v1049_v62 = vadd.f32 %v1048_v14, %v4203_v2 }
 0x19e   : > { %v1557_v46 = vpop.f32.mrf.mxu0  ;;  %1605 = vmatmul.bf16.gmra.mxu1 %v4056_v12  ;;  %2192 = vmatmul.bf16.gmra.mxu2 %v4065_v15  ;;  %v4480_v38 = vsel %vm1960_vm0, %v1948_v27, %v1949_v5 }
 0x19f   : > { %2281 = vmatmul.bf16.gmra.mxu3 %v3968_v49 }
 0x1a1   : > { %2370 = vmatmul.bf16.gmra.mxu0 %v4056_v12  ;;  %v1137_v26 = vpop.f32.mrf.mxu2 }
 0x1a2   : > { %v1138_v48 = vadd.f32 %v1137_v26, %v1049_v62  ;;  %v1468_v9 = vpop.f32.mrf.mxu3  ;;  %v4495_v26 = vld [vmem:[%s3898_s18 + $0x30] sm:$0xff] }
 0x1a3   : > { %v4485_v31 = vadd.f32 %v1557_v46, %v1468_v9  ;;  %v1050_v29 = vpop.f32.mrf.mxu1  ;;  %v3719_v46 = vld [vmem:[%s3898_s18 + $0x10] sm:$0xff] }
 0x1a4   : > { %v1950_v51 = vrot.slane %v1138_v48, 7  ;;  %v1051_v49 = vadd.f32 %v1050_v29, %v4211_v10 }
 0x1a6   : > { %v1559_v15 = vpop.f32.mrf.mxu0  ;;  %v4489_v27 = vsel %vm1960_vm0, %v1949_v5, %v1950_v51 }
 0x1a7   : > { %5012 = vst [vmem:[#allocation19_spill] sm:$0xff] %v4489_v27  ;;  %v4516_v27 = vld [vmem:[%s3898_s18 + $0x38] sm:$0xff] }
 0x1a9   : > { %v1139_v52 = vpop.f32.mrf.mxu2 }
 0x1aa   : > { %v1140_v2 = vadd.f32 %v1139_v52, %v1051_v49  ;;  %v1470_v19 = vpop.f32.mrf.mxu3 }
 0x1ab   : > { %v4492_v18 = vadd.f32 %v1559_v15, %v1470_v19  ;;  %v1053_v45 = vpop.f32.mrf.mxu1 }
 0x1ac   : > { %v1951_v14 = vrot.slane %v1140_v2, 7  ;;  %v1054_v10 = vadd.f32 %v1053_v45, %v4127_v33 }
 0x1ad   : > { %5013 = vst [vmem:[#allocation20_spill] sm:$0xff] %v4492_v18 }
 0x1ae   : > { %v1562_v62 = vpop.f32.mrf.mxu0  ;;  %1610 = vmatmul.bf16.gmra.mxu1 %v4495_v26  ;;  %2197 = vmatmul.bf16.gmra.mxu2 %v3719_v46  ;;  %v4501_v5 = vsel %vm1960_vm0, %v1950_v51, %v1951_v14 }
 0x1af   : > { %5014 = vst [vmem:[#allocation21_spill] sm:$0xff] %v4501_v5  ;;  %2286 = vmatmul.bf16.gmra.mxu3 %v4025_v3 }
 0x1b1   : > { %2375 = vmatmul.bf16.gmra.mxu0 %v4495_v26  ;;  %v1142_v48 = vpop.f32.mrf.mxu2 }
 0x1b2   : > { %v1143_v9 = vadd.f32 %v1142_v48, %v1054_v10  ;;  %v1473_v29 = vpop.f32.mrf.mxu3 }
 0x1b3   : > { %v4506_v15 = vadd.f32 %v1562_v62, %v1473_v29  ;;  %v1055_v49 = vpop.f32.mrf.mxu1  ;;  %v3721_v62 = vld [vmem:[%s3898_s18 + $0x18] sm:$0xff] }
 0x1b4   : > { %v1952_v52 = vrot.slane %v1143_v9, 7  ;;  %v1056_v19 = vadd.f32 %v1055_v49, %v4141_v39 }
 0x1b6   : > { %v1564_v2 = vpop.f32.mrf.mxu0  ;;  %v4510_v51 = vsel %vm1960_vm0, %v1951_v14, %v1952_v52 }
 0x1b7   : > { %5015 = vst [vmem:[#allocation22_spill] sm:$0xff] %v4510_v51 }
 0x1b9   : > { %v1144_v46 = vpop.f32.mrf.mxu2 }
 0x1ba   : > { %v1145_v33 = vadd.f32 %v1144_v46, %v1056_v19  ;;  %v1475_v45 = vpop.f32.mrf.mxu3 }
 0x1bb   : > { %v4513_v5 = vadd.f32 %v1564_v2, %v1475_v45  ;;  %v1058_v18 = vpop.f32.mrf.mxu1 }
 0x1bc   : > { %v1953_v10 = vrot.slane %v1145_v33, 7  ;;  %v1059_v39 = vadd.f32 %v1058_v18, %v4153_v43 }
 0x1bd   : > { %5016 = vst [vmem:[#allocation23_spill] sm:$0xff] %v4513_v5 }
 0x1be   : > { %v1567_v48 = vpop.f32.mrf.mxu0  ;;  %1615 = vmatmul.bf16.gmra.mxu1 %v4516_v27  ;;  %2202 = vmatmul.bf16.gmra.mxu2 %v3721_v62  ;;  %v4522_v14 = vsel %vm1960_vm0, %v1952_v52, %v1953_v10 }
 0x1bf   : > { %5017 = vst [vmem:[#allocation24_spill] sm:$0xff] %v4522_v14  ;;  %2291 = vmatmul.bf16.gmra.mxu3 %v4056_v12 }
 0x1c1   : > { %2380 = vmatmul.bf16.gmra.mxu0 %v4516_v27  ;;  %v1147_v9 = vpop.f32.mrf.mxu2 }
 0x1c2   : > { %v1148_v29 = vadd.f32 %v1147_v9, %v1059_v39  ;;  %v1478_v49 = vpop.f32.mrf.mxu3 }
 0x1c3   : > { %v4527_v2 = vadd.f32 %v1567_v48, %v1478_v49  ;;  %v1060_v19 = vpop.f32.mrf.mxu1 }
 0x1c4   : > { %v1954_v46 = vrot.slane %v1148_v29, 7  ;;  %v1061_v52 = vadd.f32 %v1060_v19, %v4161_v47 }
 0x1c6   : > { %v1569_v33 = vpop.f32.mrf.mxu0  ;;  %v4531_v45 = vsel %vm1960_vm0, %v1953_v10, %v1954_v46 }
 0x1c9   : > { %v1149_v62 = vpop.f32.mrf.mxu2 }
 0x1ca   : > { %v1150_v14 = vadd.f32 %v1149_v62, %v1061_v52  ;;  %v1480_v5 = vpop.f32.mrf.mxu3 }
 0x1cb   : > { %v4534_v43 = vadd.f32 %v1569_v33, %v1480_v5  ;;  %v1063_v18 = vpop.f32.mrf.mxu1 }
 0x1cc   : > { %v1955_v51 = vrot.slane %v1150_v14, 7  ;;  %v1064_v47 = vadd.f32 %v1063_v18, %v4179_v57 }
 0x1ce   : > { %v1572_v39 = vpop.f32.mrf.mxu0  ;;  %1620 = vmatmul.bf16.gmra.mxu1 %v4028_v4  ;;  %2207 = vmatmul.bf16.gmra.mxu2 %v4025_v3  ;;  %v4540_v48 = vsel %vm1960_vm0, %v1954_v46, %v1955_v51 }
 0x1cf   : > { %5018 = vst [vmem:[#allocation25_spill] sm:$0xff] %v4540_v48  ;;  %2296 = vmatmul.bf16.gmra.mxu3 %v4495_v26 }
 0x1d1   : > { %2385 = vmatmul.bf16.gmra.mxu0 %v4028_v4  ;;  %v1152_v10 = vpop.f32.mrf.mxu2 }
 0x1d2   : > { %v1153_v5 = vadd.f32 %v1152_v10, %v1064_v47  ;;  %v1483_v9 = vpop.f32.mrf.mxu3 }
 0x1d3   : > { %v4545_v29 = vadd.f32 %v1572_v39, %v1483_v9  ;;  %v1065_v14 = vpop.f32.mrf.mxu1 }
 0x1d4   : > { %v1956_v49 = vrot.slane %v1153_v5, 7  ;;  %v1066_v46 = vadd.f32 %v1065_v14, %v4193_v63 }
 0x1d5   : > { %5019 = vst [vmem:[#allocation26_spill] sm:$0xff] %v4545_v29 }
 0x1d6   : > { %v1574_v19 = vpop.f32.mrf.mxu0  ;;  %v4549_v3 = vsel %vm1960_vm0, %v1955_v51, %v1956_v49 }
 0x1d7   : > { %5020 = vst [vmem:[#allocation27_spill] sm:$0xff] %v4549_v3  ;;  %v3637_v3 = vld [vmem:[%s4603_s19 + $0x8] sm:$0xff]  }
 0x1d8   : > { %v3578_v29 = vunpack.c.h.bf16 %v3637_v3 }
 0x1d9   : > { %v1154_v33 = vpop.f32.mrf.mxu2 }
 0x1da   : > { %v1155_v52 = vadd.f32 %v1154_v33, %v1066_v46  ;;  %v1485_v62 = vpop.f32.mrf.mxu3 }
 0x1db   : > { %v4552_v57 = vadd.f32 %v1574_v19, %v1485_v62  ;;  %v1068_v4 = vpop.f32.mrf.mxu1 }
 0x1dc   : > { %v1957_v18 = vrot.slane %v1155_v52, 7  ;;  %v1069_v63 = vadd.f32 %v1068_v4, %v4205_v6 }
 0x1dd   : > { %5021 = vst [vmem:[#allocation28_spill] sm:$0xff] %v4552_v57 }
 0x1de   : > { %v1577_v47 = vpop.f32.mrf.mxu0  ;;  %1625 = vmatmul.bf16.gmra.mxu1 %v4059_v13  ;;  %2212 = vmatmul.bf16.gmra.mxu2 %v4056_v12  ;;  %v4558_v39 = vsel %vm1960_vm0, %v1956_v49, %v1957_v18  ;;  %v1704_v12 = vand.u32 31, %v4237_v55 }
 0x1df   : > { %5022 = vst [vmem:[#allocation29_spill] sm:$0xff] %v4558_v39  ;;  %2301 = vmatmul.bf16.gmra.mxu3 %v4516_v27 }
 0x1e0   : > { %vm1736_vm1 = vcmp.gt.s32.totalorder %v1704_v12, 0 }
 0x1e1   : > { %2390 = vmatmul.bf16.gmra.mxu0 %v4059_v13  ;;  %v1157_v51 = vpop.f32.mrf.mxu2 }
 0x1e2   : > { %v1158_v10 = vadd.f32 %v1157_v51, %v1069_v63  ;;  %v1488_v5 = vpop.f32.mrf.mxu3  ;;  %v4992_v63 = vmov 0.0  }
 0x1e3   : > { %v4563_v9 = vadd.f32 %v1577_v47, %v1488_v5  ;;  %v1070_v14 = vpop.f32.mrf.mxu1  ;;  %v3353_v51 = vsel %vm1736_vm1, 1.0, %v4992_v63  ;;  %v4575_v5 = vld [vmem:[%s3898_s18 + $0x50] sm:$0xff] }
 0x1e4   : > { %v1958_v19 = vrot.slane %v1158_v10, 7  ;;  %v1071_v33 = vadd.f32 %v1070_v14, %v4213_v11  ;;  %v5026_v11 = vrot.slane %v4226_v25, 7 }
 0x1e5   : > { %5023 = vst [vmem:[#allocation30_spill] sm:$0xff] %v4563_v9 }
 0x1e6   : > { %v1579_v46 = vpop.f32.mrf.mxu0  ;;  %v4568_v49 = vsel %vm1960_vm0, %v1957_v18, %v1958_v19 }
 0x1e7   : > { %5024 = vst [vmem:[#allocation31_spill] sm:$0xff] %v4568_v49  ;;  %v4623_v49 = vld [vmem:[%s3898_s18 + $0x58] sm:$0xff] }
 0x1e9   : > { %v1159_v6 = vpop.f32.mrf.mxu2 }
 0x1ea   : > { %v1160_v13 = vadd.f32 %v1159_v6, %v1071_v33  ;;  %v1490_v52 = vpop.f32.mrf.mxu3 }
 0x1eb   : > { %v4571_v62 = vadd.f32 %v1579_v46, %v1490_v52  ;;  %v1591_v4 = vpop.f32.mrf.mxu1  ;;  %v4588_v46 = vld [vmem:[%s3898_s18 + $0x40] sm:$0xff] }
 0x1ec   : > { %v1959_v47 = vrot.slane %v1160_v13, 7 }
 0x1ed   : > { %5025 = vst [vmem:[#allocation32_spill] sm:$0xff] %v4571_v62 }
 0x1ee   : > { %v2356_v10 = vpop.f32.mrf.mxu0  ;;  %1630 = vmatmul.bf16.gmra.mxu1 %v4575_v5  ;;  %2217 = vmatmul.bf16.gmra.mxu2 %v4495_v26  ;;  %v1992_v18 = vsel %vm1960_vm0, %v1959_v47, %v5026_v11  ;;  %v4585_v14 = vsel %vm1960_vm0, %v1958_v19, %v1959_v47  ;;  %v4593_v26 = vadd.f32 %v1591_v4, %v4228_v28  ;;  %v4608_v4 = vld [vmem:[%s4985_s4] ss:$0 sm:$0xff] }
 0x1ef   : > { %5027 = vst [vmem:[#allocation33_spill] sm:$0xff] %v4585_v14  ;;  %2306 = vmatmul.bf16.gmra.mxu3 %v4588_v46  ;;  %v1993_v12 = vmul.f32 %v3353_v51, %v1992_v18 }
 0x1f0   : > { %5028 = vst [vmem:[#allocation34_spill] sm:$0xff] %v4593_v26  ;;  %v4995_v11 = vrot.slane %v4593_v26, 1 }
 0x1f1   : > { %2395 = vmatmul.bf16.gmra.mxu0 %v4575_v5  ;;  %v2178_v33 = vpop.f32.mrf.mxu2 }
 0x1f2   : > { %v2179_v25 = vadd.f32 %v2178_v33, %v1993_v12  ;;  %v2267_v6 = vpop.f32.mrf.mxu3  ;;  %v4615_v33 = vstv %s2601_s15 }
 0x1f3   : > { %v1593_v13 = vpop.f32.mrf.mxu1 }
 0x1f4   : > { %v2268_v52 = vadd.f32 %v2267_v6, %v2179_v25  ;;  %v1594_v19 = vadd.f32 %v1593_v13, %v4239_v17  ;;  %v5029_v25 = vld [vmem:[#allocation3_spill] sm:$0xff] }
 0x1f6   : > { %v2358_v47 = vpop.f32.mrf.mxu0  ;;  %v2357_v51 = vadd.f32 %v2356_v10, %v2268_v52  ;;  %v2437_v28 = vrot.slane %v1594_v19, 1  ;;  %v3572_v10 = vld [vmem:[%s4603_s19] sm:$0xff]  }
 0x1f7   : > { %v3573_v63 = vunpack.c.l.bf16 %v3572_v10 }
 0x1f8   : > { %v2499_v17 = vsel %vm2468_vm2, %v4995_v11, %v2437_v28 }
 0x1f9   : > { %v2533_v18 = vadd.f32 %v2499_v17, %v2357_v51  ;;  %v2180_v12 = vpop.f32.mrf.mxu2 }
 0x1fa   : > { %v2181_v6 = vadd.f32 %v2180_v12, %v5029_v25  ;;  %v2269_v13 = vpop.f32.mrf.mxu3 }
 0x1fb   : > { %v2569_v52 = vadd.f32 %v4608_v4, %v2533_v18  ;;  %v1596_v19 = vpop.f32.mrf.mxu1 }
 0x1fc   : > { %v2270_v14 = vadd.f32 %v2269_v13, %v2181_v6  ;;  %v1597_v26 = vadd.f32 %v1596_v19, %v4254_v35  ;;  %v4633_v35 = vld [vmem:[%s3898_s18 + $0x48] sm:$0xff]  ;;  %v1676_v6 = vadd.s32 32, %v4237_v55  ;;  %v3574_v19 = vunpack.c.h.bf16 %v3572_v10 }
 0x1fd   : > { %vm2602_vm3 = vcmp.ge.f32.partialorder %v2569_v52, 0.0  ;;  %v2635_v51 = vmul.f32 %v4615_v33, %v2569_v52 }
 0x1fe   : > { %v2361_v17 = vpop.f32.mrf.mxu0  ;;  %v2359_v11 = vadd.f32 %v2358_v47, %v2270_v14  ;;  %v2438_v62 = vrot.slane %v1597_v26, 1  ;;  %1635 = vmatmul.bf16.gmra.mxu1 %v4623_v49  ;;  %2222 = vmatmul.bf16.gmra.mxu2 %v4516_v27 }
 0x1ff   : > { %v2667_v18 = vsel %vm2602_vm3, %v2569_v52, %v2635_v51  ;;  %2311 = vmatmul.bf16.gmra.mxu3 %v4633_v35 }
 0x200   : > { %v2763_v14 = vadd.f32 %v3573_v63, %v2667_v18  ;;  %v2498_v26 = vsel %vm2468_vm2, %v2437_v28, %v2438_v62  ;;  %v1675_v63 = vadd.s32 24, %v4237_v55 }
 0x201   : > { %2400 = vmatmul.bf16.gmra.mxu0 %v4623_v49  ;;  %v2534_v47 = vadd.f32 %v2498_v26, %v2359_v11  ;;  %v2183_v27 = vpop.f32.mrf.mxu2  ;;  %v1708_v26 = vand.u32 31, %v1676_v6  ;;  %v3577_v6 = vunpack.c.l.bf16 %v3637_v3 }
 0x202   : > { %2796 = vst.msk [vmem:[%s4630_s21] sm:$0xff] %vm2795_vm4, %v2763_v14  ;;  %v2184_v12 = vadd.f32 %v2183_v27, %v4259_v61  ;;  %v2272_v25 = vpop.f32.mrf.mxu3  ;;  %v1707_v9 = vand.u32 31, %v1675_v63 }
 0x203   : > { %v2570_v13 = vadd.f32 %v4608_v4, %v2534_v47  ;;  %v1598_v52 = vpop.f32.mrf.mxu1  ;;  %vm1740_vm6 = vcmp.gt.s32.totalorder %v1708_v26, 0 }
 0x204   : > { %v2273_v28 = vadd.f32 %v2272_v25, %v2184_v12  ;;  %v1599_v51 = vadd.f32 %v1598_v52, %v4261_v36  ;;  %v5030_v12 = vld [vmem:[#allocation4_spill] sm:$0xff]  ;;  %vm1835_vm7 = vcmp.lt.s32.totalorder %v1707_v9, 31 }
 0x205   : > { %vm2603_vm5 = vcmp.ge.f32.partialorder %v2570_v13, 0.0  ;;  %v2636_v11 = vmul.f32 %v4615_v33, %v2570_v13 }
 0x206   : > { %v2363_v18 = vpop.f32.mrf.mxu0  ;;  %v2362_v14 = vadd.f32 %v2361_v17, %v2273_v28  ;;  %v2439_v61 = vrot.slane %v1599_v51, 1  ;;  %v5032_v51 = vmov 0.0  }
 0x207   : > { %v2668_v27 = vsel %vm2603_vm5, %v2570_v13, %v2636_v11  ;;  %v5031_v13 = vld [vmem:[#allocation5_spill] sm:$0xff]  ;;  %v3361_v11 = vsel %vm1835_vm7, 1.0, %v5032_v51 }
 0x208   : > { %v2764_v39 = vadd.f32 %v3574_v19, %v2668_v27  ;;  %v2497_v47 = vsel %vm2468_vm2, %v2438_v62, %v2439_v61  ;;  %v4659_v27 = vld [vmem:[%s3898_s18 + $0x60] sm:$0xff] }
 0x209   : > { %v2535_v57 = vadd.f32 %v2497_v47, %v2362_v14  ;;  %v2185_v10 = vpop.f32.mrf.mxu2  ;;  %v5033_v47 = vld [vmem:[#allocation6_spill] sm:$0xff] }
 0x20a   : > { %2797 = vst.msk [vmem:[%s4630_s21 + $0x8] sm:$0xff] %vm2795_vm4, %v2764_v39  ;;  %v2186_v36 = vadd.f32 %v2185_v10, %v5030_v12  ;;  %v2274_v25 = vpop.f32.mrf.mxu3  ;;  %v3354_v39 = vsel %vm1740_vm6, 1.0, %v5032_v51 }
 0x20b   : > { %v2571_v17 = vadd.f32 %v4608_v4, %v2535_v57  ;;  %v1601_v52 = vpop.f32.mrf.mxu1  ;;  %v1997_v10 = vmul.f32 %v3354_v39, %v5033_v47 }
 0x20c   : > { %v1602_v63 = vadd.f32 %v1601_v52, %v5031_v13  ;;  %v2275_v19 = vadd.f32 %v2274_v25, %v2186_v36 }
 0x20d   : > { %vm2604_vm8 = vcmp.ge.f32.partialorder %v2571_v17, 0.0  ;;  %v2637_v62 = vmul.f32 %v4615_v33, %v2571_v17 }
 0x20e   : > { %v2366_v28 = vpop.f32.mrf.mxu0  ;;  %v2440_v14 = vrot.slane %v1602_v63, 1  ;;  %1640 = vmatmul.bf16.gmra.mxu1 %v4659_v27  ;;  %2227 = vmatmul.bf16.gmra.mxu2 %v4588_v46  ;;  %v2364_v12 = vadd.f32 %v2363_v18, %v2275_v19 }
 0x20f   : > { %v2669_v57 = vsel %vm2604_vm8, %v2571_v17, %v2637_v62  ;;  %2316 = vmatmul.bf16.gmra.mxu3 %v4575_v5  ;;  %v5034_v62 = vld [vmem:[#allocation7_spill] sm:$0xff] }
 0x210   : > { %v2765_v9 = vadd.f32 %v3577_v6, %v2669_v57  ;;  %v2496_v26 = vsel %vm2468_vm2, %v2439_v61, %v2440_v14 }
 0x211   : > { %2405 = vmatmul.bf16.gmra.mxu0 %v4659_v27  ;;  %v2504_v36 = vmul.f32 %v3361_v11, %v2496_v26  ;;  %v2188_v25 = vpop.f32.mrf.mxu2  ;;  %v3638_v26 = vld [vmem:[%s4603_s19 + $0x10] sm:$0xff]  }
 0x212   : > { %2798 = vst.msk [vmem:[%s4630_s21 + $0x10] sm:$0xff] %vm2795_vm4, %v2765_v9  ;;  %v2189_v52 = vadd.f32 %v2188_v25, %v1997_v10  ;;  %v2277_v13 = vpop.f32.mrf.mxu3 }
 0x213   : > { %v2536_v46 = vadd.f32 %v2504_v36, %v2364_v12  ;;  %v1603_v17 = vpop.f32.mrf.mxu1  ;;  %v5035_v12 = vld [vmem:[#allocation8_spill] sm:$0xff] }
 0x214   : > { %v2278_v63 = vadd.f32 %v2277_v13, %v2189_v52  ;;  %v1604_v6 = vadd.f32 %v1603_v17, %v5034_v62 }
 0x215   : > { %v2572_v57 = vadd.f32 %v4608_v4, %v2536_v46  ;;  %v5036_v46 = vld [vmem:[#allocation9_spill] sm:$0xff] }
 0x216   : > { %v2368_v61 = vpop.f32.mrf.mxu0  ;;  %v2367_v48 = vadd.f32 %v2366_v28, %v2278_v63  ;;  %v2441_v39 = vrot.slane %v1604_v6, 1  ;;  %v3581_v28 = vunpack.c.l.bf16 %v3638_v26 }
 0x217   : > { %vm2605_vm9 = vcmp.ge.f32.partialorder %v2572_v57, 0.0  ;;  %v2638_v18 = vmul.f32 %v4615_v33, %v2572_v57 }
 0x218   : > { %v2495_v19 = vsel %vm2468_vm2, %v2440_v14, %v2441_v39 }
 0x219   : > { %v2670_v11 = vsel %vm2605_vm9, %v2572_v57, %v2638_v18  ;;  %v2537_v9 = vadd.f32 %v2495_v19, %v2367_v48  ;;  %v2190_v47 = vpop.f32.mrf.mxu2 }
 0x21a   : > { %v2766_v10 = vadd.f32 %v3578_v29, %v2670_v11  ;;  %v2191_v36 = vadd.f32 %v2190_v47, %v5035_v12  ;;  %v2279_v25 = vpop.f32.mrf.mxu3  ;;  %v4683_v29 = vld [vmem:[%s3898_s18 + $0x68] sm:$0xff] }
 0x21b   : > { %v2573_v52 = vadd.f32 %v4608_v4, %v2537_v9  ;;  %v1606_v3 = vpop.f32.mrf.mxu1 }
 0x21c   : > { %2799 = vst.msk [vmem:[%s4630_s21 + $0x18] sm:$0xff] %vm2795_vm4, %v2766_v10  ;;  %v2280_v13 = vadd.f32 %v2279_v25, %v2191_v36  ;;  %v1607_v17 = vadd.f32 %v1606_v3, %v5036_v46  ;;  %v1680_v10 = vadd.s32 64, %v4237_v55  ;;  %v1679_v36 = vadd.s32 56, %v4237_v55 }
 0x21d   : > { %vm2606_vm10 = vcmp.ge.f32.partialorder %v2573_v52, 0.0  ;;  %v2639_v48 = vmul.f32 %v4615_v33, %v2573_v52  ;;  %v3582_v25 = vunpack.c.h.bf16 %v3638_v26 }
 0x21e   : > { %v2371_v14 = vpop.f32.mrf.mxu0  ;;  %v2369_v63 = vadd.f32 %v2368_v61, %v2280_v13  ;;  %v2442_v62 = vrot.slane %v1607_v17, 1  ;;  %1645 = vmatmul.bf16.gmra.mxu1 %v4683_v29  ;;  %2232 = vmatmul.bf16.gmra.mxu2 %v4633_v35  ;;  %v5037_v61 = vld [vmem:[#allocation10_spill] sm:$0xff] }
 0x21f   : > { %v2671_v6 = vsel %vm2606_vm10, %v2573_v52, %v2639_v48  ;;  %2321 = vmatmul.bf16.gmra.mxu3 %v4623_v49  ;;  %v5038_v52 = vld [vmem:[#allocation11_spill] sm:$0xff]  ;;  %v1712_v48 = vand.u32 31, %v1680_v10 }
 0x220   : > { %v2767_v57 = vadd.f32 %v3581_v28, %v2671_v6  ;;  %v2494_v18 = vsel %vm2468_vm2, %v2441_v39, %v2442_v62  ;;  %v1711_v6 = vand.u32 31, %v1679_v36 }
 0x221   : > { %2410 = vmatmul.bf16.gmra.mxu0 %v4683_v29  ;;  %v2538_v19 = vadd.f32 %v2494_v18, %v2369_v63  ;;  %v2193_v11 = vpop.f32.mrf.mxu2  ;;  %vm1744_vm12 = vcmp.gt.s32.totalorder %v1712_v48, 0 }
 0x222   : > { %2800 = vst.msk [vmem:[%s4630_s21 + $0x20] sm:$0xff] %vm2795_vm4, %v2767_v57  ;;  %v2194_v9 = vadd.f32 %v2193_v11, %v5037_v61  ;;  %v2282_v47 = vpop.f32.mrf.mxu3  ;;  %v3639_v11 = vld [vmem:[%s4603_s19 + $0x18] sm:$0xff]   ;;  %v5039_v61 = vld [vmem:[#allocation12_spill] sm:$0xff]  ;;  %vm1839_vm13 = vcmp.lt.s32.totalorder %v1711_v6, 31 }
 0x223   : > { %v2574_v35 = vadd.f32 %v4608_v4, %v2538_v19  ;;  %v1608_v12 = vpop.f32.mrf.mxu1  ;;  %v3585_v10 = vunpack.c.l.bf16 %v3639_v11  ;;  %v5041_v6 = vld [vmem:[#allocation14_spill] sm:$0xff] }
 0x224   : > { %v2283_v39 = vadd.f32 %v2282_v47, %v2194_v9  ;;  %v1609_v3 = vadd.f32 %v1608_v12, %v5038_v52  ;;  %v3355_v52 = vsel %vm1744_vm12, 1.0, %v5032_v51 }
 0x225   : > { %vm2607_vm11 = vcmp.ge.f32.partialorder %v2574_v35, 0.0  ;;  %v2640_v28 = vmul.f32 %v4615_v33, %v2574_v35 }
 0x226   : > { %v2373_v13 = vpop.f32.mrf.mxu0  ;;  %v2372_v46 = vadd.f32 %v2371_v14, %v2283_v39  ;;  %v2443_v17 = vrot.slane %v1609_v3, 1  ;;  %v3362_v3 = vsel %vm1839_vm13, 1.0, %v5032_v51 }
 0x227   : > { %v2672_v63 = vsel %vm2607_vm11, %v2574_v35, %v2640_v28  ;;  %v5040_v35 = vld [vmem:[#allocation13_spill] sm:$0xff] }
 0x228   : > { %v2768_v57 = vadd.f32 %v3582_v25, %v2672_v63  ;;  %v2493_v18 = vsel %vm2468_vm2, %v2442_v62, %v2443_v17 }
 0x229   : > { %v2539_v19 = vadd.f32 %v2493_v18, %v2372_v46  ;;  %v2195_v26 = vpop.f32.mrf.mxu2 }
 0x22a   : > { %2801 = vst.msk [vmem:[%s4630_s21 + $0x28] sm:$0xff] %vm2795_vm4, %v2768_v57  ;;  %v2196_v9 = vadd.f32 %v2195_v26, %v5039_v61  ;;  %v2284_v47 = vpop.f32.mrf.mxu3  ;;  %v2001_v57 = vmul.f32 %v3355_v52, %v5041_v6  ;;  %v5043_v6 = vld [vmem:[#allocation16_spill] sm:$0xff] }
 0x22b   : > { %v2575_v12 = vadd.f32 %v4608_v4, %v2539_v19  ;;  %v1611_v14 = vpop.f32.mrf.mxu1 }
 0x22c   : > { %v1612_v36 = vadd.f32 %v1611_v14, %v5040_v35  ;;  %v2285_v62 = vadd.f32 %v2284_v47, %v2196_v9  ;;  %v5042_v14 = vld [vmem:[#allocation15_spill] sm:$0xff] }
 0x22d   : > { %vm2608_vm14 = vcmp.ge.f32.partialorder %v2575_v12, 0.0  ;;  %v2641_v25 = vmul.f32 %v4615_v33, %v2575_v12 }
 0x22e   : > { %v2376_v39 = vpop.f32.mrf.mxu0  ;;  %v2444_v28 = vrot.slane %v1612_v36, 1  ;;  %1650 = vmatmul.bf16.gmra.mxu1 %v4319_v59  ;;  %2237 = vmatmul.bf16.gmra.mxu2 %v4575_v5  ;;  %v2374_v18 = vadd.f32 %v2373_v13, %v2285_v62 }
 0x22f   : > { %v2673_v46 = vsel %vm2608_vm14, %v2575_v12, %v2641_v25  ;;  %2326 = vmatmul.bf16.gmra.mxu3 %v4659_v27 }
 0x230   : > { %v2769_v48 = vadd.f32 %v3585_v10, %v2673_v46  ;;  %v2492_v63 = vsel %vm2468_vm2, %v2443_v17, %v2444_v28  ;;  %v3640_v46 = vld [vmem:[%s4603_s19 + $0x20] sm:$0xff]  }
 0x231   : > { %2415 = vmatmul.bf16.gmra.mxu0 %v4319_v59  ;;  %v2508_v19 = vmul.f32 %v3362_v3, %v2492_v63  ;;  %v2198_v26 = vpop.f32.mrf.mxu2  ;;  %v3586_v59 = vunpack.c.h.bf16 %v3639_v11  ;;  %v3589_v11 = vunpack.c.l.bf16 %v3640_v46 }
 0x232   : > { %2802 = vst.msk [vmem:[%s4630_s21 + $0x30] sm:$0xff] %vm2795_vm4, %v2769_v48  ;;  %v2199_v61 = vadd.f32 %v2198_v26, %v2001_v57  ;;  %v2287_v9 = vpop.f32.mrf.mxu3 }
 0x233   : > { %v2540_v5 = vadd.f32 %v2508_v19, %v2374_v18  ;;  %v1613_v47 = vpop.f32.mrf.mxu1 }
 0x234   : > { %v2288_v12 = vadd.f32 %v2287_v9, %v2199_v61  ;;  %v1614_v10 = vadd.f32 %v1613_v47, %v5042_v14 }
 0x235   : > { %v2576_v35 = vadd.f32 %v4608_v4, %v2540_v5 }
 0x236   : > { %v2378_v17 = vpop.f32.mrf.mxu0  ;;  %v2377_v36 = vadd.f32 %v2376_v39, %v2288_v12  ;;  %v2445_v25 = vrot.slane %v1614_v10, 1 }
 0x237   : > { %vm2609_vm15 = vcmp.ge.f32.partialorder %v2576_v35, 0.0  ;;  %v2642_v13 = vmul.f32 %v4615_v33, %v2576_v35 }
 0x238   : > { %v2491_v62 = vsel %vm2468_vm2, %v2444_v28, %v2445_v25 }
 0x239   : > { %v2674_v52 = vsel %vm2609_vm15, %v2576_v35, %v2642_v13  ;;  %v2541_v3 = vadd.f32 %v2491_v62, %v2377_v36  ;;  %v2200_v48 = vpop.f32.mrf.mxu2  ;;  %v1684_v36 = vadd.s32 96, %v4237_v55  ;;  %v1683_v62 = vadd.s32 88, %v4237_v55 }
 0x23a   : > { %v2770_v63 = vadd.f32 %v3586_v59, %v2674_v52  ;;  %v2201_v57 = vadd.f32 %v2200_v48, %v5043_v6  ;;  %v2289_v18 = vpop.f32.mrf.mxu3  ;;  %v3590_v52 = vunpack.c.h.bf16 %v3640_v46 }
 0x23b   : > { %v2577_v19 = vadd.f32 %v4608_v4, %v2541_v3  ;;  %v1616_v26 = vpop.f32.mrf.mxu1  ;;  %v1716_v6 = vand.u32 31, %v1684_v36  ;;  %v3728_v36 = vld [vmem:[%s3898_s18 + $0x70] sm:$0xff] }
 0x23c   : > { %2803 = vst.msk [vmem:[%s4630_s21 + $0x38] sm:$0xff] %vm2795_vm4, %v2770_v63  ;;  %v2290_v39 = vadd.f32 %v2289_v18, %v2201_v57  ;;  %v1617_v61 = vadd.f32 %v1616_v26, %v4372_v60  ;;  %v1715_v18 = vand.u32 31, %v1683_v62 }
 0x23d   : > { %vm2610_vm0 = vcmp.ge.f32.partialorder %v2577_v19, 0.0  ;;  %v2643_v28 = vmul.f32 %v4615_v33, %v2577_v19  ;;  %vm1748_vm3 = vcmp.gt.s32.totalorder %v1716_v6, 0 }
 0x23e   : > { %v2381_v9 = vpop.f32.mrf.mxu0  ;;  %v2379_v5 = vadd.f32 %v2378_v17, %v2290_v39  ;;  %v2446_v47 = vrot.slane %v1617_v61, 1  ;;  %1655 = vmatmul.bf16.gmra.mxu1 %v4359_v54  ;;  %2242 = vmatmul.bf16.gmra.mxu2 %v4623_v49  ;;  %v3641_v39 = vld [vmem:[%s4603_s19 + $0x28] sm:$0xff]   ;;  %vm1843_vm5 = vcmp.lt.s32.totalorder %v1715_v18, 31 }
 0x23f   : > { %v2675_v12 = vsel %vm2610_vm0, %v2577_v19, %v2643_v28  ;;  %2331 = vmatmul.bf16.gmra.mxu3 %v4683_v29 }
 0x240   : > { %v2771_v14 = vadd.f32 %v3589_v11, %v2675_v12  ;;  %v2490_v10 = vsel %vm2468_vm2, %v2445_v25, %v2446_v47 }
 0x241   : > { %2420 = vmatmul.bf16.gmra.mxu0 %v4359_v54  ;;  %v2542_v60 = vadd.f32 %v2490_v10, %v2379_v5  ;;  %v2203_v35 = vpop.f32.mrf.mxu2  ;;  %v3593_v5 = vunpack.c.l.bf16 %v3641_v39 }
 0x242   : > { %2804 = vst.msk [vmem:[%s4630_s21 + $0x40] sm:$0xff] %vm2795_vm4, %v2771_v14  ;;  %v2204_v17 = vadd.f32 %v2203_v35, %v4376_v34  ;;  %v2292_v59 = vpop.f32.mrf.mxu3 }
 0x243   : > { %v2578_v49 = vadd.f32 %v4608_v4, %v2542_v60  ;;  %v1618_v13 = vpop.f32.mrf.mxu1  ;;  %v3356_v60 = vsel %vm1748_vm3, 1.0, %v5032_v51 }
 0x244   : > { %v2293_v25 = vadd.f32 %v2292_v59, %v2204_v17  ;;  %v1619_v54 = vadd.f32 %v1618_v13, %v4382_v50  ;;  %v5044_v17 = vld [vmem:[#allocation17_spill] sm:$0xff]  ;;  %v2005_v13 = vmul.f32 %v3356_v60, %v4397_v23 }
 0x245   : > { %vm2611_vm1 = vcmp.ge.f32.partialorder %v2578_v49, 0.0  ;;  %v2644_v3 = vmul.f32 %v4615_v33, %v2578_v49 }
 0x246   : > { %v2383_v48 = vpop.f32.mrf.mxu0  ;;  %v2382_v63 = vadd.f32 %v2381_v9, %v2293_v25  ;;  %v2447_v34 = vrot.slane %v1619_v54, 1 }
 0x247   : > { %v2676_v57 = vsel %vm2611_vm1, %v2578_v49, %v2644_v3 }
 0x248   : > { %v2772_v19 = vadd.f32 %v3590_v52, %v2676_v57  ;;  %v2489_v26 = vsel %vm2468_vm2, %v2446_v47, %v2447_v34 }
 0x249   : > { %v2543_v11 = vadd.f32 %v2489_v26, %v2382_v63  ;;  %v2205_v46 = vpop.f32.mrf.mxu2 }
 0x24a   : > { %2805 = vst.msk [vmem:[%s4630_s21 + $0x48] sm:$0xff] %vm2795_vm4, %v2772_v19  ;;  %v2206_v50 = vadd.f32 %v2205_v46, %v4388_v44  ;;  %v2294_v61 = vpop.f32.mrf.mxu3  ;;  %v3363_v44 = vsel %vm1843_vm5, 1.0, %v5032_v51  ;;  %v3594_v19 = vunpack.c.h.bf16 %v3641_v39 }
 0x24b   : > { %v2579_v28 = vadd.f32 %v4608_v4, %v2543_v11  ;;  %v1621_v9 = vpop.f32.mrf.mxu1 }
 0x24c   : > { %v1622_v12 = vadd.f32 %v1621_v9, %v4393_v40  ;;  %v2295_v14 = vadd.f32 %v2294_v61, %v2206_v50  ;;  %v3642_v61 = vld [vmem:[%s4603_s19 + $0x30] sm:$0xff]  }
 0x24d   : > { %vm2612_vm6 = vcmp.ge.f32.partialorder %v2579_v28, 0.0  ;;  %v2645_v47 = vmul.f32 %v4615_v33, %v2579_v28 }
 0x24e   : > { %v2386_v10 = vpop.f32.mrf.mxu0  ;;  %v2448_v35 = vrot.slane %v1622_v12, 1  ;;  %1660 = vmatmul.bf16.gmra.mxu1 %v5044_v17  ;;  %2247 = vmatmul.bf16.gmra.mxu2 %v4659_v27  ;;  %v2384_v62 = vadd.f32 %v2383_v48, %v2295_v14 }
 0x24f   : > { %v2677_v59 = vsel %vm2612_vm6, %v2579_v28, %v2645_v47  ;;  %2336 = vmatmul.bf16.gmra.mxu3 %v3728_v36  ;;  %v3597_v47 = vunpack.c.l.bf16 %v3642_v61 }
 0x250   : > { %v2773_v49 = vadd.f32 %v3593_v5, %v2677_v59  ;;  %v2488_v40 = vsel %vm2468_vm2, %v2447_v34, %v2448_v35  ;;  %v3729_v59 = vld [vmem:[%s3898_s18 + $0x78] sm:$0xff] }
 0x251   : > { %2425 = vmatmul.bf16.gmra.mxu0 %v5044_v17  ;;  %v2512_v52 = vmul.f32 %v3363_v44, %v2488_v40  ;;  %v2208_v25 = vpop.f32.mrf.mxu2 }
 0x252   : > { %2806 = vst.msk [vmem:[%s4630_s21 + $0x50] sm:$0xff] %vm2795_vm4, %v2773_v49  ;;  %v2209_v54 = vadd.f32 %v2208_v25, %v2005_v13  ;;  %v2297_v3 = vpop.f32.mrf.mxu3 }
 0x253   : > { %v2544_v27 = vadd.f32 %v2512_v52, %v2384_v62  ;;  %v1623_v63 = vpop.f32.mrf.mxu1  ;;  %v1688_v52 = vadd.s32 128, %v4237_v55 }
 0x254   : > { %v2298_v6 = vadd.f32 %v2297_v3, %v2209_v54  ;;  %v1624_v57 = vadd.f32 %v1623_v63, %v4402_v41  ;;  %v1687_v54 = vadd.s32 120, %v4237_v55  ;;  %v3598_v3 = vunpack.c.h.bf16 %v3642_v61 }
 0x255   : > { %v2580_v18 = vadd.f32 %v4608_v4, %v2544_v27 }
 0x256   : > { %v2388_v34 = vpop.f32.mrf.mxu0  ;;  %v2387_v26 = vadd.f32 %v2386_v10, %v2298_v6  ;;  %v2449_v23 = vrot.slane %v1624_v57, 1 }
 0x257   : > { %vm2613_vm7 = vcmp.ge.f32.partialorder %v2580_v18, 0.0  ;;  %v2646_v48 = vmul.f32 %v4615_v33, %v2580_v18 }
 0x258   : > { %v2487_v11 = vsel %vm2468_vm2, %v2448_v35, %v2449_v23 }
 0x259   : > { %v2678_v46 = vsel %vm2613_vm7, %v2580_v18, %v2646_v48  ;;  %v2545_v50 = vadd.f32 %v2487_v11, %v2387_v26  ;;  %v2210_v28 = vpop.f32.mrf.mxu2  ;;  %v1720_v18 = vand.u32 31, %v1688_v52  ;;  %v3643_v11 = vld [vmem:[%s4603_s19 + $0x38] sm:$0xff]  }
 0x25a   : > { %v2774_v9 = vadd.f32 %v3594_v19, %v2678_v46  ;;  %v2211_v41 = vadd.f32 %v2210_v28, %v4408_v21  ;;  %v2299_v5 = vpop.f32.mrf.mxu3  ;;  %v1719_v19 = vand.u32 31, %v1687_v54 }
 0x25b   : > { %v2581_v12 = vadd.f32 %v4608_v4, %v2545_v50  ;;  %v1626_v39 = vpop.f32.mrf.mxu1  ;;  %vm1752_vm10 = vcmp.gt.s32.totalorder %v1720_v18, 0 }
 0x25c   : > { %2807 = vst.msk [vmem:[%s4630_s21 + $0x58] sm:$0xff] %vm2795_vm4, %v2774_v9  ;;  %v2300_v14 = vadd.f32 %v2299_v5, %v2211_v41  ;;  %v1627_v10 = vadd.f32 %v1626_v39, %v4413_v1  ;;  %vm1847_vm11 = vcmp.lt.s32.totalorder %v1719_v19, 31  ;;  %v3601_v9 = vunpack.c.l.bf16 %v3643_v11 }
 0x25d   : > { %vm2614_vm8 = vcmp.ge.f32.partialorder %v2581_v12, 0.0  ;;  %v2647_v60 = vmul.f32 %v4615_v33, %v2581_v12 }
 0x25e   : > { %v2391_v44 = vpop.f32.mrf.mxu0  ;;  %v2389_v35 = vadd.f32 %v2388_v34, %v2300_v14  ;;  %v2450_v17 = vrot.slane %v1627_v10, 1  ;;  %1665 = vmatmul.bf16.gmra.mxu1 %v4400_v24  ;;  %2252 = vmatmul.bf16.gmra.mxu2 %v4683_v29  ;;  %v3364_v14 = vsel %vm1847_vm11, 1.0, %v5032_v51 }
 0x25f   : > { %v2679_v21 = vsel %vm2614_vm8, %v2581_v12, %v2647_v60  ;;  %2341 = vmatmul.bf16.gmra.mxu3 %v3729_v59 }
 0x260   : > { %v2775_v36 = vadd.f32 %v3597_v47, %v2679_v21  ;;  %v2486_v49 = vsel %vm2468_vm2, %v2449_v23, %v2450_v17  ;;  %v3357_v47 = vsel %vm1752_vm10, 1.0, %v5032_v51 }
 0x261   : > { %2430 = vmatmul.bf16.gmra.mxu0 %v4400_v24  ;;  %v2546_v1 = vadd.f32 %v2486_v49, %v2389_v35  ;;  %v2213_v40 = vpop.f32.mrf.mxu2  ;;  %v2009_v35 = vmul.f32 %v3357_v47, %v4435_v30 }
 0x262   : > { %2808 = vst.msk [vmem:[%s4630_s21 + $0x60] sm:$0xff] %vm2795_vm4, %v2775_v36  ;;  %v2214_v13 = vadd.f32 %v2213_v40, %v4417_v16  ;;  %v2302_v62 = vpop.f32.mrf.mxu3 }
 0x263   : > { %v2582_v29 = vadd.f32 %v4608_v4, %v2546_v1  ;;  %v1628_v25 = vpop.f32.mrf.mxu1 }
 0x264   : > { %v2303_v27 = vadd.f32 %v2302_v62, %v2214_v13  ;;  %v1629_v24 = vadd.f32 %v1628_v25, %v4420_v0 }
 0x265   : > { %vm2615_vm9 = vcmp.ge.f32.partialorder %v2582_v29, 0.0  ;;  %v2648_v63 = vmul.f32 %v4615_v33, %v2582_v29 }
 0x266   : > { %v2393_v6 = vpop.f32.mrf.mxu0  ;;  %v2392_v57 = vadd.f32 %v2391_v44, %v2303_v27  ;;  %v2451_v16 = vrot.slane %v1629_v24, 1 }
 0x267   : > { %v2680_v34 = vsel %vm2615_vm9, %v2582_v29, %v2648_v63  ;;  %v3602_v29 = vunpack.c.h.bf16 %v3643_v11  ;;  %v3644_v63 = vld [vmem:[%s4603_s19 + $0x40] sm:$0xff]  }
 0x268   : > { %v2776_v26 = vadd.f32 %v3598_v3, %v2680_v34  ;;  %v2485_v23 = vsel %vm2468_vm2, %v2450_v17, %v2451_v16 }
 0x269   : > { %v2547_v48 = vadd.f32 %v2485_v23, %v2392_v57  ;;  %v2215_v46 = vpop.f32.mrf.mxu2 }
 0x26a   : > { %2809 = vst.msk [vmem:[%s4630_s21 + $0x68] sm:$0xff] %vm2795_vm4, %v2776_v26  ;;  %v2216_v0 = vadd.f32 %v2215_v46, %v4426_v20  ;;  %v2304_v50 = vpop.f32.mrf.mxu3  ;;  %v3605_v26 = vunpack.c.l.bf16 %v3644_v63 }
 0x26b   : > { %v2583_v61 = vadd.f32 %v4608_v4, %v2547_v48  ;;  %v1631_v28 = vpop.f32.mrf.mxu1 }
 0x26c   : > { %v1632_v41 = vadd.f32 %v1631_v28, %v4431_v22  ;;  %v2305_v12 = vadd.f32 %v2304_v50, %v2216_v0 }
 0x26d   : > { %vm2616_vm12 = vcmp.ge.f32.partialorder %v2583_v61, 0.0  ;;  %v2649_v5 = vmul.f32 %v4615_v33, %v2583_v61 }
 0x26e   : > { %v2396_v39 = vpop.f32.mrf.mxu0  ;;  %v2452_v20 = vrot.slane %v1632_v41, 1  ;;  %v2394_v17 = vadd.f32 %v2393_v6, %v2305_v12 }
 0x26f   : > { %v2681_v10 = vsel %vm2616_vm12, %v2583_v61, %v2649_v5 }
 0x270   : > { %v2777_v60 = vadd.f32 %v3601_v9, %v2681_v10  ;;  %v2484_v44 = vsel %vm2468_vm2, %v2451_v16, %v2452_v20  ;;  %v5045_v16 = vld [vmem:[#allocation18_spill] sm:$0xff]  ;;  %v3606_v10 = vunpack.c.h.bf16 %v3644_v63 }
 0x271   : > { %v2516_v21 = vmul.f32 %v3364_v14, %v2484_v44  ;;  %v2218_v22 = vpop.f32.mrf.mxu2 }
 0x272   : > { %2810 = vst.msk [vmem:[%s4630_s21 + $0x70] sm:$0xff] %vm2795_vm4, %v2777_v60  ;;  %v2219_v59 = vadd.f32 %v2218_v22, %v2009_v35  ;;  %v2307_v36 = vpop.f32.mrf.mxu3 }
 0x273   : > { %v2548_v49 = vadd.f32 %v2516_v21, %v2394_v17  ;;  %v1633_v1 = vpop.f32.mrf.mxu1 }
 0x274   : > { %v2308_v40 = vadd.f32 %v2307_v36, %v2219_v59  ;;  %v1634_v13 = vadd.f32 %v1633_v1, %v4438_v32 }
 0x275   : > { %v2584_v62 = vadd.f32 %v4608_v4, %v2548_v49 }
 0x276   : > { %v2398_v52 = vpop.f32.mrf.mxu0  ;;  %v2397_v25 = vadd.f32 %v2396_v39, %v2308_v40  ;;  %v2453_v30 = vrot.slane %v1634_v13, 1  ;;  %v3645_v13 = vld [vmem:[%s4603_s19 + $0x48] sm:$0xff]  }
 0x277   : > { %vm2617_vm13 = vcmp.ge.f32.partialorder %v2584_v62, 0.0  ;;  %v2650_v54 = vmul.f32 %v4615_v33, %v2584_v62 }
 0x278   : > { %v2483_v3 = vsel %vm2468_vm2, %v2452_v20, %v2453_v30  ;;  %v1691_v20 = vadd.s32 152, %v4237_v55 }
 0x279   : > { %v2682_v27 = vsel %vm2617_vm13, %v2584_v62, %v2650_v54  ;;  %v2549_v24 = vadd.f32 %v2483_v3, %v2397_v25  ;;  %v2220_v6 = vpop.f32.mrf.mxu2 }
 0x27a   : > { %v2778_v57 = vadd.f32 %v3602_v29, %v2682_v27  ;;  %v2221_v32 = vadd.f32 %v2220_v6, %v5045_v16  ;;  %v2309_v18 = vpop.f32.mrf.mxu3  ;;  %v1723_v36 = vand.u32 31, %v1691_v20 }
 0x27b   : > { %v2585_v34 = vadd.f32 %v4608_v4, %v2549_v24  ;;  %v1636_v19 = vpop.f32.mrf.mxu1 }
 0x27c   : > { %2811 = vst.msk [vmem:[%s4630_s21 + $0x78] sm:$0xff] %vm2795_vm4, %v2778_v57  ;;  %v2310_v23 = vadd.f32 %v2309_v18, %v2221_v32  ;;  %v1637_v48 = vadd.f32 %v1636_v19, %v4449_v37  ;;  %v1692_v37 = vadd.s32 160, %v4237_v55  ;;  %vm1851_vm1 = vcmp.lt.s32.totalorder %v1723_v36, 31 }
 0x27d   : > { %vm2618_vm14 = vcmp.ge.f32.partialorder %v2585_v34, 0.0  ;;  %v2651_v11 = vmul.f32 %v4615_v33, %v2585_v34  ;;  %v3365_v6 = vsel %vm1851_vm1, 1.0, %v5032_v51 }
 0x27e   : > { %v2401_v46 = vpop.f32.mrf.mxu0  ;;  %v2399_v0 = vadd.f32 %v2398_v52, %v2310_v23  ;;  %v2454_v50 = vrot.slane %v1637_v48, 1  ;;  %v1724_v22 = vand.u32 31, %v1692_v37  ;;  %v3646_v37 = vld [vmem:[%s4603_s19 + $0x50] sm:$0xff]  }
 0x27f   : > { %v2683_v61 = vsel %vm2618_vm14, %v2585_v34, %v2651_v11 }
 0x280   : > { %v2779_v28 = vadd.f32 %v3605_v26, %v2683_v61  ;;  %v2482_v9 = vsel %vm2468_vm2, %v2453_v30, %v2454_v50  ;;  %vm1756_vm0 = vcmp.gt.s32.totalorder %v1724_v22, 0  ;;  %v3609_v30 = vunpack.c.l.bf16 %v3645_v13 }
 0x281   : > { %v2550_v41 = vadd.f32 %v2482_v9, %v2399_v0  ;;  %v2223_v5 = vpop.f32.mrf.mxu2  ;;  %v3358_v63 = vsel %vm1756_vm0, 1.0, %v5032_v51 }
 0x282   : > { %2812 = vst.msk [vmem:[%s4630_s21 + $0x80] sm:$0xff] %vm2795_vm4, %v2779_v28  ;;  %v2224_v12 = vadd.f32 %v2223_v5, %v4453_v53  ;;  %v2312_v39 = vpop.f32.mrf.mxu3  ;;  %v2013_v18 = vmul.f32 %v3358_v63, %v4471_v7  ;;  %v3610_v28 = vunpack.c.h.bf16 %v3645_v13  ;;  %v5046_v13 = vld [vmem:[#allocation19_spill] sm:$0xff] }
 0x283   : > { %v2586_v47 = vadd.f32 %v4608_v4, %v2550_v41  ;;  %v1638_v14 = vpop.f32.mrf.mxu1 }
 0x284   : > { %v2313_v60 = vadd.f32 %v2312_v39, %v2224_v12  ;;  %v1639_v44 = vadd.f32 %v1638_v14, %v4456_v42 }
 0x285   : > { %vm2619_vm15 = vcmp.ge.f32.partialorder %v2586_v47, 0.0  ;;  %v2652_v35 = vmul.f32 %v4615_v33, %v2586_v47 }
 0x286   : > { %v2403_v17 = vpop.f32.mrf.mxu0  ;;  %v2402_v21 = vadd.f32 %v2401_v46, %v2313_v60  ;;  %v2455_v53 = vrot.slane %v1639_v44, 1  ;;  %v3613_v44 = vunpack.c.l.bf16 %v3646_v37 }
 0x287   : > { %v2684_v59 = vsel %vm2619_vm15, %v2586_v47, %v2652_v35 }
 0x288   : > { %v2780_v49 = vadd.f32 %v3606_v10, %v2684_v59  ;;  %v2481_v1 = vsel %vm2468_vm2, %v2454_v50, %v2455_v53 }
 0x289   : > { %v2551_v40 = vadd.f32 %v2481_v1, %v2402_v21  ;;  %v2225_v62 = vpop.f32.mrf.mxu2 }
 0x28a   : > { %2813 = vst.msk [vmem:[%s4630_s21 + $0x88] sm:$0xff] %vm2795_vm4, %v2780_v49  ;;  %v2226_v42 = vadd.f32 %v2225_v62, %v4462_v8  ;;  %v2314_v52 = vpop.f32.mrf.mxu3 }
 0x28b   : > { %v2587_v29 = vadd.f32 %v4608_v4, %v2551_v40  ;;  %v1641_v25 = vpop.f32.mrf.mxu1 }
 0x28c   : > { %v1642_v54 = vadd.f32 %v1641_v25, %v4467_v58  ;;  %v2315_v27 = vadd.f32 %v2314_v52, %v2226_v42  ;;  %v1695_v25 = vadd.s32 184, %v4237_v55 }
 0x28d   : > { %vm2620_vm3 = vcmp.ge.f32.partialorder %v2587_v29, 0.0  ;;  %v2653_v3 = vmul.f32 %v4615_v33, %v2587_v29 }
 0x28e   : > { %v2406_v24 = vpop.f32.mrf.mxu0  ;;  %v2456_v8 = vrot.slane %v1642_v54, 1  ;;  %v2404_v34 = vadd.f32 %v2403_v17, %v2315_v27 }
 0x28f   : > { %v2685_v57 = vsel %vm2620_vm3, %v2587_v29, %v2653_v3  ;;  %v5047_v3 = vld [vmem:[#allocation20_spill] sm:$0xff] }
 0x290   : > { %v2781_v16 = vadd.f32 %v3609_v30, %v2685_v57  ;;  %v2480_v32 = vsel %vm2468_vm2, %v2455_v53, %v2456_v8  ;;  %v3614_v30 = vunpack.c.h.bf16 %v3646_v37 }
 0x291   : > { %v2520_v19 = vmul.f32 %v3365_v6, %v2480_v32  ;;  %v2228_v58 = vpop.f32.mrf.mxu2  ;;  %v1727_v32 = vand.u32 31, %v1695_v25  ;;  %v5051_v25 = vld [vmem:[#allocation24_spill] sm:$0xff] }
 0x292   : > { %2814 = vst.msk [vmem:[%s4630_s21 + $0x90] sm:$0xff] %vm2795_vm4, %v2781_v16  ;;  %v2229_v26 = vadd.f32 %v2228_v58, %v2013_v18  ;;  %v2317_v23 = vpop.f32.mrf.mxu3  ;;  %v3647_v58 = vld [vmem:[%s4603_s19 + $0x58] sm:$0xff]  }
 0x293   : > { %v2552_v48 = vadd.f32 %v2520_v19, %v2404_v34  ;;  %v1643_v11 = vpop.f32.mrf.mxu1  ;;  %vm1855_vm9 = vcmp.lt.s32.totalorder %v1727_v32, 31 }
 0x294   : > { %v2318_v46 = vadd.f32 %v2317_v23, %v2229_v26  ;;  %v1644_v0 = vadd.f32 %v1643_v11, %v4474_v56  ;;  %v5048_v23 = vld [vmem:[#allocation21_spill] sm:$0xff] }
 0x295   : > { %v2588_v50 = vadd.f32 %v4608_v4, %v2552_v48 }
 0x296   : > { %v2408_v61 = vpop.f32.mrf.mxu0  ;;  %v2407_v9 = vadd.f32 %v2406_v24, %v2318_v46  ;;  %v2457_v7 = vrot.slane %v1644_v0, 1 }
 0x297   : > { %vm2621_vm5 = vcmp.ge.f32.partialorder %v2588_v50, 0.0  ;;  %v2654_v41 = vmul.f32 %v4615_v33, %v2588_v50 }
 0x298   : > { %v2479_v5 = vsel %vm2468_vm2, %v2456_v8, %v2457_v7 }
 0x299   : > { %v2686_v12 = vsel %vm2621_vm5, %v2588_v50, %v2654_v41  ;;  %v2553_v39 = vadd.f32 %v2479_v5, %v2407_v9  ;;  %v2230_v47 = vpop.f32.mrf.mxu2  ;;  %v3617_v50 = vunpack.c.l.bf16 %v3647_v58  ;;  %v3366_v5 = vsel %vm1855_vm9, 1.0, %v5032_v51 }
 0x29a   : > { %v2782_v14 = vadd.f32 %v3610_v28, %v2686_v12  ;;  %v2231_v56 = vadd.f32 %v2230_v47, %v4480_v38  ;;  %v2319_v20 = vpop.f32.mrf.mxu3  ;;  %v5049_v47 = vld [vmem:[#allocation22_spill] sm:$0xff] }
 0x29b   : > { %v2589_v10 = vadd.f32 %v4608_v4, %v2553_v39  ;;  %v1646_v60 = vpop.f32.mrf.mxu1 }
 0x29c   : > { %2815 = vst.msk [vmem:[%s4630_s21 + $0x98] sm:$0xff] %vm2795_vm4, %v2782_v14  ;;  %v2320_v35 = vadd.f32 %v2319_v20, %v2231_v56  ;;  %v1647_v17 = vadd.f32 %v1646_v60, %v4485_v31  ;;  %v1696_v31 = vadd.s32 192, %v4237_v55 }
 0x29d   : > { %vm2622_vm6 = vcmp.ge.f32.partialorder %v2589_v10, 0.0  ;;  %v2655_v21 = vmul.f32 %v4615_v33, %v2589_v10 }
 0x29e   : > { %v2411_v53 = vpop.f32.mrf.mxu0  ;;  %v2409_v22 = vadd.f32 %v2408_v61, %v2320_v35  ;;  %v2458_v59 = vrot.slane %v1647_v17, 1  ;;  %v1728_v57 = vand.u32 31, %v1696_v31  ;;  %v3648_v31 = vld [vmem:[%s4603_s19 + $0x60] sm:$0xff]  }
 0x29f   : > { %v2687_v36 = vsel %vm2622_vm6, %v2589_v10, %v2655_v21  ;;  %v5050_v21 = vld [vmem:[#allocation23_spill] sm:$0xff] }
 0x2a0   : > { %v2783_v49 = vadd.f32 %v3613_v44, %v2687_v36  ;;  %v2478_v38 = vsel %vm2468_vm2, %v2457_v7, %v2458_v59  ;;  %vm1760_vm8 = vcmp.gt.s32.totalorder %v1728_v57, 0 }
 0x2a1   : > { %v2554_v1 = vadd.f32 %v2478_v38, %v2409_v22  ;;  %v2233_v40 = vpop.f32.mrf.mxu2  ;;  %v3359_v41 = vsel %vm1760_vm8, 1.0, %v5032_v51  ;;  %v4887_v22 = vld [vmem:[%s4985_s4] ss:$0 sm:$0xff] }
 0x2a2   : > { %2816 = vst.msk [vmem:[%s4630_s21 + $0xa0] sm:$0xff] %vm2795_vm4, %v2783_v49  ;;  %v2234_v62 = vadd.f32 %v2233_v40, %v5046_v13  ;;  %v2322_v42 = vpop.f32.mrf.mxu3  ;;  %v2017_v14 = vmul.f32 %v3359_v41, %v5049_v47  ;;  %v3618_v49 = vunpack.c.h.bf16 %v3647_v58 }
 0x2a3   : > { %v2590_v52 = vadd.f32 %v4608_v4, %v2554_v1  ;;  %v1648_v29 = vpop.f32.mrf.mxu1 }
 0x2a4   : > { %v2323_v54 = vadd.f32 %v2322_v42, %v2234_v62  ;;  %v1649_v27 = vadd.f32 %v1648_v29, %v5047_v3 }
 0x2a5   : > { %vm2623_vm7 = vcmp.ge.f32.partialorder %v2590_v52, 0.0  ;;  %v2656_v24 = vmul.f32 %v4615_v33, %v2590_v52 }
 0x2a6   : > { %v2413_v63 = vpop.f32.mrf.mxu0  ;;  %v2412_v6 = vadd.f32 %v2411_v53, %v2323_v54  ;;  %v2459_v8 = vrot.slane %v1649_v27, 1 }
 0x2a7   : > { %v2688_v16 = vsel %vm2623_vm7, %v2590_v52, %v2656_v24  ;;  %v3621_v24 = vunpack.c.l.bf16 %v3648_v31 }
 0x2a8   : > { %v2784_v18 = vadd.f32 %v3614_v30, %v2688_v16  ;;  %v2477_v34 = vsel %vm2468_vm2, %v2458_v59, %v2459_v8 }
 0x2a9   : > { %v2555_v19 = vadd.f32 %v2477_v34, %v2412_v6  ;;  %v2235_v26 = vpop.f32.mrf.mxu2 }
 0x2aa   : > { %2817 = vst.msk [vmem:[%s4630_s21 + $0xa8] sm:$0xff] %vm2795_vm4, %v2784_v18  ;;  %v2236_v48 = vadd.f32 %v2235_v26, %v5048_v23  ;;  %v2324_v11 = vpop.f32.mrf.mxu3 }
 0x2ab   : > { %v2591_v46 = vadd.f32 %v4608_v4, %v2555_v19  ;;  %v1651_v0 = vpop.f32.mrf.mxu1 }
 0x2ac   : > { %v1652_v61 = vadd.f32 %v1651_v0, %v4506_v15  ;;  %v2325_v9 = vadd.f32 %v2324_v11, %v2236_v48  ;;  %v1699_v0 = vadd.s32 216, %v4237_v55 }
 0x2ad   : > { %vm2624_vm10 = vcmp.ge.f32.partialorder %v2591_v46, 0.0  ;;  %v2657_v28 = vmul.f32 %v4615_v33, %v2591_v46 }
 0x2ae   : > { %v2416_v7 = vpop.f32.mrf.mxu0  ;;  %v2460_v12 = vrot.slane %v1652_v61, 1  ;;  %v2414_v56 = vadd.f32 %v2413_v63, %v2325_v9 }
 0x2af   : > { %v2689_v39 = vsel %vm2624_vm10, %v2591_v46, %v2657_v28 }
 0x2b0   : > { %v2785_v37 = vadd.f32 %v3617_v50, %v2689_v39  ;;  %v2476_v4 = vsel %vm2468_vm2, %v2459_v8, %v2460_v12  ;;  %v3622_v50 = vunpack.c.h.bf16 %v3648_v31  ;;  %v1731_v39 = vand.u32 31, %v1699_v0 }
 0x2b1   : > { %v2524_v20 = vmul.f32 %v3366_v5, %v2476_v4  ;;  %v2238_v15 = vpop.f32.mrf.mxu2 }
 0x2b2   : > { %2818 = vst.msk [vmem:[%s4630_s21 + $0xb0] sm:$0xff] %vm2795_vm4, %v2785_v37  ;;  %v2239_v10 = vadd.f32 %v2238_v15, %v2017_v14  ;;  %v2327_v60 = vpop.f32.mrf.mxu3  ;;  %v3649_v14 = vld [vmem:[%s4603_s19 + $0x68] sm:$0xff]   ;;  %vm1859_vm15 = vcmp.lt.s32.totalorder %v1731_v39, 31 }
 0x2b3   : > { %v2556_v44 = vadd.f32 %v2524_v20, %v2414_v56  ;;  %v1653_v35 = vpop.f32.mrf.mxu1  ;;  %v5052_v20 = vld [vmem:[#allocation25_spill] sm:$0xff] }
 0x2b4   : > { %v2328_v17 = vadd.f32 %v2327_v60, %v2239_v10  ;;  %v1654_v53 = vadd.f32 %v1653_v35, %v5050_v21  ;;  %v5053_v35 = vld [vmem:[#allocation26_spill] sm:$0xff] }
 0x2b5   : > { %v2592_v59 = vadd.f32 %v4887_v22, %v2556_v44  ;;  %v3625_v44 = vunpack.c.l.bf16 %v3649_v14 }
 0x2b6   : > { %v2418_v36 = vpop.f32.mrf.mxu0  ;;  %v2417_v38 = vadd.f32 %v2416_v7, %v2328_v17  ;;  %v2461_v1 = vrot.slane %v1654_v53, 1 }
 0x2b7   : > { %vm2625_vm11 = vcmp.ge.f32.partialorder %v2592_v59, 0.0  ;;  %v2658_v40 = vmul.f32 %v4615_v33, %v2592_v59 }
 0x2b8   : > { %v2475_v13 = vsel %vm2468_vm2, %v2460_v12, %v2461_v1 }
 0x2b9   : > { %v2690_v62 = vsel %vm2625_vm11, %v2592_v59, %v2658_v40  ;;  %v2557_v42 = vadd.f32 %v2475_v13, %v2417_v38  ;;  %v2240_v52 = vpop.f32.mrf.mxu2 }
 0x2ba   : > { %v2786_v29 = vadd.f32 %v3618_v49, %v2690_v62  ;;  %v2241_v30 = vadd.f32 %v2240_v52, %v5051_v25  ;;  %v2329_v54 = vpop.f32.mrf.mxu3  ;;  %v5054_v62 = vld [vmem:[#allocation27_spill] sm:$0xff] }
 0x2bb   : > { %v2593_v3 = vadd.f32 %v4887_v22, %v2557_v42  ;;  %v1656_v27 = vpop.f32.mrf.mxu1 }
 0x2bc   : > { %2819 = vst.msk [vmem:[%s4630_s21 + $0xb8] sm:$0xff] %vm2795_vm4, %v2786_v29  ;;  %v2330_v63 = vadd.f32 %v2329_v54, %v2241_v30  ;;  %v1657_v6 = vadd.f32 %v1656_v27, %v4527_v2  ;;  %v1700_v2 = vadd.s32 224, %v4237_v55 }
 0x2bd   : > { %vm2626_vm12 = vcmp.ge.f32.partialorder %v2593_v3, 0.0  ;;  %v2659_v8 = vmul.f32 %v4615_v33, %v2593_v3 }
 0x2be   : > { %v2421_v57 = vpop.f32.mrf.mxu0  ;;  %v2419_v16 = vadd.f32 %v2418_v36, %v2330_v63  ;;  %v2462_v32 = vrot.slane %v1657_v6, 1  ;;  %v1732_v5 = vand.u32 31, %v1700_v2  ;;  %v3367_v36 = vsel %vm1859_vm15, 1.0, %v5032_v51  ;;  %v5056_v2 = vld [vmem:[#allocation29_spill] sm:$0xff] }
 0x2bf   : > { %v2691_v18 = vsel %vm2626_vm12, %v2593_v3, %v2659_v8  ;;  %v3626_v8 = vunpack.c.h.bf16 %v3649_v14 }
 0x2c0   : > { %v2787_v34 = vadd.f32 %v3621_v24, %v2691_v18  ;;  %v2474_v19 = vsel %vm2468_vm2, %v2461_v1, %v2462_v32  ;;  %vm1764_vm14 = vcmp.gt.s32.totalorder %v1732_v5, 0  ;;  %v5055_v24 = vld [vmem:[#allocation28_spill] sm:$0xff] }
 0x2c1   : > { %v2558_v58 = vadd.f32 %v2474_v19, %v2419_v16  ;;  %v2243_v26 = vpop.f32.mrf.mxu2  ;;  %v3360_v59 = vsel %vm1764_vm14, 1.0, %v5032_v51 }
 0x2c2   : > { %2820 = vst.msk [vmem:[%s4630_s21 + $0xc0] sm:$0xff] %vm2795_vm4, %v2787_v34  ;;  %v2244_v23 = vadd.f32 %v2243_v26, %v4531_v45  ;;  %v2332_v48 = vpop.f32.mrf.mxu3  ;;  %v2021_v42 = vmul.f32 %v3360_v59, %v5054_v62  ;;  %v3651_v62 = vld [vmem:[%s4603_s19 + $0x78] sm:$0xff]  }
 0x2c3   : > { %v2594_v11 = vadd.f32 %v4887_v22, %v2558_v58  ;;  %v1658_v46 = vpop.f32.mrf.mxu1  ;;  %v3650_v58 = vld [vmem:[%s4603_s19 + $0x70] sm:$0xff]  }
 0x2c4   : > { %v2333_v61 = vadd.f32 %v2332_v48, %v2244_v23  ;;  %v1659_v28 = vadd.f32 %v1658_v46, %v4534_v43 }
 0x2c5   : > { %vm2627_vm13 = vcmp.ge.f32.partialorder %v2594_v11, 0.0  ;;  %v2660_v9 = vmul.f32 %v4615_v33, %v2594_v11 }
 0x2c6   : > { %v2423_v7 = vpop.f32.mrf.mxu0  ;;  %v2422_v41 = vadd.f32 %v2421_v57, %v2333_v61  ;;  %v2463_v45 = vrot.slane %v1659_v28, 1  ;;  %v3629_v61 = vunpack.c.l.bf16 %v3650_v58 }
 0x2c7   : > { %v2692_v12 = vsel %vm2627_vm13, %v2594_v11, %v2660_v9  ;;  %v5057_v9 = vld [vmem:[#allocation30_spill] sm:$0xff] }
 0x2c8   : > { %v2788_v37 = vadd.f32 %v3622_v50, %v2692_v12  ;;  %v2473_v4 = vsel %vm2468_vm2, %v2462_v32, %v2463_v45 }
 0x2c9   : > { %v2559_v47 = vadd.f32 %v2473_v4, %v2422_v41  ;;  %v2245_v56 = vpop.f32.mrf.mxu2  ;;  %v1703_v4 = vadd.s32 248, %v4237_v55 }
 0x2ca   : > { %2821 = vst.msk [vmem:[%s4630_s21 + $0xc8] sm:$0xff] %vm2795_vm4, %v2788_v37  ;;  %v2246_v43 = vadd.f32 %v2245_v56, %v5052_v20  ;;  %v2334_v15 = vpop.f32.mrf.mxu3  ;;  %v5058_v56 = vld [vmem:[#allocation31_spill] sm:$0xff] }
 0x2cb   : > { %v2595_v10 = vadd.f32 %v4887_v22, %v2559_v47  ;;  %v1661_v60 = vpop.f32.mrf.mxu1 }
 0x2cc   : > { %v1662_v17 = vadd.f32 %v1661_v60, %v5053_v35  ;;  %v2335_v53 = vadd.f32 %v2334_v15, %v2246_v43 }
 0x2cd   : > { %vm2628_vm0 = vcmp.ge.f32.partialorder %v2595_v10, 0.0  ;;  %v2661_v21 = vmul.f32 %v4615_v33, %v2595_v10 }
 0x2ce   : > { %v2464_v49 = vrot.slane %v1662_v17, 1  ;;  %v2426_v1 = vpop.f32.mrf.mxu0  ;;  %v2424_v31 = vadd.f32 %v2423_v7, %v2335_v53  ;;  %v5059_v17 = vld [vmem:[#allocation32_spill] sm:$0xff]  ;;  %v1735_v53 = vand.u32 31, %v1703_v4 }
 0x2cf   : > { %v2693_v38 = vsel %vm2628_vm0, %v2595_v10, %v2661_v21 }
 0x2d0   : > { %v2789_v40 = vadd.f32 %v3625_v44, %v2693_v38  ;;  %v2472_v13 = vsel %vm2468_vm2, %v2463_v45, %v2464_v49  ;;  %v3630_v44 = vunpack.c.h.bf16 %v3650_v58  ;;  %vm1863_vm6 = vcmp.lt.s32.totalorder %v1735_v53, 31 }
 0x2d1   : > { %v2528_v52 = vmul.f32 %v3367_v36, %v2472_v13  ;;  %v2248_v29 = vpop.f32.mrf.mxu2 }
 0x2d2   : > { %2822 = vst.msk [vmem:[%s4630_s21 + $0xd0] sm:$0xff] %vm2795_vm4, %v2789_v40  ;;  %v2249_v25 = vadd.f32 %v2248_v29, %v2021_v42  ;;  %v2337_v30 = vpop.f32.mrf.mxu3  ;;  %v5061_v29 = vld [vmem:[#allocation34_spill] sm:$0xff] }
 0x2d3   : > { %v2560_v54 = vadd.f32 %v2528_v52, %v2424_v31  ;;  %v1663_v3 = vpop.f32.mrf.mxu1  ;;  %v5060_v31 = vld [vmem:[#allocation33_spill] sm:$0xff] }
 0x2d4   : > { %v2338_v27 = vadd.f32 %v2337_v30, %v2249_v25  ;;  %v1664_v63 = vadd.f32 %v1663_v3, %v5055_v24  ;;  %v5062_v25 = vrot.slane %v5061_v29, 1  ;;  %v3368_v3 = vsel %vm1863_vm6, 1.0, %v5032_v51 }
 0x2d5   : > { %v2596_v6 = vadd.f32 %v4887_v22, %v2560_v54  ;;  %v3633_v24 = vunpack.c.l.bf16 %v3651_v62 }
 0x2d6   : > { %v2427_v57 = vadd.f32 %v2426_v1, %v2338_v27  ;;  %v2465_v16 = vrot.slane %v1664_v63, 1  ;;  %v2428_v26 = vpop.f32.mrf.mxu0 }
 0x2d7   : > { %vm2629_vm1 = vcmp.ge.f32.partialorder %v2596_v6, 0.0  ;;  %v2662_v32 = vmul.f32 %v4615_v33, %v2596_v6 }
 0x2d8   : > { %v2471_v18 = vsel %vm2468_vm2, %v2464_v49, %v2465_v16 }
 0x2d9   : > { %v2694_v34 = vsel %vm2629_vm1, %v2596_v6, %v2662_v32  ;;  %v2561_v19 = vadd.f32 %v2471_v18, %v2427_v57  ;;  %v2250_v23 = vpop.f32.mrf.mxu2 }
 0x2da   : > { %v2790_v48 = vadd.f32 %v3626_v8, %v2694_v34  ;;  %v2251_v11 = vadd.f32 %v2250_v23, %v5056_v2  ;;  %v2339_v46 = vpop.f32.mrf.mxu3 }
 0x2db   : > { %v2597_v0 = vadd.f32 %v4887_v22, %v2561_v19  ;;  %v1666_v50 = vpop.f32.mrf.mxu1  ;;  %v3634_v19 = vunpack.c.h.bf16 %v3651_v62 }
 0x2dc   : > { %2823 = vst.msk [vmem:[%s4630_s21 + $0xd8] sm:$0xff] %vm2795_vm4, %v2790_v48  ;;  %v2340_v28 = vadd.f32 %v2339_v46, %v2251_v11  ;;  %v1667_v7 = vadd.f32 %v1666_v50, %v5057_v9 }
 0x2dd   : > { %vm2630_vm3 = vcmp.ge.f32.partialorder %v2597_v0, 0.0  ;;  %v2663_v41 = vmul.f32 %v4615_v33, %v2597_v0 }
 0x2de   : > { %v2429_v45 = vadd.f32 %v2428_v26, %v2340_v28  ;;  %v2466_v5 = vrot.slane %v1667_v7, 1  ;;  %v2431_v10 = vpop.f32.mrf.mxu0 }
 0x2df   : > { %v2695_v12 = vsel %vm2630_vm3, %v2597_v0, %v2663_v41 }
 0x2e0   : > { %v2791_v39 = vadd.f32 %v3629_v61, %v2695_v12  ;;  %v2470_v37 = vsel %vm2468_vm2, %v2465_v16, %v2466_v5 }
 0x2e1   : > { %v2562_v47 = vadd.f32 %v2470_v37, %v2429_v45  ;;  %v2253_v14 = vpop.f32.mrf.mxu2 }
 0x2e2   : > { %2824 = vst.msk [vmem:[%s4630_s21 + $0xe0] sm:$0xff] %vm2795_vm4, %v2791_v39  ;;  %v2254_v20 = vadd.f32 %v2253_v14, %v5058_v56  ;;  %v2342_v43 = vpop.f32.mrf.mxu3 }
 0x2e3   : > { %v2598_v15 = vadd.f32 %v4887_v22, %v2562_v47  ;;  %v1668_v60 = vpop.f32.mrf.mxu1 }
 0x2e4   : > { %v2343_v35 = vadd.f32 %v2342_v43, %v2254_v20  ;;  %v1669_v21 = vadd.f32 %v1668_v60, %v5059_v17 }
 0x2e5   : > { %vm2631_vm5 = vcmp.ge.f32.partialorder %v2598_v15, 0.0  ;;  %v2664_v59 = vmul.f32 %v4615_v33, %v2598_v15 }
 0x2e6   : > { %v2432_v36 = vadd.f32 %v2431_v10, %v2343_v35  ;;  %v2467_v49 = vrot.slane %v1669_v21, 1  ;;  %v2433_v8 = vpop.f32.mrf.mxu0 }
 0x2e7   : > { %v2696_v38 = vsel %vm2631_vm5, %v2598_v15, %v2664_v59 }
 0x2e8   : > { %v2792_v1 = vadd.f32 %v3630_v44, %v2696_v38  ;;  %v2469_v40 = vsel %vm2468_vm2, %v2466_v5, %v2467_v49  ;;  %v2500_v30 = vsel %vm2468_vm2, %v2467_v49, %v5062_v25 }
 0x2e9   : > { %v2563_v13 = vadd.f32 %v2469_v40, %v2432_v36  ;;  %v2255_v42 = vpop.f32.mrf.mxu2  ;;  %v2532_v16 = vmul.f32 %v3368_v3, %v2500_v30 }
 0x2ea   : > { %2825 = vst.msk [vmem:[%s4630_s21 + $0xe8] sm:$0xff] %vm2795_vm4, %v2792_v1  ;;  %v2256_v52 = vadd.f32 %v2255_v42, %v5060_v31  ;;  %v2344_v27 = vpop.f32.mrf.mxu3 }
 0x2eb   : > { %v2599_v54 = vadd.f32 %v4887_v22, %v2563_v13 }
 0x2ec   : > { %v2345_v63 = vadd.f32 %v2344_v27, %v2256_v52 }
 0x2ed   : > { %vm2632_vm7 = vcmp.ge.f32.partialorder %v2599_v54, 0.0  ;;  %v2665_v6 = vmul.f32 %v4615_v33, %v2599_v54 }
 0x2ee   : > { %v2434_v57 = vadd.f32 %v2433_v8, %v2345_v63 }
 0x2ef   : > { %v2697_v32 = vsel %vm2632_vm7, %v2599_v54, %v2665_v6 }
 0x2f0   : > { %v2793_v18 = vadd.f32 %v3633_v24, %v2697_v32  ;;  %v2564_v34 = vadd.f32 %v2532_v16, %v2434_v57 }
 0x2f2   : > { %2826 = vst.msk [vmem:[%s4630_s21 + $0xf0] sm:$0xff] %vm2795_vm4, %v2793_v18  ;;  %v2600_v55 = vadd.f32 %v4887_v22, %v2564_v34 }
 0x2f4   : > { %vm2633_vm2 = vcmp.ge.f32.partialorder %v2600_v55, 0.0  ;;  %v2666_v51 = vmul.f32 %v4615_v33, %v2600_v55 }
 0x2f6   : > { %v2698_v58 = vsel %vm2633_vm2, %v2600_v55, %v2666_v51 }
 0x2f7   : > { %v2794_v26 = vadd.f32 %v3634_v19, %v2698_v58 }
 0x2f9   : > { %2827 = vst.msk [vmem:[%s4630_s21 + $0xf8] sm:$0xff] %vm2795_vm4, %v2794_v26 }
 0x2fa PF: > { %s18_s30 = sadd.s32 1, %s3769_s30   ;;  %s5063_s26 = smov %s3761_s28 }
 0x2fb   : > { %p15_p1 = scmp.ge.s32.totalorder %s18_s30, 10   ;;  %s5064_s27 = smov %s3765_s29 }
 0x2fc   : > { %s5065_s28 = smov %s5068_s5  ;;  %s5066_s29 = smov %s5072_s8 }
 0x2fd   :  { %17 = sbr.rel (!%p15_p1) target bundleno = 3 (0x3), region = 89 }

</bundles_post_ra>
